<compile_context>
chip_gen: v6e
topology: v6e:2x2x1
jax: 0.10.0
libtpu: 0.0.40
codegen_flags: <defaults>
</compile_context>

<pallas_src>
import functools

import jax
import jax.numpy as jnp
from jax.experimental import pallas as pl
from jax.experimental.pallas import tpu as pltpu

EPS = 1e-5
LANE = 128  # channel padding granularity


# ----------------------------- Pallas kernels ------------------------------ #

def _accum_conv3x3_taps(load_slab, w_ref, acc_ref, n_rows):
    """acc_ref <- sum_{ky,kx} shift(slab_ky, kx-1) @ w[ky, kx], f32 accumulate.

    load_slab(ky) must return an (n_rows, cp) f32 view whose rows are the flattened
    padded image starting at padded row `ky` (an aligned, copy-free row slice).
    The kx shift is a +-1 rotation of the whole flattened slab (pltpu.roll, XLU);
    its wrap-around rows only land in the masked padding columns.
    """
    first = True
    for ky in range(3):
        slab = load_slab(ky)
        for kx in range(3):
            src = slab if kx == 1 else pltpu.roll(slab, (1 - kx) % n_rows, axis=0)
            d = jnp.dot(src.astype(w_ref.dtype), w_ref[ky, kx],
                        preferred_element_type=jnp.float32)
            if first:
                acc_ref[...] = d          # first tap initializes (no zeroing pass)
                first = False
            else:
                acc_ref[...] += d         # v7x: fuses into MXU-result accumulation


def _store_channel_stats(stats_ref, acc):
    # per-image partial [sum, sum_of_squares] for the global BN statistics
    stats_ref[0, 0:1, :] = jnp.sum(acc, axis=0, keepdims=True)
    stats_ref[0, 1:2, :] = jnp.sum(acc * acc, axis=0, keepdims=True)


def conv_stats_kernel(x_ref, mask_ref, w_ref, o_ref, stats_ref, acc_ref, *, H, Wq):
    """conv1 over one (flattened, spatially padded) image + BN1 partial stats."""
    n_rows = H * Wq
    _accum_conv3x3_taps(lambda ky: x_ref[0, ky * Wq: ky * Wq + n_rows, :],
                        w_ref, acc_ref, n_rows)
    acc = acc_ref[...] * mask_ref[...]        # zero the Wq-W padding columns exactly
    o_ref[0] = acc.astype(o_ref.dtype)
    _store_channel_stats(stats_ref, acc)


def bn_relu_conv_stats_kernel(o1_ref, mask_ref, scale_ref, shift_ref, w_ref,
                              o2_ref, stats_ref, pad_ref, acc_ref, *, H, Wq):
    """Fused BN1(affine) + ReLU + conv2 + BN2 partial stats (y1 stays in VMEM)."""
    n_rows = H * Wq
    mask = mask_ref[...]

    # BN1 affine + ReLU in f32; re-mask so the padding columns are exact zeros again
    # (they double as conv2's zero padding along W).
    y1 = jnp.maximum(o1_ref[0].astype(jnp.float32) * scale_ref[...] + shift_ref[...], 0.0)
    y1 = y1 * mask

    # Halo scratch: the interior rows are fully overwritten each step (one contiguous
    # store); only the top/bottom padding rows are zeroed (every step, since with
    # "parallel" semantics each TensorCore owns its own scratch instance).
    border = jnp.zeros((Wq, pad_ref.shape[-1]), pad_ref.dtype)
    pad_ref[0:Wq, :] = border
    pad_ref[(H + 1) * Wq:(H + 2) * Wq, :] = border
    pad_ref[Wq:(H + 1) * Wq, :] = y1

    _accum_conv3x3_taps(lambda ky: pad_ref[ky * Wq: ky * Wq + n_rows, :],
                        w_ref, acc_ref, n_rows)
    acc = acc_ref[...] * mask
    o2_ref[0] = acc.astype(o2_ref.dtype)
    _store_channel_stats(stats_ref, acc)


def bn_add_relu_kernel(o_ref, scale_ref, shift_ref, res_ref, out_ref):
    """BN2(affine) + residual add + ReLU - lane-dense streaming pass."""
    out_ref[...] = jnp.maximum(
        o_ref[...].astype(jnp.float32) * scale_ref[...] + shift_ref[...]
        + res_ref[...].astype(jnp.float32), 0.0).astype(out_ref.dtype)


# ------------------------------ glue (plain JAX) --------------------------- #

def _round_up(x, m):
    return (x + m - 1) // m * m


def _pick_tile_m(m, cap=1024):
    # Largest sublane-aligned row tile <= cap that divides m.  m is always a multiple
    # of 8 here (Wq % 8 == 0), so this never degrades to one giant un-pipelined block.
    start = (min(cap, m) // 8) * 8
    for t in range(start, 7, -8):
        if m % t == 0:
            return t
    return m


def _compiler_params():
    # Generation-aware VMEM budget: ~3/4 of physical, capped at 96 MiB, floor 32 MiB.
    try:
        cap = int(getattr(pltpu.get_tpu_info(), "vmem_capacity_bytes", 0)) or 64 * 1024 * 1024
    except Exception:
        cap = 64 * 1024 * 1024
    limit = max(32 * 1024 * 1024, min(96 * 1024 * 1024, (cap * 3) // 4))
    return pltpu.CompilerParams(
        dimension_semantics=("parallel",),    # shard the per-image / per-tile grid across TCs
        vmem_limit_bytes=limit,
    )


def _prep_weight(w_oihw, cp, dtype):
    # PyTorch conv weight (Cout, Cin, 3, 3) -> (3, 3, Cin_pad, Cout_pad), MXU dtype
    co, ci = w_oihw.shape[0], w_oihw.shape[1]
    w = jnp.transpose(w_oihw, (2, 3, 1, 0))
    w = jnp.pad(w, ((0, 0), (0, 0), (0, cp - ci), (0, cp - co)))
    return w.astype(dtype)


def _pad_channels(v, cp, fill=0.0):
    return jnp.pad(v, (0, cp - v.shape[0]), constant_values=fill)


def _bn_affine(stats, count, gamma, beta):
    # stats: (N, 2, Cp) partial [sum, sum_sq] per image -> fused BN scale/shift.
    # NOTE: E[x^2]-E[x]^2 in f32 can cancel for extreme mean/std ratios; acceptable here,
    # a Welford-style combine would be the robust alternative.
    s = jnp.sum(stats[:, 0, :], axis=0)
    ss = jnp.sum(stats[:, 1, :], axis=0)
    mean = s / count
    var = jnp.maximum(ss / count - mean * mean, 0.0)   # biased variance (train-mode BN)
    scale = gamma * jax.lax.rsqrt(var + EPS)
    shift = beta - mean * scale
    return (scale.reshape(1, -1).astype(jnp.float32),
            shift.reshape(1, -1).astype(jnp.float32))


def basic_block_forward(x_nchw, params, *, compute_dtype=jnp.bfloat16):
    """BasicBlock.forward: stride=1, dilation=1, identity residual.

    compute_dtype: dtype of the MXU operands and of the inter-pass intermediates
    (o1 / o2 / residual).  bf16 (default) = 2-4x MXU throughput and half the
    inter-pass HBM traffic; f32 = exact-parity mode.  Accumulation and BN stats
    are always f32.
    """
    N, C, H, W = x_nchw.shape
    cout = params["w1"].shape[0]
    assert cout == C, "identity residual requires fan_in == fan_out"
    cp = _round_up(C, LANE)
    Wq = _round_up(W + 2, 8)          # sublane-aligned padded width; valid cols are [1, W+1)
    Hq = H + 2
    n_rows = H * Wq                   # rows of the per-image (row, channel) output slab
    Mq = N * n_rows
    count = N * H * W                 # number of *valid* pixels for the BN statistics

    # NHWC, channels padded to a lane multiple, conv1's spatial zero padding baked in.
    x = jnp.transpose(x_nchw, (0, 2, 3, 1))
    xq = jnp.pad(x, ((0, 0), (1, 1), (1, Wq - W - 1), (0, cp - C)))      # (N, Hq, Wq, cp) f32
    res = xq[:, 1:H + 1].reshape(Mq, cp).astype(compute_dtype)           # residual, o2 layout
    xflat = xq.reshape(N, Hq * Wq, cp)                                   # rolls stay 32-bit

    # validity mask over the padded width (1 for cols 1..W, 0 for padding columns)
    col = jnp.arange(Wq)
    mask = jnp.tile(((col >= 1) & (col <= W)).astype(jnp.float32), H).reshape(n_rows, 1)

    w1 = _prep_weight(params["w1"], cp, compute_dtype)
    w2 = _prep_weight(params["w2"], cp, compute_dtype)
    g1 = _pad_channels(params["g1"], cp, 1.0)
    b1 = _pad_channels(params["b1"], cp, 0.0)
    g2 = _pad_channels(params["g2"], cp, 1.0)
    b2 = _pad_channels(params["b2"], cp, 0.0)

    cparams = _compiler_params()
    wspec = pl.BlockSpec((3, 3, cp, cp), lambda i: (0, 0, 0, 0))
    vspec = pl.BlockSpec((1, cp), lambda i: (0, 0))
    mspec = pl.BlockSpec((n_rows, 1), lambda i: (0, 0))
    ospec = pl.BlockSpec((1, n_rows, cp), lambda i: (i, 0, 0))
    sspec = pl.BlockSpec((1, 2, cp), lambda i: (i, 0, 0))
    xspec = pl.BlockSpec((1, Hq * Wq, cp), lambda i: (i, 0, 0))

    # ---- pass 1: conv1 + per-image BN1 partial stats ----
    o1, st1 = pl.pallas_call(
        functools.partial(conv_stats_kernel, H=H, Wq=Wq),
        out_shape=(jax.ShapeDtypeStruct((N, n_rows, cp), compute_dtype),
                   jax.ShapeDtypeStruct((N, 2, cp), jnp.float32)),
        grid=(N,),
        in_specs=[xspec, mspec, wspec],
        out_specs=(ospec, sspec),
        scratch_shapes=[pltpu.VMEM((n_rows, cp), jnp.float32)],
        compiler_params=cparams,
    )(xflat, mask, w1)
    scale1, shift1 = _bn_affine(st1, count, g1, b1)

    # ---- pass 2: BN1 + ReLU + conv2 + BN2 partial stats, fused in VMEM ----
    o2, st2 = pl.pallas_call(
        functools.partial(bn_relu_conv_stats_kernel, H=H, Wq=Wq),
        out_shape=(jax.ShapeDtypeStruct((N, n_rows, cp), compute_dtype),
                   jax.ShapeDtypeStruct((N, 2, cp), jnp.float32)),
        grid=(N,),
        in_specs=[ospec, mspec, vspec, vspec, wspec],
        out_specs=(ospec, sspec),
        scratch_shapes=[pltpu.VMEM((Hq * Wq, cp), jnp.float32),   # halo scratch for y1
                        pltpu.VMEM((n_rows, cp), jnp.float32)],   # f32 tap accumulator
        compiler_params=cparams,
    )(o1, mask, scale1, shift1, w2)
    scale2, shift2 = _bn_affine(st2, count, g2, b2)

    # ---- pass 3: BN2 + residual + ReLU, lane-dense row-tiled streaming ----
    tile_m = _pick_tile_m(Mq)
    out = pl.pallas_call(
        bn_add_relu_kernel,
        out_shape=jax.ShapeDtypeStruct((Mq, cp), jnp.float32),
        grid=(Mq // tile_m,),
        in_specs=[pl.BlockSpec((tile_m, cp), lambda i: (i, 0)), vspec, vspec,
                  pl.BlockSpec((tile_m, cp), lambda i: (i, 0))],
        out_specs=pl.BlockSpec((tile_m, cp), lambda i: (i, 0)),
        compiler_params=cparams,
    )(o2.reshape(Mq, cp), scale2, shift2, res)

    out = out.reshape(N, H, Wq, cp)[:, :, 1:W + 1, :C]   # drop padding cols + channels
    return jnp.transpose(out, (0, 3, 1, 2))              # back to NCHW


# ------------------------------ pure-JAX reference ------------------------- #

def ref_forward(x, params):
    def conv(z, w):
        return jax.lax.conv_general_dilated(
            z, w, (1, 1), ((1, 1), (1, 1)),
            dimension_numbers=("NCHW", "OIHW", "NCHW"))

    def bn(z, g, b):
        mean = z.mean(axis=(0, 2, 3), keepdims=True)
        var = jnp.square(z - mean).mean(axis=(0, 2, 3), keepdims=True)
        return (z - mean) / jnp.sqrt(var + EPS) * g.reshape(1, -1, 1, 1) + b.reshape(1, -1, 1, 1)

    out = jax.nn.relu(bn(conv(x, params["w1"]), params["g1"], params["b1"]))
    out = bn(conv(out, params["w2"]), params["g2"], params["b2"]) + x
    return jax.nn.relu(out)


# ----------------------------------- main ----------------------------------- #

if __name__ == "__main__":
    key = jax.random.PRNGKey(0)
    k = jax.random.split(key, 7)
    N, C, H, W = 2, 4, 16, 16                      # fan_in == fan_out == 4, stride=1
    x = jax.random.normal(k[0], (N, C, H, W), jnp.float32)

    fan = C * 9
    params = {
        "w1": jax.random.normal(k[1], (C, C, 3, 3), jnp.float32) / jnp.sqrt(fan),
        "w2": jax.random.normal(k[2], (C, C, 3, 3), jnp.float32) / jnp.sqrt(fan),
        "g1": 1.0 + 0.1 * jax.random.normal(k[3], (C,), jnp.float32),
        "b1": 0.1 * jax.random.normal(k[4], (C,), jnp.float32),
        "g2": 1.0 + 0.1 * jax.random.normal(k[5], (C,), jnp.float32),
        "b2": 0.1 * jax.random.normal(k[6], (C,), jnp.float32),
    }

    ref = jax.block_until_ready(ref_forward(x, params))

    # Opt-in exact-parity path: f32 operands and intermediates.
    fwd_f32 = jax.jit(functools.partial(basic_block_forward, compute_dtype=jnp.float32))
    out_f32 = jax.block_until_ready(fwd_f32(x, params))
    assert out_f32.shape == x.shape and out_f32.dtype == x.dtype
    if not jnp.allclose(out_f32, ref, atol=1e-4, rtol=1e-4):
        raise AssertionError("Pallas BasicBlock (f32 parity mode) does not match reference")

    # Default perf path: bf16 MXU operands + bf16 inter-pass intermediates, f32 accumulate/BN.
    fwd_bf16 = jax.jit(basic_block_forward)
    out_bf16 = jax.block_until_ready(fwd_bf16(x, params))
    if not (bool(jnp.all(jnp.isfinite(out_bf16)))
            and float(jnp.max(jnp.abs(out_bf16 - ref))) < 0.25):
        raise AssertionError("Pallas BasicBlock (bf16 mode) deviates too much from reference")

    print("KERNEL_OK")
</pallas_src>

<mosaic_0001>
module attributes {stable_mosaic.version = 11 : i64} {
  func.func @conv_stats_kernel(%arg0: i32, %arg1: memref<1x432x128xf32, #tpu.memory_space<vmem>>, %arg2: memref<384x1xf32, #tpu.memory_space<vmem>>, %arg3: memref<3x3x128x128xf32, #tpu.memory_space<vmem>>, %arg4: memref<1x384x128xf32, #tpu.memory_space<vmem>>, %arg5: memref<1x2x128xf32, #tpu.memory_space<vmem>>, %arg6: memref<384x128xf32, #tpu.memory_space<vmem>>) attributes {dimension_semantics = [#tpu.dimension_semantics<parallel>], iteration_bounds = array<i64: 2>, scalar_prefetch = 0 : i64, scratch_operands = 1 : i64, tpu.core_type = #tpu.core_type<tc>, window_params = [{transform_indices = @transform_0, window_bounds = array<i64: 1, 432, 128>}, {pipeline_mode = #tpu.pipeline_mode<synchronous>, transform_indices = @transform_1, window_bounds = array<i64: 384, 1>}, {pipeline_mode = #tpu.pipeline_mode<synchronous>, transform_indices = @transform_2, window_bounds = array<i64: 3, 3, 128, 128>}, {transform_indices = @transform_3, window_bounds = array<i64: 1, 384, 128>}, {transform_indices = @transform_4, window_bounds = array<i64: 1, 2, 128>}]} {
    %c0 = arith.constant 0 : index
    %c0_0 = arith.constant 0 : index
    %c0_1 = arith.constant 0 : index
    %0 = vector.load %arg1[%c0, %c0_0, %c0_1] : memref<1x432x128xf32, #tpu.memory_space<vmem>>, vector<1x384x128xf32>
    %1 = vector.shape_cast %0 : vector<1x384x128xf32> to vector<384x128xf32>
    %c1_i32 = arith.constant 1 : i32
    %2 = tpu.dynamic_rotate %1 by %c1_i32 dim 0 : vector<384x128xf32>, i32 -> vector<384x128xf32>
    %c0_2 = arith.constant 0 : index
    %c0_3 = arith.constant 0 : index
    %c0_4 = arith.constant 0 : index
    %c0_5 = arith.constant 0 : index
    %3 = vector.load %arg3[%c0_2, %c0_3, %c0_4, %c0_5] : memref<3x3x128x128xf32, #tpu.memory_space<vmem>>, vector<1x1x128x128xf32>
    %4 = vector.shape_cast %3 : vector<1x1x128x128xf32> to vector<128x128xf32>
    %cst = arith.constant dense<0.000000e+00> : vector<384x128xf32>
    %5 = tpu.matmul %2, %4, %cst {dimension_numbers = #tpu.dot_dimension_numbers<[1], [0], [0], [1], [0, 0, 1, 1], [], []>} : vector<384x128xf32>, vector<128x128xf32>, vector<384x128xf32> -> vector<384x128xf32>
    %c0_6 = arith.constant 0 : index
    %c0_7 = arith.constant 0 : index
    %6 = vector.load %arg6[%c0_6, %c0_7] : memref<384x128xf32, #tpu.memory_space<vmem>>, vector<384x128xf32>
    tpu.vector_store %arg6[%c0_6, %c0_7], %5 {strides = array<i32>} : memref<384x128xf32, #tpu.memory_space<vmem>>, vector<384x128xf32>,
    %c0_8 = arith.constant 0 : index
    %c1 = arith.constant 1 : index
    %c0_9 = arith.constant 0 : index
    %c0_10 = arith.constant 0 : index
    %7 = vector.load %arg3[%c0_8, %c1, %c0_9, %c0_10] : memref<3x3x128x128xf32, #tpu.memory_space<vmem>>, vector<1x1x128x128xf32>
    %8 = vector.shape_cast %7 : vector<1x1x128x128xf32> to vector<128x128xf32>
    %cst_11 = arith.constant dense<0.000000e+00> : vector<384x128xf32>
    %9 = tpu.matmul %1, %8, %cst_11 {dimension_numbers = #tpu.dot_dimension_numbers<[1], [0], [0], [1], [0, 0, 1, 1], [], []>} : vector<384x128xf32>, vector<128x128xf32>, vector<384x128xf32> -> vector<384x128xf32>
    %c0_12 = arith.constant 0 : index
    %c0_13 = arith.constant 0 : index
    %10 = vector.load %arg6[%c0_12, %c0_13] : memref<384x128xf32, #tpu.memory_space<vmem>>, vector<384x128xf32>
    %11 = arith.addf %10, %9 : vector<384x128xf32>
    %c0_14 = arith.constant 0 : index
    %c0_15 = arith.constant 0 : index
    %12 = vector.load %arg6[%c0_14, %c0_15] : memref<384x128xf32, #tpu.memory_space<vmem>>, vector<384x128xf32>
    tpu.vector_store %arg6[%c0_14, %c0_15], %11 {strides = array<i32>} : memref<384x128xf32, #tpu.memory_space<vmem>>, vector<384x128xf32>,
    %c383_i32 = arith.constant 383 : i32
    %13 = tpu.dynamic_rotate %1 by %c383_i32 dim 0 : vector<384x128xf32>, i32 -> vector<384x128xf32>
    %c0_16 = arith.constant 0 : index
    %c2 = arith.constant 2 : index
    %c0_17 = arith.constant 0 : index
    %c0_18 = arith.constant 0 : index
    %14 = vector.load %arg3[%c0_16, %c2, %c0_17, %c0_18] : memref<3x3x128x128xf32, #tpu.memory_space<vmem>>, vector<1x1x128x128xf32>
    %15 = vector.shape_cast %14 : vector<1x1x128x128xf32> to vector<128x128xf32>
    %cst_19 = arith.constant dense<0.000000e+00> : vector<384x128xf32>
    %16 = tpu.matmul %13, %15, %cst_19 {dimension_numbers = #tpu.dot_dimension_numbers<[1], [0], [0], [1], [0, 0, 1, 1], [], []>} : vector<384x128xf32>, vector<128x128xf32>, vector<384x128xf32> -> vector<384x128xf32>
    %c0_20 = arith.constant 0 : index
    %c0_21 = arith.constant 0 : index
    %17 = vector.load %arg6[%c0_20, %c0_21] : memref<384x128xf32, #tpu.memory_space<vmem>>, vector<384x128xf32>
    %18 = arith.addf %17, %16 : vector<384x128xf32>
    %c0_22 = arith.constant 0 : index
    %c0_23 = arith.constant 0 : index
    %19 = vector.load %arg6[%c0_22, %c0_23] : memref<384x128xf32, #tpu.memory_space<vmem>>, vector<384x128xf32>
    tpu.vector_store %arg6[%c0_22, %c0_23], %18 {strides = array<i32>} : memref<384x128xf32, #tpu.memory_space<vmem>>, vector<384x128xf32>,
    %c0_24 = arith.constant 0 : index
    %c24 = arith.constant 24 : index
    %c0_25 = arith.constant 0 : index
    %20 = vector.load %arg1[%c0_24, %c24, %c0_25] : memref<1x432x128xf32, #tpu.memory_space<vmem>>, vector<1x384x128xf32>
    %21 = vector.shape_cast %20 : vector<1x384x128xf32> to vector<384x128xf32>
    %c1_i32_26 = arith.constant 1 : i32
    %22 = tpu.dynamic_rotate %21 by %c1_i32_26 dim 0 : vector<384x128xf32>, i32 -> vector<384x128xf32>
    %c1_27 = arith.constant 1 : index
    %c0_28 = arith.constant 0 : index
    %c0_29 = arith.constant 0 : index
    %c0_30 = arith.constant 0 : index
    %23 = vector.load %arg3[%c1_27, %c0_28, %c0_29, %c0_30] : memref<3x3x128x128xf32, #tpu.memory_space<vmem>>, vector<1x1x128x128xf32>
    %24 = vector.shape_cast %23 : vector<1x1x128x128xf32> to vector<128x128xf32>
    %cst_31 = arith.constant dense<0.000000e+00> : vector<384x128xf32>
    %25 = tpu.matmul %22, %24, %cst_31 {dimension_numbers = #tpu.dot_dimension_numbers<[1], [0], [0], [1], [0, 0, 1, 1], [], []>} : vector<384x128xf32>, vector<128x128xf32>, vector<384x128xf32> -> vector<384x128xf32>
    %c0_32 = arith.constant 0 : index
    %c0_33 = arith.constant 0 : index
    %26 = vector.load %arg6[%c0_32, %c0_33] : memref<384x128xf32, #tpu.memory_space<vmem>>, vector<384x128xf32>
    %27 = arith.addf %26, %25 : vector<384x128xf32>
    %c0_34 = arith.constant 0 : index
    %c0_35 = arith.constant 0 : index
    %28 = vector.load %arg6[%c0_34, %c0_35] : memref<384x128xf32, #tpu.memory_space<vmem>>, vector<384x128xf32>
    tpu.vector_store %arg6[%c0_34, %c0_35], %27 {strides = array<i32>} : memref<384x128xf32, #tpu.memory_space<vmem>>, vector<384x128xf32>,
    %c1_36 = arith.constant 1 : index
    %c1_37 = arith.constant 1 : index
    %c0_38 = arith.constant 0 : index
    %c0_39 = arith.constant 0 : index
    %29 = vector.load %arg3[%c1_36, %c1_37, %c0_38, %c0_39] : memref<3x3x128x128xf32, #tpu.memory_space<vmem>>, vector<1x1x128x128xf32>
    %30 = vector.shape_cast %29 : vector<1x1x128x128xf32> to vector<128x128xf32>
    %cst_40 = arith.constant dense<0.000000e+00> : vector<384x128xf32>
    %31 = tpu.matmul %21, %30, %cst_40 {dimension_numbers = #tpu.dot_dimension_numbers<[1], [0], [0], [1], [0, 0, 1, 1], [], []>} : vector<384x128xf32>, vector<128x128xf32>, vector<384x128xf32> -> vector<384x128xf32>
    %c0_41 = arith.constant 0 : index
    %c0_42 = arith.constant 0 : index
    %32 = vector.load %arg6[%c0_41, %c0_42] : memref<384x128xf32, #tpu.memory_space<vmem>>, vector<384x128xf32>
    %33 = arith.addf %32, %31 : vector<384x128xf32>
    %c0_43 = arith.constant 0 : index
    %c0_44 = arith.constant 0 : index
    %34 = vector.load %arg6[%c0_43, %c0_44] : memref<384x128xf32, #tpu.memory_space<vmem>>, vector<384x128xf32>
    tpu.vector_store %arg6[%c0_43, %c0_44], %33 {strides = array<i32>} : memref<384x128xf32, #tpu.memory_space<vmem>>, vector<384x128xf32>,
    %c383_i32_45 = arith.constant 383 : i32
    %35 = tpu.dynamic_rotate %21 by %c383_i32_45 dim 0 : vector<384x128xf32>, i32 -> vector<384x128xf32>
    %c1_46 = arith.constant 1 : index
    %c2_47 = arith.constant 2 : index
    %c0_48 = arith.constant 0 : index
    %c0_49 = arith.constant 0 : index
    %36 = vector.load %arg3[%c1_46, %c2_47, %c0_48, %c0_49] : memref<3x3x128x128xf32, #tpu.memory_space<vmem>>, vector<1x1x128x128xf32>
    %37 = vector.shape_cast %36 : vector<1x1x128x128xf32> to vector<128x128xf32>
    %cst_50 = arith.constant dense<0.000000e+00> : vector<384x128xf32>
    %38 = tpu.matmul %35, %37, %cst_50 {dimension_numbers = #tpu.dot_dimension_numbers<[1], [0], [0], [1], [0, 0, 1, 1], [], []>} : vector<384x128xf32>, vector<128x128xf32>, vector<384x128xf32> -> vector<384x128xf32>
    %c0_51 = arith.constant 0 : index
    %c0_52 = arith.constant 0 : index
    %39 = vector.load %arg6[%c0_51, %c0_52] : memref<384x128xf32, #tpu.memory_space<vmem>>, vector<384x128xf32>
    %40 = arith.addf %39, %38 : vector<384x128xf32>
    %c0_53 = arith.constant 0 : index
    %c0_54 = arith.constant 0 : index
    %41 = vector.load %arg6[%c0_53, %c0_54] : memref<384x128xf32, #tpu.memory_space<vmem>>, vector<384x128xf32>
    tpu.vector_store %arg6[%c0_53, %c0_54], %40 {strides = array<i32>} : memref<384x128xf32, #tpu.memory_space<vmem>>, vector<384x128xf32>,
    %c0_55 = arith.constant 0 : index
    %c48 = arith.constant 48 : index
    %c0_56 = arith.constant 0 : index
    %42 = vector.load %arg1[%c0_55, %c48, %c0_56] : memref<1x432x128xf32, #tpu.memory_space<vmem>>, vector<1x384x128xf32>
    %43 = vector.shape_cast %42 : vector<1x384x128xf32> to vector<384x128xf32>
    %c1_i32_57 = arith.constant 1 : i32
    %44 = tpu.dynamic_rotate %43 by %c1_i32_57 dim 0 : vector<384x128xf32>, i32 -> vector<384x128xf32>
    %c2_58 = arith.constant 2 : index
    %c0_59 = arith.constant 0 : index
    %c0_60 = arith.constant 0 : index
    %c0_61 = arith.constant 0 : index
    %45 = vector.load %arg3[%c2_58, %c0_59, %c0_60, %c0_61] : memref<3x3x128x128xf32, #tpu.memory_space<vmem>>, vector<1x1x128x128xf32>
    %46 = vector.shape_cast %45 : vector<1x1x128x128xf32> to vector<128x128xf32>
    %cst_62 = arith.constant dense<0.000000e+00> : vector<384x128xf32>
    %47 = tpu.matmul %44, %46, %cst_62 {dimension_numbers = #tpu.dot_dimension_numbers<[1], [0], [0], [1], [0, 0, 1, 1], [], []>} : vector<384x128xf32>, vector<128x128xf32>, vector<384x128xf32> -> vector<384x128xf32>
    %c0_63 = arith.constant 0 : index
    %c0_64 = arith.constant 0 : index
    %48 = vector.load %arg6[%c0_63, %c0_64] : memref<384x128xf32, #tpu.memory_space<vmem>>, vector<384x128xf32>
    %49 = arith.addf %48, %47 : vector<384x128xf32>
    %c0_65 = arith.constant 0 : index
    %c0_66 = arith.constant 0 : index
    %50 = vector.load %arg6[%c0_65, %c0_66] : memref<384x128xf32, #tpu.memory_space<vmem>>, vector<384x128xf32>
    tpu.vector_store %arg6[%c0_65, %c0_66], %49 {strides = array<i32>} : memref<384x128xf32, #tpu.memory_space<vmem>>, vector<384x128xf32>,
    %c2_67 = arith.constant 2 : index
    %c1_68 = arith.constant 1 : index
    %c0_69 = arith.constant 0 : index
    %c0_70 = arith.constant 0 : index
    %51 = vector.load %arg3[%c2_67, %c1_68, %c0_69, %c0_70] : memref<3x3x128x128xf32, #tpu.memory_space<vmem>>, vector<1x1x128x128xf32>
    %52 = vector.shape_cast %51 : vector<1x1x128x128xf32> to vector<128x128xf32>
    %cst_71 = arith.constant dense<0.000000e+00> : vector<384x128xf32>
    %53 = tpu.matmul %43, %52, %cst_71 {dimension_numbers = #tpu.dot_dimension_numbers<[1], [0], [0], [1], [0, 0, 1, 1], [], []>} : vector<384x128xf32>, vector<128x128xf32>, vector<384x128xf32> -> vector<384x128xf32>
    %c0_72 = arith.constant 0 : index
    %c0_73 = arith.constant 0 : index
    %54 = vector.load %arg6[%c0_72, %c0_73] : memref<384x128xf32, #tpu.memory_space<vmem>>, vector<384x128xf32>
    %55 = arith.addf %54, %53 : vector<384x128xf32>
    %c0_74 = arith.constant 0 : index
    %c0_75 = arith.constant 0 : index
    %56 = vector.load %arg6[%c0_74, %c0_75] : memref<384x128xf32, #tpu.memory_space<vmem>>, vector<384x128xf32>
    tpu.vector_store %arg6[%c0_74, %c0_75], %55 {strides = array<i32>} : memref<384x128xf32, #tpu.memory_space<vmem>>, vector<384x128xf32>,
    %c383_i32_76 = arith.constant 383 : i32
    %57 = tpu.dynamic_rotate %43 by %c383_i32_76 dim 0 : vector<384x128xf32>, i32 -> vector<384x128xf32>
    %c2_77 = arith.constant 2 : index
    %c2_78 = arith.constant 2 : index
    %c0_79 = arith.constant 0 : index
    %c0_80 = arith.constant 0 : index
    %58 = vector.load %arg3[%c2_77, %c2_78, %c0_79, %c0_80] : memref<3x3x128x128xf32, #tpu.memory_space<vmem>>, vector<1x1x128x128xf32>
    %59 = vector.shape_cast %58 : vector<1x1x128x128xf32> to vector<128x128xf32>
    %cst_81 = arith.constant dense<0.000000e+00> : vector<384x128xf32>
    %60 = tpu.matmul %57, %59, %cst_81 {dimension_numbers = #tpu.dot_dimension_numbers<[1], [0], [0], [1], [0, 0, 1, 1], [], []>} : vector<384x128xf32>, vector<128x128xf32>, vector<384x128xf32> -> vector<384x128xf32>
    %c0_82 = arith.constant 0 : index
    %c0_83 = arith.constant 0 : index
    %61 = vector.load %arg6[%c0_82, %c0_83] : memref<384x128xf32, #tpu.memory_space<vmem>>, vector<384x128xf32>
    %62 = arith.addf %61, %60 : vector<384x128xf32>
    %c0_84 = arith.constant 0 : index
    %c0_85 = arith.constant 0 : index
    %63 = vector.load %arg6[%c0_84, %c0_85] : memref<384x128xf32, #tpu.memory_space<vmem>>, vector<384x128xf32>
    tpu.vector_store %arg6[%c0_84, %c0_85], %62 {strides = array<i32>} : memref<384x128xf32, #tpu.memory_space<vmem>>, vector<384x128xf32>,
    %c0_86 = arith.constant 0 : index
    %c0_87 = arith.constant 0 : index
    %64 = vector.load %arg6[%c0_86, %c0_87] : memref<384x128xf32, #tpu.memory_space<vmem>>, vector<384x128xf32>
    %c0_88 = arith.constant 0 : index
    %c0_89 = arith.constant 0 : index
    %65 = vector.load %arg2[%c0_88, %c0_89] : memref<384x1xf32, #tpu.memory_space<vmem>>, vector<384x1xf32>
    %66 = vector.broadcast %65 : vector<384x1xf32> to vector<384x128xf32>
    %67 = arith.mulf %64, %66 : vector<384x128xf32>
    %c0_90 = arith.constant 0 : index
    %c0_91 = arith.constant 0 : index
    %c0_92 = arith.constant 0 : index
    %68 = vector.load %arg4[%c0_90, %c0_91, %c0_92] : memref<1x384x128xf32, #tpu.memory_space<vmem>>, vector<1x384x128xf32>
    %69 = vector.shape_cast %68 : vector<1x384x128xf32> to vector<384x128xf32>
    %70 = vector.shape_cast %67 : vector<384x128xf32> to vector<1x384x128xf32>
    tpu.vector_store %arg4[%c0_90, %c0_91, %c0_92], %70 {strides = array<i32>} : memref<1x384x128xf32, #tpu.memory_space<vmem>>, vector<1x384x128xf32>,
    %cst_93 = arith.constant dense<0.000000e+00> : vector<128xf32>
    %71 = vector.multi_reduction <add>, %67, %cst_93 [0] : vector<384x128xf32> to vector<128xf32>
    %72 = vector.shape_cast %71 : vector<128xf32> to vector<1x128xf32>
    %c0_94 = arith.constant 0 : index
    %c0_95 = arith.constant 0 : index
    %c0_96 = arith.constant 0 : index
    %73 = vector.load %arg5[%c0_94, %c0_95, %c0_96] : memref<1x2x128xf32, #tpu.memory_space<vmem>>, vector<1x1x128xf32>
    %74 = vector.shape_cast %73 : vector<1x1x128xf32> to vector<1x128xf32>
    %75 = vector.shape_cast %72 : vector<1x128xf32> to vector<1x1x128xf32>
    tpu.vector_store %arg5[%c0_94, %c0_95, %c0_96], %75 {strides = array<i32>} : memref<1x2x128xf32, #tpu.memory_space<vmem>>, vector<1x1x128xf32>,
    %76 = arith.mulf %67, %67 : vector<384x128xf32>
    %cst_97 = arith.constant dense<0.000000e+00> : vector<128xf32>
    %77 = vector.multi_reduction <add>, %76, %cst_97 [0] : vector<384x128xf32> to vector<128xf32>
    %78 = vector.shape_cast %77 : vector<128xf32> to vector<1x128xf32>
    %c0_98 = arith.constant 0 : index
    %c1_99 = arith.constant 1 : index
    %c0_100 = arith.constant 0 : index
    %79 = vector.load %arg5[%c0_98, %c1_99, %c0_100] : memref<1x2x128xf32, #tpu.memory_space<vmem>>, vector<1x1x128xf32>
    %80 = vector.shape_cast %79 : vector<1x1x128xf32> to vector<1x128xf32>
    %81 = vector.shape_cast %78 : vector<1x128xf32> to vector<1x1x128xf32>
    tpu.vector_store %arg5[%c0_98, %c1_99, %c0_100], %81 {strides = array<i32>} : memref<1x2x128xf32, #tpu.memory_space<vmem>>, vector<1x1x128xf32>,
    return
  }
  func.func @transform_0(%arg0: i32) -> (i32, i32, i32) {
    %c0_i32 = arith.constant 0 : i32
    %c0_i32_0 = arith.constant 0 : i32
    %c0_i32_1 = arith.constant 0 : i32
    return %arg0, %c0_i32, %c0_i32_0 : i32, i32, i32
  }
  func.func @transform_1(%arg0: i32) -> (i32, i32) {
    %c0_i32 = arith.constant 0 : i32
    %c0_i32_0 = arith.constant 0 : i32
    %c0_i32_1 = arith.constant 0 : i32
    return %c0_i32, %c0_i32_0 : i32, i32
  }
  func.func @transform_2(%arg0: i32) -> (i32, i32, i32, i32) {
    %c0_i32 = arith.constant 0 : i32
    %c0_i32_0 = arith.constant 0 : i32
    %c0_i32_1 = arith.constant 0 : i32
    %c0_i32_2 = arith.constant 0 : i32
    %c0_i32_3 = arith.constant 0 : i32
    return %c0_i32, %c0_i32_0, %c0_i32_1, %c0_i32_2 : i32, i32, i32, i32
  }
  func.func @transform_3(%arg0: i32) -> (i32, i32, i32) {
    %c0_i32 = arith.constant 0 : i32
    %c0_i32_0 = arith.constant 0 : i32
    %c0_i32_1 = arith.constant 0 : i32
    return %arg0, %c0_i32, %c0_i32_0 : i32, i32, i32
  }
  func.func @transform_4(%arg0: i32) -> (i32, i32, i32) {
    %c0_i32 = arith.constant 0 : i32
    %c0_i32_0 = arith.constant 0 : i32
    %c0_i32_1 = arith.constant 0 : i32
    return %arg0, %c0_i32, %c0_i32_0 : i32, i32, i32
  }
}

module attributes {stable_mosaic.version = 11 : i64} {
  func.func @bn_relu_conv_stats_kernel(%arg0: i32, %arg1: memref<1x384x128xf32, #tpu.memory_space<vmem>>, %arg2: memref<384x1xf32, #tpu.memory_space<vmem>>, %arg3: memref<1x128xf32, #tpu.memory_space<vmem>>, %arg4: memref<1x128xf32, #tpu.memory_space<vmem>>, %arg5: memref<3x3x128x128xf32, #tpu.memory_space<vmem>>, %arg6: memref<1x384x128xf32, #tpu.memory_space<vmem>>, %arg7: memref<1x2x128xf32, #tpu.memory_space<vmem>>, %arg8: memref<432x128xf32, #tpu.memory_space<vmem>>, %arg9: memref<384x128xf32, #tpu.memory_space<vmem>>) attributes {dimension_semantics = [#tpu.dimension_semantics<parallel>], iteration_bounds = array<i64: 2>, scalar_prefetch = 0 : i64, scratch_operands = 2 : i64, tpu.core_type = #tpu.core_type<tc>, window_params = [{transform_indices = @transform_0, window_bounds = array<i64: 1, 384, 128>}, {pipeline_mode = #tpu.pipeline_mode<synchronous>, transform_indices = @transform_1, window_bounds = array<i64: 384, 1>}, {pipeline_mode = #tpu.pipeline_mode<synchronous>, transform_indices = @transform_2, window_bounds = array<i64: 1, 128>}, {pipeline_mode = #tpu.pipeline_mode<synchronous>, transform_indices = @transform_3, window_bounds = array<i64: 1, 128>}, {pipeline_mode = #tpu.pipeline_mode<synchronous>, transform_indices = @transform_4, window_bounds = array<i64: 3, 3, 128, 128>}, {transform_indices = @transform_5, window_bounds = array<i64: 1, 384, 128>}, {transform_indices = @transform_6, window_bounds = array<i64: 1, 2, 128>}]} {
    %c0 = arith.constant 0 : index
    %c0_0 = arith.constant 0 : index
    %0 = vector.load %arg2[%c0, %c0_0] : memref<384x1xf32, #tpu.memory_space<vmem>>, vector<384x1xf32>
    %c0_1 = arith.constant 0 : index
    %c0_2 = arith.constant 0 : index
    %c0_3 = arith.constant 0 : index
    %1 = vector.load %arg1[%c0_1, %c0_2, %c0_3] : memref<1x384x128xf32, #tpu.memory_space<vmem>>, vector<1x384x128xf32>
    %2 = vector.shape_cast %1 : vector<1x384x128xf32> to vector<384x128xf32>
    %c0_4 = arith.constant 0 : index
    %c0_5 = arith.constant 0 : index
    %3 = vector.load %arg3[%c0_4, %c0_5] : memref<1x128xf32, #tpu.memory_space<vmem>>, vector<1x128xf32>
    %4 = vector.broadcast %3 : vector<1x128xf32> to vector<384x128xf32>
    %5 = arith.mulf %2, %4 : vector<384x128xf32>
    %c0_6 = arith.constant 0 : index
    %c0_7 = arith.constant 0 : index
    %6 = vector.load %arg4[%c0_6, %c0_7] : memref<1x128xf32, #tpu.memory_space<vmem>>, vector<1x128xf32>
    %7 = vector.broadcast %6 : vector<1x128xf32> to vector<384x128xf32>
    %8 = arith.addf %5, %7 : vector<384x128xf32>
    %cst = arith.constant 0.000000e+00 : f32
    %9 = vector.broadcast %cst : f32 to vector<384x128xf32>
    %10 = arith.maximumf %8, %9 : vector<384x128xf32>
    %11 = vector.broadcast %0 : vector<384x1xf32> to vector<384x128xf32>
    %12 = arith.mulf %10, %11 : vector<384x128xf32>
    %cst_8 = arith.constant 0.000000e+00 : f32
    %13 = vector.broadcast %cst_8 : f32 to vector<24x128xf32>
    %c0_9 = arith.constant 0 : index
    %c0_10 = arith.constant 0 : index
    %14 = vector.load %arg8[%c0_9, %c0_10] : memref<432x128xf32, #tpu.memory_space<vmem>>, vector<24x128xf32>
    tpu.vector_store %arg8[%c0_9, %c0_10], %13 {strides = array<i32>} : memref<432x128xf32, #tpu.memory_space<vmem>>, vector<24x128xf32>,
    %c408 = arith.constant 408 : index
    %c0_11 = arith.constant 0 : index
    %15 = vector.load %arg8[%c408, %c0_11] : memref<432x128xf32, #tpu.memory_space<vmem>>, vector<24x128xf32>
    tpu.vector_store %arg8[%c408, %c0_11], %13 {strides = array<i32>} : memref<432x128xf32, #tpu.memory_space<vmem>>, vector<24x128xf32>,
    %c24 = arith.constant 24 : index
    %c0_12 = arith.constant 0 : index
    %16 = vector.load %arg8[%c24, %c0_12] : memref<432x128xf32, #tpu.memory_space<vmem>>, vector<384x128xf32>
    tpu.vector_store %arg8[%c24, %c0_12], %12 {strides = array<i32>} : memref<432x128xf32, #tpu.memory_space<vmem>>, vector<384x128xf32>,
    %c0_13 = arith.constant 0 : index
    %c0_14 = arith.constant 0 : index
    %17 = vector.load %arg8[%c0_13, %c0_14] : memref<432x128xf32, #tpu.memory_space<vmem>>, vector<384x128xf32>
    %c1_i32 = arith.constant 1 : i32
    %18 = tpu.dynamic_rotate %17 by %c1_i32 dim 0 : vector<384x128xf32>, i32 -> vector<384x128xf32>
    %c0_15 = arith.constant 0 : index
    %c0_16 = arith.constant 0 : index
    %c0_17 = arith.constant 0 : index
    %c0_18 = arith.constant 0 : index
    %19 = vector.load %arg5[%c0_15, %c0_16, %c0_17, %c0_18] : memref<3x3x128x128xf32, #tpu.memory_space<vmem>>, vector<1x1x128x128xf32>
    %20 = vector.shape_cast %19 : vector<1x1x128x128xf32> to vector<128x128xf32>
    %cst_19 = arith.constant dense<0.000000e+00> : vector<384x128xf32>
    %21 = tpu.matmul %18, %20, %cst_19 {dimension_numbers = #tpu.dot_dimension_numbers<[1], [0], [0], [1], [0, 0, 1, 1], [], []>} : vector<384x128xf32>, vector<128x128xf32>, vector<384x128xf32> -> vector<384x128xf32>
    %c0_20 = arith.constant 0 : index
    %c0_21 = arith.constant 0 : index
    %22 = vector.load %arg9[%c0_20, %c0_21] : memref<384x128xf32, #tpu.memory_space<vmem>>, vector<384x128xf32>
    tpu.vector_store %arg9[%c0_20, %c0_21], %21 {strides = array<i32>} : memref<384x128xf32, #tpu.memory_space<vmem>>, vector<384x128xf32>,
    %c0_22 = arith.constant 0 : index
    %c1 = arith.constant 1 : index
    %c0_23 = arith.constant 0 : index
    %c0_24 = arith.constant 0 : index
    %23 = vector.load %arg5[%c0_22, %c1, %c0_23, %c0_24] : memref<3x3x128x128xf32, #tpu.memory_space<vmem>>, vector<1x1x128x128xf32>
    %24 = vector.shape_cast %23 : vector<1x1x128x128xf32> to vector<128x128xf32>
    %cst_25 = arith.constant dense<0.000000e+00> : vector<384x128xf32>
    %25 = tpu.matmul %17, %24, %cst_25 {dimension_numbers = #tpu.dot_dimension_numbers<[1], [0], [0], [1], [0, 0, 1, 1], [], []>} : vector<384x128xf32>, vector<128x128xf32>, vector<384x128xf32> -> vector<384x128xf32>
    %c0_26 = arith.constant 0 : index
    %c0_27 = arith.constant 0 : index
    %26 = vector.load %arg9[%c0_26, %c0_27] : memref<384x128xf32, #tpu.memory_space<vmem>>, vector<384x128xf32>
    %27 = arith.addf %26, %25 : vector<384x128xf32>
    %c0_28 = arith.constant 0 : index
    %c0_29 = arith.constant 0 : index
    %28 = vector.load %arg9[%c0_28, %c0_29] : memref<384x128xf32, #tpu.memory_space<vmem>>, vector<384x128xf32>
    tpu.vector_store %arg9[%c0_28, %c0_29], %27 {strides = array<i32>} : memref<384x128xf32, #tpu.memory_space<vmem>>, vector<384x128xf32>,
    %c383_i32 = arith.constant 383 : i32
    %29 = tpu.dynamic_rotate %17 by %c383_i32 dim 0 : vector<384x128xf32>, i32 -> vector<384x128xf32>
    %c0_30 = arith.constant 0 : index
    %c2 = arith.constant 2 : index
    %c0_31 = arith.constant 0 : index
    %c0_32 = arith.constant 0 : index
    %30 = vector.load %arg5[%c0_30, %c2, %c0_31, %c0_32] : memref<3x3x128x128xf32, #tpu.memory_space<vmem>>, vector<1x1x128x128xf32>
    %31 = vector.shape_cast %30 : vector<1x1x128x128xf32> to vector<128x128xf32>
    %cst_33 = arith.constant dense<0.000000e+00> : vector<384x128xf32>
    %32 = tpu.matmul %29, %31, %cst_33 {dimension_numbers = #tpu.dot_dimension_numbers<[1], [0], [0], [1], [0, 0, 1, 1], [], []>} : vector<384x128xf32>, vector<128x128xf32>, vector<384x128xf32> -> vector<384x128xf32>
    %c0_34 = arith.constant 0 : index
    %c0_35 = arith.constant 0 : index
    %33 = vector.load %arg9[%c0_34, %c0_35] : memref<384x128xf32, #tpu.memory_space<vmem>>, vector<384x128xf32>
    %34 = arith.addf %33, %32 : vector<384x128xf32>
    %c0_36 = arith.constant 0 : index
    %c0_37 = arith.constant 0 : index
    %35 = vector.load %arg9[%c0_36, %c0_37] : memref<384x128xf32, #tpu.memory_space<vmem>>, vector<384x128xf32>
    tpu.vector_store %arg9[%c0_36, %c0_37], %34 {strides = array<i32>} : memref<384x128xf32, #tpu.memory_space<vmem>>, vector<384x128xf32>,
    %c24_38 = arith.constant 24 : index
    %c0_39 = arith.constant 0 : index
    %36 = vector.load %arg8[%c24_38, %c0_39] : memref<432x128xf32, #tpu.memory_space<vmem>>, vector<384x128xf32>
    %c1_i32_40 = arith.constant 1 : i32
    %37 = tpu.dynamic_rotate %36 by %c1_i32_40 dim 0 : vector<384x128xf32>, i32 -> vector<384x128xf32>
    %c1_41 = arith.constant 1 : index
    %c0_42 = arith.constant 0 : index
    %c0_43 = arith.constant 0 : index
    %c0_44 = arith.constant 0 : index
    %38 = vector.load %arg5[%c1_41, %c0_42, %c0_43, %c0_44] : memref<3x3x128x128xf32, #tpu.memory_space<vmem>>, vector<1x1x128x128xf32>
    %39 = vector.shape_cast %38 : vector<1x1x128x128xf32> to vector<128x128xf32>
    %cst_45 = arith.constant dense<0.000000e+00> : vector<384x128xf32>
    %40 = tpu.matmul %37, %39, %cst_45 {dimension_numbers = #tpu.dot_dimension_numbers<[1], [0], [0], [1], [0, 0, 1, 1], [], []>} : vector<384x128xf32>, vector<128x128xf32>, vector<384x128xf32> -> vector<384x128xf32>
    %c0_46 = arith.constant 0 : index
    %c0_47 = arith.constant 0 : index
    %41 = vector.load %arg9[%c0_46, %c0_47] : memref<384x128xf32, #tpu.memory_space<vmem>>, vector<384x128xf32>
    %42 = arith.addf %41, %40 : vector<384x128xf32>
    %c0_48 = arith.constant 0 : index
    %c0_49 = arith.constant 0 : index
    %43 = vector.load %arg9[%c0_48, %c0_49] : memref<384x128xf32, #tpu.memory_space<vmem>>, vector<384x128xf32>
    tpu.vector_store %arg9[%c0_48, %c0_49], %42 {strides = array<i32>} : memref<384x128xf32, #tpu.memory_space<vmem>>, vector<384x128xf32>,
    %c1_50 = arith.constant 1 : index
    %c1_51 = arith.constant 1 : index
    %c0_52 = arith.constant 0 : index
    %c0_53 = arith.constant 0 : index
    %44 = vector.load %arg5[%c1_50, %c1_51, %c0_52, %c0_53] : memref<3x3x128x128xf32, #tpu.memory_space<vmem>>, vector<1x1x128x128xf32>
    %45 = vector.shape_cast %44 : vector<1x1x128x128xf32> to vector<128x128xf32>
    %cst_54 = arith.constant dense<0.000000e+00> : vector<384x128xf32>
    %46 = tpu.matmul %36, %45, %cst_54 {dimension_numbers = #tpu.dot_dimension_numbers<[1], [0], [0], [1], [0, 0, 1, 1], [], []>} : vector<384x128xf32>, vector<128x128xf32>, vector<384x128xf32> -> vector<384x128xf32>
    %c0_55 = arith.constant 0 : index
    %c0_56 = arith.constant 0 : index
    %47 = vector.load %arg9[%c0_55, %c0_56] : memref<384x128xf32, #tpu.memory_space<vmem>>, vector<384x128xf32>
    %48 = arith.addf %47, %46 : vector<384x128xf32>
    %c0_57 = arith.constant 0 : index
    %c0_58 = arith.constant 0 : index
    %49 = vector.load %arg9[%c0_57, %c0_58] : memref<384x128xf32, #tpu.memory_space<vmem>>, vector<384x128xf32>
    tpu.vector_store %arg9[%c0_57, %c0_58], %48 {strides = array<i32>} : memref<384x128xf32, #tpu.memory_space<vmem>>, vector<384x128xf32>,
    %c383_i32_59 = arith.constant 383 : i32
    %50 = tpu.dynamic_rotate %36 by %c383_i32_59 dim 0 : vector<384x128xf32>, i32 -> vector<384x128xf32>
    %c1_60 = arith.constant 1 : index
    %c2_61 = arith.constant 2 : index
    %c0_62 = arith.constant 0 : index
    %c0_63 = arith.constant 0 : index
    %51 = vector.load %arg5[%c1_60, %c2_61, %c0_62, %c0_63] : memref<3x3x128x128xf32, #tpu.memory_space<vmem>>, vector<1x1x128x128xf32>
    %52 = vector.shape_cast %51 : vector<1x1x128x128xf32> to vector<128x128xf32>
    %cst_64 = arith.constant dense<0.000000e+00> : vector<384x128xf32>
    %53 = tpu.matmul %50, %52, %cst_64 {dimension_numbers = #tpu.dot_dimension_numbers<[1], [0], [0], [1], [0, 0, 1, 1], [], []>} : vector<384x128xf32>, vector<128x128xf32>, vector<384x128xf32> -> vector<384x128xf32>
    %c0_65 = arith.constant 0 : index
    %c0_66 = arith.constant 0 : index
    %54 = vector.load %arg9[%c0_65, %c0_66] : memref<384x128xf32, #tpu.memory_space<vmem>>, vector<384x128xf32>
    %55 = arith.addf %54, %53 : vector<384x128xf32>
    %c0_67 = arith.constant 0 : index
    %c0_68 = arith.constant 0 : index
    %56 = vector.load %arg9[%c0_67, %c0_68] : memref<384x128xf32, #tpu.memory_space<vmem>>, vector<384x128xf32>
    tpu.vector_store %arg9[%c0_67, %c0_68], %55 {strides = array<i32>} : memref<384x128xf32, #tpu.memory_space<vmem>>, vector<384x128xf32>,
    %c48 = arith.constant 48 : index
    %c0_69 = arith.constant 0 : index
    %57 = vector.load %arg8[%c48, %c0_69] : memref<432x128xf32, #tpu.memory_space<vmem>>, vector<384x128xf32>
    %c1_i32_70 = arith.constant 1 : i32
    %58 = tpu.dynamic_rotate %57 by %c1_i32_70 dim 0 : vector<384x128xf32>, i32 -> vector<384x128xf32>
    %c2_71 = arith.constant 2 : index
    %c0_72 = arith.constant 0 : index
    %c0_73 = arith.constant 0 : index
    %c0_74 = arith.constant 0 : index
    %59 = vector.load %arg5[%c2_71, %c0_72, %c0_73, %c0_74] : memref<3x3x128x128xf32, #tpu.memory_space<vmem>>, vector<1x1x128x128xf32>
    %60 = vector.shape_cast %59 : vector<1x1x128x128xf32> to vector<128x128xf32>
    %cst_75 = arith.constant dense<0.000000e+00> : vector<384x128xf32>
    %61 = tpu.matmul %58, %60, %cst_75 {dimension_numbers = #tpu.dot_dimension_numbers<[1], [0], [0], [1], [0, 0, 1, 1], [], []>} : vector<384x128xf32>, vector<128x128xf32>, vector<384x128xf32> -> vector<384x128xf32>
    %c0_76 = arith.constant 0 : index
    %c0_77 = arith.constant 0 : index
    %62 = vector.load %arg9[%c0_76, %c0_77] : memref<384x128xf32, #tpu.memory_space<vmem>>, vector<384x128xf32>
    %63 = arith.addf %62, %61 : vector<384x128xf32>
    %c0_78 = arith.constant 0 : index
    %c0_79 = arith.constant 0 : index
    %64 = vector.load %arg9[%c0_78, %c0_79] : memref<384x128xf32, #tpu.memory_space<vmem>>, vector<384x128xf32>
    tpu.vector_store %arg9[%c0_78, %c0_79], %63 {strides = array<i32>} : memref<384x128xf32, #tpu.memory_space<vmem>>, vector<384x128xf32>,
    %c2_80 = arith.constant 2 : index
    %c1_81 = arith.constant 1 : index
    %c0_82 = arith.constant 0 : index
    %c0_83 = arith.constant 0 : index
    %65 = vector.load %arg5[%c2_80, %c1_81, %c0_82, %c0_83] : memref<3x3x128x128xf32, #tpu.memory_space<vmem>>, vector<1x1x128x128xf32>
    %66 = vector.shape_cast %65 : vector<1x1x128x128xf32> to vector<128x128xf32>
    %cst_84 = arith.constant dense<0.000000e+00> : vector<384x128xf32>
    %67 = tpu.matmul %57, %66, %cst_84 {dimension_numbers = #tpu.dot_dimension_numbers<[1], [0], [0], [1], [0, 0, 1, 1], [], []>} : vector<384x128xf32>, vector<128x128xf32>, vector<384x128xf32> -> vector<384x128xf32>
    %c0_85 = arith.constant 0 : index
    %c0_86 = arith.constant 0 : index
    %68 = vector.load %arg9[%c0_85, %c0_86] : memref<384x128xf32, #tpu.memory_space<vmem>>, vector<384x128xf32>
    %69 = arith.addf %68, %67 : vector<384x128xf32>
    %c0_87 = arith.constant 0 : index
    %c0_88 = arith.constant 0 : index
    %70 = vector.load %arg9[%c0_87, %c0_88] : memref<384x128xf32, #tpu.memory_space<vmem>>, vector<384x128xf32>
    tpu.vector_store %arg9[%c0_87, %c0_88], %69 {strides = array<i32>} : memref<384x128xf32, #tpu.memory_space<vmem>>, vector<384x128xf32>,
    %c383_i32_89 = arith.constant 383 : i32
    %71 = tpu.dynamic_rotate %57 by %c383_i32_89 dim 0 : vector<384x128xf32>, i32 -> vector<384x128xf32>
    %c2_90 = arith.constant 2 : index
    %c2_91 = arith.constant 2 : index
    %c0_92 = arith.constant 0 : index
    %c0_93 = arith.constant 0 : index
    %72 = vector.load %arg5[%c2_90, %c2_91, %c0_92, %c0_93] : memref<3x3x128x128xf32, #tpu.memory_space<vmem>>, vector<1x1x128x128xf32>
    %73 = vector.shape_cast %72 : vector<1x1x128x128xf32> to vector<128x128xf32>
    %cst_94 = arith.constant dense<0.000000e+00> : vector<384x128xf32>
    %74 = tpu.matmul %71, %73, %cst_94 {dimension_numbers = #tpu.dot_dimension_numbers<[1], [0], [0], [1], [0, 0, 1, 1], [], []>} : vector<384x128xf32>, vector<128x128xf32>, vector<384x128xf32> -> vector<384x128xf32>
    %c0_95 = arith.constant 0 : index
    %c0_96 = arith.constant 0 : index
    %75 = vector.load %arg9[%c0_95, %c0_96] : memref<384x128xf32, #tpu.memory_space<vmem>>, vector<384x128xf32>
    %76 = arith.addf %75, %74 : vector<384x128xf32>
    %c0_97 = arith.constant 0 : index
    %c0_98 = arith.constant 0 : index
    %77 = vector.load %arg9[%c0_97, %c0_98] : memref<384x128xf32, #tpu.memory_space<vmem>>, vector<384x128xf32>
    tpu.vector_store %arg9[%c0_97, %c0_98], %76 {strides = array<i32>} : memref<384x128xf32, #tpu.memory_space<vmem>>, vector<384x128xf32>,
    %c0_99 = arith.constant 0 : index
    %c0_100 = arith.constant 0 : index
    %78 = vector.load %arg9[%c0_99, %c0_100] : memref<384x128xf32, #tpu.memory_space<vmem>>, vector<384x128xf32>
    %79 = vector.broadcast %0 : vector<384x1xf32> to vector<384x128xf32>
    %80 = arith.mulf %78, %79 : vector<384x128xf32>
    %c0_101 = arith.constant 0 : index
    %c0_102 = arith.constant 0 : index
    %c0_103 = arith.constant 0 : index
    %81 = vector.load %arg6[%c0_101, %c0_102, %c0_103] : memref<1x384x128xf32, #tpu.memory_space<vmem>>, vector<1x384x128xf32>
    %82 = vector.shape_cast %81 : vector<1x384x128xf32> to vector<384x128xf32>
    %83 = vector.shape_cast %80 : vector<384x128xf32> to vector<1x384x128xf32>
    tpu.vector_store %arg6[%c0_101, %c0_102, %c0_103], %83 {strides = array<i32>} : memref<1x384x128xf32, #tpu.memory_space<vmem>>, vector<1x384x128xf32>,
    %cst_104 = arith.constant dense<0.000000e+00> : vector<128xf32>
    %84 = vector.multi_reduction <add>, %80, %cst_104 [0] : vector<384x128xf32> to vector<128xf32>
    %85 = vector.shape_cast %84 : vector<128xf32> to vector<1x128xf32>
    %c0_105 = arith.constant 0 : index
    %c0_106 = arith.constant 0 : index
    %c0_107 = arith.constant 0 : index
    %86 = vector.load %arg7[%c0_105, %c0_106, %c0_107] : memref<1x2x128xf32, #tpu.memory_space<vmem>>, vector<1x1x128xf32>
    %87 = vector.shape_cast %86 : vector<1x1x128xf32> to vector<1x128xf32>
    %88 = vector.shape_cast %85 : vector<1x128xf32> to vector<1x1x128xf32>
    tpu.vector_store %arg7[%c0_105, %c0_106, %c0_107], %88 {strides = array<i32>} : memref<1x2x128xf32, #tpu.memory_space<vmem>>, vector<1x1x128xf32>,
    %89 = arith.mulf %80, %80 : vector<384x128xf32>
    %cst_108 = arith.constant dense<0.000000e+00> : vector<128xf32>
    %90 = vector.multi_reduction <add>, %89, %cst_108 [0] : vector<384x128xf32> to vector<128xf32>
    %91 = vector.shape_cast %90 : vector<128xf32> to vector<1x128xf32>
    %c0_109 = arith.constant 0 : index
    %c1_110 = arith.constant 1 : index
    %c0_111 = arith.constant 0 : index
    %92 = vector.load %arg7[%c0_109, %c1_110, %c0_111] : memref<1x2x128xf32, #tpu.memory_space<vmem>>, vector<1x1x128xf32>
    %93 = vector.shape_cast %92 : vector<1x1x128xf32> to vector<1x128xf32>
    %94 = vector.shape_cast %91 : vector<1x128xf32> to vector<1x1x128xf32>
    tpu.vector_store %arg7[%c0_109, %c1_110, %c0_111], %94 {strides = array<i32>} : memref<1x2x128xf32, #tpu.memory_space<vmem>>, vector<1x1x128xf32>,
    return
  }
  func.func @transform_0(%arg0: i32) -> (i32, i32, i32) {
    %c0_i32 = arith.constant 0 : i32
    %c0_i32_0 = arith.constant 0 : i32
    %c0_i32_1 = arith.constant 0 : i32
    return %arg0, %c0_i32, %c0_i32_0 : i32, i32, i32
  }
  func.func @transform_1(%arg0: i32) -> (i32, i32) {
    %c0_i32 = arith.constant 0 : i32
    %c0_i32_0 = arith.constant 0 : i32
    %c0_i32_1 = arith.constant 0 : i32
    return %c0_i32, %c0_i32_0 : i32, i32
  }
  func.func @transform_2(%arg0: i32) -> (i32, i32) {
    %c0_i32 = arith.constant 0 : i32
    %c0_i32_0 = arith.constant 0 : i32
    %c0_i32_1 = arith.constant 0 : i32
    return %c0_i32, %c0_i32_0 : i32, i32
  }
  func.func @transform_3(%arg0: i32) -> (i32, i32) {
    %c0_i32 = arith.constant 0 : i32
    %c0_i32_0 = arith.constant 0 : i32
    %c0_i32_1 = arith.constant 0 : i32
    return %c0_i32, %c0_i32_0 : i32, i32
  }
  func.func @transform_4(%arg0: i32) -> (i32, i32, i32, i32) {
    %c0_i32 = arith.constant 0 : i32
    %c0_i32_0 = arith.constant 0 : i32
    %c0_i32_1 = arith.constant 0 : i32
    %c0_i32_2 = arith.constant 0 : i32
    %c0_i32_3 = arith.constant 0 : i32
    return %c0_i32, %c0_i32_0, %c0_i32_1, %c0_i32_2 : i32, i32, i32, i32
  }
  func.func @transform_5(%arg0: i32) -> (i32, i32, i32) {
    %c0_i32 = arith.constant 0 : i32
    %c0_i32_0 = arith.constant 0 : i32
    %c0_i32_1 = arith.constant 0 : i32
    return %arg0, %c0_i32, %c0_i32_0 : i32, i32, i32
  }
  func.func @transform_6(%arg0: i32) -> (i32, i32, i32) {
    %c0_i32 = arith.constant 0 : i32
    %c0_i32_0 = arith.constant 0 : i32
    %c0_i32_1 = arith.constant 0 : i32
    return %arg0, %c0_i32, %c0_i32_0 : i32, i32, i32
  }
}

module attributes {stable_mosaic.version = 11 : i64} {
  func.func @bn_add_relu_kernel(%arg0: i32, %arg1: memref<768x128xf32, #tpu.memory_space<vmem>>, %arg2: memref<1x128xf32, #tpu.memory_space<vmem>>, %arg3: memref<1x128xf32, #tpu.memory_space<vmem>>, %arg4: memref<768x128xf32, #tpu.memory_space<vmem>>, %arg5: memref<768x128xf32, #tpu.memory_space<vmem>>) attributes {dimension_semantics = [#tpu.dimension_semantics<parallel>], iteration_bounds = array<i64: 1>, scalar_prefetch = 0 : i64, scratch_operands = 0 : i64, tpu.core_type = #tpu.core_type<tc>, window_params = [{transform_indices = @transform_0, window_bounds = array<i64: 768, 128>}, {pipeline_mode = #tpu.pipeline_mode<synchronous>, transform_indices = @transform_1, window_bounds = array<i64: 1, 128>}, {pipeline_mode = #tpu.pipeline_mode<synchronous>, transform_indices = @transform_2, window_bounds = array<i64: 1, 128>}, {transform_indices = @transform_3, window_bounds = array<i64: 768, 128>}, {transform_indices = @transform_4, window_bounds = array<i64: 768, 128>}]} {
    %c0 = arith.constant 0 : index
    %c0_0 = arith.constant 0 : index
    %0 = vector.load %arg1[%c0, %c0_0] : memref<768x128xf32, #tpu.memory_space<vmem>>, vector<768x128xf32>
    %c0_1 = arith.constant 0 : index
    %c0_2 = arith.constant 0 : index
    %1 = vector.load %arg2[%c0_1, %c0_2] : memref<1x128xf32, #tpu.memory_space<vmem>>, vector<1x128xf32>
    %2 = vector.broadcast %1 : vector<1x128xf32> to vector<768x128xf32>
    %3 = arith.mulf %0, %2 : vector<768x128xf32>
    %c0_3 = arith.constant 0 : index
    %c0_4 = arith.constant 0 : index
    %4 = vector.load %arg3[%c0_3, %c0_4] : memref<1x128xf32, #tpu.memory_space<vmem>>, vector<1x128xf32>
    %5 = vector.broadcast %4 : vector<1x128xf32> to vector<768x128xf32>
    %6 = arith.addf %3, %5 : vector<768x128xf32>
    %c0_5 = arith.constant 0 : index
    %c0_6 = arith.constant 0 : index
    %7 = vector.load %arg4[%c0_5, %c0_6] : memref<768x128xf32, #tpu.memory_space<vmem>>, vector<768x128xf32>
    %8 = arith.addf %6, %7 : vector<768x128xf32>
    %cst = arith.constant 0.000000e+00 : f32
    %9 = vector.broadcast %cst : f32 to vector<768x128xf32>
    %10 = arith.maximumf %8, %9 : vector<768x128xf32>
    %c0_7 = arith.constant 0 : index
    %c0_8 = arith.constant 0 : index
    %11 = vector.load %arg5[%c0_7, %c0_8] : memref<768x128xf32, #tpu.memory_space<vmem>>, vector<768x128xf32>
    tpu.vector_store %arg5[%c0_7, %c0_8], %10 {strides = array<i32>} : memref<768x128xf32, #tpu.memory_space<vmem>>, vector<768x128xf32>,
    return
  }
  func.func @transform_0(%arg0: i32) -> (i32, i32) {
    %c0_i32 = arith.constant 0 : i32
    %c0_i32_0 = arith.constant 0 : i32
    return %arg0, %c0_i32 : i32, i32
  }
  func.func @transform_1(%arg0: i32) -> (i32, i32) {
    %c0_i32 = arith.constant 0 : i32
    %c0_i32_0 = arith.constant 0 : i32
    %c0_i32_1 = arith.constant 0 : i32
    return %c0_i32, %c0_i32_0 : i32, i32
  }
  func.func @transform_2(%arg0: i32) -> (i32, i32) {
    %c0_i32 = arith.constant 0 : i32
    %c0_i32_0 = arith.constant 0 : i32
    %c0_i32_1 = arith.constant 0 : i32
    return %c0_i32, %c0_i32_0 : i32, i32
  }
  func.func @transform_3(%arg0: i32) -> (i32, i32) {
    %c0_i32 = arith.constant 0 : i32
    %c0_i32_0 = arith.constant 0 : i32
    return %arg0, %c0_i32 : i32, i32
  }
  func.func @transform_4(%arg0: i32) -> (i32, i32) {
    %c0_i32 = arith.constant 0 : i32
    %c0_i32_0 = arith.constant 0 : i32
    return %arg0, %c0_i32 : i32, i32
  }
}

</mosaic_0001>

<bundles_post_ra>
// kernel: tile.8
= control target key start
LH: loop header
LB: loop body
LE: loop exit
PB: predicated region body
PF: predicated region fallthrough
CT: control target
= control target key end

     0   :  { %s28_s0 = inlined_call_operand.vmem [shape: f32[24], index: 0, kind: input, shape index: {}]   ;;  %s29_s1 = inlined_call_operand.vmem [shape: f32[16,24], index: 1, kind: output, shape index: {}]  }
   0x1   :  { %v4_v0 = vld [vmem:[%s28_s0] ss:$0 sm:$0xff] }
   0x2   :  { %5 = vst [vmem:[%s29_s1] sm:$0xff] %v4_v0  ;;  %8 = vst [vmem:[%s29_s1 + $0x8] sm:$0xff] %v4_v0 }

// kernel: tile.0
= control target key start
LH: loop header
LB: loop body
LE: loop exit
PB: predicated region body
PF: predicated region fallthrough
CT: control target
= control target key end

     0   :  { %s821_s8 = smov 126   ;;  %s822_s9 = smov 127   ;;  %vm3_vm0 = vcmask 7168   ;;  %s1630_s0 = inlined_call_operand.vmem [shape: f32[16,24], index: 0, kind: input, shape index: {}]   ;;  %s1631_s1 = inlined_call_operand.vmem [shape: f32[384,1], index: 1, kind: output, shape index: {}]  }
   0x1   :  { %v38_v0 = vld.sshfl [vmem:[%s1630_s0] sm:$0xff pattern:$0x56741230]   ;;  %v604_v1 = vld.sshfl [vmem:[%s1630_s0 + $0x8] sm:$0xff pattern:$0x56741230]  }
   0x2   :  { %39 = vrot.lane.b32.xlu1 %v38_v0, %s821_s8  ;;  %14 = vrot.lane.b32.xlu0 %v38_v0, %s822_s9  ;;  %s823_s12 = smov 125   ;;  %s824_s13 = smov 124   ;;  %v658_v2 = vld.sshfl [vmem:[%s1630_s0 + $0x8] sm:$0xff pattern:$0x67452301]   ;;  %v2_v6 = vld [vmem:[%s1630_s0] sm:$0xff]  }
   0x3   :  { %s825_s14 = smov 123   ;;  %s826_s15 = smov 122   ;;  %v188_v3 = vld.sshfl [vmem:[%s1630_s0] sm:$0xff pattern:$0x67452301]   ;;  %v588_v7 = vld [vmem:[%s1630_s0 + $0x8] sm:$0xff]  }
   0x4   :  { %s827_s16 = smov 121   ;;  %s828_s21 = smov 120   ;;  %v730_v4 = vld.sshfl [vmem:[%s1630_s0 + $0x8] sm:$0xff pattern:$0x74563012]  }
   0x5   :  { %s829_s22 = smov 119   ;;  %s830_s23 = smov 118   ;;  %v388_v5 = vld.sshfl [vmem:[%s1630_s0] sm:$0xff pattern:$0x74563012]  }
   0x6   :  { %52 = vrot.lane.b32.xlu1 %v604_v1, %s821_s8  ;;  %27 = vrot.lane.b32.xlu0 %v604_v1, %s822_s9  ;;  %s831_s24 = smov 117   ;;  %s832_s25 = smov 116   ;;  %4 = vst.msk [vmem:[%s1631_s1] ss:$24 sm:$0xf] %vm3_vm0, %v2_v6  }
   0x7   :  { %s833_s26 = smov 115   ;;  %s834_s27 = smov 114   ;;  %5 = vst.msk [vmem:[%s1631_s1] ss:$24 sm:$0xf0] %vm3_vm0, %v2_v6  }
   0x8   :  { %s835_s28 = smov 113   ;;  %s836_s4 = smov 112   ;;  %589 = vst.msk [vmem:[%s1631_s1 + $0xc0] ss:$24 sm:$0xf] %vm3_vm0, %v588_v7  }
   0x9   :  { %s837_s5 = smov 111   ;;  %s838_s6 = smov 110   ;;  %590 = vst.msk [vmem:[%s1631_s1 + $0xc0] ss:$24 sm:$0xf0] %vm3_vm0, %v588_v7  }
   0xa   :  { %77 = vrot.lane.b32.xlu1 %v604_v1, %s823_s12  ;;  %64 = vrot.lane.b32.xlu0 %v38_v0, %s823_s12  ;;  %s839_s7 = smov 109   ;;  %s840_s19 = smov 108  }
   0xb   :  { %s841_s20 = smov 107  }
   0xe   :  { %102 = vrot.lane.b32.xlu1 %v604_v1, %s824_s13  ;;  %89 = vrot.lane.b32.xlu0 %v38_v0, %s824_s13 }
  0x12   :  { %127 = vrot.lane.b32.xlu1 %v604_v1, %s825_s14  ;;  %114 = vrot.lane.b32.xlu0 %v38_v0, %s825_s14 }
  0x16   :  { %152 = vrot.lane.b32.xlu1 %v604_v1, %s826_s15  ;;  %139 = vrot.lane.b32.xlu0 %v38_v0, %s826_s15 }
  0x1a   :  { %177 = vrot.lane.b32.xlu1 %v604_v1, %s827_s16  ;;  %164 = vrot.lane.b32.xlu0 %v38_v0, %s827_s16 }
  0x1e   :  { %202 = vrot.lane.b32.xlu1 %v658_v2, %s828_s21  ;;  %189 = vrot.lane.b32.xlu0 %v188_v3, %s828_s21  ;;  %s842_s21 = smov 106  }
  0x22   :  { %227 = vrot.lane.b32.xlu1 %v658_v2, %s829_s22  ;;  %214 = vrot.lane.b32.xlu0 %v188_v3, %s829_s22  ;;  %s843_s22 = smov 105  }
  0x26   :  { %252 = vrot.lane.b32.xlu1 %v658_v2, %s830_s23  ;;  %239 = vrot.lane.b32.xlu0 %v188_v3, %s830_s23 }
  0x2a   :  { %277 = vrot.lane.b32.xlu1 %v658_v2, %s831_s24  ;;  %264 = vrot.lane.b32.xlu0 %v188_v3, %s831_s24 }
  0x2e   :  { %302 = vrot.lane.b32.xlu1 %v658_v2, %s832_s25  ;;  %289 = vrot.lane.b32.xlu0 %v188_v3, %s832_s25 }
  0x32   :  { %327 = vrot.lane.b32.xlu1 %v658_v2, %s833_s26  ;;  %314 = vrot.lane.b32.xlu0 %v188_v3, %s833_s26 }
  0x36   :  { %352 = vrot.lane.b32.xlu1 %v658_v2, %s834_s27  ;;  %339 = vrot.lane.b32.xlu0 %v188_v3, %s834_s27 }
  0x3a   :  { %377 = vrot.lane.b32.xlu1 %v658_v2, %s835_s28  ;;  %364 = vrot.lane.b32.xlu0 %v188_v3, %s835_s28 }
  0x3e   :  { %402 = vrot.lane.b32.xlu1 %v730_v4, %s836_s4  ;;  %389 = vrot.lane.b32.xlu0 %v388_v5, %s836_s4 }
  0x42   :  { %427 = vrot.lane.b32.xlu1 %v730_v4, %s837_s5  ;;  %414 = vrot.lane.b32.xlu0 %v388_v5, %s837_s5 }
  0x46   :  { %452 = vrot.lane.b32.xlu1 %v730_v4, %s838_s6  ;;  %439 = vrot.lane.b32.xlu0 %v388_v5, %s838_s6 }
  0x4a   :  { %477 = vrot.lane.b32.xlu1 %v730_v4, %s839_s7  ;;  %464 = vrot.lane.b32.xlu0 %v388_v5, %s839_s7 }
  0x4e   :  { %502 = vrot.lane.b32.xlu1 %v730_v4, %s840_s19  ;;  %489 = vrot.lane.b32.xlu0 %v388_v5, %s840_s19 }
  0x52   :  { %527 = vrot.lane.b32.xlu1 %v730_v4, %s841_s20  ;;  %514 = vrot.lane.b32.xlu0 %v388_v5, %s841_s20 }
  0x56   :  { %552 = vrot.lane.b32.xlu1 %v730_v4, %s842_s21  ;;  %539 = vrot.lane.b32.xlu0 %v388_v5, %s842_s21 }
  0x5a   :  { %577 = vrot.lane.b32.xlu1 %v730_v4, %s843_s22  ;;  %564 = vrot.lane.b32.xlu0 %v388_v5, %s843_s22 }
  0x74   :  { %v40_v8 = vpop.permute.xlu1 %39   ;;  %v15_v9 = vpop.permute.xlu0 %14  }
  0x75   :  { %600 = vst.msk [vmem:[%s1631_s1 + $0x2] ss:$72 sm:$0x3] %vm3_vm0, %v40_v8   ;;  %601 = vst.msk [vmem:[%s1631_s1 + $0x62] ss:$-24 sm:$0xc] %vm3_vm0, %v40_v8  }
  0x76   :  { %602 = vst.msk [vmem:[%s1631_s1 - $0xbe] ss:$72 sm:$0x30] %vm3_vm0, %v40_v8   ;;  %603 = vst.msk [vmem:[%s1631_s1 + $0x122] ss:$-24 sm:$0xc0] %vm3_vm0, %v40_v8  }
  0x77   :  { %591 = vst.msk [vmem:[%s1631_s1 + $0x1] ss:$72 sm:$0x3] %vm3_vm0, %v15_v9   ;;  %592 = vst.msk [vmem:[%s1631_s1 + $0x61] ss:$-24 sm:$0xc] %vm3_vm0, %v15_v9  }
  0x78   :  { %593 = vst.msk [vmem:[%s1631_s1 - $0xbf] ss:$72 sm:$0x30] %vm3_vm0, %v15_v9   ;;  %594 = vst.msk [vmem:[%s1631_s1 + $0x121] ss:$-24 sm:$0xc0] %vm3_vm0, %v15_v9   ;;  %v53_v10 = vpop.permute.xlu1 %52   ;;  %v28_v11 = vpop.permute.xlu0 %27  }
  0x79   :  { %605 = vst.msk [vmem:[%s1631_s1 + $0xc2] ss:$72 sm:$0x3] %vm3_vm0, %v53_v10   ;;  %606 = vst.msk [vmem:[%s1631_s1 + $0x122] ss:$-24 sm:$0xc] %vm3_vm0, %v53_v10  }
  0x7a   :  { %607 = vst.msk [vmem:[%s1631_s1 + $0x2] ss:$72 sm:$0x30] %vm3_vm0, %v53_v10   ;;  %608 = vst.msk [vmem:[%s1631_s1 + $0x1e2] ss:$-24 sm:$0xc0] %vm3_vm0, %v53_v10  }
  0x7b   :  { %596 = vst.msk [vmem:[%s1631_s1 + $0xc1] ss:$72 sm:$0x3] %vm3_vm0, %v28_v11   ;;  %597 = vst.msk [vmem:[%s1631_s1 + $0x121] ss:$-24 sm:$0xc] %vm3_vm0, %v28_v11  }
  0x7c   :  { %598 = vst.msk [vmem:[%s1631_s1 + $0x1] ss:$72 sm:$0x30] %vm3_vm0, %v28_v11   ;;  %599 = vst.msk [vmem:[%s1631_s1 + $0x1e1] ss:$-24 sm:$0xc0] %vm3_vm0, %v28_v11   ;;  %v78_v12 = vpop.permute.xlu1 %77   ;;  %v65_v13 = vpop.permute.xlu0 %64  }
  0x7d   :  { %614 = vst.msk [vmem:[%s1631_s1 + $0xc3] ss:$72 sm:$0x3] %vm3_vm0, %v78_v12   ;;  %615 = vst.msk [vmem:[%s1631_s1 + $0x123] ss:$-24 sm:$0xc] %vm3_vm0, %v78_v12  }
  0x7e   :  { %616 = vst.msk [vmem:[%s1631_s1 + $0x3] ss:$72 sm:$0x30] %vm3_vm0, %v78_v12   ;;  %617 = vst.msk [vmem:[%s1631_s1 + $0x1e3] ss:$-24 sm:$0xc0] %vm3_vm0, %v78_v12  }
  0x7f   :  { %609 = vst.msk [vmem:[%s1631_s1 + $0x3] ss:$72 sm:$0x3] %vm3_vm0, %v65_v13   ;;  %610 = vst.msk [vmem:[%s1631_s1 + $0x63] ss:$-24 sm:$0xc] %vm3_vm0, %v65_v13  }
  0x80   :  { %611 = vst.msk [vmem:[%s1631_s1 - $0xbd] ss:$72 sm:$0x30] %vm3_vm0, %v65_v13   ;;  %612 = vst.msk [vmem:[%s1631_s1 + $0x123] ss:$-24 sm:$0xc0] %vm3_vm0, %v65_v13   ;;  %v103_v14 = vpop.permute.xlu1 %102   ;;  %v90_v15 = vpop.permute.xlu0 %89  }
  0x81   :  { %623 = vst.msk [vmem:[%s1631_s1 + $0xc4] ss:$72 sm:$0x3] %vm3_vm0, %v103_v14   ;;  %624 = vst.msk [vmem:[%s1631_s1 + $0x124] ss:$-24 sm:$0xc] %vm3_vm0, %v103_v14  }
  0x82   :  { %625 = vst.msk [vmem:[%s1631_s1 + $0x4] ss:$72 sm:$0x30] %vm3_vm0, %v103_v14   ;;  %626 = vst.msk [vmem:[%s1631_s1 + $0x1e4] ss:$-24 sm:$0xc0] %vm3_vm0, %v103_v14  }
  0x83   :  { %618 = vst.msk [vmem:[%s1631_s1 + $0x4] ss:$72 sm:$0x3] %vm3_vm0, %v90_v15   ;;  %619 = vst.msk [vmem:[%s1631_s1 + $0x64] ss:$-24 sm:$0xc] %vm3_vm0, %v90_v15  }
  0x84   :  { %620 = vst.msk [vmem:[%s1631_s1 - $0xbc] ss:$72 sm:$0x30] %vm3_vm0, %v90_v15   ;;  %621 = vst.msk [vmem:[%s1631_s1 + $0x124] ss:$-24 sm:$0xc0] %vm3_vm0, %v90_v15   ;;  %v128_v16 = vpop.permute.xlu1 %127   ;;  %v115_v17 = vpop.permute.xlu0 %114  }
  0x85   :  { %632 = vst.msk [vmem:[%s1631_s1 + $0xc5] ss:$72 sm:$0x3] %vm3_vm0, %v128_v16   ;;  %633 = vst.msk [vmem:[%s1631_s1 + $0x125] ss:$-24 sm:$0xc] %vm3_vm0, %v128_v16  }
  0x86   :  { %634 = vst.msk [vmem:[%s1631_s1 + $0x5] ss:$72 sm:$0x30] %vm3_vm0, %v128_v16   ;;  %635 = vst.msk [vmem:[%s1631_s1 + $0x1e5] ss:$-24 sm:$0xc0] %vm3_vm0, %v128_v16  }
  0x87   :  { %627 = vst.msk [vmem:[%s1631_s1 + $0x5] ss:$72 sm:$0x3] %vm3_vm0, %v115_v17   ;;  %628 = vst.msk [vmem:[%s1631_s1 + $0x65] ss:$-24 sm:$0xc] %vm3_vm0, %v115_v17  }
  0x88   :  { %629 = vst.msk [vmem:[%s1631_s1 - $0xbb] ss:$72 sm:$0x30] %vm3_vm0, %v115_v17   ;;  %630 = vst.msk [vmem:[%s1631_s1 + $0x125] ss:$-24 sm:$0xc0] %vm3_vm0, %v115_v17   ;;  %v153_v18 = vpop.permute.xlu1 %152   ;;  %v140_v19 = vpop.permute.xlu0 %139  }
  0x89   :  { %641 = vst.msk [vmem:[%s1631_s1 + $0xc6] ss:$72 sm:$0x3] %vm3_vm0, %v153_v18   ;;  %642 = vst.msk [vmem:[%s1631_s1 + $0x126] ss:$-24 sm:$0xc] %vm3_vm0, %v153_v18  }
  0x8a   :  { %643 = vst.msk [vmem:[%s1631_s1 + $0x6] ss:$72 sm:$0x30] %vm3_vm0, %v153_v18   ;;  %644 = vst.msk [vmem:[%s1631_s1 + $0x1e6] ss:$-24 sm:$0xc0] %vm3_vm0, %v153_v18  }
  0x8b   :  { %636 = vst.msk [vmem:[%s1631_s1 + $0x6] ss:$72 sm:$0x3] %vm3_vm0, %v140_v19   ;;  %637 = vst.msk [vmem:[%s1631_s1 + $0x66] ss:$-24 sm:$0xc] %vm3_vm0, %v140_v19  }
  0x8c   :  { %638 = vst.msk [vmem:[%s1631_s1 - $0xba] ss:$72 sm:$0x30] %vm3_vm0, %v140_v19   ;;  %639 = vst.msk [vmem:[%s1631_s1 + $0x126] ss:$-24 sm:$0xc0] %vm3_vm0, %v140_v19   ;;  %v178_v20 = vpop.permute.xlu1 %177   ;;  %v165_v21 = vpop.permute.xlu0 %164  }
  0x8d   :  { %650 = vst.msk [vmem:[%s1631_s1 + $0xc7] ss:$72 sm:$0x3] %vm3_vm0, %v178_v20   ;;  %651 = vst.msk [vmem:[%s1631_s1 + $0x127] ss:$-24 sm:$0xc] %vm3_vm0, %v178_v20  }
  0x8e   :  { %652 = vst.msk [vmem:[%s1631_s1 + $0x7] ss:$72 sm:$0x30] %vm3_vm0, %v178_v20   ;;  %653 = vst.msk [vmem:[%s1631_s1 + $0x1e7] ss:$-24 sm:$0xc0] %vm3_vm0, %v178_v20  }
  0x8f   :  { %645 = vst.msk [vmem:[%s1631_s1 + $0x7] ss:$72 sm:$0x3] %vm3_vm0, %v165_v21   ;;  %646 = vst.msk [vmem:[%s1631_s1 + $0x67] ss:$-24 sm:$0xc] %vm3_vm0, %v165_v21  }
  0x90   :  { %647 = vst.msk [vmem:[%s1631_s1 - $0xb9] ss:$72 sm:$0x30] %vm3_vm0, %v165_v21   ;;  %648 = vst.msk [vmem:[%s1631_s1 + $0x127] ss:$-24 sm:$0xc0] %vm3_vm0, %v165_v21   ;;  %v203_v22 = vpop.permute.xlu1 %202   ;;  %v190_v23 = vpop.permute.xlu0 %189  }
  0x91   :  { %659 = vst.msk [vmem:[%s1631_s1 + $0xe0] ss:$-24 sm:$0x3] %vm3_vm0, %v203_v22   ;;  %660 = vst.msk [vmem:[%s1631_s1 + $0x140] ss:$-24 sm:$0xc] %vm3_vm0, %v203_v22  }
  0x92   :  { %661 = vst.msk [vmem:[%s1631_s1 + $0x1a0] ss:$-24 sm:$0x30] %vm3_vm0, %v203_v22   ;;  %662 = vst.msk [vmem:[%s1631_s1 + $0x200] ss:$-24 sm:$0xc0] %vm3_vm0, %v203_v22  }
  0x93   :  { %654 = vst.msk [vmem:[%s1631_s1 + $0x20] ss:$-24 sm:$0x3] %vm3_vm0, %v190_v23   ;;  %655 = vst.msk [vmem:[%s1631_s1 + $0x80] ss:$-24 sm:$0xc] %vm3_vm0, %v190_v23  }
  0x94   :  { %656 = vst.msk [vmem:[%s1631_s1 + $0xe0] ss:$-24 sm:$0x30] %vm3_vm0, %v190_v23   ;;  %657 = vst.msk [vmem:[%s1631_s1 + $0x140] ss:$-24 sm:$0xc0] %vm3_vm0, %v190_v23   ;;  %v228_v24 = vpop.permute.xlu1 %227   ;;  %v215_v25 = vpop.permute.xlu0 %214  }
  0x95   :  { %668 = vst.msk [vmem:[%s1631_s1 + $0xe1] ss:$-24 sm:$0x3] %vm3_vm0, %v228_v24   ;;  %669 = vst.msk [vmem:[%s1631_s1 + $0x141] ss:$-24 sm:$0xc] %vm3_vm0, %v228_v24  }
  0x96   :  { %670 = vst.msk [vmem:[%s1631_s1 + $0x1a1] ss:$-24 sm:$0x30] %vm3_vm0, %v228_v24   ;;  %671 = vst.msk [vmem:[%s1631_s1 + $0x201] ss:$-24 sm:$0xc0] %vm3_vm0, %v228_v24  }
  0x97   :  { %663 = vst.msk [vmem:[%s1631_s1 + $0x21] ss:$-24 sm:$0x3] %vm3_vm0, %v215_v25   ;;  %664 = vst.msk [vmem:[%s1631_s1 + $0x81] ss:$-24 sm:$0xc] %vm3_vm0, %v215_v25  }
  0x98   :  { %665 = vst.msk [vmem:[%s1631_s1 + $0xe1] ss:$-24 sm:$0x30] %vm3_vm0, %v215_v25   ;;  %666 = vst.msk [vmem:[%s1631_s1 + $0x141] ss:$-24 sm:$0xc0] %vm3_vm0, %v215_v25   ;;  %v253_v26 = vpop.permute.xlu1 %252   ;;  %v240_v27 = vpop.permute.xlu0 %239  }
  0x99   :  { %677 = vst.msk [vmem:[%s1631_s1 + $0xe2] ss:$-24 sm:$0x3] %vm3_vm0, %v253_v26   ;;  %678 = vst.msk [vmem:[%s1631_s1 + $0x142] ss:$-24 sm:$0xc] %vm3_vm0, %v253_v26  }
  0x9a   :  { %679 = vst.msk [vmem:[%s1631_s1 + $0x1a2] ss:$-24 sm:$0x30] %vm3_vm0, %v253_v26   ;;  %680 = vst.msk [vmem:[%s1631_s1 + $0x202] ss:$-24 sm:$0xc0] %vm3_vm0, %v253_v26  }
  0x9b   :  { %672 = vst.msk [vmem:[%s1631_s1 + $0x22] ss:$-24 sm:$0x3] %vm3_vm0, %v240_v27   ;;  %673 = vst.msk [vmem:[%s1631_s1 + $0x82] ss:$-24 sm:$0xc] %vm3_vm0, %v240_v27  }
  0x9c   :  { %674 = vst.msk [vmem:[%s1631_s1 + $0xe2] ss:$-24 sm:$0x30] %vm3_vm0, %v240_v27   ;;  %675 = vst.msk [vmem:[%s1631_s1 + $0x142] ss:$-24 sm:$0xc0] %vm3_vm0, %v240_v27   ;;  %v278_v28 = vpop.permute.xlu1 %277   ;;  %v265_v29 = vpop.permute.xlu0 %264  }
  0x9d   :  { %686 = vst.msk [vmem:[%s1631_s1 + $0xe3] ss:$-24 sm:$0x3] %vm3_vm0, %v278_v28   ;;  %687 = vst.msk [vmem:[%s1631_s1 + $0x143] ss:$-24 sm:$0xc] %vm3_vm0, %v278_v28  }
  0x9e   :  { %688 = vst.msk [vmem:[%s1631_s1 + $0x1a3] ss:$-24 sm:$0x30] %vm3_vm0, %v278_v28   ;;  %689 = vst.msk [vmem:[%s1631_s1 + $0x203] ss:$-24 sm:$0xc0] %vm3_vm0, %v278_v28  }
  0x9f   :  { %681 = vst.msk [vmem:[%s1631_s1 + $0x23] ss:$-24 sm:$0x3] %vm3_vm0, %v265_v29   ;;  %682 = vst.msk [vmem:[%s1631_s1 + $0x83] ss:$-24 sm:$0xc] %vm3_vm0, %v265_v29  }
  0xa0   :  { %683 = vst.msk [vmem:[%s1631_s1 + $0xe3] ss:$-24 sm:$0x30] %vm3_vm0, %v265_v29   ;;  %684 = vst.msk [vmem:[%s1631_s1 + $0x143] ss:$-24 sm:$0xc0] %vm3_vm0, %v265_v29   ;;  %v303_v30 = vpop.permute.xlu1 %302   ;;  %v290_v31 = vpop.permute.xlu0 %289  }
  0xa1   :  { %695 = vst.msk [vmem:[%s1631_s1 + $0xe4] ss:$-24 sm:$0x3] %vm3_vm0, %v303_v30   ;;  %696 = vst.msk [vmem:[%s1631_s1 + $0x144] ss:$-24 sm:$0xc] %vm3_vm0, %v303_v30  }
  0xa2   :  { %697 = vst.msk [vmem:[%s1631_s1 + $0x1a4] ss:$-24 sm:$0x30] %vm3_vm0, %v303_v30   ;;  %698 = vst.msk [vmem:[%s1631_s1 + $0x204] ss:$-24 sm:$0xc0] %vm3_vm0, %v303_v30  }
  0xa3   :  { %690 = vst.msk [vmem:[%s1631_s1 + $0x24] ss:$-24 sm:$0x3] %vm3_vm0, %v290_v31   ;;  %691 = vst.msk [vmem:[%s1631_s1 + $0x84] ss:$-24 sm:$0xc] %vm3_vm0, %v290_v31  }
  0xa4   :  { %692 = vst.msk [vmem:[%s1631_s1 + $0xe4] ss:$-24 sm:$0x30] %vm3_vm0, %v290_v31   ;;  %693 = vst.msk [vmem:[%s1631_s1 + $0x144] ss:$-24 sm:$0xc0] %vm3_vm0, %v290_v31   ;;  %v328_v32 = vpop.permute.xlu1 %327   ;;  %v315_v33 = vpop.permute.xlu0 %314  }
  0xa5   :  { %704 = vst.msk [vmem:[%s1631_s1 + $0xe5] ss:$-24 sm:$0x3] %vm3_vm0, %v328_v32   ;;  %705 = vst.msk [vmem:[%s1631_s1 + $0x145] ss:$-24 sm:$0xc] %vm3_vm0, %v328_v32  }
  0xa6   :  { %706 = vst.msk [vmem:[%s1631_s1 + $0x1a5] ss:$-24 sm:$0x30] %vm3_vm0, %v328_v32   ;;  %707 = vst.msk [vmem:[%s1631_s1 + $0x205] ss:$-24 sm:$0xc0] %vm3_vm0, %v328_v32  }
  0xa7   :  { %699 = vst.msk [vmem:[%s1631_s1 + $0x25] ss:$-24 sm:$0x3] %vm3_vm0, %v315_v33   ;;  %700 = vst.msk [vmem:[%s1631_s1 + $0x85] ss:$-24 sm:$0xc] %vm3_vm0, %v315_v33  }
  0xa8   :  { %701 = vst.msk [vmem:[%s1631_s1 + $0xe5] ss:$-24 sm:$0x30] %vm3_vm0, %v315_v33   ;;  %702 = vst.msk [vmem:[%s1631_s1 + $0x145] ss:$-24 sm:$0xc0] %vm3_vm0, %v315_v33   ;;  %v353_v34 = vpop.permute.xlu1 %352   ;;  %v340_v35 = vpop.permute.xlu0 %339  }
  0xa9   :  { %713 = vst.msk [vmem:[%s1631_s1 + $0xe6] ss:$-24 sm:$0x3] %vm3_vm0, %v353_v34   ;;  %714 = vst.msk [vmem:[%s1631_s1 + $0x146] ss:$-24 sm:$0xc] %vm3_vm0, %v353_v34  }
  0xaa   :  { %715 = vst.msk [vmem:[%s1631_s1 + $0x1a6] ss:$-24 sm:$0x30] %vm3_vm0, %v353_v34   ;;  %716 = vst.msk [vmem:[%s1631_s1 + $0x206] ss:$-24 sm:$0xc0] %vm3_vm0, %v353_v34  }
  0xab   :  { %708 = vst.msk [vmem:[%s1631_s1 + $0x26] ss:$-24 sm:$0x3] %vm3_vm0, %v340_v35   ;;  %709 = vst.msk [vmem:[%s1631_s1 + $0x86] ss:$-24 sm:$0xc] %vm3_vm0, %v340_v35  }
  0xac   :  { %710 = vst.msk [vmem:[%s1631_s1 + $0xe6] ss:$-24 sm:$0x30] %vm3_vm0, %v340_v35   ;;  %711 = vst.msk [vmem:[%s1631_s1 + $0x146] ss:$-24 sm:$0xc0] %vm3_vm0, %v340_v35   ;;  %v378_v36 = vpop.permute.xlu1 %377   ;;  %v365_v37 = vpop.permute.xlu0 %364  }
  0xad   :  { %722 = vst.msk [vmem:[%s1631_s1 + $0xe7] ss:$-24 sm:$0x3] %vm3_vm0, %v378_v36   ;;  %723 = vst.msk [vmem:[%s1631_s1 + $0x147] ss:$-24 sm:$0xc] %vm3_vm0, %v378_v36  }
  0xae   :  { %724 = vst.msk [vmem:[%s1631_s1 + $0x1a7] ss:$-24 sm:$0x30] %vm3_vm0, %v378_v36   ;;  %725 = vst.msk [vmem:[%s1631_s1 + $0x207] ss:$-24 sm:$0xc0] %vm3_vm0, %v378_v36  }
  0xaf   :  { %717 = vst.msk [vmem:[%s1631_s1 + $0x27] ss:$-24 sm:$0x3] %vm3_vm0, %v365_v37   ;;  %718 = vst.msk [vmem:[%s1631_s1 + $0x87] ss:$-24 sm:$0xc] %vm3_vm0, %v365_v37  }
  0xb0   :  { %719 = vst.msk [vmem:[%s1631_s1 + $0xe7] ss:$-24 sm:$0x30] %vm3_vm0, %v365_v37   ;;  %720 = vst.msk [vmem:[%s1631_s1 + $0x147] ss:$-24 sm:$0xc0] %vm3_vm0, %v365_v37   ;;  %v403_v38 = vpop.permute.xlu1 %402   ;;  %v390_v39 = vpop.permute.xlu0 %389  }
  0xb1   :  { %731 = vst.msk [vmem:[%s1631_s1 + $0x100] ss:$-24 sm:$0x7] %vm3_vm0, %v403_v38   ;;  %732 = vst.msk [vmem:[%s1631_s1 + $0x40] ss:$72 sm:$0x18] %vm3_vm0, %v403_v38  }
  0xb2   :  { %733 = vst.msk [vmem:[%s1631_s1 + $0x1c0] ss:$-24 sm:$0x60] %vm3_vm0, %v403_v38   ;;  %734 = vst.msk [vmem:[%s1631_s1 + $0x171] sm:$0x80] %vm3_vm0, %v403_v38  }
  0xb3   :  { %726 = vst.msk [vmem:[%s1631_s1 + $0x40] ss:$-24 sm:$0x7] %vm3_vm0, %v390_v39   ;;  %727 = vst.msk [vmem:[%s1631_s1 - $0x80] ss:$72 sm:$0x18] %vm3_vm0, %v390_v39  }
  0xb4   :  { %728 = vst.msk [vmem:[%s1631_s1 + $0x100] ss:$-24 sm:$0x60] %vm3_vm0, %v390_v39   ;;  %729 = vst.msk [vmem:[%s1631_s1 + $0xb1] sm:$0x80] %vm3_vm0, %v390_v39   ;;  %v428_v40 = vpop.permute.xlu1 %427   ;;  %v415_v41 = vpop.permute.xlu0 %414  }
  0xb5   :  { %740 = vst.msk [vmem:[%s1631_s1 + $0x101] ss:$-24 sm:$0x7] %vm3_vm0, %v428_v40   ;;  %741 = vst.msk [vmem:[%s1631_s1 + $0x41] ss:$72 sm:$0x18] %vm3_vm0, %v428_v40  }
  0xb6   :  { %742 = vst.msk [vmem:[%s1631_s1 + $0x1c1] ss:$-24 sm:$0x60] %vm3_vm0, %v428_v40   ;;  %743 = vst.msk [vmem:[%s1631_s1 + $0x172] sm:$0x80] %vm3_vm0, %v428_v40  }
  0xb7   :  { %735 = vst.msk [vmem:[%s1631_s1 + $0x41] ss:$-24 sm:$0x7] %vm3_vm0, %v415_v41   ;;  %736 = vst.msk [vmem:[%s1631_s1 - $0x7f] ss:$72 sm:$0x18] %vm3_vm0, %v415_v41  }
  0xb8   :  { %737 = vst.msk [vmem:[%s1631_s1 + $0x101] ss:$-24 sm:$0x60] %vm3_vm0, %v415_v41   ;;  %738 = vst.msk [vmem:[%s1631_s1 + $0xb2] sm:$0x80] %vm3_vm0, %v415_v41   ;;  %v453_v42 = vpop.permute.xlu1 %452   ;;  %v440_v43 = vpop.permute.xlu0 %439  }
  0xb9   :  { %749 = vst.msk [vmem:[%s1631_s1 + $0x102] ss:$-24 sm:$0x7] %vm3_vm0, %v453_v42   ;;  %750 = vst.msk [vmem:[%s1631_s1 + $0x42] ss:$72 sm:$0x18] %vm3_vm0, %v453_v42  }
  0xba   :  { %751 = vst.msk [vmem:[%s1631_s1 + $0x1c2] ss:$-24 sm:$0x60] %vm3_vm0, %v453_v42   ;;  %752 = vst.msk [vmem:[%s1631_s1 + $0x173] sm:$0x80] %vm3_vm0, %v453_v42  }
  0xbb   :  { %744 = vst.msk [vmem:[%s1631_s1 + $0x42] ss:$-24 sm:$0x7] %vm3_vm0, %v440_v43   ;;  %745 = vst.msk [vmem:[%s1631_s1 - $0x7e] ss:$72 sm:$0x18] %vm3_vm0, %v440_v43  }
  0xbc   :  { %746 = vst.msk [vmem:[%s1631_s1 + $0x102] ss:$-24 sm:$0x60] %vm3_vm0, %v440_v43   ;;  %747 = vst.msk [vmem:[%s1631_s1 + $0xb3] sm:$0x80] %vm3_vm0, %v440_v43   ;;  %v478_v44 = vpop.permute.xlu1 %477   ;;  %v465_v45 = vpop.permute.xlu0 %464  }
  0xbd   :  { %758 = vst.msk [vmem:[%s1631_s1 + $0x103] ss:$-24 sm:$0x7] %vm3_vm0, %v478_v44   ;;  %759 = vst.msk [vmem:[%s1631_s1 + $0x43] ss:$72 sm:$0x18] %vm3_vm0, %v478_v44  }
  0xbe   :  { %760 = vst.msk [vmem:[%s1631_s1 + $0x1c3] ss:$-24 sm:$0x60] %vm3_vm0, %v478_v44   ;;  %761 = vst.msk [vmem:[%s1631_s1 + $0x174] sm:$0x80] %vm3_vm0, %v478_v44  }
  0xbf   :  { %753 = vst.msk [vmem:[%s1631_s1 + $0x43] ss:$-24 sm:$0x7] %vm3_vm0, %v465_v45   ;;  %754 = vst.msk [vmem:[%s1631_s1 - $0x7d] ss:$72 sm:$0x18] %vm3_vm0, %v465_v45  }
  0xc0   :  { %755 = vst.msk [vmem:[%s1631_s1 + $0x103] ss:$-24 sm:$0x60] %vm3_vm0, %v465_v45   ;;  %756 = vst.msk [vmem:[%s1631_s1 + $0xb4] sm:$0x80] %vm3_vm0, %v465_v45   ;;  %v503_v46 = vpop.permute.xlu1 %502   ;;  %v490_v47 = vpop.permute.xlu0 %489  }
  0xc1   :  { %767 = vst.msk [vmem:[%s1631_s1 + $0x104] ss:$-24 sm:$0x7] %vm3_vm0, %v503_v46   ;;  %768 = vst.msk [vmem:[%s1631_s1 + $0x44] ss:$72 sm:$0x18] %vm3_vm0, %v503_v46  }
  0xc2   :  { %769 = vst.msk [vmem:[%s1631_s1 + $0x1c4] ss:$-24 sm:$0x60] %vm3_vm0, %v503_v46   ;;  %770 = vst.msk [vmem:[%s1631_s1 + $0x175] sm:$0x80] %vm3_vm0, %v503_v46  }
  0xc3   :  { %762 = vst.msk [vmem:[%s1631_s1 + $0x44] ss:$-24 sm:$0x7] %vm3_vm0, %v490_v47   ;;  %763 = vst.msk [vmem:[%s1631_s1 - $0x7c] ss:$72 sm:$0x18] %vm3_vm0, %v490_v47  }
  0xc4   :  { %764 = vst.msk [vmem:[%s1631_s1 + $0x104] ss:$-24 sm:$0x60] %vm3_vm0, %v490_v47   ;;  %765 = vst.msk [vmem:[%s1631_s1 + $0xb5] sm:$0x80] %vm3_vm0, %v490_v47   ;;  %v528_v48 = vpop.permute.xlu1 %527   ;;  %v515_v49 = vpop.permute.xlu0 %514  }
  0xc5   :  { %776 = vst.msk [vmem:[%s1631_s1 + $0x105] ss:$-24 sm:$0x7] %vm3_vm0, %v528_v48   ;;  %777 = vst.msk [vmem:[%s1631_s1 + $0x45] ss:$72 sm:$0x18] %vm3_vm0, %v528_v48  }
  0xc6   :  { %778 = vst.msk [vmem:[%s1631_s1 + $0x1c5] ss:$-24 sm:$0x60] %vm3_vm0, %v528_v48   ;;  %779 = vst.msk [vmem:[%s1631_s1 + $0x176] sm:$0x80] %vm3_vm0, %v528_v48  }
  0xc7   :  { %771 = vst.msk [vmem:[%s1631_s1 + $0x45] ss:$-24 sm:$0x7] %vm3_vm0, %v515_v49   ;;  %772 = vst.msk [vmem:[%s1631_s1 - $0x7b] ss:$72 sm:$0x18] %vm3_vm0, %v515_v49  }
  0xc8   :  { %773 = vst.msk [vmem:[%s1631_s1 + $0x105] ss:$-24 sm:$0x60] %vm3_vm0, %v515_v49   ;;  %774 = vst.msk [vmem:[%s1631_s1 + $0xb6] sm:$0x80] %vm3_vm0, %v515_v49   ;;  %v553_v50 = vpop.permute.xlu1 %552   ;;  %v540_v51 = vpop.permute.xlu0 %539  }
  0xc9   :  { %785 = vst.msk [vmem:[%s1631_s1 + $0x106] ss:$-24 sm:$0x7] %vm3_vm0, %v553_v50   ;;  %786 = vst.msk [vmem:[%s1631_s1 + $0x46] ss:$72 sm:$0x18] %vm3_vm0, %v553_v50  }
  0xca   :  { %787 = vst.msk [vmem:[%s1631_s1 + $0x1c6] ss:$-24 sm:$0x60] %vm3_vm0, %v553_v50   ;;  %788 = vst.msk [vmem:[%s1631_s1 + $0x177] sm:$0x80] %vm3_vm0, %v553_v50  }
  0xcb   :  { %780 = vst.msk [vmem:[%s1631_s1 + $0x46] ss:$-24 sm:$0x7] %vm3_vm0, %v540_v51   ;;  %781 = vst.msk [vmem:[%s1631_s1 - $0x7a] ss:$72 sm:$0x18] %vm3_vm0, %v540_v51  }
  0xcc   :  { %782 = vst.msk [vmem:[%s1631_s1 + $0x106] ss:$-24 sm:$0x60] %vm3_vm0, %v540_v51   ;;  %783 = vst.msk [vmem:[%s1631_s1 + $0xb7] sm:$0x80] %vm3_vm0, %v540_v51   ;;  %v578_v52 = vpop.permute.xlu1 %577   ;;  %v565_v53 = vpop.permute.xlu0 %564  }
  0xcd   :  { %794 = vst.msk [vmem:[%s1631_s1 + $0x107] ss:$-24 sm:$0x7] %vm3_vm0, %v578_v52   ;;  %795 = vst.msk [vmem:[%s1631_s1 + $0x47] ss:$72 sm:$0x18] %vm3_vm0, %v578_v52  }
  0xce   :  { %796 = vst.msk [vmem:[%s1631_s1 + $0x1c7] ss:$-24 sm:$0x60] %vm3_vm0, %v578_v52   ;;  %797 = vst.msk [vmem:[%s1631_s1 + $0x178] sm:$0x80] %vm3_vm0, %v578_v52  }
  0xcf   :  { %789 = vst.msk [vmem:[%s1631_s1 + $0x47] ss:$-24 sm:$0x7] %vm3_vm0, %v565_v53   ;;  %790 = vst.msk [vmem:[%s1631_s1 - $0x79] ss:$72 sm:$0x18] %vm3_vm0, %v565_v53  }
  0xd0   :  { %791 = vst.msk [vmem:[%s1631_s1 + $0x107] ss:$-24 sm:$0x60] %vm3_vm0, %v565_v53   ;;  %792 = vst.msk [vmem:[%s1631_s1 + $0xb8] sm:$0x80] %vm3_vm0, %v565_v53  }

// kernel: basic_block_forward.5
= control target key start
LH: loop header
LB: loop body
LE: loop exit
PB: predicated region body
PF: predicated region fallthrough
CT: control target
= control target key end

     0   :  { %s1812_s0 = inlined_call_operand.vmem [shape: f32[768,128], index: 0, kind: input, shape index: {}]   ;;  %s1813_s1 = inlined_call_operand.vmem [shape: f32[1,128], index: 1, kind: input, shape index: {}]   ;;  %s1814_s2 = inlined_call_operand.vmem [shape: f32[1,128], index: 2, kind: input, shape index: {}]   ;;  %s1815_s3 = inlined_call_operand.vmem [shape: f32[768,128], index: 3, kind: input, shape index: {}]   ;;  %s1816_s4 = inlined_call_operand.vmem [shape: f32[768,128], index: 4, kind: output, shape index: {}]  }
   0x1   :  { %v17_v0 = vld [vmem:[%s1812_s0] sm:$0xff]  ;;  %v18_v4 = vld [vmem:[%s1812_s0 + $0x8] sm:$0xff]  ;;  %v19_v7 = vld [vmem:[%s1812_s0 + $0x10] sm:$0xff] }
   0x2   :  { %v742_v1 = vld [vmem:[%s1813_s1] ss:$0 sm:$0xff]  ;;  %v20_v8 = vld [vmem:[%s1812_s0 + $0x18] sm:$0xff]  ;;  %v320_v10 = vld [vmem:[%s1815_s3 + $0x8] sm:$0xff] }
   0x3   :  { %v747_v2 = vld [vmem:[%s1814_s2] ss:$0 sm:$0xff]  ;;  %v120_v3 = vmul.f32 %v742_v1, %v17_v0  ;;  %v121_v6 = vmul.f32 %v742_v1, %v18_v4  ;;  %v122_v11 = vmul.f32 %v742_v1, %v19_v7  ;;  %v321_v12 = vld [vmem:[%s1815_s3 + $0x10] sm:$0xff]  ;;  %v123_v13 = vmul.f32 %v742_v1, %v20_v8  ;;  %v322_v16 = vld [vmem:[%s1815_s3 + $0x18] sm:$0xff] }
   0x4   :  { %v319_v5 = vld [vmem:[%s1815_s3] sm:$0xff]  ;;  %v22_v18 = vld [vmem:[%s1812_s0 + $0x28] sm:$0xff]  ;;  %v23_v19 = vld [vmem:[%s1812_s0 + $0x30] sm:$0xff] }
   0x5   :  { %v223_v9 = vadd.f32 %v747_v2, %v120_v3  ;;  %v21_v14 = vld [vmem:[%s1812_s0 + $0x20] sm:$0xff]  ;;  %v224_v15 = vadd.f32 %v747_v2, %v121_v6  ;;  %v225_v21 = vadd.f32 %v747_v2, %v122_v11  ;;  %v226_v22 = vadd.f32 %v747_v2, %v123_v13  ;;  %v24_v25 = vld [vmem:[%s1812_s0 + $0x38] sm:$0xff]  ;;  %v324_v28 = vld [vmem:[%s1815_s3 + $0x28] sm:$0xff] }
   0x6   :  { %v124_v17 = vmul.f32 %v742_v1, %v21_v14  ;;  %v323_v23 = vld [vmem:[%s1815_s3 + $0x20] sm:$0xff]  ;;  %v125_v24 = vmul.f32 %v742_v1, %v22_v18  ;;  %v126_v29 = vmul.f32 %v742_v1, %v23_v19  ;;  %v127_v30 = vmul.f32 %v742_v1, %v24_v25  ;;  %v325_v36 = vld [vmem:[%s1815_s3 + $0x30] sm:$0xff]  ;;  %v326_v37 = vld [vmem:[%s1815_s3 + $0x38] sm:$0xff] }
   0x7   :  { %v415_v20 = vadd.f32 %v319_v5, %v223_v9  ;;  %v416_v26 = vadd.f32 %v320_v10, %v224_v15  ;;  %v25_v31 = vld [vmem:[%s1812_s0 + $0x40] sm:$0xff]  ;;  %v417_v33 = vadd.f32 %v321_v12, %v225_v21  ;;  %v418_v34 = vadd.f32 %v322_v16, %v226_v22  ;;  %v26_v38 = vld [vmem:[%s1812_s0 + $0x48] sm:$0xff]  ;;  %v27_v43 = vld [vmem:[%s1812_s0 + $0x50] sm:$0xff] }
   0x8   :  { %v227_v27 = vadd.f32 %v747_v2, %v124_v17  ;;  %v228_v35 = vadd.f32 %v747_v2, %v125_v24  ;;  %v229_v41 = vadd.f32 %v747_v2, %v126_v29  ;;  %v230_v42 = vadd.f32 %v747_v2, %v127_v30  ;;  %v28_v44 = vld [vmem:[%s1812_s0 + $0x58] sm:$0xff]  ;;  %v29_v49 = vld [vmem:[%s1812_s0 + $0x60] sm:$0xff]  ;;  %v30_v55 = vld [vmem:[%s1812_s0 + $0x68] sm:$0xff] }
   0x9   :  { %v511_v32 = vmax.f32 %v415_v20, 0.0  ;;  %v512_v39 = vmax.f32 %v416_v26, 0.0  ;;  %v513_v45 = vmax.f32 %v417_v33, 0.0  ;;  %v514_v46 = vmax.f32 %v418_v34, 0.0  ;;  %v327_v53 = vld [vmem:[%s1815_s3 + $0x40] sm:$0xff]  ;;  %v328_v58 = vld [vmem:[%s1815_s3 + $0x48] sm:$0xff] }
   0xa   :  { %v419_v40 = vadd.f32 %v323_v23, %v227_v27  ;;  %v420_v47 = vadd.f32 %v324_v28, %v228_v35  ;;  %v128_v48 = vmul.f32 %v742_v1, %v25_v31  ;;  %v421_v51 = vadd.f32 %v325_v36, %v229_v41  ;;  %v31_v61 = vld [vmem:[%s1812_s0 + $0x70] sm:$0xff]  ;;  %v32_v62 = vld [vmem:[%s1812_s0 + $0x78] sm:$0xff]  ;;  %v331_v10 = vld [vmem:[%s1815_s3 + $0x60] sm:$0xff] }
   0xb   :  { %607 = vst [vmem:[%s1816_s4] sm:$0xff] %v511_v32  ;;  %608 = vst [vmem:[%s1816_s4 + $0x8] sm:$0xff] %v512_v39  ;;  %v422_v52 = vadd.f32 %v326_v37, %v230_v42  ;;  %v129_v54 = vmul.f32 %v742_v1, %v26_v38  ;;  %v130_v59 = vmul.f32 %v742_v1, %v27_v43  ;;  %v329_v4 = vld [vmem:[%s1815_s3 + $0x50] sm:$0xff]  ;;  %v330_v5 = vld [vmem:[%s1815_s3 + $0x58] sm:$0xff] }
   0xc   :  { %v515_v50 = vmax.f32 %v419_v40, 0.0  ;;  %609 = vst [vmem:[%s1816_s4 + $0x10] sm:$0xff] %v513_v45  ;;  %610 = vst [vmem:[%s1816_s4 + $0x18] sm:$0xff] %v514_v46  ;;  %v516_v56 = vmax.f32 %v420_v47, 0.0  ;;  %v231_v57 = vadd.f32 %v747_v2, %v128_v48  ;;  %v131_v60 = vmul.f32 %v742_v1, %v28_v44  ;;  %v332_v14 = vld [vmem:[%s1815_s3 + $0x68] sm:$0xff]  ;;  %v33_v17 = vld [vmem:[%s1812_s0 + $0x80] sm:$0xff] }
   0xd   :  { %v517_v63 = vmax.f32 %v421_v51, 0.0  ;;  %v518_v0 = vmax.f32 %v422_v52, 0.0  ;;  %v232_v3 = vadd.f32 %v747_v2, %v129_v54  ;;  %v132_v6 = vmul.f32 %v742_v1, %v29_v49  ;;  %v333_v22 = vld [vmem:[%s1815_s3 + $0x70] sm:$0xff]  ;;  %v334_v23 = vld [vmem:[%s1815_s3 + $0x78] sm:$0xff]  ;;  %v34_v24 = vld [vmem:[%s1812_s0 + $0x88] sm:$0xff] }
   0xe   :  { %611 = vst [vmem:[%s1816_s4 + $0x20] sm:$0xff] %v515_v50  ;;  %612 = vst [vmem:[%s1816_s4 + $0x28] sm:$0xff] %v516_v56  ;;  %v423_v7 = vadd.f32 %v327_v53, %v231_v57  ;;  %v233_v8 = vadd.f32 %v747_v2, %v130_v59  ;;  %v234_v9 = vadd.f32 %v747_v2, %v131_v60  ;;  %v35_v29 = vld [vmem:[%s1812_s0 + $0x90] sm:$0xff]  ;;  %v36_v30 = vld [vmem:[%s1812_s0 + $0x98] sm:$0xff] }
   0xf   :  { %v133_v11 = vmul.f32 %v742_v1, %v30_v55  ;;  %613 = vst [vmem:[%s1816_s4 + $0x30] sm:$0xff] %v517_v63  ;;  %614 = vst [vmem:[%s1816_s4 + $0x38] sm:$0xff] %v518_v0  ;;  %v424_v12 = vadd.f32 %v328_v58, %v232_v3  ;;  %v235_v13 = vadd.f32 %v747_v2, %v132_v6  ;;  %v37_v35 = vld [vmem:[%s1812_s0 + $0xa0] sm:$0xff]  ;;  %v38_v41 = vld [vmem:[%s1812_s0 + $0xa8] sm:$0xff] }
  0x10   :  { %v134_v15 = vmul.f32 %v742_v1, %v31_v61  ;;  %v135_v16 = vmul.f32 %v742_v1, %v32_v62  ;;  %v519_v18 = vmax.f32 %v423_v7, 0.0  ;;  %v425_v19 = vadd.f32 %v329_v4, %v233_v8  ;;  %v335_v39 = vld [vmem:[%s1815_s3 + $0x80] sm:$0xff]  ;;  %v336_v44 = vld [vmem:[%s1815_s3 + $0x88] sm:$0xff]  ;;  %v39_v47 = vld [vmem:[%s1812_s0 + $0xb0] sm:$0xff] }
  0x11   :  { %v426_v20 = vadd.f32 %v330_v5, %v234_v9  ;;  %v236_v21 = vadd.f32 %v747_v2, %v133_v11  ;;  %v520_v25 = vmax.f32 %v424_v12, 0.0  ;;  %v427_v26 = vadd.f32 %v331_v10, %v235_v13  ;;  %v40_v48 = vld [vmem:[%s1812_s0 + $0xb8] sm:$0xff]  ;;  %v337_v52 = vld [vmem:[%s1815_s3 + $0x90] sm:$0xff]  ;;  %v339_v58 = vld [vmem:[%s1815_s3 + $0xa0] sm:$0xff] }
  0x12   :  { %v237_v27 = vadd.f32 %v747_v2, %v134_v15  ;;  %v238_v28 = vadd.f32 %v747_v2, %v135_v16  ;;  %615 = vst [vmem:[%s1816_s4 + $0x40] sm:$0xff] %v519_v18  ;;  %v521_v31 = vmax.f32 %v425_v19, 0.0  ;;  %v136_v34 = vmul.f32 %v742_v1, %v33_v17  ;;  %v338_v53 = vld [vmem:[%s1815_s3 + $0x98] sm:$0xff]  ;;  %v340_v62 = vld [vmem:[%s1815_s3 + $0xa8] sm:$0xff]  ;;  %v41_v3 = vld [vmem:[%s1812_s0 + $0xc0] sm:$0xff] }
  0x13   :  { %v522_v32 = vmax.f32 %v426_v20, 0.0  ;;  %v428_v33 = vadd.f32 %v332_v14, %v236_v21  ;;  %616 = vst [vmem:[%s1816_s4 + $0x48] sm:$0xff] %v520_v25  ;;  %v523_v36 = vmax.f32 %v427_v26, 0.0  ;;  %v137_v40 = vmul.f32 %v742_v1, %v34_v24  ;;  %v341_v8 = vld [vmem:[%s1815_s3 + $0xb0] sm:$0xff]  ;;  %v342_v9 = vld [vmem:[%s1815_s3 + $0xb8] sm:$0xff]  ;;  %v42_v10 = vld [vmem:[%s1812_s0 + $0xc8] sm:$0xff] }
  0x14   :  { %v429_v37 = vadd.f32 %v333_v22, %v237_v27  ;;  %v430_v38 = vadd.f32 %v334_v23, %v238_v28  ;;  %617 = vst [vmem:[%s1816_s4 + $0x50] sm:$0xff] %v521_v31  ;;  %v239_v43 = vadd.f32 %v747_v2, %v136_v34  ;;  %v138_v45 = vmul.f32 %v742_v1, %v35_v29  ;;  %v43_v15 = vld [vmem:[%s1812_s0 + $0xd0] sm:$0xff]  ;;  %v44_v16 = vld [vmem:[%s1812_s0 + $0xd8] sm:$0xff]  ;;  %v45_v21 = vld [vmem:[%s1812_s0 + $0xe0] sm:$0xff] }
  0x15   :  { %618 = vst [vmem:[%s1816_s4 + $0x58] sm:$0xff] %v522_v32  ;;  %v524_v42 = vmax.f32 %v428_v33, 0.0  ;;  %v139_v46 = vmul.f32 %v742_v1, %v36_v30  ;;  %619 = vst [vmem:[%s1816_s4 + $0x60] sm:$0xff] %v523_v36  ;;  %v240_v51 = vadd.f32 %v747_v2, %v137_v40  ;;  %v140_v54 = vmul.f32 %v742_v1, %v37_v35  ;;  %v343_v25 = vld [vmem:[%s1815_s3 + $0xc0] sm:$0xff]  ;;  %v46_v27 = vld [vmem:[%s1812_s0 + $0xe8] sm:$0xff] }
  0x16   :  { %v525_v49 = vmax.f32 %v429_v37, 0.0  ;;  %v526_v50 = vmax.f32 %v430_v38, 0.0  ;;  %v431_v55 = vadd.f32 %v335_v39, %v239_v43  ;;  %v241_v56 = vadd.f32 %v747_v2, %v138_v45  ;;  %v344_v30 = vld [vmem:[%s1815_s3 + $0xc8] sm:$0xff]  ;;  %v47_v33 = vld [vmem:[%s1812_s0 + $0xf0] sm:$0xff]  ;;  %v48_v34 = vld [vmem:[%s1812_s0 + $0xf8] sm:$0xff] }
  0x17   :  { %620 = vst [vmem:[%s1816_s4 + $0x68] sm:$0xff] %v524_v42  ;;  %v242_v57 = vadd.f32 %v747_v2, %v139_v46  ;;  %v141_v59 = vmul.f32 %v742_v1, %v38_v41  ;;  %v432_v60 = vadd.f32 %v336_v44, %v240_v51  ;;  %v243_v61 = vadd.f32 %v747_v2, %v140_v54  ;;  %v345_v38 = vld [vmem:[%s1815_s3 + $0xd0] sm:$0xff]  ;;  %v346_v39 = vld [vmem:[%s1815_s3 + $0xd8] sm:$0xff]  ;;  %v347_v44 = vld [vmem:[%s1815_s3 + $0xe0] sm:$0xff] }
  0x18   :  { %621 = vst [vmem:[%s1816_s4 + $0x70] sm:$0xff] %v525_v49  ;;  %622 = vst [vmem:[%s1816_s4 + $0x78] sm:$0xff] %v526_v50  ;;  %v142_v63 = vmul.f32 %v742_v1, %v39_v47  ;;  %v143_v0 = vmul.f32 %v742_v1, %v40_v48  ;;  %v527_v4 = vmax.f32 %v431_v55, 0.0  ;;  %v433_v5 = vadd.f32 %v337_v52, %v241_v56  ;;  %v348_v48 = vld [vmem:[%s1815_s3 + $0xe8] sm:$0xff]  ;;  %v49_v51 = vld [vmem:[%s1812_s0 + $0x100] sm:$0xff] }
  0x19   :  { %v434_v6 = vadd.f32 %v338_v53, %v242_v57  ;;  %v244_v7 = vadd.f32 %v747_v2, %v141_v59  ;;  %v528_v11 = vmax.f32 %v432_v60, 0.0  ;;  %v435_v12 = vadd.f32 %v339_v58, %v243_v61  ;;  %v349_v56 = vld [vmem:[%s1815_s3 + $0xf0] sm:$0xff]  ;;  %v350_v57 = vld [vmem:[%s1815_s3 + $0xf8] sm:$0xff]  ;;  %v50_v58 = vld [vmem:[%s1812_s0 + $0x108] sm:$0xff] }
  0x1a   :  { %v245_v13 = vadd.f32 %v747_v2, %v142_v63  ;;  %v246_v14 = vadd.f32 %v747_v2, %v143_v0  ;;  %623 = vst [vmem:[%s1816_s4 + $0x80] sm:$0xff] %v527_v4  ;;  %v529_v17 = vmax.f32 %v433_v5, 0.0  ;;  %v144_v20 = vmul.f32 %v742_v1, %v41_v3  ;;  %v51_v63 = vld [vmem:[%s1812_s0 + $0x110] sm:$0xff]  ;;  %v52_v0 = vld [vmem:[%s1812_s0 + $0x118] sm:$0xff] }
  0x1b   :  { %v530_v18 = vmax.f32 %v434_v6, 0.0  ;;  %v436_v19 = vadd.f32 %v340_v62, %v244_v7  ;;  %624 = vst [vmem:[%s1816_s4 + $0x88] sm:$0xff] %v528_v11  ;;  %v531_v22 = vmax.f32 %v435_v12, 0.0  ;;  %v145_v26 = vmul.f32 %v742_v1, %v42_v10  ;;  %v53_v7 = vld [vmem:[%s1812_s0 + $0x120] sm:$0xff] }
  0x1c   :  { %v437_v23 = vadd.f32 %v341_v8, %v245_v13  ;;  %v438_v24 = vadd.f32 %v342_v9, %v246_v14  ;;  %625 = vst [vmem:[%s1816_s4 + $0x90] sm:$0xff] %v529_v17  ;;  %v247_v29 = vadd.f32 %v747_v2, %v144_v20  ;;  %v146_v31 = vmul.f32 %v742_v1, %v43_v15  ;;  %v351_v11 = vld [vmem:[%s1815_s3 + $0x100] sm:$0xff]  ;;  %v54_v13 = vld [vmem:[%s1812_s0 + $0x128] sm:$0xff]  ;;  %v56_v20 = vld [vmem:[%s1812_s0 + $0x138] sm:$0xff] }
  0x1d   :  { %626 = vst [vmem:[%s1816_s4 + $0x98] sm:$0xff] %v530_v18  ;;  %v532_v28 = vmax.f32 %v436_v19, 0.0  ;;  %v147_v32 = vmul.f32 %v742_v1, %v44_v16  ;;  %627 = vst [vmem:[%s1816_s4 + $0xa0] sm:$0xff] %v531_v22  ;;  %v248_v37 = vadd.f32 %v747_v2, %v145_v26  ;;  %v148_v40 = vmul.f32 %v742_v1, %v45_v21  ;;  %v352_v16 = vld [vmem:[%s1815_s3 + $0x108] sm:$0xff]  ;;  %v55_v19 = vld [vmem:[%s1812_s0 + $0x130] sm:$0xff] }
  0x1e   :  { %v533_v35 = vmax.f32 %v437_v23, 0.0  ;;  %v534_v36 = vmax.f32 %v438_v24, 0.0  ;;  %v439_v41 = vadd.f32 %v343_v25, %v247_v29  ;;  %v249_v42 = vadd.f32 %v747_v2, %v146_v31  ;;  %v353_v24 = vld [vmem:[%s1815_s3 + $0x110] sm:$0xff]  ;;  %v354_v25 = vld [vmem:[%s1815_s3 + $0x118] sm:$0xff] }
  0x1f   :  { %628 = vst [vmem:[%s1816_s4 + $0xa8] sm:$0xff] %v532_v28  ;;  %v250_v43 = vadd.f32 %v747_v2, %v147_v32  ;;  %v149_v45 = vmul.f32 %v742_v1, %v46_v27  ;;  %v440_v46 = vadd.f32 %v344_v30, %v248_v37  ;;  %v251_v47 = vadd.f32 %v747_v2, %v148_v40  ;;  %v355_v30 = vld [vmem:[%s1815_s3 + $0x120] sm:$0xff] }
  0x20   :  { %629 = vst [vmem:[%s1816_s4 + $0xb0] sm:$0xff] %v533_v35  ;;  %630 = vst [vmem:[%s1816_s4 + $0xb8] sm:$0xff] %v534_v36  ;;  %v150_v49 = vmul.f32 %v742_v1, %v47_v33  ;;  %v151_v50 = vmul.f32 %v742_v1, %v48_v34  ;;  %v535_v52 = vmax.f32 %v439_v41, 0.0  ;;  %v441_v53 = vadd.f32 %v345_v38, %v249_v42  ;;  %v356_v34 = vld [vmem:[%s1815_s3 + $0x128] sm:$0xff]  ;;  %v57_v37 = vld [vmem:[%s1812_s0 + $0x140] sm:$0xff] }
  0x21   :  { %v442_v54 = vadd.f32 %v346_v39, %v250_v43  ;;  %v252_v55 = vadd.f32 %v747_v2, %v149_v45  ;;  %v536_v59 = vmax.f32 %v440_v46, 0.0  ;;  %v443_v60 = vadd.f32 %v347_v44, %v251_v47  ;;  %v357_v42 = vld [vmem:[%s1815_s3 + $0x130] sm:$0xff]  ;;  %v358_v43 = vld [vmem:[%s1815_s3 + $0x138] sm:$0xff]  ;;  %v58_v44 = vld [vmem:[%s1812_s0 + $0x148] sm:$0xff] }
  0x22   :  { %v253_v61 = vadd.f32 %v747_v2, %v150_v49  ;;  %v254_v62 = vadd.f32 %v747_v2, %v151_v50  ;;  %631 = vst [vmem:[%s1816_s4 + $0xc0] sm:$0xff] %v535_v52  ;;  %v537_v3 = vmax.f32 %v441_v53, 0.0  ;;  %v152_v6 = vmul.f32 %v742_v1, %v49_v51  ;;  %v59_v49 = vld [vmem:[%s1812_s0 + $0x150] sm:$0xff]  ;;  %v60_v50 = vld [vmem:[%s1812_s0 + $0x158] sm:$0xff] }
  0x23   :  { %v538_v4 = vmax.f32 %v442_v54, 0.0  ;;  %v444_v5 = vadd.f32 %v348_v48, %v252_v55  ;;  %632 = vst [vmem:[%s1816_s4 + $0xc8] sm:$0xff] %v536_v59  ;;  %v539_v8 = vmax.f32 %v443_v60, 0.0  ;;  %v153_v12 = vmul.f32 %v742_v1, %v50_v58  ;;  %v61_v55 = vld [vmem:[%s1812_s0 + $0x160] sm:$0xff] }
  0x24   :  { %v445_v9 = vadd.f32 %v349_v56, %v253_v61  ;;  %v446_v10 = vadd.f32 %v350_v57, %v254_v62  ;;  %633 = vst [vmem:[%s1816_s4 + $0xd0] sm:$0xff] %v537_v3  ;;  %v255_v15 = vadd.f32 %v747_v2, %v152_v6  ;;  %v154_v17 = vmul.f32 %v742_v1, %v51_v63  ;;  %v359_v59 = vld [vmem:[%s1815_s3 + $0x140] sm:$0xff]  ;;  %v62_v61 = vld [vmem:[%s1812_s0 + $0x168] sm:$0xff]  ;;  %v64_v6 = vld [vmem:[%s1812_s0 + $0x178] sm:$0xff] }
  0x25   :  { %634 = vst [vmem:[%s1816_s4 + $0xd8] sm:$0xff] %v538_v4  ;;  %v540_v14 = vmax.f32 %v444_v5, 0.0  ;;  %v155_v18 = vmul.f32 %v742_v1, %v52_v0  ;;  %635 = vst [vmem:[%s1816_s4 + $0xe0] sm:$0xff] %v539_v8  ;;  %v256_v23 = vadd.f32 %v747_v2, %v153_v12  ;;  %v156_v26 = vmul.f32 %v742_v1, %v53_v7  ;;  %v360_v0 = vld [vmem:[%s1815_s3 + $0x148] sm:$0xff]  ;;  %v63_v5 = vld [vmem:[%s1812_s0 + $0x170] sm:$0xff] }
  0x26   :  { %v541_v21 = vmax.f32 %v445_v9, 0.0  ;;  %v542_v22 = vmax.f32 %v446_v10, 0.0  ;;  %v447_v27 = vadd.f32 %v351_v11, %v255_v15  ;;  %v257_v28 = vadd.f32 %v747_v2, %v154_v17  ;;  %v361_v10 = vld [vmem:[%s1815_s3 + $0x150] sm:$0xff]  ;;  %v362_v11 = vld [vmem:[%s1815_s3 + $0x158] sm:$0xff] }
  0x27   :  { %636 = vst [vmem:[%s1816_s4 + $0xe8] sm:$0xff] %v540_v14  ;;  %v258_v29 = vadd.f32 %v747_v2, %v155_v18  ;;  %v157_v31 = vmul.f32 %v742_v1, %v54_v13  ;;  %v448_v32 = vadd.f32 %v352_v16, %v256_v23  ;;  %v259_v33 = vadd.f32 %v747_v2, %v156_v26  ;;  %v363_v16 = vld [vmem:[%s1815_s3 + $0x160] sm:$0xff] }
  0x28   :  { %637 = vst [vmem:[%s1816_s4 + $0xf0] sm:$0xff] %v541_v21  ;;  %638 = vst [vmem:[%s1816_s4 + $0xf8] sm:$0xff] %v542_v22  ;;  %v158_v35 = vmul.f32 %v742_v1, %v55_v19  ;;  %v159_v36 = vmul.f32 %v742_v1, %v56_v20  ;;  %v543_v38 = vmax.f32 %v447_v27, 0.0  ;;  %v449_v39 = vadd.f32 %v353_v24, %v257_v28  ;;  %v364_v20 = vld [vmem:[%s1815_s3 + $0x168] sm:$0xff]  ;;  %v65_v23 = vld [vmem:[%s1812_s0 + $0x180] sm:$0xff] }
  0x29   :  { %v450_v40 = vadd.f32 %v354_v25, %v258_v29  ;;  %v260_v41 = vadd.f32 %v747_v2, %v157_v31  ;;  %v544_v45 = vmax.f32 %v448_v32, 0.0  ;;  %v451_v46 = vadd.f32 %v355_v30, %v259_v33  ;;  %v365_v28 = vld [vmem:[%s1815_s3 + $0x170] sm:$0xff]  ;;  %v366_v29 = vld [vmem:[%s1815_s3 + $0x178] sm:$0xff]  ;;  %v66_v30 = vld [vmem:[%s1812_s0 + $0x188] sm:$0xff] }
  0x2a   :  { %v261_v47 = vadd.f32 %v747_v2, %v158_v35  ;;  %v262_v48 = vadd.f32 %v747_v2, %v159_v36  ;;  %639 = vst [vmem:[%s1816_s4 + $0x100] sm:$0xff] %v543_v38  ;;  %v545_v51 = vmax.f32 %v449_v39, 0.0  ;;  %v160_v54 = vmul.f32 %v742_v1, %v57_v37  ;;  %v67_v35 = vld [vmem:[%s1812_s0 + $0x190] sm:$0xff]  ;;  %v68_v36 = vld [vmem:[%s1812_s0 + $0x198] sm:$0xff] }
  0x2b   :  { %v546_v52 = vmax.f32 %v450_v40, 0.0  ;;  %v452_v53 = vadd.f32 %v356_v34, %v260_v41  ;;  %640 = vst [vmem:[%s1816_s4 + $0x108] sm:$0xff] %v544_v45  ;;  %v547_v56 = vmax.f32 %v451_v46, 0.0  ;;  %v161_v60 = vmul.f32 %v742_v1, %v58_v44  ;;  %v69_v41 = vld [vmem:[%s1812_s0 + $0x1a0] sm:$0xff] }
  0x2c   :  { %v453_v57 = vadd.f32 %v357_v42, %v261_v47  ;;  %v454_v58 = vadd.f32 %v358_v43, %v262_v48  ;;  %641 = vst [vmem:[%s1816_s4 + $0x110] sm:$0xff] %v545_v51  ;;  %v263_v63 = vadd.f32 %v747_v2, %v160_v54  ;;  %v162_v3 = vmul.f32 %v742_v1, %v59_v49  ;;  %v367_v45 = vld [vmem:[%s1815_s3 + $0x180] sm:$0xff]  ;;  %v70_v47 = vld [vmem:[%s1812_s0 + $0x1a8] sm:$0xff]  ;;  %v72_v54 = vld [vmem:[%s1812_s0 + $0x1b8] sm:$0xff] }
  0x2d   :  { %642 = vst [vmem:[%s1816_s4 + $0x118] sm:$0xff] %v546_v52  ;;  %v548_v62 = vmax.f32 %v452_v53, 0.0  ;;  %v163_v4 = vmul.f32 %v742_v1, %v60_v50  ;;  %643 = vst [vmem:[%s1816_s4 + $0x120] sm:$0xff] %v547_v56  ;;  %v264_v9 = vadd.f32 %v747_v2, %v161_v60  ;;  %v164_v12 = vmul.f32 %v742_v1, %v61_v55  ;;  %v368_v50 = vld [vmem:[%s1815_s3 + $0x188] sm:$0xff]  ;;  %v71_v53 = vld [vmem:[%s1812_s0 + $0x1b0] sm:$0xff] }
  0x2e   :  { %v549_v7 = vmax.f32 %v453_v57, 0.0  ;;  %v550_v8 = vmax.f32 %v454_v58, 0.0  ;;  %v455_v13 = vadd.f32 %v359_v59, %v263_v63  ;;  %v265_v14 = vadd.f32 %v747_v2, %v162_v3  ;;  %v369_v58 = vld [vmem:[%s1815_s3 + $0x190] sm:$0xff]  ;;  %v370_v59 = vld [vmem:[%s1815_s3 + $0x198] sm:$0xff] }
  0x2f   :  { %644 = vst [vmem:[%s1816_s4 + $0x128] sm:$0xff] %v548_v62  ;;  %v266_v15 = vadd.f32 %v747_v2, %v163_v4  ;;  %v165_v17 = vmul.f32 %v742_v1, %v62_v61  ;;  %v456_v18 = vadd.f32 %v360_v0, %v264_v9  ;;  %v267_v19 = vadd.f32 %v747_v2, %v164_v12  ;;  %v371_v0 = vld [vmem:[%s1815_s3 + $0x1a0] sm:$0xff] }
  0x30   :  { %645 = vst [vmem:[%s1816_s4 + $0x130] sm:$0xff] %v549_v7  ;;  %646 = vst [vmem:[%s1816_s4 + $0x138] sm:$0xff] %v550_v8  ;;  %v166_v21 = vmul.f32 %v742_v1, %v63_v5  ;;  %v167_v22 = vmul.f32 %v742_v1, %v64_v6  ;;  %v551_v24 = vmax.f32 %v455_v13, 0.0  ;;  %v457_v25 = vadd.f32 %v361_v10, %v265_v14  ;;  %v372_v6 = vld [vmem:[%s1815_s3 + $0x1a8] sm:$0xff]  ;;  %v73_v9 = vld [vmem:[%s1812_s0 + $0x1c0] sm:$0xff] }
  0x31   :  { %v458_v26 = vadd.f32 %v362_v11, %v266_v15  ;;  %v268_v27 = vadd.f32 %v747_v2, %v165_v17  ;;  %v552_v31 = vmax.f32 %v456_v18, 0.0  ;;  %v459_v32 = vadd.f32 %v363_v16, %v267_v19  ;;  %v373_v14 = vld [vmem:[%s1815_s3 + $0x1b0] sm:$0xff]  ;;  %v374_v15 = vld [vmem:[%s1815_s3 + $0x1b8] sm:$0xff]  ;;  %v74_v16 = vld [vmem:[%s1812_s0 + $0x1c8] sm:$0xff] }
  0x32   :  { %v269_v33 = vadd.f32 %v747_v2, %v166_v21  ;;  %v270_v34 = vadd.f32 %v747_v2, %v167_v22  ;;  %647 = vst [vmem:[%s1816_s4 + $0x140] sm:$0xff] %v551_v24  ;;  %v553_v37 = vmax.f32 %v457_v25, 0.0  ;;  %v168_v40 = vmul.f32 %v742_v1, %v65_v23  ;;  %v75_v21 = vld [vmem:[%s1812_s0 + $0x1d0] sm:$0xff]  ;;  %v76_v22 = vld [vmem:[%s1812_s0 + $0x1d8] sm:$0xff] }
  0x33   :  { %v554_v38 = vmax.f32 %v458_v26, 0.0  ;;  %v460_v39 = vadd.f32 %v364_v20, %v268_v27  ;;  %648 = vst [vmem:[%s1816_s4 + $0x148] sm:$0xff] %v552_v31  ;;  %v555_v42 = vmax.f32 %v459_v32, 0.0  ;;  %v169_v46 = vmul.f32 %v742_v1, %v66_v30  ;;  %v77_v27 = vld [vmem:[%s1812_s0 + $0x1e0] sm:$0xff] }
  0x34   :  { %v461_v43 = vadd.f32 %v365_v28, %v269_v33  ;;  %v462_v44 = vadd.f32 %v366_v29, %v270_v34  ;;  %649 = vst [vmem:[%s1816_s4 + $0x150] sm:$0xff] %v553_v37  ;;  %v271_v49 = vadd.f32 %v747_v2, %v168_v40  ;;  %v170_v51 = vmul.f32 %v742_v1, %v67_v35  ;;  %v375_v31 = vld [vmem:[%s1815_s3 + $0x1c0] sm:$0xff]  ;;  %v78_v33 = vld [vmem:[%s1812_s0 + $0x1e8] sm:$0xff]  ;;  %v80_v40 = vld [vmem:[%s1812_s0 + $0x1f8] sm:$0xff] }
  0x35   :  { %650 = vst [vmem:[%s1816_s4 + $0x158] sm:$0xff] %v554_v38  ;;  %v556_v48 = vmax.f32 %v460_v39, 0.0  ;;  %v171_v52 = vmul.f32 %v742_v1, %v68_v36  ;;  %651 = vst [vmem:[%s1816_s4 + $0x160] sm:$0xff] %v555_v42  ;;  %v272_v57 = vadd.f32 %v747_v2, %v169_v46  ;;  %v172_v60 = vmul.f32 %v742_v1, %v69_v41  ;;  %v376_v36 = vld [vmem:[%s1815_s3 + $0x1c8] sm:$0xff]  ;;  %v79_v39 = vld [vmem:[%s1812_s0 + $0x1f0] sm:$0xff] }
  0x36   :  { %v557_v55 = vmax.f32 %v461_v43, 0.0  ;;  %v558_v56 = vmax.f32 %v462_v44, 0.0  ;;  %v463_v61 = vadd.f32 %v367_v45, %v271_v49  ;;  %v273_v62 = vadd.f32 %v747_v2, %v170_v51  ;;  %v377_v44 = vld [vmem:[%s1815_s3 + $0x1d0] sm:$0xff]  ;;  %v378_v45 = vld [vmem:[%s1815_s3 + $0x1d8] sm:$0xff] }
  0x37   :  { %652 = vst [vmem:[%s1816_s4 + $0x168] sm:$0xff] %v556_v48  ;;  %v274_v63 = vadd.f32 %v747_v2, %v171_v52  ;;  %v173_v3 = vmul.f32 %v742_v1, %v70_v47  ;;  %v464_v4 = vadd.f32 %v368_v50, %v272_v57  ;;  %v275_v5 = vadd.f32 %v747_v2, %v172_v60  ;;  %v379_v50 = vld [vmem:[%s1815_s3 + $0x1e0] sm:$0xff] }
  0x38   :  { %653 = vst [vmem:[%s1816_s4 + $0x170] sm:$0xff] %v557_v55  ;;  %654 = vst [vmem:[%s1816_s4 + $0x178] sm:$0xff] %v558_v56  ;;  %v174_v7 = vmul.f32 %v742_v1, %v71_v53  ;;  %v175_v8 = vmul.f32 %v742_v1, %v72_v54  ;;  %v559_v10 = vmax.f32 %v463_v61, 0.0  ;;  %v465_v11 = vadd.f32 %v369_v58, %v273_v62  ;;  %v380_v54 = vld [vmem:[%s1815_s3 + $0x1e8] sm:$0xff]  ;;  %v81_v57 = vld [vmem:[%s1812_s0 + $0x200] sm:$0xff] }
  0x39   :  { %v466_v12 = vadd.f32 %v370_v59, %v274_v63  ;;  %v276_v13 = vadd.f32 %v747_v2, %v173_v3  ;;  %v560_v17 = vmax.f32 %v464_v4, 0.0  ;;  %v467_v18 = vadd.f32 %v371_v0, %v275_v5  ;;  %v381_v62 = vld [vmem:[%s1815_s3 + $0x1f0] sm:$0xff]  ;;  %v382_v63 = vld [vmem:[%s1815_s3 + $0x1f8] sm:$0xff]  ;;  %v82_v0 = vld [vmem:[%s1812_s0 + $0x208] sm:$0xff] }
  0x3a   :  { %v277_v19 = vadd.f32 %v747_v2, %v174_v7  ;;  %v278_v20 = vadd.f32 %v747_v2, %v175_v8  ;;  %655 = vst [vmem:[%s1816_s4 + $0x180] sm:$0xff] %v559_v10  ;;  %v561_v23 = vmax.f32 %v465_v11, 0.0  ;;  %v176_v26 = vmul.f32 %v742_v1, %v73_v9  ;;  %v83_v7 = vld [vmem:[%s1812_s0 + $0x210] sm:$0xff]  ;;  %v84_v8 = vld [vmem:[%s1812_s0 + $0x218] sm:$0xff] }
  0x3b   :  { %v562_v24 = vmax.f32 %v466_v12, 0.0  ;;  %v468_v25 = vadd.f32 %v372_v6, %v276_v13  ;;  %656 = vst [vmem:[%s1816_s4 + $0x188] sm:$0xff] %v560_v17  ;;  %v563_v28 = vmax.f32 %v467_v18, 0.0  ;;  %v177_v32 = vmul.f32 %v742_v1, %v74_v16  ;;  %v85_v13 = vld [vmem:[%s1812_s0 + $0x220] sm:$0xff] }
  0x3c   :  { %v469_v29 = vadd.f32 %v373_v14, %v277_v19  ;;  %v470_v30 = vadd.f32 %v374_v15, %v278_v20  ;;  %657 = vst [vmem:[%s1816_s4 + $0x190] sm:$0xff] %v561_v23  ;;  %v279_v35 = vadd.f32 %v747_v2, %v176_v26  ;;  %v178_v37 = vmul.f32 %v742_v1, %v75_v21  ;;  %v383_v17 = vld [vmem:[%s1815_s3 + $0x200] sm:$0xff]  ;;  %v86_v19 = vld [vmem:[%s1812_s0 + $0x228] sm:$0xff]  ;;  %v88_v26 = vld [vmem:[%s1812_s0 + $0x238] sm:$0xff] }
  0x3d   :  { %658 = vst [vmem:[%s1816_s4 + $0x198] sm:$0xff] %v562_v24  ;;  %v564_v34 = vmax.f32 %v468_v25, 0.0  ;;  %v179_v38 = vmul.f32 %v742_v1, %v76_v22  ;;  %659 = vst [vmem:[%s1816_s4 + $0x1a0] sm:$0xff] %v563_v28  ;;  %v280_v43 = vadd.f32 %v747_v2, %v177_v32  ;;  %v180_v46 = vmul.f32 %v742_v1, %v77_v27  ;;  %v384_v22 = vld [vmem:[%s1815_s3 + $0x208] sm:$0xff]  ;;  %v87_v25 = vld [vmem:[%s1812_s0 + $0x230] sm:$0xff] }
  0x3e   :  { %v565_v41 = vmax.f32 %v469_v29, 0.0  ;;  %v566_v42 = vmax.f32 %v470_v30, 0.0  ;;  %v471_v47 = vadd.f32 %v375_v31, %v279_v35  ;;  %v281_v48 = vadd.f32 %v747_v2, %v178_v37  ;;  %v385_v30 = vld [vmem:[%s1815_s3 + $0x210] sm:$0xff]  ;;  %v386_v31 = vld [vmem:[%s1815_s3 + $0x218] sm:$0xff] }
  0x3f   :  { %660 = vst [vmem:[%s1816_s4 + $0x1a8] sm:$0xff] %v564_v34  ;;  %v282_v49 = vadd.f32 %v747_v2, %v179_v38  ;;  %v181_v51 = vmul.f32 %v742_v1, %v78_v33  ;;  %v472_v52 = vadd.f32 %v376_v36, %v280_v43  ;;  %v283_v53 = vadd.f32 %v747_v2, %v180_v46  ;;  %v387_v36 = vld [vmem:[%s1815_s3 + $0x220] sm:$0xff] }
  0x40   :  { %661 = vst [vmem:[%s1816_s4 + $0x1b0] sm:$0xff] %v565_v41  ;;  %662 = vst [vmem:[%s1816_s4 + $0x1b8] sm:$0xff] %v566_v42  ;;  %v182_v55 = vmul.f32 %v742_v1, %v79_v39  ;;  %v183_v56 = vmul.f32 %v742_v1, %v80_v40  ;;  %v567_v58 = vmax.f32 %v471_v47, 0.0  ;;  %v473_v59 = vadd.f32 %v377_v44, %v281_v48  ;;  %v388_v40 = vld [vmem:[%s1815_s3 + $0x228] sm:$0xff]  ;;  %v89_v43 = vld [vmem:[%s1812_s0 + $0x240] sm:$0xff] }
  0x41   :  { %v474_v60 = vadd.f32 %v378_v45, %v282_v49  ;;  %v284_v61 = vadd.f32 %v747_v2, %v181_v51  ;;  %v568_v3 = vmax.f32 %v472_v52, 0.0  ;;  %v475_v4 = vadd.f32 %v379_v50, %v283_v53  ;;  %v389_v48 = vld [vmem:[%s1815_s3 + $0x230] sm:$0xff]  ;;  %v390_v49 = vld [vmem:[%s1815_s3 + $0x238] sm:$0xff]  ;;  %v90_v50 = vld [vmem:[%s1812_s0 + $0x248] sm:$0xff] }
  0x42   :  { %v285_v5 = vadd.f32 %v747_v2, %v182_v55  ;;  %v286_v6 = vadd.f32 %v747_v2, %v183_v56  ;;  %663 = vst [vmem:[%s1816_s4 + $0x1c0] sm:$0xff] %v567_v58  ;;  %v569_v9 = vmax.f32 %v473_v59, 0.0  ;;  %v184_v12 = vmul.f32 %v742_v1, %v81_v57  ;;  %v91_v55 = vld [vmem:[%s1812_s0 + $0x250] sm:$0xff]  ;;  %v92_v56 = vld [vmem:[%s1812_s0 + $0x258] sm:$0xff] }
  0x43   :  { %v570_v10 = vmax.f32 %v474_v60, 0.0  ;;  %v476_v11 = vadd.f32 %v380_v54, %v284_v61  ;;  %664 = vst [vmem:[%s1816_s4 + $0x1c8] sm:$0xff] %v568_v3  ;;  %v571_v14 = vmax.f32 %v475_v4, 0.0  ;;  %v185_v18 = vmul.f32 %v742_v1, %v82_v0  ;;  %v93_v61 = vld [vmem:[%s1812_s0 + $0x260] sm:$0xff] }
  0x44   :  { %v477_v15 = vadd.f32 %v381_v62, %v285_v5  ;;  %v478_v16 = vadd.f32 %v382_v63, %v286_v6  ;;  %665 = vst [vmem:[%s1816_s4 + $0x1d0] sm:$0xff] %v569_v9  ;;  %v287_v21 = vadd.f32 %v747_v2, %v184_v12  ;;  %v186_v23 = vmul.f32 %v742_v1, %v83_v7  ;;  %v391_v3 = vld [vmem:[%s1815_s3 + $0x240] sm:$0xff]  ;;  %v94_v5 = vld [vmem:[%s1812_s0 + $0x268] sm:$0xff]  ;;  %v95_v12 = vld [vmem:[%s1812_s0 + $0x270] sm:$0xff] }
  0x45   :  { %666 = vst [vmem:[%s1816_s4 + $0x1d8] sm:$0xff] %v570_v10  ;;  %v572_v20 = vmax.f32 %v476_v11, 0.0  ;;  %v187_v24 = vmul.f32 %v742_v1, %v84_v8  ;;  %667 = vst [vmem:[%s1816_s4 + $0x1e0] sm:$0xff] %v571_v14  ;;  %v288_v29 = vadd.f32 %v747_v2, %v185_v18  ;;  %v188_v32 = vmul.f32 %v742_v1, %v85_v13  ;;  %v392_v8 = vld [vmem:[%s1815_s3 + $0x248] sm:$0xff]  ;;  %v1557_v10 = vld [vmem:[%s1813_s1] ss:$0 sm:$0xff] }
  0x46   :  { %v573_v27 = vmax.f32 %v477_v15, 0.0  ;;  %v574_v28 = vmax.f32 %v478_v16, 0.0  ;;  %v479_v33 = vadd.f32 %v383_v17, %v287_v21  ;;  %v289_v34 = vadd.f32 %v747_v2, %v186_v23  ;;  %v1572_v14 = vld [vmem:[%s1814_s2] ss:$0 sm:$0xff]  ;;  %v393_v16 = vld [vmem:[%s1815_s3 + $0x250] sm:$0xff]  ;;  %v394_v17 = vld [vmem:[%s1815_s3 + $0x258] sm:$0xff] }
  0x47   :  { %668 = vst [vmem:[%s1816_s4 + $0x1e8] sm:$0xff] %v572_v20  ;;  %v290_v35 = vadd.f32 %v747_v2, %v187_v24  ;;  %v189_v37 = vmul.f32 %v742_v1, %v86_v19  ;;  %v480_v38 = vadd.f32 %v384_v22, %v288_v29  ;;  %v291_v39 = vadd.f32 %v747_v2, %v188_v32  ;;  %v395_v22 = vld [vmem:[%s1815_s3 + $0x260] sm:$0xff] }
  0x48   :  { %669 = vst [vmem:[%s1816_s4 + $0x1f0] sm:$0xff] %v573_v27  ;;  %670 = vst [vmem:[%s1816_s4 + $0x1f8] sm:$0xff] %v574_v28  ;;  %v190_v41 = vmul.f32 %v742_v1, %v87_v25  ;;  %v191_v42 = vmul.f32 %v742_v1, %v88_v26  ;;  %v575_v44 = vmax.f32 %v479_v33, 0.0  ;;  %v481_v45 = vadd.f32 %v385_v30, %v289_v34  ;;  %v396_v26 = vld [vmem:[%s1815_s3 + $0x268] sm:$0xff]  ;;  %v97_v29 = vld [vmem:[%s1812_s0 + $0x280] sm:$0xff] }
  0x49   :  { %v482_v46 = vadd.f32 %v386_v31, %v290_v35  ;;  %v292_v47 = vadd.f32 %v747_v2, %v189_v37  ;;  %v576_v51 = vmax.f32 %v480_v38, 0.0  ;;  %v483_v52 = vadd.f32 %v387_v36, %v291_v39  ;;  %v397_v34 = vld [vmem:[%s1815_s3 + $0x270] sm:$0xff]  ;;  %v398_v35 = vld [vmem:[%s1815_s3 + $0x278] sm:$0xff]  ;;  %v98_v36 = vld [vmem:[%s1812_s0 + $0x288] sm:$0xff] }
  0x4a   :  { %v293_v53 = vadd.f32 %v747_v2, %v190_v41  ;;  %v294_v54 = vadd.f32 %v747_v2, %v191_v42  ;;  %671 = vst [vmem:[%s1816_s4 + $0x200] sm:$0xff] %v575_v44  ;;  %v577_v57 = vmax.f32 %v481_v45, 0.0  ;;  %v192_v60 = vmul.f32 %v742_v1, %v89_v43  ;;  %v99_v41 = vld [vmem:[%s1812_s0 + $0x290] sm:$0xff]  ;;  %v100_v42 = vld [vmem:[%s1812_s0 + $0x298] sm:$0xff] }
  0x4b   :  { %v578_v58 = vmax.f32 %v482_v46, 0.0  ;;  %v484_v59 = vadd.f32 %v388_v40, %v292_v47  ;;  %672 = vst [vmem:[%s1816_s4 + $0x208] sm:$0xff] %v576_v51  ;;  %v579_v62 = vmax.f32 %v483_v52, 0.0  ;;  %v193_v4 = vmul.f32 %v742_v1, %v90_v50  ;;  %v101_v47 = vld [vmem:[%s1812_s0 + $0x2a0] sm:$0xff] }
  0x4c   :  { %v485_v63 = vadd.f32 %v389_v48, %v293_v53  ;;  %v486_v0 = vadd.f32 %v390_v49, %v294_v54  ;;  %673 = vst [vmem:[%s1816_s4 + $0x210] sm:$0xff] %v577_v57  ;;  %v295_v7 = vadd.f32 %v747_v2, %v192_v60  ;;  %v194_v9 = vmul.f32 %v742_v1, %v91_v55  ;;  %v96_v2 = vld [vmem:[%s1812_s0 + $0x278] sm:$0xff]  ;;  %v399_v51 = vld [vmem:[%s1815_s3 + $0x280] sm:$0xff]  ;;  %v102_v53 = vld [vmem:[%s1812_s0 + $0x2a8] sm:$0xff] }
  0x4d   :  { %674 = vst [vmem:[%s1816_s4 + $0x218] sm:$0xff] %v578_v58  ;;  %v580_v6 = vmax.f32 %v484_v59, 0.0  ;;  %v195_v11 = vmul.f32 %v1557_v10, %v92_v56  ;;  %675 = vst [vmem:[%s1816_s4 + $0x220] sm:$0xff] %v579_v62  ;;  %v296_v15 = vadd.f32 %v1572_v14, %v193_v4  ;;  %v196_v18 = vmul.f32 %v1557_v10, %v93_v61  ;;  %v400_v56 = vld [vmem:[%s1815_s3 + $0x288] sm:$0xff]  ;;  %v103_v59 = vld [vmem:[%s1812_s0 + $0x2b0] sm:$0xff] }
  0x4e   :  { %v581_v1 = vmax.f32 %v485_v63, 0.0  ;;  %v582_v13 = vmax.f32 %v486_v0, 0.0  ;;  %v487_v19 = vadd.f32 %v391_v3, %v295_v7  ;;  %v297_v20 = vadd.f32 %v1572_v14, %v194_v9  ;;  %v104_v60 = vld [vmem:[%s1812_s0 + $0x2b8] sm:$0xff]  ;;  %v401_v0 = vld [vmem:[%s1815_s3 + $0x290] sm:$0xff] }
  0x4f   :  { %676 = vst [vmem:[%s1816_s4 + $0x228] sm:$0xff] %v580_v6  ;;  %v298_v21 = vadd.f32 %v1572_v14, %v195_v11  ;;  %v197_v23 = vmul.f32 %v1557_v10, %v94_v5  ;;  %v488_v24 = vadd.f32 %v392_v8, %v296_v15  ;;  %v299_v25 = vadd.f32 %v1572_v14, %v196_v18  ;;  %v402_v3 = vld [vmem:[%s1815_s3 + $0x298] sm:$0xff]  ;;  %v403_v8 = vld [vmem:[%s1815_s3 + $0x2a0] sm:$0xff] }
  0x50   :  { %677 = vst [vmem:[%s1816_s4 + $0x230] sm:$0xff] %v581_v1  ;;  %678 = vst [vmem:[%s1816_s4 + $0x238] sm:$0xff] %v582_v13  ;;  %v198_v27 = vmul.f32 %v1557_v10, %v95_v12  ;;  %v199_v28 = vmul.f32 %v1557_v10, %v96_v2  ;;  %v583_v30 = vmax.f32 %v487_v19, 0.0  ;;  %v489_v31 = vadd.f32 %v393_v16, %v297_v20  ;;  %v404_v2 = vld [vmem:[%s1815_s3 + $0x2a8] sm:$0xff]  ;;  %v105_v15 = vld [vmem:[%s1812_s0 + $0x2c0] sm:$0xff] }
  0x51   :  { %v490_v32 = vadd.f32 %v394_v17, %v298_v21  ;;  %v300_v33 = vadd.f32 %v1572_v14, %v197_v23  ;;  %v584_v37 = vmax.f32 %v488_v24, 0.0  ;;  %v491_v38 = vadd.f32 %v395_v22, %v299_v25  ;;  %v405_v20 = vld [vmem:[%s1815_s3 + $0x2b0] sm:$0xff]  ;;  %v406_v21 = vld [vmem:[%s1815_s3 + $0x2b8] sm:$0xff]  ;;  %v106_v22 = vld [vmem:[%s1812_s0 + $0x2c8] sm:$0xff] }
  0x52   :  { %v301_v39 = vadd.f32 %v1572_v14, %v198_v27  ;;  %v302_v40 = vadd.f32 %v1572_v14, %v199_v28  ;;  %679 = vst [vmem:[%s1816_s4 + $0x240] sm:$0xff] %v583_v30  ;;  %v585_v43 = vmax.f32 %v489_v31, 0.0  ;;  %v200_v46 = vmul.f32 %v1557_v10, %v97_v29  ;;  %v107_v27 = vld [vmem:[%s1812_s0 + $0x2d0] sm:$0xff]  ;;  %v108_v28 = vld [vmem:[%s1812_s0 + $0x2d8] sm:$0xff] }
  0x53   :  { %v586_v44 = vmax.f32 %v490_v32, 0.0  ;;  %v492_v45 = vadd.f32 %v396_v26, %v300_v33  ;;  %680 = vst [vmem:[%s1816_s4 + $0x248] sm:$0xff] %v584_v37  ;;  %v587_v48 = vmax.f32 %v491_v38, 0.0  ;;  %v201_v52 = vmul.f32 %v1557_v10, %v98_v36  ;;  %v109_v33 = vld [vmem:[%s1812_s0 + $0x2e0] sm:$0xff] }
  0x54   :  { %v493_v49 = vadd.f32 %v397_v34, %v301_v39  ;;  %v494_v50 = vadd.f32 %v398_v35, %v302_v40  ;;  %681 = vst [vmem:[%s1816_s4 + $0x250] sm:$0xff] %v585_v43  ;;  %v303_v55 = vadd.f32 %v1572_v14, %v200_v46  ;;  %v202_v57 = vmul.f32 %v1557_v10, %v99_v41  ;;  %v407_v37 = vld [vmem:[%s1815_s3 + $0x2c0] sm:$0xff]  ;;  %v110_v39 = vld [vmem:[%s1812_s0 + $0x2e8] sm:$0xff]  ;;  %v112_v46 = vld [vmem:[%s1812_s0 + $0x2f8] sm:$0xff] }
  0x55   :  { %682 = vst [vmem:[%s1816_s4 + $0x258] sm:$0xff] %v586_v44  ;;  %v588_v54 = vmax.f32 %v492_v45, 0.0  ;;  %v203_v58 = vmul.f32 %v1557_v10, %v100_v42  ;;  %683 = vst [vmem:[%s1816_s4 + $0x260] sm:$0xff] %v587_v48  ;;  %v304_v63 = vadd.f32 %v1572_v14, %v201_v52  ;;  %v204_v4 = vmul.f32 %v1557_v10, %v101_v47  ;;  %v408_v42 = vld [vmem:[%s1815_s3 + $0x2c8] sm:$0xff]  ;;  %v111_v45 = vld [vmem:[%s1812_s0 + $0x2f0] sm:$0xff] }
  0x56   :  { %v589_v61 = vmax.f32 %v493_v49, 0.0  ;;  %v590_v62 = vmax.f32 %v494_v50, 0.0  ;;  %v495_v5 = vadd.f32 %v399_v51, %v303_v55  ;;  %v305_v6 = vadd.f32 %v1572_v14, %v202_v57  ;;  %v409_v50 = vld [vmem:[%s1815_s3 + $0x2d0] sm:$0xff]  ;;  %v410_v51 = vld [vmem:[%s1815_s3 + $0x2d8] sm:$0xff] }
  0x57   :  { %684 = vst [vmem:[%s1816_s4 + $0x268] sm:$0xff] %v588_v54  ;;  %v306_v7 = vadd.f32 %v1572_v14, %v203_v58  ;;  %v205_v9 = vmul.f32 %v1557_v10, %v102_v53  ;;  %v496_v11 = vadd.f32 %v400_v56, %v304_v63  ;;  %v307_v12 = vadd.f32 %v1572_v14, %v204_v4  ;;  %v411_v56 = vld [vmem:[%s1815_s3 + $0x2e0] sm:$0xff] }
  0x58   :  { %685 = vst [vmem:[%s1816_s4 + $0x270] sm:$0xff] %v589_v61  ;;  %686 = vst [vmem:[%s1816_s4 + $0x278] sm:$0xff] %v590_v62  ;;  %v206_v1 = vmul.f32 %v1557_v10, %v103_v59  ;;  %v207_v13 = vmul.f32 %v1557_v10, %v104_v60  ;;  %v591_v16 = vmax.f32 %v495_v5, 0.0  ;;  %v497_v17 = vadd.f32 %v401_v0, %v305_v6  ;;  %v412_v60 = vld [vmem:[%s1815_s3 + $0x2e8] sm:$0xff]  ;;  %v413_v5 = vld [vmem:[%s1815_s3 + $0x2f0] sm:$0xff] }
  0x59   :  { %v498_v18 = vadd.f32 %v402_v3, %v306_v7  ;;  %v308_v19 = vadd.f32 %v1572_v14, %v205_v9  ;;  %v592_v23 = vmax.f32 %v496_v11, 0.0  ;;  %v499_v24 = vadd.f32 %v403_v8, %v307_v12  ;;  %v414_v6 = vld [vmem:[%s1815_s3 + $0x2f8] sm:$0xff] }
  0x5a   :  { %v309_v25 = vadd.f32 %v1572_v14, %v206_v1  ;;  %v310_v26 = vadd.f32 %v1572_v14, %v207_v13  ;;  %687 = vst [vmem:[%s1816_s4 + $0x280] sm:$0xff] %v591_v16  ;;  %v593_v29 = vmax.f32 %v497_v17, 0.0  ;;  %v208_v32 = vmul.f32 %v1557_v10, %v105_v15 }
  0x5b   :  { %v594_v30 = vmax.f32 %v498_v18, 0.0  ;;  %v500_v31 = vadd.f32 %v404_v2, %v308_v19  ;;  %688 = vst [vmem:[%s1816_s4 + $0x288] sm:$0xff] %v592_v23  ;;  %v595_v34 = vmax.f32 %v499_v24, 0.0  ;;  %v209_v38 = vmul.f32 %v1557_v10, %v106_v22 }
  0x5c   :  { %v501_v35 = vadd.f32 %v405_v20, %v309_v25  ;;  %v502_v36 = vadd.f32 %v406_v21, %v310_v26  ;;  %689 = vst [vmem:[%s1816_s4 + $0x290] sm:$0xff] %v593_v29  ;;  %v311_v41 = vadd.f32 %v1572_v14, %v208_v32  ;;  %v210_v43 = vmul.f32 %v1557_v10, %v107_v27 }
  0x5d   :  { %690 = vst [vmem:[%s1816_s4 + $0x298] sm:$0xff] %v594_v30  ;;  %v596_v40 = vmax.f32 %v500_v31, 0.0  ;;  %v211_v44 = vmul.f32 %v1557_v10, %v108_v28  ;;  %691 = vst [vmem:[%s1816_s4 + $0x2a0] sm:$0xff] %v595_v34  ;;  %v312_v49 = vadd.f32 %v1572_v14, %v209_v38  ;;  %v212_v52 = vmul.f32 %v1557_v10, %v109_v33 }
  0x5e   :  { %v597_v47 = vmax.f32 %v501_v35, 0.0  ;;  %v598_v48 = vmax.f32 %v502_v36, 0.0  ;;  %v503_v53 = vadd.f32 %v407_v37, %v311_v41  ;;  %v313_v54 = vadd.f32 %v1572_v14, %v210_v43 }
  0x5f   :  { %692 = vst [vmem:[%s1816_s4 + $0x2a8] sm:$0xff] %v596_v40  ;;  %v314_v55 = vadd.f32 %v1572_v14, %v211_v44  ;;  %v213_v57 = vmul.f32 %v1557_v10, %v110_v39  ;;  %v504_v58 = vadd.f32 %v408_v42, %v312_v49  ;;  %v315_v59 = vadd.f32 %v1572_v14, %v212_v52 }
  0x60   :  { %693 = vst [vmem:[%s1816_s4 + $0x2b0] sm:$0xff] %v597_v47  ;;  %694 = vst [vmem:[%s1816_s4 + $0x2b8] sm:$0xff] %v598_v48  ;;  %v214_v61 = vmul.f32 %v1557_v10, %v111_v45  ;;  %v215_v62 = vmul.f32 %v1557_v10, %v112_v46  ;;  %v599_v63 = vmax.f32 %v503_v53, 0.0  ;;  %v505_v0 = vadd.f32 %v409_v50, %v313_v54 }
  0x61   :  { %v506_v3 = vadd.f32 %v410_v51, %v314_v55  ;;  %v316_v4 = vadd.f32 %v1572_v14, %v213_v57  ;;  %v600_v7 = vmax.f32 %v504_v58, 0.0  ;;  %v507_v8 = vadd.f32 %v411_v56, %v315_v59 }
  0x62   :  { %v317_v9 = vadd.f32 %v1572_v14, %v214_v61  ;;  %v318_v11 = vadd.f32 %v1572_v14, %v215_v62  ;;  %695 = vst [vmem:[%s1816_s4 + $0x2c0] sm:$0xff] %v599_v63  ;;  %v601_v10 = vmax.f32 %v505_v0, 0.0 }
  0x63   :  { %v602_v12 = vmax.f32 %v506_v3, 0.0  ;;  %v508_v2 = vadd.f32 %v412_v60, %v316_v4  ;;  %696 = vst [vmem:[%s1816_s4 + $0x2c8] sm:$0xff] %v600_v7  ;;  %v603_v1 = vmax.f32 %v507_v8, 0.0 }
  0x64   :  { %v509_v13 = vadd.f32 %v413_v5, %v317_v9  ;;  %v510_v15 = vadd.f32 %v414_v6, %v318_v11  ;;  %697 = vst [vmem:[%s1816_s4 + $0x2d0] sm:$0xff] %v601_v10 }
  0x65   :  { %698 = vst [vmem:[%s1816_s4 + $0x2d8] sm:$0xff] %v602_v12  ;;  %v604_v14 = vmax.f32 %v508_v2, 0.0  ;;  %699 = vst [vmem:[%s1816_s4 + $0x2e0] sm:$0xff] %v603_v1 }
  0x66   :  { %v605_v16 = vmax.f32 %v509_v13, 0.0  ;;  %v606_v17 = vmax.f32 %v510_v15, 0.0 }
  0x67   :  { %700 = vst [vmem:[%s1816_s4 + $0x2e8] sm:$0xff] %v604_v14 }
  0x68   :  { %701 = vst [vmem:[%s1816_s4 + $0x2f0] sm:$0xff] %v605_v16  ;;  %702 = vst [vmem:[%s1816_s4 + $0x2f8] sm:$0xff] %v606_v17 }

// kernel: basic_block_forward.4
= control target key start
LH: loop header
LB: loop body
LE: loop exit
PB: predicated region body
PF: predicated region fallthrough
CT: control target
= control target key end

     0   :  { %s7808_s21 = smov 0   ;;  %s10551_s0 = inlined_call_operand.vmem [shape: f32[2,384,128], index: 0, kind: input, shape index: {}]   ;;  %s10552_s1 = inlined_call_operand.vmem [shape: f32[384,1], index: 1, kind: input, shape index: {}]   ;;  %s10553_s2 = inlined_call_operand.vmem [shape: f32[1,128], index: 2, kind: input, shape index: {}]   ;;  %s10554_s3 = inlined_call_operand.vmem [shape: f32[1,128], index: 3, kind: input, shape index: {}]   ;;  %s10555_s4 = inlined_call_operand.vmem [shape: f32[3,3,128,128], index: 4, kind: input, shape index: {}]   ;;  %s10556_s5 = inlined_call_operand.vmem [shape: f32[2,384,128], index: 5, kind: output, shape index: {0}]   ;;  %s10557_s6 = inlined_call_operand.vmem [shape: f32[2,2,128], index: 6, kind: output, shape index: {1}]  }
   0x1 LB: > { %s6066_s22 = sadd.s32 4294967295, %s7769_s21   ;;  %p6070_p0 = scmp.ge.s32.totalorder %s7769_s21, 1  ;;  %s7769_s21 = sphi %s7808_s21, %s17_s21  }
   0x2   : > { %p215_p1 = scmp.lt.s32.totalorder %s7769_s21, 3 }
   0x4   : > { %p216_p2 = pnand %p6070_p0, %p215_p1 }
   0x6   : > { %219 = sbr.rel (%p216_p2) target bundleno = 834 (0x342), region = 40 }
   0xb   : > { %v285_v0 = vld [vmem:[%s10552_s1 + $0xb0] sm:$0xff]  ;;  %v283_v1 = vld [vmem:[%s10552_s1 + $0xa0] sm:$0xff]  ;;  %v7771_v2 = vmov 0   ;;  %v284_v4 = vld [vmem:[%s10552_s1 + $0xa8] sm:$0xff]  ;;  %p249_p3 = scmp.lt.s32.totalorder %s6066_s22, 1 }
   0xc   : > { %7762 = vset.pattern.permute.xlu1 %v7771_v2  ;;  %7761 = vset.pattern.permute.xlu0 %v7771_v2  ;;  %v307_v3 = vld [vmem:[%s10552_s1 + $0x160] sm:$0xff]  ;;  %v286_v6 = vld [vmem:[%s10552_s1 + $0xb8] sm:$0xff]  ;;  %v288_v7 = vld [vmem:[%s10552_s1 + $0xc8] sm:$0xff] }
   0xd   : > { %629 = vperm.xlu1 %7762, %v285_v0   ;;  %619 = vperm.xlu0 %7761, %v283_v1   ;;  %v287_v5 = vld [vmem:[%s10552_s1 + $0xc0] sm:$0xff]  ;;  %v264_v9 = vld [vmem:[%s10552_s1 + $0x8] sm:$0xff]  ;;  %v289_v10 = vld [vmem:[%s10552_s1 + $0xd0] sm:$0xff]  ;;  %s11370_s22 = smov (!%p249_p3, %s6066_s22), 1 }
   0xe   : > { %v263_v8 = vld [vmem:[%s10552_s1] sm:$0xff]  ;;  %v1021_v11 = vld [vmem:[%s10555_s4 + $0x78] sm:$0xff]  ;;  %v1020_v12 = vld [vmem:[%s10555_s4 + $0x70] sm:$0xff]  ;;  %s7750_s27 = smul.u32 384, %s11370_s22 }
   0xf   : > { %7718 = vmatprep.subr.mxu1 %v1021_v11  ;;  %6782 = vmatprep.subr.mxu0 %v1021_v11  ;;  %v290_v13 = vld [vmem:[%s10552_s1 + $0xd8] sm:$0xff]  ;;  %v265_v14 = vld [vmem:[%s10552_s1 + $0x10] sm:$0xff]  ;;  %v1019_v15 = vld [vmem:[%s10555_s4 + $0x68] sm:$0xff] }
  0x10   : > { %7734 = vmatpush3.msra.mxu1 %v1021_v11  ;;  %6783 = vmatpush3.msra.mxu0 %v1021_v11  ;;  %v1018_v16 = vld [vmem:[%s10555_s4 + $0x60] sm:$0xff]  ;;  %v266_v17 = vld [vmem:[%s10552_s1 + $0x18] sm:$0xff]  ;;  %v292_v20 = vld [vmem:[%s10552_s1 + $0xe8] sm:$0xff]  ;;  %s7982_s14 = scalar_lea.vmem %s10551_s0, %s7750_s27  ;;  %s10400_s15 = scalar_lea.vmem %s10556_s5, %s7750_s27 }
  0x11   : > { %739 = vperm.xlu1 %7762, %v307_v3   ;;  %624 = vperm.xlu0 %7761, %v284_v4   ;;  %v291_v18 = vld [vmem:[%s10552_s1 + $0xe0] sm:$0xff]  ;;  %v1017_v19 = vld [vmem:[%s10555_s4 + $0x58] sm:$0xff]  ;;  %v1016_v22 = vld [vmem:[%s10555_s4 + $0x50] sm:$0xff]  ;;  %s6073_s27 = sshll.u32 %s11370_s22, 1 }
  0x12   : > { %7719 = vmatprep.subr.mxu1 %v1020_v12  ;;  %6784 = vmatprep.subr.mxu0 %v1020_v12  ;;  %v267_v21 = vld [vmem:[%s10552_s1 + $0x20] sm:$0xff]  ;;  %v1015_v23 = vld [vmem:[%s10555_s4 + $0x48] sm:$0xff]  ;;  %v293_v25 = vld [vmem:[%s10552_s1 + $0xf0] sm:$0xff]  ;;  %s262_s18 = scalar_lea.vmem %s10557_s6, %s6073_s27 }
  0x13   : > { %7735 = vmatpush3.msra.mxu1 %v1020_v12  ;;  %6785 = vmatpush3.msra.mxu0 %v1020_v12  ;;  %v268_v24 = vld [vmem:[%s10552_s1 + $0x28] sm:$0xff]  ;;  %v1014_v26 = vld [vmem:[%s10555_s4 + $0x40] sm:$0xff]  ;;  %v294_v27 = vld [vmem:[%s10552_s1 + $0xf8] sm:$0xff] }
  0x14   : > { %7720 = vmatprep.subr.mxu1 %v1019_v15  ;;  %6786 = vmatprep.subr.mxu0 %v1019_v15  ;;  %v269_v28 = vld [vmem:[%s10552_s1 + $0x30] sm:$0xff]  ;;  %v1013_v29 = vld [vmem:[%s10555_s4 + $0x38] sm:$0xff]  ;;  %v295_v32 = vld [vmem:[%s10552_s1 + $0x100] sm:$0xff] }
  0x15   : > { %639 = vperm.xlu1 %7762, %v287_v5   ;;  %634 = vperm.xlu0 %7761, %v286_v6   ;;  %v1012_v30 = vld [vmem:[%s10555_s4 + $0x30] sm:$0xff]  ;;  %v270_v31 = vld [vmem:[%s10552_s1 + $0x38] sm:$0xff]  ;;  %v1011_v33 = vld [vmem:[%s10555_s4 + $0x28] sm:$0xff] }
  0x16   : > { %7736 = vmatpush3.msra.mxu1 %v1019_v15  ;;  %6787 = vmatpush3.msra.mxu0 %v1019_v15  ;;  %v296_v34 = vld [vmem:[%s10552_s1 + $0x108] sm:$0xff]  ;;  %v271_v35 = vld [vmem:[%s10552_s1 + $0x40] sm:$0xff]  ;;  %v1009_v37 = vld [vmem:[%s10555_s4 + $0x18] sm:$0xff] }
  0x17   : > { %7721 = vmatprep.subr.mxu1 %v1018_v16  ;;  %6788 = vmatprep.subr.mxu0 %v1018_v16  ;;  %v1010_v36 = vld [vmem:[%s10555_s4 + $0x20] sm:$0xff]  ;;  %v272_v38 = vld [vmem:[%s10552_s1 + $0x48] sm:$0xff]  ;;  %v297_v39 = vld [vmem:[%s10552_s1 + $0x110] sm:$0xff] }
  0x18   : > { %7737 = vmatpush3.msra.mxu1 %v1018_v16  ;;  %6789 = vmatpush3.msra.mxu0 %v1018_v16  ;;  %v1008_v40 = vld [vmem:[%s10555_s4 + $0x10] sm:$0xff]  ;;  %v298_v41 = vld [vmem:[%s10552_s1 + $0x118] sm:$0xff]  ;;  %v1007_v43 = vld [vmem:[%s10555_s4 + $0x8] sm:$0xff] }
  0x19   : > { %644 = vperm.xlu1 %7762, %v288_v7   ;;  %519 = vperm.xlu0 %7761, %v263_v8   ;;  %v273_v42 = vld [vmem:[%s10552_s1 + $0x50] sm:$0xff]  ;;  %v1006_v44 = vld [vmem:[%s10555_s4] sm:$0xff]  ;;  %v274_v45 = vld [vmem:[%s10552_s1 + $0x58] sm:$0xff] }
  0x1a   : > { %7722 = vmatprep.subr.mxu1 %v1017_v19  ;;  %6790 = vmatprep.subr.mxu0 %v1017_v19  ;;  %v299_v46 = vld [vmem:[%s10552_s1 + $0x120] sm:$0xff]  ;;  %v7964_v47 = vld [vmem:[%s10555_s4 + $0xf8] sm:$0xff]  ;;  %v300_v49 = vld [vmem:[%s10552_s1 + $0x128] sm:$0xff] }
  0x1b   : > { %7738 = vmatpush3.msra.mxu1 %v1017_v19  ;;  %6791 = vmatpush3.msra.mxu0 %v1017_v19  ;;  %v7969_v48 = vld [vmem:[%s10555_s4 + $0x178] sm:$0xff]  ;;  %v275_v50 = vld [vmem:[%s10552_s1 + $0x60] sm:$0xff]  ;;  %v325_v53 = vld [vmem:[%s7982_s14 + $0x70] sm:$0xff] }
  0x1c   : > { %7723 = vmatprep.subr.mxu1 %v1016_v22  ;;  %6792 = vmatprep.subr.mxu0 %v1016_v22  ;;  %v7987_v51 = vld [vmem:[%s10553_s2] ss:$0 sm:$0xff]  ;;  %v350_v52 = vld [vmem:[%s7982_s14 + $0x138] sm:$0xff]  ;;  %v276_v57 = vld [vmem:[%s10552_s1 + $0x68] sm:$0xff] }
  0x1d   : > { %524 = vperm.xlu1 %7762, %v264_v9   ;;  %649 = vperm.xlu0 %7761, %v289_v10   ;;  %v405_v54 = vmul.f32 %v7987_v51, %v350_v52  ;;  %v380_v55 = vmul.f32 %v7987_v51, %v325_v53  ;;  %v7998_v56 = vld [vmem:[%s10554_s3] ss:$0 sm:$0xff]  ;;  %v301_v58 = vld [vmem:[%s10552_s1 + $0x130] sm:$0xff]  ;;  %v326_v61 = vld [vmem:[%s7982_s14 + $0x78] sm:$0xff] }
  0x1e   : > { %7739 = vmatpush3.msra.mxu1 %v1016_v22  ;;  %6793 = vmatpush3.msra.mxu0 %v1016_v22  ;;  %v351_v62 = vld [vmem:[%s7982_s14 + $0x140] sm:$0xff]  ;;  %v381_v63 = vmul.f32 %v7987_v51, %v326_v61  ;;  %v302_v1 = vld [vmem:[%s10552_s1 + $0x138] sm:$0xff]  ;;  %v277_v2 = vld [vmem:[%s10552_s1 + $0x70] sm:$0xff] }
  0x1f   : > { %7724 = vmatprep.subr.mxu1 %v1015_v23  ;;  %6794 = vmatprep.subr.mxu0 %v1015_v23  ;;  %v8007_v59 = vadd.f32 %v7998_v56, %v405_v54  ;;  %v8010_v60 = vadd.f32 %v7998_v56, %v380_v55  ;;  %v406_v0 = vmul.f32 %v7987_v51, %v351_v62  ;;  %v352_v5 = vld [vmem:[%s7982_s14 + $0x148] sm:$0xff]  ;;  %v327_v6 = vld [vmem:[%s7982_s14 + $0x80] sm:$0xff]  ;;  %v278_v9 = vld [vmem:[%s10552_s1 + $0x78] sm:$0xff] }
  0x20   : > { %7740 = vmatpush3.msra.mxu1 %v1015_v23  ;;  %6795 = vmatpush3.msra.mxu0 %v1015_v23  ;;  %v8023_v3 = vadd.f32 %v7998_v56, %v381_v63  ;;  %v407_v7 = vmul.f32 %v7987_v51, %v352_v5  ;;  %v382_v8 = vmul.f32 %v7987_v51, %v327_v6  ;;  %v303_v10 = vld [vmem:[%s10552_s1 + $0x140] sm:$0xff]  ;;  %v329_v22 = vld [vmem:[%s7982_s14 + $0x90] sm:$0xff]  ;;  %v332_v53 = vld [vmem:[%s7982_s14 + $0xa8] sm:$0xff] }
  0x21   : > { %654 = vperm.xlu1 %7762, %v290_v13   ;;  %529 = vperm.xlu0 %7761, %v265_v14   ;;  %v8026_v4 = vadd.f32 %v7998_v56, %v406_v0  ;;  %v328_v13 = vld [vmem:[%s7982_s14 + $0x88] sm:$0xff]  ;;  %v353_v14 = vld [vmem:[%s7982_s14 + $0x150] sm:$0xff]  ;;  %v355_v52 = vld [vmem:[%s7982_s14 + $0x160] sm:$0xff] }
  0x22   : > { %7725 = vmatprep.subr.mxu1 %v1014_v26  ;;  %6796 = vmatprep.subr.mxu0 %v1014_v26  ;;  %v8039_v11 = vadd.f32 %v7998_v56, %v407_v7  ;;  %v8042_v12 = vadd.f32 %v7998_v56, %v382_v8  ;;  %v383_v15 = vmul.f32 %v7987_v51, %v328_v13  ;;  %v335_v61 = vld [vmem:[%s7982_s14 + $0xc0] sm:$0xff]  ;;  %v334_v62 = vld [vmem:[%s7982_s14 + $0xb8] sm:$0xff]  ;;  %v336_v0 = vld [vmem:[%s7982_s14 + $0xc8] sm:$0xff] }
  0x23   : > { %7741 = vmatpush3.msra.mxu1 %v1014_v26  ;;  %6797 = vmatpush3.msra.mxu0 %v1014_v26  ;;  %v408_v16 = vmul.f32 %v7987_v51, %v353_v14  ;;  %v305_v26 = vld [vmem:[%s10552_s1 + $0x150] sm:$0xff]  ;;  %v390_v6 = vmul.f32 %v7987_v51, %v335_v61  ;;  %v389_v7 = vmul.f32 %v7987_v51, %v334_v62  ;;  %v311_v8 = vld [vmem:[%s7982_s14] sm:$0xff] }
  0x24   : > { %7726 = vmatprep.subr.mxu1 %v1013_v29  ;;  %6798 = vmatprep.subr.mxu0 %v1013_v29  ;;  %v8055_v19 = vadd.f32 %v7998_v56, %v383_v15 }
  0x25   : > { %534 = vperm.xlu1 %7762, %v266_v17   ;;  %659 = vperm.xlu0 %7761, %v291_v18   ;;  %v304_v17 = vld [vmem:[%s10552_s1 + $0x148] sm:$0xff]  ;;  %v279_v18 = vld [vmem:[%s10552_s1 + $0x80] sm:$0xff] }
  0x26   : > { %7742 = vmatpush3.msra.mxu1 %v1013_v29  ;;  %6799 = vmatpush3.msra.mxu0 %v1013_v29  ;;  %v358_v29 = vld [vmem:[%s7982_s14 + $0x178] sm:$0xff] }
  0x27   : > { %7727 = vmatprep.subr.mxu1 %v1012_v30  ;;  %6800 = vmatprep.subr.mxu0 %v1012_v30 }
  0x28   : > { %7743 = vmatpush3.msra.mxu1 %v1012_v30  ;;  %6801 = vmatpush3.msra.mxu0 %v1012_v30  ;;  %v330_v30 = vld [vmem:[%s7982_s14 + $0x98] sm:$0xff] }
  0x29   : > { %664 = vperm.xlu1 %7762, %v292_v20   ;;  %539 = vperm.xlu0 %7761, %v267_v21   ;;  %v8058_v20 = vadd.f32 %v7998_v56, %v408_v16  ;;  %v354_v21 = vld [vmem:[%s7982_s14 + $0x158] sm:$0xff] }
  0x2a   : > { %7728 = vmatprep.subr.mxu1 %v1011_v33  ;;  %6802 = vmatprep.subr.mxu0 %v1011_v33  ;;  %v409_v23 = vmul.f32 %v7987_v51, %v354_v21 }
  0x2b   : > { %7744 = vmatpush3.msra.mxu1 %v1011_v33  ;;  %6803 = vmatpush3.msra.mxu0 %v1011_v33  ;;  %v306_v33 = vld [vmem:[%s10552_s1 + $0x158] sm:$0xff] }
  0x2c   : > { %7729 = vmatprep.subr.mxu1 %v1010_v36  ;;  %6804 = vmatprep.subr.mxu0 %v1010_v36 }
  0x2d   : > { %544 = vperm.xlu1 %7762, %v268_v24   ;;  %669 = vperm.xlu0 %7761, %v293_v25   ;;  %v384_v24 = vmul.f32 %v7987_v51, %v329_v22  ;;  %v280_v25 = vld [vmem:[%s10552_s1 + $0x88] sm:$0xff] }
  0x2e   : > { %7745 = vmatpush3.msra.mxu1 %v1010_v36  ;;  %6805 = vmatpush3.msra.mxu0 %v1010_v36 }
  0x2f   : > { %7730 = vmatprep.subr.mxu1 %v1009_v37  ;;  %6806 = vmatprep.subr.mxu0 %v1009_v37 }
  0x30   : > { %7746 = vmatpush3.msra.mxu1 %v1009_v37  ;;  %6807 = vmatpush3.msra.mxu0 %v1009_v37  ;;  %v357_v37 = vld [vmem:[%s7982_s14 + $0x170] sm:$0xff] }
  0x31   : > { %674 = vperm.xlu1 %7762, %v294_v27   ;;  %549 = vperm.xlu0 %7761, %v269_v28   ;;  %v8071_v27 = vadd.f32 %v7998_v56, %v409_v23  ;;  %v8074_v28 = vadd.f32 %v7998_v56, %v384_v24  ;;  %v445_v23 = vadd.f32 %v7998_v56, %v390_v6 }
  0x32   : > { %7731 = vmatprep.subr.mxu1 %v1008_v40  ;;  %6808 = vmatprep.subr.mxu0 %v1008_v40  ;;  %v444_v24 = vadd.f32 %v7998_v56, %v389_v7 }
  0x33   : > { %7747 = vmatpush3.msra.mxu1 %v1008_v40  ;;  %6809 = vmatpush3.msra.mxu0 %v1008_v40 }
  0x34   : > { %7732 = vmatprep.subr.mxu1 %v1007_v43  ;;  %6810 = vmatprep.subr.mxu0 %v1007_v43 }
  0x35   : > { %554 = vperm.xlu1 %7762, %v270_v31   ;;  %679 = vperm.xlu0 %7761, %v295_v32   ;;  %v413_v31 = vmul.f32 %v7987_v51, %v358_v29  ;;  %v385_v32 = vmul.f32 %v7987_v51, %v330_v30 }
  0x36   : > { %7748 = vmatpush3.msra.mxu1 %v1007_v43  ;;  %6811 = vmatpush3.msra.mxu0 %v1007_v43 }
  0x37   : > { %7733 = vmatprep.subr.mxu1 %v1006_v44  ;;  %6812 = vmatprep.subr.mxu0 %v1006_v44  ;;  %v8090_v36 = vadd.f32 %v7998_v56, %v385_v32  ;;  %v338_v32 = vld [vmem:[%s7982_s14 + $0xd8] sm:$0xff] }
  0x38   : > { %7749 = vmatpush3.msra.mxu1 %v1006_v44  ;;  %6813 = vmatpush3.msra.mxu0 %v1006_v44 }
  0x39   : > { %684 = vperm.xlu1 %7762, %v296_v34   ;;  %559 = vperm.xlu0 %7761, %v271_v35   ;;  %v281_v34 = vld [vmem:[%s10552_s1 + $0x90] sm:$0xff]  ;;  %v8087_v35 = vadd.f32 %v7998_v56, %v413_v31 }
  0x3a   : > { %6886 = vmatprep.subr.mxu1 %v7964_v47  ;;  %6990 = vmatprep.subr.mxu0 %v7969_v48 }
  0x3d   : > { %564 = vperm.xlu1 %7762, %v272_v38   ;;  %689 = vperm.xlu0 %7761, %v297_v39   ;;  %v356_v38 = vld [vmem:[%s7982_s14 + $0x168] sm:$0xff]  ;;  %v412_v39 = vmul.f32 %v7987_v51, %v357_v37 }
  0x3e   : > { %v411_v40 = vmul.f32 %v7987_v51, %v356_v38  ;;  %v10559_v38 = vmov 0.0  }
  0x3f   : > { %v8103_v43 = vadd.f32 %v7998_v56, %v412_v39  ;;  %v8158_v39 = vrot.slane %v10559_v38, 7 }
  0x40   : > { %v8106_v44 = vadd.f32 %v7998_v56, %v411_v40 }
  0x41   : > { %694 = vperm.xlu1 %7762, %v298_v41   ;;  %569 = vperm.xlu0 %7761, %v273_v42   ;;  %v310_v41 = vld [vmem:[%s10552_s1 + $0x178] sm:$0xff]  ;;  %10839 = vst [vmem:[#allocation4_spill] sm:$0xff] %v8103_v43  ;;  %10848 = vst [vmem:[#allocation13_spill] sm:$0xff] %v8158_v39 }
  0x42   : > { %v282_v42 = vld [vmem:[%s10552_s1 + $0x98] sm:$0xff]  ;;  %10840 = vst [vmem:[#allocation5_spill] sm:$0xff] %v8106_v44 }
  0x45   : > { %574 = vperm.xlu1 %7762, %v274_v45   ;;  %699 = vperm.xlu0 %7761, %v299_v46   ;;  %v309_v45 = vld [vmem:[%s10552_s1 + $0x170] sm:$0xff]  ;;  %v308_v46 = vld [vmem:[%s10552_s1 + $0x168] sm:$0xff] }
  0x49   : > { %704 = vperm.xlu1 %7762, %v300_v49   ;;  %579 = vperm.xlu0 %7761, %v275_v50   ;;  %v331_v49 = vld [vmem:[%s7982_s14 + $0xa0] sm:$0xff]  ;;  %v333_v50 = vld [vmem:[%s7982_s14 + $0xb0] sm:$0xff] }
  0x4a   : > { %v386_v54 = vmul.f32 %v7987_v51, %v331_v49  ;;  %v388_v55 = vmul.f32 %v7987_v51, %v333_v50  ;;  %v492_v49 = vmax.f32 %v444_v24, 0.0  ;;  %v313_v50 = vld [vmem:[%s7982_s14 + $0x10] sm:$0xff] }
  0x4c   : > { %v441_v63 = vadd.f32 %v7998_v56, %v386_v54 }
  0x4d   : > { %584 = vperm.xlu1 %7762, %v276_v57   ;;  %709 = vperm.xlu0 %7761, %v301_v58   ;;  %v410_v57 = vmul.f32 %v7987_v51, %v355_v52  ;;  %v387_v58 = vmul.f32 %v7987_v51, %v332_v53  ;;  %v393_v53 = vmul.f32 %v7987_v51, %v338_v32 }
  0x4e   : > { %v489_v13 = vmax.f32 %v441_v63, 0.0 }
  0x4f   : > { %v442_v5 = vadd.f32 %v7998_v56, %v387_v58 }
  0x51   : > { %714 = vperm.xlu1 %7762, %v302_v1   ;;  %589 = vperm.xlu0 %7761, %v277_v2   ;;  %v443_v1 = vadd.f32 %v7998_v56, %v388_v55  ;;  %v465_v2 = vadd.f32 %v7998_v56, %v410_v57  ;;  %v490_v22 = vmax.f32 %v442_v5, 0.0  ;;  %v314_v5 = vld [vmem:[%s7982_s14 + $0x18] sm:$0xff] }
  0x53   : > { %v491_v15 = vmax.f32 %v443_v1, 0.0  ;;  %v513_v21 = vmax.f32 %v465_v2, 0.0  ;;  %v368_v2 = vmul.f32 %v7987_v51, %v313_v50 }
  0x55   : > { %594 = vperm.xlu1 %7762, %v278_v9   ;;  %719 = vperm.xlu0 %7761, %v303_v10   ;;  %v955_v9 = vlaneseq  ;;  %v391_v10 = vmul.f32 %v7987_v51, %v336_v0 }
  0x57   : > { %v446_v29 = vadd.f32 %v7998_v56, %v391_v10  ;;  %v339_v10 = vld [vmem:[%s7982_s14 + $0xe0] sm:$0xff] }
  0x58   : > { %v394_v32 = vmul.f32 %v7987_v51, %v339_v10 }
  0x59   : > { %724 = vperm.xlu1 %7762, %v304_v17   ;;  %599 = vperm.xlu0 %7761, %v279_v18   ;;  %v366_v17 = vmul.f32 %v7987_v51, %v311_v8  ;;  %v312_v18 = vld [vmem:[%s7982_s14 + $0x8] sm:$0xff]  ;;  %v494_v52 = vmax.f32 %v446_v29, 0.0 }
  0x5a   : > { %v367_v31 = vmul.f32 %v7987_v51, %v312_v18 }
  0x5b   : > { %v421_v40 = vadd.f32 %v7998_v56, %v366_v17 }
  0x5c   : > { %v422_v58 = vadd.f32 %v7998_v56, %v367_v31  ;;  %v423_v31 = vadd.f32 %v7998_v56, %v368_v2 }
  0x5d   : > { %604 = vperm.xlu1 %7762, %v280_v25   ;;  %729 = vperm.xlu0 %7761, %v305_v26   ;;  %v337_v25 = vld [vmem:[%s7982_s14 + $0xd0] sm:$0xff]  ;;  %v8142_v26 = vshrl.u32 %v955_v9, 7  ;;  %v469_v0 = vmax.f32 %v421_v40, 0.0  ;;  %v340_v40 = vld [vmem:[%s7982_s14 + $0xe8] sm:$0xff] }
  0x5e   : > { %v471_v2 = vmax.f32 %v423_v31, 0.0 }
  0x5f   : > { %10843 = vst [vmem:[#allocation8_spill] sm:$0xff] %v8142_v26  ;;  %vm957_vm0 = vcmp.lt.s32.totalorder %v8142_v26, 1  ;;  %vm1889_vm1 = vcmp.lt.s32.totalorder %v8142_v26, 7 }
  0x61   : > { %734 = vperm.xlu1 %7762, %v306_v33   ;;  %609 = vperm.xlu0 %7761, %v281_v34  }
  0x65   : > { %754 = vperm.xlu1 %7762, %v310_v41   ;;  %614 = vperm.xlu0 %7761, %v282_v42   ;;  %v392_v41 = vmul.f32 %v7987_v51, %v337_v25  ;;  %v470_v25 = vmax.f32 %v422_v58, 0.0 }
  0x67   : > { %v447_v1 = vadd.f32 %v7998_v56, %v392_v41  ;;  %v6106_v41 = vld [vmem:[%s10555_s4 + $0x170] sm:$0xff] }
  0x69   : > { %749 = vperm.xlu1 %7762, %v309_v45   ;;  %744 = vperm.xlu0 %7761, %v308_v46   ;;  %v493_v46 = vmax.f32 %v445_v23, 0.0  ;;  %v495_v29 = vmax.f32 %v447_v1, 0.0 }
  0x88   : > { %v8133_v14 = vpop.permute.xlu1 %629  ;;  %v8135_v16 = vpop.permute.xlu0 %619 }
  0x89   : > { %10841 = vst [vmem:[#allocation6_spill] sm:$0xff] %v8133_v14  ;;  %10842 = vst [vmem:[#allocation7_spill] sm:$0xff] %v8135_v16  ;;  %v8146_v30 = vmul.f32 %v8135_v16, %v489_v13  ;;  %v8151_v33 = vmul.f32 %v8133_v14, %v491_v15  ;;  %v6090_v15 = vld [vmem:[%s10555_s4 + $0xf0] sm:$0xff] }
  0x8b   : > { %10844 = vst [vmem:[#allocation9_spill] sm:$0xff] %v8146_v30  ;;  %10845 = vst [vmem:[#allocation10_spill] sm:$0xff] %v8151_v33  ;;  %v10558_v55 = vrot.slane %v8146_v30, 7  ;;  %v932_v63 = vrot.slane %v8151_v33, 7 }
  0x8c   : > { %v8153_v34 = vpop.permute.xlu1 %739  ;;  %v8155_v37 = vpop.permute.xlu0 %624 }
  0x8d   : > { %10846 = vst [vmem:[#allocation11_spill] sm:$0xff] %v8153_v34  ;;  %10847 = vst [vmem:[#allocation12_spill] sm:$0xff] %v8155_v37  ;;  %v8163_v42 = vmul.f32 %v8153_v34, %v513_v21  ;;  %v8166_v45 = vmul.f32 %v8155_v37, %v490_v22  ;;  %v8215_v21 = vadd.f32 %v7998_v56, %v393_v53 }
  0x8e   : > { %v369_v22 = vmul.f32 %v7987_v51, %v314_v5 }
  0x8f   : > { %10849 = vst [vmem:[#allocation14_spill] sm:$0xff] %v8163_v42  ;;  %10850 = vst [vmem:[#allocation15_spill] sm:$0xff] %v8166_v45  ;;  %v8172_v54 = vrot.slane %v8163_v42, 7  ;;  %v931_v57 = vrot.slane %v8166_v45, 7 }
  0x90   : > { %v8177_v61 = vpop.permute.xlu1 %639  ;;  %v8179_v62 = vpop.permute.xlu0 %634  ;;  %v424_v5 = vadd.f32 %v7998_v56, %v369_v22 }
  0x91   : > { %10851 = vst [vmem:[#allocation16_spill] sm:$0xff] %v8172_v54  ;;  %10852 = vst [vmem:[#allocation17_spill] sm:$0xff] %v8177_v61  ;;  %v8186_v6 = vmul.f32 %v8177_v61, %v493_v46  ;;  %v8189_v7 = vmul.f32 %v8179_v62, %v492_v49  ;;  %v1005_v8 = vsel %vm957_vm0, %v8172_v54, %v8158_v39 }
  0x92   : > { %10853 = vst [vmem:[#allocation18_spill] sm:$0xff] %v8179_v62  ;;  %v8199_v9 = vsel %vm957_vm0, %v10558_v55, %v931_v57  ;;  %6814 = vmatprep.mubr.f32.mxu0 %v1005_v8  ;;  %v8205_v13 = vsel %vm957_vm0, %v931_v57, %v932_v63  ;;  %v315_v57 = vld [vmem:[%s7982_s14 + $0x20] sm:$0xff]  ;;  %v449_v8 = vadd.f32 %v7998_v56, %v394_v32  ;;  %v472_v34 = vmax.f32 %v424_v5, 0.0 }
  0x93   : > { %10854 = vst [vmem:[#allocation19_spill] sm:$0xff] %v8186_v6  ;;  %10855 = vst [vmem:[#allocation20_spill] sm:$0xff] %v8189_v7  ;;  %6850 = vmatprep.mubr.f32.mxu1 %v8199_v9  ;;  %6815 = vmatmul.mubr.f32.vlgmr.msra.gmra.mxu0 %v8158_v39  ;;  %v933_v17 = vrot.slane %v8189_v7, 7  ;;  %v934_v18 = vrot.slane %v8186_v6, 7  ;;  %v370_v10 = vmul.f32 %v7987_v51, %v315_v57 }
  0x94   : > { %10856 = vst [vmem:[#allocation21_spill] sm:$0xff] %v8199_v9  ;;  %10857 = vst [vmem:[#allocation22_spill] sm:$0xff] %v8205_v13  ;;  %6851 = vmatmul.mubr.f32.vlgmr.msra.gmra.mxu1 %v8205_v13  ;;  %v8218_v23 = vpop.permute.xlu1 %644  ;;  %v8220_v24 = vpop.permute.xlu0 %519  ;;  %6817 = vmatprep.mubr.f32.mxu0 %v8158_v39 }
  0x95   : > { %10858 = vst [vmem:[#allocation23_spill] sm:$0xff] %v8218_v23  ;;  %10859 = vst [vmem:[#allocation24_spill] sm:$0xff] %v8220_v24  ;;  %6887 = vmatpush3.msra.mxu1 %v7964_v47  ;;  %v8231_v46 = vmul.f32 %v8218_v23, %v494_v52  ;;  %v8234_v49 = vmul.f32 %v8220_v24, %v469_v0  ;;  %v8238_v50 = vsel %vm957_vm0, %v932_v63, %v933_v17  ;;  %v6089_v47 = vld [vmem:[%s10555_s4 + $0xe8] sm:$0xff]  ;;  %v342_v23 = vld [vmem:[%s7982_s14 + $0xf8] sm:$0xff] }
  0x96   : > { %10861 = vst [vmem:[#allocation26_spill] sm:$0xff] %v8238_v50  ;;  %v8242_v53 = vsel %vm957_vm0, %v933_v17, %v934_v18  ;;  %6888 = vmatprep.subr.mxu1 %v6090_v15  ;;  %6853 = vmatprep.mubr.f32.mxu1 %v8238_v50  ;;  %v496_v63 = vmax.f32 %v8215_v21, 0.0  ;;  %v395_v0 = vmul.f32 %v7987_v51, %v340_v40  ;;  %v316_v17 = vld [vmem:[%s7982_s14 + $0x28] sm:$0xff]  ;;  %v318_v24 = vld [vmem:[%s7982_s14 + $0x38] sm:$0xff] }
  0x97   : > { %10860 = vst [vmem:[#allocation25_spill] sm:$0xff] %v8231_v46  ;;  %10862 = vst [vmem:[#allocation27_spill] sm:$0xff] %v8242_v53  ;;  %6991 = vmatpush3.msra.mxu0 %v7969_v48  ;;  %v8252_v52 = vrot.slane %v8234_v49, 7  ;;  %v935_v58 = vrot.slane %v8231_v46, 7  ;;  %6889 = vmatpush3.msra.mxu1 %v6090_v15  ;;  %v6105_v21 = vld [vmem:[%s10555_s4 + $0x168] sm:$0xff]  ;;  %v341_v15 = vld [vmem:[%s7982_s14 + $0xf0] sm:$0xff] }
  0x98   : > { %6854 = vmatmul.mubr.f32.gmra.mxu1 %v8242_v53  ;;  %6992 = vmatprep.subr.mxu0 %v6106_v41  ;;  %v8257_v1 = vpop.permute.xlu1 %524  ;;  %v8259_v48 = vpop.permute.xlu0 %649  ;;  %v396_v61 = vmul.f32 %v7987_v51, %v341_v15  ;;  %v320_v53 = vld [vmem:[%s7982_s14 + $0x48] sm:$0xff] }
  0x99   : > { %10863 = vst [vmem:[#allocation28_spill] sm:$0xff] %v8252_v52  ;;  %10864 = vst [vmem:[#allocation29_spill] sm:$0xff] %v8257_v1  ;;  %6993 = vmatpush3.msra.mxu0 %v6106_v41  ;;  %v8269_v40 = vmul.f32 %v8257_v1, %v470_v25  ;;  %v8272_v55 = vmul.f32 %v8259_v48, %v495_v29  ;;  %v1002_v22 = vsel %vm957_vm0, %v8158_v39, %v8252_v52  ;;  %v6088_v25 = vld [vmem:[%s10555_s4 + $0xe0] sm:$0xff] }
  0x9a   : > { %10865 = vst [vmem:[#allocation30_spill] sm:$0xff] %v8259_v48  ;;  %v8280_v31 = vsel %vm957_vm0, %v934_v18, %v935_v58  ;;  %6890 = vmatprep.subr.mxu1 %v6089_v47  ;;  %6818 = vmatmul.mubr.f32.gmra.mxu0 %v1002_v22  ;;  %v8290_v41 = vadd.f32 %v7998_v56, %v395_v0  ;;  %v497_v22 = vmax.f32 %v449_v8, 0.0  ;;  %v6104_v0 = vld [vmem:[%s10555_s4 + $0x160] sm:$0xff] }
  0x9b   : > { %10866 = vst [vmem:[#allocation31_spill] sm:$0xff] %v8272_v55  ;;  %10867 = vst [vmem:[#allocation32_spill] sm:$0xff] %v8280_v31  ;;  %6856 = vmatprep.mubr.f32.mxu1 %v8280_v31  ;;  %v911_v29 = vrot.slane %v8269_v40, 7  ;;  %v936_v32 = vrot.slane %v8272_v55, 7  ;;  %v371_v18 = vmul.f32 %v7987_v51, %v316_v17  ;;  %6891 = vmatpush3.msra.mxu1 %v6089_v47  ;;  %v6087_v47 = vld [vmem:[%s10555_s4 + $0xd8] sm:$0xff] }
  0x9c   : > { %6994 = vmatprep.subr.mxu0 %v6105_v21  ;;  %v8293_v57 = vpop.permute.xlu1 %654  ;;  %v8295_v38 = vpop.permute.xlu0 %529  ;;  %v425_v48 = vadd.f32 %v7998_v56, %v370_v10  ;;  %6892 = vmatprep.subr.mxu1 %v6088_v25  ;;  %v451_v37 = vadd.f32 %v7998_v56, %v396_v61 }
  0x9d   : > { %10868 = vst [vmem:[#allocation33_spill] sm:$0xff] %v8293_v57  ;;  %10869 = vst [vmem:[#allocation34_spill] sm:$0xff] %v8295_v38  ;;  %6995 = vmatpush3.msra.mxu0 %v6105_v21  ;;  %v8307_v17 = vmul.f32 %v8293_v57, %v496_v63  ;;  %v8310_v5 = vmul.f32 %v8295_v38, %v471_v2  ;;  %v8315_v8 = vsel %vm957_vm0, %v8252_v52, %v911_v29  ;;  %v317_v21 = vld [vmem:[%s7982_s14 + $0x30] sm:$0xff]  ;;  %v6103_v63 = vld [vmem:[%s10555_s4 + $0x158] sm:$0xff] }
  0x9e   : > { %10871 = vst [vmem:[#allocation36_spill] sm:$0xff] %v8315_v8  ;;  %v8319_v10 = vsel %vm957_vm0, %v935_v58, %v936_v32  ;;  %6893 = vmatpush3.msra.mxu1 %v6088_v25  ;;  %6820 = vmatprep.mubr.f32.mxu0 %v8315_v8  ;;  %v498_v57 = vmax.f32 %v8290_v41, 0.0  ;;  %v397_v58 = vmul.f32 %v7987_v51, %v342_v23  ;;  %v473_v62 = vmax.f32 %v425_v48, 0.0  ;;  %v6086_v23 = vld [vmem:[%s10555_s4 + $0xd0] sm:$0xff]  ;;  %v348_v8 = vld [vmem:[%s7982_s14 + $0x128] sm:$0xff] }
  0x9f   : > { %10870 = vst [vmem:[#allocation35_spill] sm:$0xff] %v8307_v17  ;;  %10872 = vst [vmem:[#allocation37_spill] sm:$0xff] %v8319_v10  ;;  %6857 = vmatmul.mubr.f32.gmra.mxu1 %v8319_v10  ;;  %v912_v2 = vrot.slane %v8310_v5, 7  ;;  %v937_v15 = vrot.slane %v8307_v17, 7  ;;  %6996 = vmatprep.subr.mxu0 %v6104_v0  ;;  %v426_v16 = vadd.f32 %v7998_v56, %v371_v18  ;;  %v343_v18 = vld [vmem:[%s7982_s14 + $0x100] sm:$0xff]  ;;  %v499_v39 = vmax.f32 %v451_v37, 0.0 }
  0xa0   : > { %6894 = vmatprep.subr.mxu1 %v6087_v47  ;;  %v8331_v25 = vpop.permute.xlu1 %534  ;;  %v8333_v14 = vpop.permute.xlu0 %659  ;;  %v372_v38 = vmul.f32 %v7987_v51, %v317_v21  ;;  %6997 = vmatpush3.msra.mxu0 %v6104_v0  ;;  %v6102_v0 = vld [vmem:[%s10555_s4 + $0x150] sm:$0xff]  ;;  %v398_v44 = vmul.f32 %v7987_v51, %v343_v18  ;;  %v319_v37 = vld [vmem:[%s7982_s14 + $0x40] sm:$0xff] }
  0xa1   : > { %10873 = vst [vmem:[#allocation38_spill] sm:$0xff] %v8331_v25  ;;  %10874 = vst [vmem:[#allocation39_spill] sm:$0xff] %v8333_v14  ;;  %6895 = vmatpush3.msra.mxu1 %v6087_v47  ;;  %v8343_v41 = vmul.f32 %v8331_v25, %v472_v34  ;;  %v8346_v1 = vmul.f32 %v8333_v14, %v497_v22  ;;  %v8350_v48 = vsel %vm957_vm0, %v911_v29, %v912_v2  ;;  %v6085_v34 = vld [vmem:[%s10555_s4 + $0xc8] sm:$0xff] }
  0xa2   : > { %10877 = vst [vmem:[#allocation42_spill] sm:$0xff] %v8350_v48  ;;  %v8354_v61 = vsel %vm957_vm0, %v936_v32, %v937_v15  ;;  %6998 = vmatprep.subr.mxu0 %v6103_v63  ;;  %6821 = vmatmul.mubr.f32.gmra.mxu0 %v8350_v48  ;;  %v8370_v22 = vadd.f32 %v7998_v56, %v397_v58  ;;  %v474_v25 = vmax.f32 %v426_v16, 0.0 }
  0xa3   : > { %10875 = vst [vmem:[#allocation40_spill] sm:$0xff] %v8343_v41  ;;  %10876 = vst [vmem:[#allocation41_spill] sm:$0xff] %v8346_v1  ;;  %6859 = vmatprep.mubr.f32.mxu1 %v8354_v61  ;;  %v8366_v29 = vrot.slane %v8343_v41, 7  ;;  %v938_v32 = vrot.slane %v8346_v1, 7  ;;  %v373_v47 = vmul.f32 %v7987_v51, %v318_v24  ;;  %6896 = vmatprep.subr.mxu1 %v6086_v23 }
  0xa4   : > { %10878 = vst [vmem:[#allocation43_spill] sm:$0xff] %v8354_v61  ;;  %6999 = vmatpush3.msra.mxu0 %v6103_v63  ;;  %v8373_v21 = vpop.permute.xlu1 %664  ;;  %v8375_v14 = vpop.permute.xlu0 %539  ;;  %v427_v43 = vadd.f32 %v7998_v56, %v372_v38  ;;  %v344_v61 = vld [vmem:[%s7982_s14 + $0x108] sm:$0xff]  ;;  %6897 = vmatpush3.msra.mxu1 %v6086_v23  ;;  %v374_v31 = vmul.f32 %v7987_v51, %v319_v37 }
  0xa5   : > { %10879 = vst [vmem:[#allocation44_spill] sm:$0xff] %v8366_v29  ;;  %10880 = vst [vmem:[#allocation45_spill] sm:$0xff] %v8373_v21  ;;  %7000 = vmatprep.subr.mxu0 %v6102_v0  ;;  %v8381_v58 = vmul.f32 %v8373_v21, %v498_v57  ;;  %v8384_v24 = vmul.f32 %v8375_v14, %v473_v62  ;;  %v8389_v63 = vsel %vm957_vm0, %v912_v2, %v8366_v29  ;;  %v6101_v38 = vld [vmem:[%s10555_s4 + $0x148] sm:$0xff]  ;;  %v6084_v62 = vld [vmem:[%s10555_s4 + $0xc0] sm:$0xff] }
  0xa6   : > { %10881 = vst [vmem:[#allocation46_spill] sm:$0xff] %v8375_v14  ;;  %10884 = vst [vmem:[#allocation49_spill] sm:$0xff] %v8389_v63  ;;  %v8393_v16 = vsel %vm957_vm0, %v937_v15, %v938_v32  ;;  %6898 = vmatprep.subr.mxu1 %v6085_v34  ;;  %6823 = vmatprep.mubr.f32.mxu0 %v8389_v63  ;;  %v500_v15 = vmax.f32 %v8370_v22, 0.0  ;;  %v399_v23 = vmul.f32 %v7987_v51, %v344_v61  ;;  %v6100_v61 = vld [vmem:[%s10555_s4 + $0x140] sm:$0xff]  ;;  %v345_v22 = vld [vmem:[%s7982_s14 + $0x110] sm:$0xff] }
  0xa7   : > { %10882 = vst [vmem:[#allocation47_spill] sm:$0xff] %v8381_v58  ;;  %10883 = vst [vmem:[#allocation48_spill] sm:$0xff] %v8384_v24  ;;  %6860 = vmatmul.mubr.f32.gmra.mxu1 %v8393_v16  ;;  %v914_v57 = vrot.slane %v8384_v24, 7  ;;  %v939_v2 = vrot.slane %v8381_v58, 7  ;;  %7001 = vmatpush3.msra.mxu0 %v6102_v0  ;;  %v475_v14 = vmax.f32 %v427_v43, 0.0  ;;  %v428_v10 = vadd.f32 %v7998_v56, %v373_v47  ;;  %v6083_v47 = vld [vmem:[%s10555_s4 + $0xb8] sm:$0xff] }
  0xa8   : > { %10885 = vst [vmem:[#allocation50_spill] sm:$0xff] %v8393_v16  ;;  %6899 = vmatpush3.msra.mxu1 %v6085_v34  ;;  %v8408_v18 = vpop.permute.xlu1 %544  ;;  %v8410_v21 = vpop.permute.xlu0 %669  ;;  %v453_v16 = vadd.f32 %v7998_v56, %v398_v44  ;;  %7002 = vmatprep.subr.mxu0 %v6101_v38  ;;  %v8443_v37 = vadd.f32 %v7998_v56, %v399_v23 }
  0xa9   : > { %10886 = vst [vmem:[#allocation51_spill] sm:$0xff] %v8408_v18  ;;  %10887 = vst [vmem:[#allocation52_spill] sm:$0xff] %v8410_v21  ;;  %6900 = vmatprep.subr.mxu1 %v6084_v62  ;;  %v8420_v0 = vmul.f32 %v8408_v18, %v474_v25  ;;  %v8423_v34 = vmul.f32 %v8410_v21, %v499_v39  ;;  %v8428_v43 = vsel %vm957_vm0, %v8366_v29, %v914_v57 }
  0xaa   : > { %10890 = vst [vmem:[#allocation55_spill] sm:$0xff] %v8428_v43  ;;  %v8432_v44 = vsel %vm957_vm0, %v938_v32, %v939_v2  ;;  %7003 = vmatpush3.msra.mxu0 %v6101_v38  ;;  %v375_v32 = vmul.f32 %v7987_v51, %v320_v53  ;;  %6901 = vmatpush3.msra.mxu1 %v6084_v62  ;;  %v476_v18 = vmax.f32 %v428_v10, 0.0  ;;  %v501_v29 = vmax.f32 %v453_v16, 0.0  ;;  %v6099_v53 = vld [vmem:[%s10555_s4 + $0x138] sm:$0xff]  ;;  %v6082_v62 = vld [vmem:[%s10555_s4 + $0xb0] sm:$0xff] }
  0xab   : > { %10888 = vst [vmem:[#allocation53_spill] sm:$0xff] %v8420_v0  ;;  %10889 = vst [vmem:[#allocation54_spill] sm:$0xff] %v8423_v34  ;;  %6824 = vmatmul.mubr.f32.gmra.mxu0 %v8428_v43  ;;  %6862 = vmatprep.mubr.f32.mxu1 %v8432_v44  ;;  %v915_v39 = vrot.slane %v8420_v0, 7  ;;  %v940_v25 = vrot.slane %v8423_v34, 7  ;;  %v400_v50 = vmul.f32 %v7987_v51, %v345_v22  ;;  %v321_v22 = vld [vmem:[%s7982_s14 + $0x50] sm:$0xff]  ;;  %v322_v43 = vld [vmem:[%s7982_s14 + $0x58] sm:$0xff] }
  0xac   : > { %10891 = vst [vmem:[#allocation56_spill] sm:$0xff] %v8432_v44  ;;  %7004 = vmatprep.subr.mxu0 %v6100_v61  ;;  %v8446_v38 = vpop.permute.xlu1 %674  ;;  %v8448_v21 = vpop.permute.xlu0 %549  ;;  %v429_v44 = vadd.f32 %v7998_v56, %v374_v31  ;;  %6902 = vmatprep.subr.mxu1 %v6083_v47 }
  0xad   : > { %10892 = vst [vmem:[#allocation57_spill] sm:$0xff] %v8446_v38  ;;  %10893 = vst [vmem:[#allocation58_spill] sm:$0xff] %v8448_v21  ;;  %7005 = vmatpush3.msra.mxu0 %v6100_v61  ;;  %v8459_v23 = vmul.f32 %v8446_v38, %v500_v15  ;;  %v8462_v10 = vmul.f32 %v8448_v21, %v475_v14  ;;  %v8466_v31 = vsel %vm957_vm0, %v914_v57, %v915_v39  ;;  %v346_v61 = vld [vmem:[%s7982_s14 + $0x118] sm:$0xff]  ;;  %v6098_v14 = vld [vmem:[%s10555_s4 + $0x130] sm:$0xff] }
  0xae   : > { %10896 = vst [vmem:[#allocation61_spill] sm:$0xff] %v8466_v31  ;;  %v8470_v16 = vsel %vm957_vm0, %v939_v2, %v940_v25  ;;  %6903 = vmatpush3.msra.mxu1 %v6083_v47  ;;  %6826 = vmatprep.mubr.f32.mxu0 %v8466_v31  ;;  %v502_v38 = vmax.f32 %v8443_v37, 0.0  ;;  %v8483_v2 = vadd.f32 %v7998_v56, %v375_v32  ;;  %v6081_v37 = vld [vmem:[%s10555_s4 + $0xa8] sm:$0xff] }
  0xaf   : > { %10894 = vst [vmem:[#allocation59_spill] sm:$0xff] %v8459_v23  ;;  %10895 = vst [vmem:[#allocation60_spill] sm:$0xff] %v8462_v10  ;;  %6863 = vmatmul.mubr.f32.gmra.mxu1 %v8470_v16  ;;  %v916_v15 = vrot.slane %v8462_v10, 7  ;;  %v941_v57 = vrot.slane %v8459_v23, 7  ;;  %7006 = vmatprep.subr.mxu0 %v6099_v53  ;;  %v455_v13 = vadd.f32 %v7998_v56, %v400_v50 }
  0xb0   : > { %10897 = vst [vmem:[#allocation62_spill] sm:$0xff] %v8470_v16  ;;  %6904 = vmatprep.subr.mxu1 %v6082_v62  ;;  %v8485_v47 = vpop.permute.xlu1 %554  ;;  %v8487_v21 = vpop.permute.xlu0 %679  ;;  %v477_v16 = vmax.f32 %v429_v44, 0.0  ;;  %v401_v9 = vmul.f32 %v7987_v51, %v346_v61  ;;  %v376_v31 = vmul.f32 %v7987_v51, %v321_v22  ;;  %7007 = vmatpush3.msra.mxu0 %v6099_v53  ;;  %v347_v53 = vld [vmem:[%s7982_s14 + $0x120] sm:$0xff] }
  0xb1   : > { %10898 = vst [vmem:[#allocation63_spill] sm:$0xff] %v8485_v47  ;;  %10899 = vst [vmem:[#allocation64_spill] sm:$0xff] %v8487_v21  ;;  %6905 = vmatpush3.msra.mxu1 %v6082_v62  ;;  %v8497_v32 = vmul.f32 %v8485_v47, %v476_v18  ;;  %v8500_v63 = vmul.f32 %v8487_v21, %v501_v29  ;;  %v8504_v50 = vsel %vm957_vm0, %v915_v39, %v916_v15  ;;  %v6097_v62 = vld [vmem:[%s10555_s4 + $0x128] sm:$0xff]  ;;  %v6080_v29 = vld [vmem:[%s10555_s4 + $0xa0] sm:$0xff] }
  0xb2   : > { %10902 = vst [vmem:[#allocation67_spill] sm:$0xff] %v8504_v50  ;;  %v8508_v44 = vsel %vm957_vm0, %v940_v25, %v941_v57  ;;  %7008 = vmatprep.subr.mxu0 %v6098_v14  ;;  %6827 = vmatmul.mubr.f32.gmra.mxu0 %v8504_v50  ;;  %v478_v25 = vmax.f32 %v8483_v2, 0.0  ;;  %v377_v61 = vmul.f32 %v7987_v51, %v322_v43  ;;  %v503_v47 = vmax.f32 %v455_v13, 0.0  ;;  %v323_v13 = vld [vmem:[%s7982_s14 + $0x60] sm:$0xff] }
  0xb3   : > { %10900 = vst [vmem:[#allocation65_spill] sm:$0xff] %v8497_v32  ;;  %10901 = vst [vmem:[#allocation66_spill] sm:$0xff] %v8500_v63  ;;  %6865 = vmatprep.mubr.f32.mxu1 %v8508_v44  ;;  %v917_v18 = vrot.slane %v8497_v32, 7  ;;  %v942_v39 = vrot.slane %v8500_v63, 7  ;;  %6906 = vmatprep.subr.mxu1 %v6081_v37  ;;  %v431_v50 = vadd.f32 %v7998_v56, %v376_v31  ;;  %v6096_v31 = vld [vmem:[%s10555_s4 + $0x120] sm:$0xff] }
  0xb4   : > { %10903 = vst [vmem:[#allocation68_spill] sm:$0xff] %v8508_v44  ;;  %7009 = vmatpush3.msra.mxu0 %v6098_v14  ;;  %v8523_v22 = vpop.permute.xlu1 %684  ;;  %v8525_v21 = vpop.permute.xlu0 %559  ;;  %v456_v44 = vadd.f32 %v7998_v56, %v401_v9  ;;  %v402_v48 = vmul.f32 %v7987_v51, %v347_v53  ;;  %6907 = vmatpush3.msra.mxu1 %v6081_v37 }
  0xb5   : > { %10904 = vst [vmem:[#allocation69_spill] sm:$0xff] %v8523_v22  ;;  %10905 = vst [vmem:[#allocation70_spill] sm:$0xff] %v8525_v21  ;;  %7010 = vmatprep.subr.mxu0 %v6097_v62  ;;  %v8532_v2 = vmul.f32 %v8523_v22, %v502_v38  ;;  %v8535_v43 = vmul.f32 %v8525_v21, %v477_v16  ;;  %v8539_v14 = vsel %vm957_vm0, %v916_v15, %v917_v18  ;;  %v6079_v38 = vld [vmem:[%s10555_s4 + $0x98] sm:$0xff] }
  0xb6   : > { %10908 = vst [vmem:[#allocation73_spill] sm:$0xff] %v8539_v14  ;;  %v8543_v9 = vsel %vm957_vm0, %v941_v57, %v942_v39  ;;  %6908 = vmatprep.subr.mxu1 %v6080_v29  ;;  %6829 = vmatprep.mubr.f32.mxu0 %v8539_v14  ;;  %v432_v57 = vadd.f32 %v7998_v56, %v377_v61  ;;  %v504_v21 = vmax.f32 %v456_v44, 0.0  ;;  %v479_v14 = vmax.f32 %v431_v50, 0.0  ;;  %v324_v50 = vld [vmem:[%s7982_s14 + $0x68] sm:$0xff]  ;;  %v349_v61 = vld [vmem:[%s7982_s14 + $0x130] sm:$0xff] }
  0xb7   : > { %10906 = vst [vmem:[#allocation71_spill] sm:$0xff] %v8532_v2  ;;  %10907 = vst [vmem:[#allocation72_spill] sm:$0xff] %v8535_v43  ;;  %6866 = vmatmul.mubr.f32.gmra.mxu1 %v8543_v9  ;;  %v918_v16 = vrot.slane %v8535_v43, 7  ;;  %v943_v15 = vrot.slane %v8532_v2, 7  ;;  %v403_v37 = vmul.f32 %v7987_v51, %v348_v8  ;;  %7011 = vmatpush3.msra.mxu0 %v6097_v62  ;;  %v6095_v8 = vld [vmem:[%s10555_s4 + $0x118] sm:$0xff] }
  0xb8   : > { %10909 = vst [vmem:[#allocation74_spill] sm:$0xff] %v8543_v9  ;;  %6909 = vmatpush3.msra.mxu1 %v6080_v29  ;;  %v8558_v53 = vpop.permute.xlu1 %564  ;;  %v8560_v22 = vpop.permute.xlu0 %689  ;;  %v457_v9 = vadd.f32 %v7998_v56, %v402_v48  ;;  %v378_v52 = vmul.f32 %v7987_v51, %v323_v13  ;;  %7012 = vmatprep.subr.mxu0 %v6096_v31  ;;  %v6078_v13 = vld [vmem:[%s10555_s4 + $0x90] sm:$0xff] }
  0xb9   : > { %10910 = vst [vmem:[#allocation75_spill] sm:$0xff] %v8558_v53  ;;  %10911 = vst [vmem:[#allocation76_spill] sm:$0xff] %v8560_v22  ;;  %6910 = vmatprep.subr.mxu1 %v6079_v38  ;;  %v8568_v62 = vmul.f32 %v8558_v53, %v478_v25  ;;  %v8571_v29 = vmul.f32 %v8560_v22, %v503_v47  ;;  %v8575_v44 = vsel %vm957_vm0, %v917_v18, %v918_v16 }
  0xba   : > { %10914 = vst [vmem:[#allocation79_spill] sm:$0xff] %v8575_v44  ;;  %v8579_v48 = vsel %vm957_vm0, %v942_v39, %v943_v15  ;;  %7013 = vmatpush3.msra.mxu0 %v6096_v31  ;;  %v480_v25 = vmax.f32 %v432_v57, 0.0  ;;  %v458_v22 = vadd.f32 %v7998_v56, %v403_v37  ;;  %6911 = vmatpush3.msra.mxu1 %v6079_v38  ;;  %v505_v53 = vmax.f32 %v457_v9, 0.0  ;;  %v6094_v57 = vld [vmem:[%s10555_s4 + $0x110] sm:$0xff]  ;;  %v6077_v38 = vld [vmem:[%s10555_s4 + $0x88] sm:$0xff] }
  0xbb   : > { %10912 = vst [vmem:[#allocation77_spill] sm:$0xff] %v8568_v62  ;;  %10913 = vst [vmem:[#allocation78_spill] sm:$0xff] %v8571_v29  ;;  %6830 = vmatmul.mubr.f32.gmra.mxu0 %v8575_v44  ;;  %6868 = vmatprep.mubr.f32.mxu1 %v8579_v48  ;;  %v919_v47 = vrot.slane %v8568_v62, 7  ;;  %v944_v18 = vrot.slane %v8571_v29, 7  ;;  %v433_v42 = vadd.f32 %v7998_v56, %v378_v52 }
  0xbc   : > { %10915 = vst [vmem:[#allocation80_spill] sm:$0xff] %v8579_v48  ;;  %7014 = vmatprep.subr.mxu0 %v6095_v8  ;;  %v8591_v39 = vpop.permute.xlu1 %694  ;;  %v8593_v31 = vpop.permute.xlu0 %569  ;;  %v379_v44 = vmul.f32 %v7987_v51, %v324_v50  ;;  %v404_v48 = vmul.f32 %v7987_v51, %v349_v61  ;;  %6912 = vmatprep.subr.mxu1 %v6078_v13 }
  0xbd   : > { %10916 = vst [vmem:[#allocation81_spill] sm:$0xff] %v8591_v39  ;;  %10917 = vst [vmem:[#allocation82_spill] sm:$0xff] %v8593_v31  ;;  %7015 = vmatpush3.msra.mxu0 %v6095_v8  ;;  %v8605_v37 = vmul.f32 %v8591_v39, %v504_v21  ;;  %v8608_v9 = vmul.f32 %v8593_v31, %v479_v14  ;;  %v8612_v52 = vsel %vm957_vm0, %v918_v16, %v919_v47  ;;  %v6093_v21 = vld [vmem:[%s10555_s4 + $0x108] sm:$0xff]  ;;  %v6076_v31 = vld [vmem:[%s10555_s4 + $0x80] sm:$0xff] }
  0xbe   : > { %10920 = vst [vmem:[#allocation85_spill] sm:$0xff] %v8612_v52  ;;  %v8616_v51 = vsel %vm957_vm0, %v943_v15, %v944_v18  ;;  %6913 = vmatpush3.msra.mxu1 %v6078_v13  ;;  %6832 = vmatprep.mubr.f32.mxu0 %v8612_v52  ;;  %v506_v15 = vmax.f32 %v458_v22, 0.0  ;;  %v481_v61 = vmax.f32 %v433_v42, 0.0  ;;  %v434_v13 = vadd.f32 %v7998_v56, %v379_v44 }
  0xbf   : > { %10918 = vst [vmem:[#allocation83_spill] sm:$0xff] %v8605_v37  ;;  %10919 = vst [vmem:[#allocation84_spill] sm:$0xff] %v8608_v9  ;;  %6869 = vmatmul.mubr.f32.gmra.mxu1 %v8616_v51  ;;  %v920_v14 = vrot.slane %v8608_v9, 7  ;;  %v945_v8 = vrot.slane %v8605_v37, 7  ;;  %7016 = vmatprep.subr.mxu0 %v6094_v57  ;;  %v459_v39 = vadd.f32 %v7998_v56, %v404_v48  ;;  %v6092_v56 = vld [vmem:[%s10555_s4 + $0x100] sm:$0xff] }
  0xc0   : > { %10921 = vst [vmem:[#allocation86_spill] sm:$0xff] %v8616_v51  ;;  %6914 = vmatprep.subr.mxu1 %v6077_v38  ;;  %v8625_v16 = vpop.permute.xlu1 %574  ;;  %v8627_v50 = vpop.permute.xlu0 %699  ;;  %7017 = vmatpush3.msra.mxu0 %v6094_v57  ;;  %v8662_v57 = vld [vmem:[%s10555_s4 + $0x1f8] sm:$0xff] }
  0xc1   : > { %10922 = vst [vmem:[#allocation87_spill] sm:$0xff] %v8625_v16  ;;  %10923 = vst [vmem:[#allocation88_spill] sm:$0xff] %v8627_v50  ;;  %6915 = vmatpush3.msra.mxu1 %v6077_v38  ;;  %v8635_v51 = vmul.f32 %v8625_v16, %v480_v25  ;;  %v8638_v52 = vmul.f32 %v8627_v50, %v505_v53  ;;  %v8642_v22 = vsel %vm957_vm0, %v919_v47, %v920_v14  ;;  %v8667_v38 = vld [vmem:[%s10555_s4 + $0x278] sm:$0xff] }
  0xc2   : > { %v8646_v42 = vsel %vm957_vm0, %v944_v18, %v945_v8  ;;  %7018 = vmatprep.subr.mxu0 %v6093_v21  ;;  %6833 = vmatmul.mubr.f32.gmra.mxu0 %v8642_v22  ;;  %v482_v18 = vmax.f32 %v434_v13, 0.0  ;;  %v507_v25 = vmax.f32 %v459_v39, 0.0 }
  0xc3   : > { %10924 = vst [vmem:[#allocation89_spill] sm:$0xff] %v8635_v51  ;;  %10925 = vst [vmem:[#allocation90_spill] sm:$0xff] %v8638_v52  ;;  %6871 = vmatprep.mubr.f32.mxu1 %v8646_v42  ;;  %v921_v53 = vrot.slane %v8635_v51, 7  ;;  %v946_v44 = vrot.slane %v8638_v52, 7  ;;  %6916 = vmatprep.subr.mxu1 %v6076_v31 }
  0xc4   : > { %10926 = vst [vmem:[#allocation91_spill] sm:$0xff] %v8646_v42  ;;  %7019 = vmatpush3.msra.mxu0 %v6093_v21  ;;  %v8655_v48 = vpop.permute.xlu1 %704  ;;  %v8657_v47 = vpop.permute.xlu0 %579  ;;  %6917 = vmatpush3.msra.mxu1 %v6076_v31 }
  0xc5   : > { %10927 = vst [vmem:[#allocation92_spill] sm:$0xff] %v8655_v48  ;;  %10928 = vst [vmem:[#allocation93_spill] sm:$0xff] %v8657_v47  ;;  %7020 = vmatprep.subr.mxu0 %v6092_v56  ;;  %v8670_v21 = vmul.f32 %v8655_v48, %v506_v15  ;;  %v8673_v50 = vmul.f32 %v8657_v47, %v481_v61  ;;  %v8677_v39 = vsel %vm957_vm0, %v920_v14, %v921_v53 }
  0xc6   : > { %v8681_v31 = vsel %vm957_vm0, %v945_v8, %v946_v44  ;;  %7021 = vmatpush3.msra.mxu0 %v6092_v56  ;;  %6835 = vmatprep.mubr.f32.mxu0 %v8677_v39  ;;  %v508_v8 = vmax.f32 %v8007_v59, 0.0  ;;  %v483_v56 = vmax.f32 %v8010_v60, 0.0 }
  0xc7   : > { %10929 = vst [vmem:[#allocation94_spill] sm:$0xff] %v8670_v21  ;;  %10930 = vst [vmem:[#allocation95_spill] sm:$0xff] %v8673_v50  ;;  %6872 = vmatmul.mubr.f32.gmra.mxu1 %v8681_v31  ;;  %v922_v13 = vrot.slane %v8673_v50, 7  ;;  %v947_v15 = vrot.slane %v8670_v21, 7  ;;  %7094 = vmatprep.subr.mxu1 %v8662_v57 }
  0xc8   : > { %10931 = vst [vmem:[#allocation96_spill] sm:$0xff] %v8681_v31  ;;  %7198 = vmatprep.subr.mxu0 %v8667_v38  ;;  %v8689_v61 = vpop.permute.xlu1 %584  ;;  %v8691_v14 = vpop.permute.xlu0 %709 }
  0xc9   : > { %10932 = vst [vmem:[#allocation97_spill] sm:$0xff] %v8689_v61  ;;  %10933 = vst [vmem:[#allocation98_spill] sm:$0xff] %v8691_v14  ;;  %v8696_v48 = vmul.f32 %v8689_v61, %v482_v18  ;;  %v8699_v47 = vmul.f32 %v8691_v14, %v507_v25  ;;  %v8703_v16 = vsel %vm957_vm0, %v921_v53, %v922_v13  ;;  %v484_v14 = vmax.f32 %v8023_v3, 0.0 }
  0xca   : > { %v8707_v31 = vsel %vm957_vm0, %v946_v44, %v947_v15  ;;  %6836 = vmatmul.mubr.f32.gmra.mxu0 %v8703_v16  ;;  %v509_v53 = vmax.f32 %v8026_v4, 0.0 }
  0xcb   : > { %10934 = vst [vmem:[#allocation99_spill] sm:$0xff] %v8696_v48  ;;  %10935 = vst [vmem:[#allocation100_spill] sm:$0xff] %v8699_v47  ;;  %6874 = vmatprep.mubr.f32.mxu1 %v8707_v31  ;;  %v923_v59 = vrot.slane %v8696_v48, 7  ;;  %v948_v60 = vrot.slane %v8699_v47, 7 }
  0xcc   : > { %10936 = vst [vmem:[#allocation101_spill] sm:$0xff] %v8707_v31  ;;  %v8713_v18 = vpop.permute.xlu1 %714  ;;  %v8715_v25 = vpop.permute.xlu0 %589 }
  0xcd   : > { %10937 = vst [vmem:[#allocation102_spill] sm:$0xff] %v8713_v18  ;;  %10938 = vst [vmem:[#allocation103_spill] sm:$0xff] %v8715_v25  ;;  %v8720_v61 = vmul.f32 %v8713_v18, %v508_v8  ;;  %v8723_v44 = vmul.f32 %v8715_v25, %v483_v56  ;;  %v8727_v31 = vsel %vm957_vm0, %v922_v13, %v923_v59  ;;  %v510_v18 = vmax.f32 %v8039_v11, 0.0 }
  0xce   : > { %10941 = vst [vmem:[#allocation106_spill] sm:$0xff] %v8727_v31  ;;  %v8731_v42 = vsel %vm957_vm0, %v947_v15, %v948_v60  ;;  %6838 = vmatprep.mubr.f32.mxu0 %v8727_v31  ;;  %v485_v13 = vmax.f32 %v8042_v12, 0.0 }
  0xcf   : > { %10939 = vst [vmem:[#allocation104_spill] sm:$0xff] %v8720_v61  ;;  %10940 = vst [vmem:[#allocation105_spill] sm:$0xff] %v8723_v44  ;;  %6875 = vmatmul.mubr.f32.gmra.mxu1 %v8731_v42  ;;  %v924_v3 = vrot.slane %v8723_v44, 7  ;;  %v949_v4 = vrot.slane %v8720_v61, 7 }
  0xd0   : > { %10942 = vst [vmem:[#allocation107_spill] sm:$0xff] %v8731_v42  ;;  %v8737_v8 = vpop.permute.xlu1 %594  ;;  %v8739_v56 = vpop.permute.xlu0 %719 }
  0xd1   : > { %10943 = vst [vmem:[#allocation108_spill] sm:$0xff] %v8737_v8  ;;  %10944 = vst [vmem:[#allocation109_spill] sm:$0xff] %v8739_v56  ;;  %v8744_v25 = vmul.f32 %v8737_v8, %v484_v14  ;;  %v8747_v15 = vmul.f32 %v8739_v56, %v509_v53  ;;  %v8751_v42 = vsel %vm957_vm0, %v923_v59, %v924_v3  ;;  %v486_v56 = vmax.f32 %v8055_v19, 0.0 }
  0xd2   : > { %10947 = vst [vmem:[#allocation112_spill] sm:$0xff] %v8751_v42  ;;  %v8755_v31 = vsel %vm957_vm0, %v948_v60, %v949_v4  ;;  %6839 = vmatmul.mubr.f32.gmra.mxu0 %v8751_v42  ;;  %v511_v59 = vmax.f32 %v8058_v20, 0.0 }
  0xd3   : > { %10945 = vst [vmem:[#allocation110_spill] sm:$0xff] %v8744_v25  ;;  %10946 = vst [vmem:[#allocation111_spill] sm:$0xff] %v8747_v15  ;;  %6877 = vmatprep.mubr.f32.mxu1 %v8755_v31  ;;  %v925_v11 = vrot.slane %v8744_v25, 7  ;;  %v950_v12 = vrot.slane %v8747_v15, 7 }
  0xd4   : > { %10948 = vst [vmem:[#allocation113_spill] sm:$0xff] %v8755_v31  ;;  %v8761_v14 = vpop.permute.xlu1 %724  ;;  %v8763_v53 = vpop.permute.xlu0 %599 }
  0xd5   : > { %10949 = vst [vmem:[#allocation114_spill] sm:$0xff] %v8761_v14  ;;  %10950 = vst [vmem:[#allocation115_spill] sm:$0xff] %v8763_v53  ;;  %v8768_v8 = vmul.f32 %v8761_v14, %v510_v18  ;;  %v8771_v60 = vmul.f32 %v8763_v53, %v485_v13  ;;  %v8775_v31 = vsel %vm957_vm0, %v924_v3, %v925_v11  ;;  %v512_v14 = vmax.f32 %v8071_v27, 0.0 }
  0xd6   : > { %10953 = vst [vmem:[#allocation118_spill] sm:$0xff] %v8775_v31  ;;  %v8779_v42 = vsel %vm957_vm0, %v949_v4, %v950_v12  ;;  %6841 = vmatprep.mubr.f32.mxu0 %v8775_v31  ;;  %v487_v3 = vmax.f32 %v8074_v28, 0.0 }
  0xd7   : > { %10951 = vst [vmem:[#allocation116_spill] sm:$0xff] %v8768_v8  ;;  %10952 = vst [vmem:[#allocation117_spill] sm:$0xff] %v8771_v60  ;;  %6878 = vmatmul.mubr.f32.gmra.mxu1 %v8779_v42  ;;  %v926_v19 = vrot.slane %v8771_v60, 7  ;;  %v951_v20 = vrot.slane %v8768_v8, 7 }
  0xd8   : > { %10954 = vst [vmem:[#allocation119_spill] sm:$0xff] %v8779_v42  ;;  %v8785_v18 = vpop.permute.xlu1 %604  ;;  %v8787_v13 = vpop.permute.xlu0 %729 }
  0xd9   : > { %10955 = vst [vmem:[#allocation120_spill] sm:$0xff] %v8785_v18  ;;  %10956 = vst [vmem:[#allocation121_spill] sm:$0xff] %v8787_v13  ;;  %v8792_v53 = vmul.f32 %v8785_v18, %v486_v56  ;;  %v8795_v4 = vmul.f32 %v8787_v13, %v511_v59  ;;  %v8799_v42 = vsel %vm957_vm0, %v925_v11, %v926_v19  ;;  %v488_v13 = vmax.f32 %v8090_v36, 0.0 }
  0xda   : > { %v8803_v31 = vsel %vm957_vm0, %v950_v12, %v951_v20  ;;  %6842 = vmatmul.mubr.f32.gmra.mxu0 %v8799_v42 }
  0xdb   : > { %10957 = vst [vmem:[#allocation122_spill] sm:$0xff] %v8792_v53  ;;  %10958 = vst [vmem:[#allocation123_spill] sm:$0xff] %v8795_v4  ;;  %6880 = vmatprep.mubr.f32.mxu1 %v8803_v31  ;;  %v927_v27 = vrot.slane %v8792_v53, 7  ;;  %v952_v28 = vrot.slane %v8795_v4, 7 }
  0xdc   : > { %10959 = vst [vmem:[#allocation124_spill] sm:$0xff] %v8803_v31  ;;  %v8809_v56 = vpop.permute.xlu1 %734  ;;  %v8811_v59 = vpop.permute.xlu0 %609 }
  0xdd   : > { %10960 = vst [vmem:[#allocation125_spill] sm:$0xff] %v8809_v56  ;;  %10961 = vst [vmem:[#allocation126_spill] sm:$0xff] %v8811_v59  ;;  %v8815_v11 = vmul.f32 %v8809_v56, %v512_v14  ;;  %v8818_v12 = vmul.f32 %v8811_v59, %v487_v3  ;;  %v8822_v18 = vsel %vm957_vm0, %v926_v19, %v927_v27 }
  0xde   : > { %v8826_v31 = vsel %vm957_vm0, %v951_v20, %v952_v28  ;;  %6844 = vmatprep.mubr.f32.mxu0 %v8822_v18 }
  0xdf   : > { %10962 = vst [vmem:[#allocation127_spill] sm:$0xff] %v8815_v11  ;;  %10963 = vst [vmem:[#allocation128_spill] sm:$0xff] %v8818_v12  ;;  %6881 = vmatmul.mubr.f32.gmra.mxu1 %v8826_v31  ;;  %v928_v36 = vrot.slane %v8818_v12, 7  ;;  %v953_v14 = vrot.slane %v8815_v11, 7 }
  0xe0   : > { %10964 = vst [vmem:[#allocation129_spill] sm:$0xff] %v8826_v31  ;;  %v8832_v56 = vpop.permute.xlu0 %614  ;;  %v8903_v31 = vrot.slane %v8343_v41, 1 }
  0xe1   : > { %10965 = vst [vmem:[#allocation130_spill] sm:$0xff] %v8832_v56  ;;  %v8835_v3 = vmul.f32 %v8832_v56, %v488_v13  ;;  %v8839_v19 = vsel %vm957_vm0, %v927_v27, %v928_v36  ;;  %v8843_v20 = vsel %vm957_vm0, %v952_v28, %v953_v14  ;;  %v8850_v59 = vsel %vm957_vm0, %v953_v14, %v8172_v54  ;;  %v6122_v14 = vld [vmem:[%s10555_s4 + $0x1f0] sm:$0xff] }
  0xe2   : > { %10967 = vst [vmem:[#allocation132_spill] sm:$0xff] %v8843_v20  ;;  %6845 = vmatmul.mubr.f32.gmra.mxu0 %v8839_v19  ;;  %6883 = vmatprep.mubr.f32.mxu1 %v8843_v20  ;;  %10968 = vst [vmem:[#allocation133_spill] sm:$0xff] %v8850_v59  ;;  %v10969_v56 = vmov 0.0   ;;  %v10970_v28 = vrot.slane %v8146_v30, 7 }
  0xe3   : > { %10966 = vst [vmem:[#allocation131_spill] sm:$0xff] %v8835_v3  ;;  %6884 = vmatmul.mubr.f32.gmra.mxu1 %v8850_v59  ;;  %v929_v13 = vrot.slane %v8835_v3, 7  ;;  %v8872_v54 = vrot.slane %v10969_v56, 1  ;;  %10975 = vst [vmem:[#allocation138_spill] sm:$0xff] %v8903_v31 }
  0xe4   : > { %6918 = vmatprep.mubr.f32.mxu1 %v10969_v56 }
  0xe5   : > { %v8857_v27 = vsel %vm957_vm0, %v928_v36, %v929_v13  ;;  %v8863_v20 = vsel %vm957_vm0, %v929_v13, %v10970_v28  ;;  %10972 = vst [vmem:[#allocation135_spill] sm:$0xff] %v8872_v54  ;;  %v8877_v36 = vrot.slane %v8234_v49, 1  ;;  %v1845_v13 = vrot.slane %v8269_v40, 1  ;;  %v6138_v28 = vld [vmem:[%s10555_s4 + $0x270] sm:$0xff] }
  0xe6   : > { %10971 = vst [vmem:[#allocation134_spill] sm:$0xff] %v8863_v20  ;;  %6847 = vmatprep.mubr.f32.mxu0 %v8857_v27 }
  0xe7   : > { %6848 = vmatmul.mubr.f32.gmra.mxu0 %v8863_v20  ;;  %6919 = vmatmul.mubr.f32.vlgmr.msra.gmra.mxu1 %v10969_v56  ;;  %10973 = vst [vmem:[#allocation136_spill] sm:$0xff] %v8877_v36  ;;  %v8900_v59 = vsel %vm1889_vm1, %v8877_v36, %v1845_v13  ;;  %v6136_v20 = vld [vmem:[%s10555_s4 + $0x260] sm:$0xff] }
  0xe8   : > { %7095 = vmatpush3.msra.mxu1 %v8662_v57  ;;  %6921 = vmatprep.mubr.f32.mxu1 %v10969_v56  ;;  %v1846_v57 = vrot.slane %v8310_v5, 1  ;;  %v6121_v56 = vld [vmem:[%s10555_s4 + $0x1e8] sm:$0xff]  ;;  %10974 = vst [vmem:[#allocation137_spill] sm:$0xff] %v8900_v59 }
  0xe9   : > { %7022 = vmatprep.mubr.f32.mxu0 %v8872_v54  ;;  %7096 = vmatprep.subr.mxu1 %v6122_v14 }
  0xea   : > { %7097 = vmatpush3.msra.mxu1 %v6122_v14  ;;  %v1934_v14 = vsel %vm1889_vm1, %v8872_v54, %v8877_v36  ;;  %v1848_v36 = vrot.slane %v8384_v24, 1 }
  0xeb   : > { %6922 = vmatmul.mubr.f32.gmra.mxu1 %v8234_v49  ;;  %7023 = vmatmul.mubr.f32.vlgmr.msra.gmra.mxu0 %v8872_v54 }
  0xec   : > { %7199 = vmatpush3.msra.mxu0 %v8667_v38  ;;  %6924 = vmatprep.mubr.f32.mxu1 %v8269_v40  ;;  %v6137_v38 = vld [vmem:[%s10555_s4 + $0x268] sm:$0xff] }
  0xed   : > { %7025 = vmatprep.mubr.f32.mxu0 %v1934_v14  ;;  %7200 = vmatprep.subr.mxu0 %v6138_v28  ;;  %v8912_v14 = vsel %vm1889_vm1, %v1845_v13, %v1846_v57  ;;  %v1849_v13 = vrot.slane %v8420_v0, 1 }
  0xee   : > { %7201 = vmatpush3.msra.mxu0 %v6138_v28  ;;  %7098 = vmatprep.subr.mxu1 %v6121_v56  ;;  %10976 = vst [vmem:[#allocation139_spill] sm:$0xff] %v8912_v14  ;;  %v6120_v28 = vld [vmem:[%s10555_s4 + $0x1e0] sm:$0xff] }
  0xef   : > { %6925 = vmatmul.mubr.f32.gmra.mxu1 %v8310_v5  ;;  %7026 = vmatmul.mubr.f32.gmra.mxu0 %v8900_v59  ;;  %v8923_v59 = vsel %vm1889_vm1, %v1846_v57, %v8903_v31  ;;  %v1850_v57 = vrot.slane %v8462_v10, 1 }
  0xf0   : > { %6927 = vmatprep.mubr.f32.mxu1 %v8343_v41  ;;  %7028 = vmatprep.mubr.f32.mxu0 %v8912_v14  ;;  %10977 = vst [vmem:[#allocation140_spill] sm:$0xff] %v8923_v59  ;;  %v1851_v14 = vrot.slane %v8497_v32, 1 }
  0xf1   : > { %7099 = vmatpush3.msra.mxu1 %v6121_v56  ;;  %7202 = vmatprep.subr.mxu0 %v6137_v38  ;;  %v8934_v56 = vsel %vm1889_vm1, %v8903_v31, %v1848_v36  ;;  %v6135_v31 = vld [vmem:[%s10555_s4 + $0x258] sm:$0xff] }
  0xf2   : > { %7203 = vmatpush3.msra.mxu0 %v6137_v38  ;;  %7100 = vmatprep.subr.mxu1 %v6120_v28  ;;  %10978 = vst [vmem:[#allocation141_spill] sm:$0xff] %v8934_v56  ;;  %v6119_v38 = vld [vmem:[%s10555_s4 + $0x1d8] sm:$0xff] }
  0xf3   : > { %6928 = vmatmul.mubr.f32.gmra.mxu1 %v8384_v24  ;;  %7029 = vmatmul.mubr.f32.gmra.mxu0 %v8923_v59  ;;  %v8944_v59 = vsel %vm1889_vm1, %v1848_v36, %v1849_v13  ;;  %v6118_v36 = vld [vmem:[%s10555_s4 + $0x1d0] sm:$0xff] }
  0xf4   : > { %6930 = vmatprep.mubr.f32.mxu1 %v8420_v0  ;;  %7031 = vmatprep.mubr.f32.mxu0 %v8934_v56  ;;  %10979 = vst [vmem:[#allocation142_spill] sm:$0xff] %v8944_v59  ;;  %v1852_v56 = vrot.slane %v8535_v43, 1 }
  0xf5   : > { %7101 = vmatpush3.msra.mxu1 %v6120_v28  ;;  %7204 = vmatprep.subr.mxu0 %v6136_v20  ;;  %v8954_v28 = vsel %vm1889_vm1, %v1849_v13, %v1850_v57  ;;  %v6134_v13 = vld [vmem:[%s10555_s4 + $0x250] sm:$0xff] }
  0xf6   : > { %7205 = vmatpush3.msra.mxu0 %v6136_v20  ;;  %7102 = vmatprep.subr.mxu1 %v6119_v38  ;;  %10980 = vst [vmem:[#allocation143_spill] sm:$0xff] %v8954_v28  ;;  %v8964_v20 = vsel %vm1889_vm1, %v1850_v57, %v1851_v14  ;;  %v6117_v57 = vld [vmem:[%s10555_s4 + $0x1c8] sm:$0xff] }
  0xf7   : > { %6931 = vmatmul.mubr.f32.gmra.mxu1 %v8462_v10  ;;  %7032 = vmatmul.mubr.f32.gmra.mxu0 %v8944_v59  ;;  %10981 = vst [vmem:[#allocation144_spill] sm:$0xff] %v8964_v20  ;;  %v1853_v59 = vrot.slane %v8568_v62, 1 }
  0xf8   : > { %6933 = vmatprep.mubr.f32.mxu1 %v8497_v32  ;;  %7034 = vmatprep.mubr.f32.mxu0 %v8954_v28  ;;  %v1854_v28 = vrot.slane %v8608_v9, 1 }
  0xf9   : > { %7103 = vmatpush3.msra.mxu1 %v6119_v38  ;;  %7206 = vmatprep.subr.mxu0 %v6135_v31  ;;  %v8974_v38 = vsel %vm1889_vm1, %v1851_v14, %v1852_v56  ;;  %v6133_v14 = vld [vmem:[%s10555_s4 + $0x248] sm:$0xff] }
  0xfa   : > { %7207 = vmatpush3.msra.mxu0 %v6135_v31  ;;  %7104 = vmatprep.subr.mxu1 %v6118_v36  ;;  %10982 = vst [vmem:[#allocation145_spill] sm:$0xff] %v8974_v38  ;;  %v8984_v31 = vsel %vm1889_vm1, %v1852_v56, %v1853_v59  ;;  %v6116_v56 = vld [vmem:[%s10555_s4 + $0x1c0] sm:$0xff] }
  0xfb   : > { %6934 = vmatmul.mubr.f32.gmra.mxu1 %v8535_v43  ;;  %7035 = vmatmul.mubr.f32.gmra.mxu0 %v8964_v20  ;;  %10983 = vst [vmem:[#allocation146_spill] sm:$0xff] %v8984_v31  ;;  %v1855_v20 = vrot.slane %v8635_v51, 1 }
  0xfc   : > { %6936 = vmatprep.mubr.f32.mxu1 %v8568_v62  ;;  %7037 = vmatprep.mubr.f32.mxu0 %v8974_v38  ;;  %v1856_v38 = vrot.slane %v8673_v50, 1 }
  0xfd   : > { %7105 = vmatpush3.msra.mxu1 %v6118_v36  ;;  %7208 = vmatprep.subr.mxu0 %v6134_v13  ;;  %v8994_v36 = vsel %vm1889_vm1, %v1853_v59, %v1854_v28  ;;  %v6132_v59 = vld [vmem:[%s10555_s4 + $0x240] sm:$0xff] }
  0xfe   : > { %7209 = vmatpush3.msra.mxu0 %v6134_v13  ;;  %7106 = vmatprep.subr.mxu1 %v6117_v57  ;;  %10984 = vst [vmem:[#allocation147_spill] sm:$0xff] %v8994_v36  ;;  %v9004_v13 = vsel %vm1889_vm1, %v1854_v28, %v1855_v20  ;;  %v6115_v28 = vld [vmem:[%s10555_s4 + $0x1b8] sm:$0xff] }
  0xff   : > { %6937 = vmatmul.mubr.f32.gmra.mxu1 %v8608_v9  ;;  %7038 = vmatmul.mubr.f32.gmra.mxu0 %v8984_v31  ;;  %10985 = vst [vmem:[#allocation148_spill] sm:$0xff] %v9004_v13  ;;  %v1857_v31 = vrot.slane %v8696_v48, 1 }
 0x100   : > { %6939 = vmatprep.mubr.f32.mxu1 %v8635_v51  ;;  %7040 = vmatprep.mubr.f32.mxu0 %v8994_v36  ;;  %v1858_v36 = vrot.slane %v8723_v44, 1 }
 0x101   : > { %7107 = vmatpush3.msra.mxu1 %v6117_v57  ;;  %7210 = vmatprep.subr.mxu0 %v6133_v14  ;;  %v9014_v57 = vsel %vm1889_vm1, %v1855_v20, %v1856_v38  ;;  %v6131_v20 = vld [vmem:[%s10555_s4 + $0x238] sm:$0xff] }
 0x102   : > { %7211 = vmatpush3.msra.mxu0 %v6133_v14  ;;  %7108 = vmatprep.subr.mxu1 %v6116_v56  ;;  %10986 = vst [vmem:[#allocation149_spill] sm:$0xff] %v9014_v57  ;;  %v9024_v14 = vsel %vm1889_vm1, %v1856_v38, %v1857_v31  ;;  %v6114_v38 = vld [vmem:[%s10555_s4 + $0x1b0] sm:$0xff] }
 0x103   : > { %6940 = vmatmul.mubr.f32.gmra.mxu1 %v8673_v50  ;;  %7041 = vmatmul.mubr.f32.gmra.mxu0 %v9004_v13  ;;  %10987 = vst [vmem:[#allocation150_spill] sm:$0xff] %v9024_v14  ;;  %v1859_v13 = vrot.slane %v8744_v25, 1 }
 0x104   : > { %6942 = vmatprep.mubr.f32.mxu1 %v8696_v48  ;;  %7043 = vmatprep.mubr.f32.mxu0 %v9014_v57  ;;  %v1860_v57 = vrot.slane %v8771_v60, 1 }
 0x105   : > { %7109 = vmatpush3.msra.mxu1 %v6116_v56  ;;  %7212 = vmatprep.subr.mxu0 %v6132_v59  ;;  %v9034_v56 = vsel %vm1889_vm1, %v1857_v31, %v1858_v36  ;;  %v6130_v31 = vld [vmem:[%s10555_s4 + $0x230] sm:$0xff] }
 0x106   : > { %7213 = vmatpush3.msra.mxu0 %v6132_v59  ;;  %7110 = vmatprep.subr.mxu1 %v6115_v28  ;;  %10988 = vst [vmem:[#allocation151_spill] sm:$0xff] %v9034_v56  ;;  %v9044_v59 = vsel %vm1889_vm1, %v1858_v36, %v1859_v13  ;;  %v6113_v36 = vld [vmem:[%s10555_s4 + $0x1a8] sm:$0xff] }
 0x107   : > { %6943 = vmatmul.mubr.f32.gmra.mxu1 %v8723_v44  ;;  %7044 = vmatmul.mubr.f32.gmra.mxu0 %v9024_v14  ;;  %10989 = vst [vmem:[#allocation152_spill] sm:$0xff] %v9044_v59  ;;  %v1861_v14 = vrot.slane %v8792_v53, 1 }
 0x108   : > { %6945 = vmatprep.mubr.f32.mxu1 %v8744_v25  ;;  %7046 = vmatprep.mubr.f32.mxu0 %v9034_v56  ;;  %v1862_v56 = vrot.slane %v8818_v12, 1 }
 0x109   : > { %7111 = vmatpush3.msra.mxu1 %v6115_v28  ;;  %7214 = vmatprep.subr.mxu0 %v6131_v20  ;;  %v9054_v28 = vsel %vm1889_vm1, %v1859_v13, %v1860_v57  ;;  %v6129_v13 = vld [vmem:[%s10555_s4 + $0x228] sm:$0xff] }
 0x10a   : > { %7215 = vmatpush3.msra.mxu0 %v6131_v20  ;;  %7112 = vmatprep.subr.mxu1 %v6114_v38  ;;  %10990 = vst [vmem:[#allocation153_spill] sm:$0xff] %v9054_v28  ;;  %v9064_v20 = vsel %vm1889_vm1, %v1860_v57, %v1861_v14  ;;  %v6112_v57 = vld [vmem:[%s10555_s4 + $0x1a0] sm:$0xff] }
 0x10b   : > { %6946 = vmatmul.mubr.f32.gmra.mxu1 %v8771_v60  ;;  %7047 = vmatmul.mubr.f32.gmra.mxu0 %v9044_v59  ;;  %10991 = vst [vmem:[#allocation154_spill] sm:$0xff] %v9064_v20  ;;  %v1863_v59 = vrot.slane %v8835_v3, 1 }
 0x10c   : > { %6948 = vmatprep.mubr.f32.mxu1 %v8792_v53  ;;  %7049 = vmatprep.mubr.f32.mxu0 %v9054_v28 }
 0x10d   : > { %7113 = vmatpush3.msra.mxu1 %v6114_v38  ;;  %7216 = vmatprep.subr.mxu0 %v6130_v31  ;;  %v9074_v38 = vsel %vm1889_vm1, %v1861_v14, %v1862_v56  ;;  %v9084_v28 = vsel %vm1889_vm1, %v1862_v56, %v1863_v59  ;;  %v6128_v14 = vld [vmem:[%s10555_s4 + $0x220] sm:$0xff]  ;;  %v6111_v56 = vld [vmem:[%s10555_s4 + $0x198] sm:$0xff] }
 0x10e   : > { %7217 = vmatpush3.msra.mxu0 %v6130_v31  ;;  %7114 = vmatprep.subr.mxu1 %v6113_v36  ;;  %10992 = vst [vmem:[#allocation155_spill] sm:$0xff] %v9074_v38  ;;  %v1864_v31 = vrot.slane %v8146_v30, 1  ;;  %10993 = vst [vmem:[#allocation156_spill] sm:$0xff] %v9084_v28 }
 0x10f   : > { %6949 = vmatmul.mubr.f32.gmra.mxu1 %v8818_v12  ;;  %7050 = vmatmul.mubr.f32.gmra.mxu0 %v9064_v20  ;;  %v1865_v20 = vrot.slane %v8166_v45, 1 }
 0x110   : > { %6951 = vmatprep.mubr.f32.mxu1 %v8835_v3  ;;  %7052 = vmatprep.mubr.f32.mxu0 %v9074_v38 }
 0x111   : > { %7115 = vmatpush3.msra.mxu1 %v6113_v36  ;;  %7218 = vmatprep.subr.mxu0 %v6129_v13  ;;  %v9094_v36 = vsel %vm1889_vm1, %v1863_v59, %v1864_v31  ;;  %v9104_v38 = vsel %vm1889_vm1, %v1864_v31, %v1865_v20  ;;  %v6127_v59 = vld [vmem:[%s10555_s4 + $0x218] sm:$0xff]  ;;  %v6110_v31 = vld [vmem:[%s10555_s4 + $0x190] sm:$0xff] }
 0x112   : > { %7219 = vmatpush3.msra.mxu0 %v6129_v13  ;;  %7116 = vmatprep.subr.mxu1 %v6112_v57  ;;  %10994 = vst [vmem:[#allocation157_spill] sm:$0xff] %v9094_v36  ;;  %v1866_v13 = vrot.slane %v8151_v33, 1  ;;  %10995 = vst [vmem:[#allocation158_spill] sm:$0xff] %v9104_v38 }
 0x113   : > { %6952 = vmatmul.mubr.f32.gmra.mxu1 %v8146_v30  ;;  %7053 = vmatmul.mubr.f32.gmra.mxu0 %v9084_v28  ;;  %v1867_v28 = vrot.slane %v8189_v7, 1 }
 0x114   : > { %6954 = vmatprep.mubr.f32.mxu1 %v8166_v45  ;;  %7055 = vmatprep.mubr.f32.mxu0 %v9094_v36  ;;  %v1868_v36 = vrot.slane %v8186_v6, 1 }
 0x115   : > { %7117 = vmatpush3.msra.mxu1 %v6112_v57  ;;  %7220 = vmatprep.subr.mxu0 %v6128_v14  ;;  %v9114_v57 = vsel %vm1889_vm1, %v1865_v20, %v1866_v13  ;;  %v6126_v20 = vld [vmem:[%s10555_s4 + $0x210] sm:$0xff] }
 0x116   : > { %7221 = vmatpush3.msra.mxu0 %v6128_v14  ;;  %7118 = vmatprep.subr.mxu1 %v6111_v56  ;;  %10996 = vst [vmem:[#allocation159_spill] sm:$0xff] %v9114_v57  ;;  %v9124_v14 = vsel %vm1889_vm1, %v1866_v13, %v1867_v28  ;;  %v6109_v13 = vld [vmem:[%s10555_s4 + $0x188] sm:$0xff] }
 0x117   : > { %6955 = vmatmul.mubr.f32.gmra.mxu1 %v8151_v33  ;;  %7056 = vmatmul.mubr.f32.gmra.mxu0 %v9104_v38  ;;  %10997 = vst [vmem:[#allocation160_spill] sm:$0xff] %v9124_v14  ;;  %v1869_v38 = vrot.slane %v8231_v46, 1 }
 0x118   : > { %6957 = vmatprep.mubr.f32.mxu1 %v8189_v7  ;;  %7058 = vmatprep.mubr.f32.mxu0 %v9114_v57  ;;  %v1870_v57 = vrot.slane %v8272_v55, 1 }
 0x119   : > { %7119 = vmatpush3.msra.mxu1 %v6111_v56  ;;  %7222 = vmatprep.subr.mxu0 %v6127_v59  ;;  %v9134_v56 = vsel %vm1889_vm1, %v1867_v28, %v1868_v36  ;;  %v6125_v28 = vld [vmem:[%s10555_s4 + $0x208] sm:$0xff] }
 0x11a   : > { %7223 = vmatpush3.msra.mxu0 %v6127_v59  ;;  %7120 = vmatprep.subr.mxu1 %v6110_v31  ;;  %10998 = vst [vmem:[#allocation161_spill] sm:$0xff] %v9134_v56  ;;  %v9144_v59 = vsel %vm1889_vm1, %v1868_v36, %v1869_v38  ;;  %v6108_v36 = vld [vmem:[%s10555_s4 + $0x180] sm:$0xff] }
 0x11b   : > { %6958 = vmatmul.mubr.f32.gmra.mxu1 %v8186_v6  ;;  %7059 = vmatmul.mubr.f32.gmra.mxu0 %v9124_v14  ;;  %10999 = vst [vmem:[#allocation162_spill] sm:$0xff] %v9144_v59  ;;  %v1871_v14 = vrot.slane %v8307_v17, 1 }
 0x11c   : > { %6960 = vmatprep.mubr.f32.mxu1 %v8231_v46  ;;  %7061 = vmatprep.mubr.f32.mxu0 %v9134_v56  ;;  %v1872_v56 = vrot.slane %v8346_v1, 1 }
 0x11d   : > { %7121 = vmatpush3.msra.mxu1 %v6110_v31  ;;  %7224 = vmatprep.subr.mxu0 %v6126_v20  ;;  %v9154_v31 = vsel %vm1889_vm1, %v1869_v38, %v1870_v57  ;;  %v6124_v38 = vld [vmem:[%s10555_s4 + $0x200] sm:$0xff] }
 0x11e   : > { %7225 = vmatpush3.msra.mxu0 %v6126_v20  ;;  %7122 = vmatprep.subr.mxu1 %v6109_v13  ;;  %11000 = vst [vmem:[#allocation163_spill] sm:$0xff] %v9154_v31  ;;  %v9164_v20 = vsel %vm1889_vm1, %v1870_v57, %v1871_v14  ;;  %v9180_v57 = vld [vmem:[%s10555_s4 + $0x2f8] sm:$0xff] }
 0x11f   : > { %6961 = vmatmul.mubr.f32.gmra.mxu1 %v8272_v55  ;;  %7062 = vmatmul.mubr.f32.gmra.mxu0 %v9144_v59  ;;  %11001 = vst [vmem:[#allocation164_spill] sm:$0xff] %v9164_v20  ;;  %v1873_v59 = vrot.slane %v8381_v58, 1 }
 0x120   : > { %6963 = vmatprep.mubr.f32.mxu1 %v8307_v17  ;;  %7064 = vmatprep.mubr.f32.mxu0 %v9154_v31  ;;  %v1874_v31 = vrot.slane %v8423_v34, 1 }
 0x121   : > { %7123 = vmatpush3.msra.mxu1 %v6109_v13  ;;  %7226 = vmatprep.subr.mxu0 %v6125_v28  ;;  %v9174_v13 = vsel %vm1889_vm1, %v1871_v14, %v1872_v56  ;;  %v1875_v14 = vrot.slane %v8459_v23, 1 }
 0x122   : > { %7227 = vmatpush3.msra.mxu0 %v6125_v28  ;;  %7124 = vmatprep.subr.mxu1 %v6108_v36  ;;  %11002 = vst [vmem:[#allocation165_spill] sm:$0xff] %v9174_v13  ;;  %v9186_v28 = vsel %vm1889_vm1, %v1872_v56, %v1873_v59  ;;  %v1876_v56 = vrot.slane %v8500_v63, 1 }
 0x123   : > { %6964 = vmatmul.mubr.f32.gmra.mxu1 %v8346_v1  ;;  %7065 = vmatmul.mubr.f32.gmra.mxu0 %v9164_v20  ;;  %11003 = vst [vmem:[#allocation166_spill] sm:$0xff] %v9186_v28  ;;  %v9193_v20 = vld [vmem:[%s10555_s4 + $0x378] sm:$0xff] }
 0x124   : > { %6966 = vmatprep.mubr.f32.mxu1 %v8381_v58  ;;  %7067 = vmatprep.mubr.f32.mxu0 %v9174_v13  ;;  %v1877_v13 = vrot.slane %v8532_v2, 1 }
 0x125   : > { %7125 = vmatpush3.msra.mxu1 %v6108_v36  ;;  %7228 = vmatprep.subr.mxu0 %v6124_v38  ;;  %v9199_v36 = vsel %vm1889_vm1, %v1873_v59, %v1874_v31  ;;  %v9214_v59 = vsel %vm1889_vm1, %v1875_v14, %v1876_v56 }
 0x126   : > { %7229 = vmatpush3.msra.mxu0 %v6124_v38  ;;  %7302 = vmatprep.subr.mxu1 %v9180_v57  ;;  %11004 = vst [vmem:[#allocation167_spill] sm:$0xff] %v9199_v36  ;;  %v9207_v38 = vsel %vm1889_vm1, %v1874_v31, %v1875_v14  ;;  %11006 = vst [vmem:[#allocation169_spill] sm:$0xff] %v9214_v59  ;;  %v9221_v31 = vsel %vm1889_vm1, %v1876_v56, %v1877_v13 }
 0x127   : > { %6967 = vmatmul.mubr.f32.gmra.mxu1 %v8423_v34  ;;  %7068 = vmatmul.mubr.f32.gmra.mxu0 %v9186_v28  ;;  %11005 = vst [vmem:[#allocation168_spill] sm:$0xff] %v9207_v38  ;;  %v1878_v28 = vrot.slane %v8571_v29, 1  ;;  %11007 = vst [vmem:[#allocation170_spill] sm:$0xff] %v9221_v31 }
 0x128   : > { %6969 = vmatprep.mubr.f32.mxu1 %v8459_v23  ;;  %7070 = vmatprep.mubr.f32.mxu0 %v9199_v36  ;;  %v1879_v36 = vrot.slane %v8605_v37, 1 }
 0x129   : > { %7406 = vmatprep.subr.mxu0 %v9193_v20  ;;  %v9228_v14 = vsel %vm1889_vm1, %v1877_v13, %v1878_v28 }
 0x12a   : > { %11008 = vst [vmem:[#allocation171_spill] sm:$0xff] %v9228_v14  ;;  %v9235_v56 = vsel %vm1889_vm1, %v1878_v28, %v1879_v36 }
 0x12b   : > { %6970 = vmatmul.mubr.f32.gmra.mxu1 %v8500_v63  ;;  %7071 = vmatmul.mubr.f32.gmra.mxu0 %v9207_v38  ;;  %v1880_v38 = vrot.slane %v8638_v52, 1  ;;  %11009 = vst [vmem:[#allocation172_spill] sm:$0xff] %v9235_v56 }
 0x12c   : > { %6972 = vmatprep.mubr.f32.mxu1 %v8532_v2  ;;  %7073 = vmatprep.mubr.f32.mxu0 %v9214_v59  ;;  %v1881_v59 = vrot.slane %v8670_v21, 1 }
 0x12d   : > { %v9242_v13 = vsel %vm1889_vm1, %v1879_v36, %v1880_v38 }
 0x12e   : > { %11010 = vst [vmem:[#allocation173_spill] sm:$0xff] %v9242_v13  ;;  %v9249_v28 = vsel %vm1889_vm1, %v1880_v38, %v1881_v59 }
 0x12f   : > { %6973 = vmatmul.mubr.f32.gmra.mxu1 %v8571_v29  ;;  %7074 = vmatmul.mubr.f32.gmra.mxu0 %v9221_v31  ;;  %v1882_v31 = vrot.slane %v8699_v47, 1  ;;  %11011 = vst [vmem:[#allocation174_spill] sm:$0xff] %v9249_v28 }
 0x130   : > { %6975 = vmatprep.mubr.f32.mxu1 %v8605_v37  ;;  %7076 = vmatprep.mubr.f32.mxu0 %v9228_v14  ;;  %v1883_v14 = vrot.slane %v8720_v61, 1 }
 0x131   : > { %v9257_v36 = vsel %vm1889_vm1, %v1881_v59, %v1882_v31 }
 0x132   : > { %11012 = vst [vmem:[#allocation175_spill] sm:$0xff] %v9257_v36  ;;  %v9266_v38 = vsel %vm1889_vm1, %v1882_v31, %v1883_v14 }
 0x133   : > { %6976 = vmatmul.mubr.f32.gmra.mxu1 %v8638_v52  ;;  %7077 = vmatmul.mubr.f32.gmra.mxu0 %v9235_v56  ;;  %v516_v52 = vmax.f32 %v8087_v35, 0.0  ;;  %v1884_v56 = vrot.slane %v8747_v15, 1  ;;  %11014 = vst [vmem:[#allocation177_spill] sm:$0xff] %v9266_v38  ;;  %v1885_v35 = vrot.slane %v8768_v8, 1 }
 0x134   : > { %6978 = vmatprep.mubr.f32.mxu1 %v8670_v21  ;;  %7079 = vmatprep.mubr.f32.mxu0 %v9242_v13  ;;  %v9260_v21 = vpop.permute.xlu1 %754  ;;  %v1886_v13 = vrot.slane %v8795_v4, 1 }
 0x135   : > { %11013 = vst [vmem:[#allocation176_spill] sm:$0xff] %v9260_v21  ;;  %v9276_v59 = vsel %vm1889_vm1, %v1883_v14, %v1884_v56  ;;  %v9283_v31 = vsel %vm1889_vm1, %v1884_v56, %v1885_v35 }
 0x136   : > { %11016 = vst [vmem:[#allocation179_spill] sm:$0xff] %v9276_v59  ;;  %11017 = vst [vmem:[#allocation180_spill] sm:$0xff] %v9283_v31  ;;  %v9290_v14 = vsel %vm1889_vm1, %v1885_v35, %v1886_v13 }
 0x137   : > { %6979 = vmatmul.mubr.f32.gmra.mxu1 %v8699_v47  ;;  %7080 = vmatmul.mubr.f32.gmra.mxu0 %v9249_v28  ;;  %v9270_v28 = vmul.f32 %v9260_v21, %v516_v52  ;;  %v1887_v52 = vrot.slane %v8815_v11, 1  ;;  %11018 = vst [vmem:[#allocation181_spill] sm:$0xff] %v9290_v14 }
 0x138   : > { %6981 = vmatprep.mubr.f32.mxu1 %v8720_v61  ;;  %7082 = vmatprep.mubr.f32.mxu0 %v9257_v36  ;;  %v11026_v36 = vld [vmem:[#allocation42_spill] sm:$0xff] }
 0x139   : > { %11015 = vst [vmem:[#allocation178_spill] sm:$0xff] %v9270_v28  ;;  %v9293_v21 = vrot.slane %v9270_v28, 7 }
 0x13b   : > { %6982 = vmatmul.mubr.f32.gmra.mxu1 %v8747_v15  ;;  %7083 = vmatmul.mubr.f32.gmra.mxu0 %v9266_v38  ;;  %11019 = vst [vmem:[#allocation182_spill] sm:$0xff] %v9293_v21  ;;  %v9302_v38 = vsel %vm1889_vm1, %v1886_v13, %v1887_v52 }
 0x13c   : > { %6984 = vmatprep.mubr.f32.mxu1 %v8768_v8  ;;  %7085 = vmatprep.mubr.f32.mxu0 %v9276_v59  ;;  %v11020_v59 = vld [vmem:[#allocation14_spill] sm:$0xff]  ;;  %11022 = vst [vmem:[#allocation184_spill] sm:$0xff] %v9302_v38 }
 0x13d   : > { %v9298_v56 = vrot.slane %v11020_v59, 1 }
 0x13f   : > { %6985 = vmatmul.mubr.f32.gmra.mxu1 %v8795_v4  ;;  %7086 = vmatmul.mubr.f32.gmra.mxu0 %v9283_v31  ;;  %11021 = vst [vmem:[#allocation183_spill] sm:$0xff] %v9298_v56  ;;  %v9309_v35 = vsel %vm1889_vm1, %v1887_v52, %v9298_v56  ;;  %v11024_v31 = vld [vmem:[#allocation28_spill] sm:$0xff]  ;;  %v1937_v13 = vsel %vm1889_vm1, %v9298_v56, %v8872_v54  ;;  %v6154_v52 = vld [vmem:[%s10555_s4 + $0x2f0] sm:$0xff] }
 0x140   : > { %6987 = vmatprep.mubr.f32.mxu1 %v8815_v11  ;;  %7088 = vmatprep.mubr.f32.mxu0 %v9290_v14  ;;  %11023 = vst [vmem:[#allocation185_spill] sm:$0xff] %v9309_v35  ;;  %v2547_v14 = vsel %vm957_vm0, %v9293_v21, %v11024_v31  ;;  %v11027_v31 = vld [vmem:[#allocation49_spill] sm:$0xff]  ;;  %v6150_v54 = vld [vmem:[%s10555_s4 + $0x2d0] sm:$0xff] }
 0x143   : > { %6988 = vmatmul.mubr.f32.gmra.mxu1 %v11020_v59  ;;  %7089 = vmatmul.mubr.f32.gmra.mxu0 %v9302_v38  ;;  %v11025_v38 = vld [vmem:[#allocation36_spill] sm:$0xff] }
 0x144   : > { %7091 = vmatprep.mubr.f32.mxu0 %v9309_v35  ;;  %7126 = vmatprep.mubr.f32.mxu1 %v2547_v14  ;;  %v6170_v14 = vld [vmem:[%s10555_s4 + $0x370] sm:$0xff]  ;;  %v6159_v35 = vld [vmem:[%s10555_s4 + $0x318] sm:$0xff] }
 0x147   : > { %7092 = vmatmul.mubr.f32.gmra.mxu0 %v1937_v13  ;;  %7127 = vmatmul.mubr.f32.vlgmr.msra.gmra.mxu1 %v11025_v38  ;;  %v6153_v38 = vld [vmem:[%s10555_s4 + $0x2e8] sm:$0xff]  ;;  %v6168_v13 = vld [vmem:[%s10555_s4 + $0x360] sm:$0xff] }
 0x148   : > { %7129 = vmatprep.mubr.f32.mxu1 %v11026_v36  ;;  %7230 = vmatprep.mubr.f32.mxu0 %v8234_v49  ;;  %v11028_v36 = vld [vmem:[#allocation55_spill] sm:$0xff]  ;;  %v11029_v49 = vld [vmem:[#allocation61_spill] sm:$0xff] }
 0x149   : > { %7303 = vmatpush3.msra.mxu1 %v9180_v57  ;;  %v6152_v57 = vld [vmem:[%s10555_s4 + $0x2e0] sm:$0xff] }
 0x14a   : > { %7304 = vmatprep.subr.mxu1 %v6154_v52 }
 0x14b   : > { %7130 = vmatmul.mubr.f32.gmra.mxu1 %v11027_v31  ;;  %7231 = vmatmul.mubr.f32.vlgmr.msra.gmra.mxu0 %v8269_v40  ;;  %v6169_v40 = vld [vmem:[%s10555_s4 + $0x368] sm:$0xff]  ;;  %v11032_v31 = vld [vmem:[#allocation79_spill] sm:$0xff] }
 0x14c   : > { %7407 = vmatpush3.msra.mxu0 %v9193_v20  ;;  %7132 = vmatprep.mubr.f32.mxu1 %v11028_v36  ;;  %v11030_v20 = vld [vmem:[#allocation67_spill] sm:$0xff] }
 0x14d   : > { %7233 = vmatprep.mubr.f32.mxu0 %v8310_v5  ;;  %7305 = vmatpush3.msra.mxu1 %v6154_v52  ;;  %v11031_v5 = vld [vmem:[#allocation73_spill] sm:$0xff]  ;;  %v6151_v52 = vld [vmem:[%s10555_s4 + $0x2d8] sm:$0xff] }
 0x14e   : > { %7408 = vmatprep.subr.mxu0 %v6170_v14  ;;  %7306 = vmatprep.subr.mxu1 %v6153_v38 }
 0x14f   : > { %7133 = vmatmul.mubr.f32.gmra.mxu1 %v11029_v49  ;;  %7234 = vmatmul.mubr.f32.gmra.mxu0 %v8343_v41  ;;  %v6160_v41 = vld [vmem:[%s10555_s4 + $0x320] sm:$0xff] }
 0x150   : > { %7135 = vmatprep.mubr.f32.mxu1 %v11030_v20  ;;  %7236 = vmatprep.mubr.f32.mxu0 %v8384_v24 }
 0x151   : > { %7409 = vmatpush3.msra.mxu0 %v6170_v14  ;;  %7307 = vmatpush3.msra.mxu1 %v6153_v38  ;;  %v11033_v14 = vld [vmem:[#allocation85_spill] sm:$0xff]  ;;  %v6167_v38 = vld [vmem:[%s10555_s4 + $0x358] sm:$0xff] }
 0x152   : > { %7410 = vmatprep.subr.mxu0 %v6169_v40  ;;  %7308 = vmatprep.subr.mxu1 %v6152_v57 }
 0x153   : > { %7136 = vmatmul.mubr.f32.gmra.mxu1 %v11031_v5  ;;  %7237 = vmatmul.mubr.f32.gmra.mxu0 %v8420_v0  ;;  %v6144_v0 = vld [vmem:[%s10555_s4 + $0x2a0] sm:$0xff] }
 0x154   : > { %7138 = vmatprep.mubr.f32.mxu1 %v11032_v31  ;;  %7239 = vmatprep.mubr.f32.mxu0 %v8462_v10  ;;  %v9400_v10 = vpop.f32.mrf.mxu0 }
 0x155   : > { %7411 = vmatpush3.msra.mxu0 %v6169_v40  ;;  %7309 = vmatpush3.msra.mxu1 %v6152_v57  ;;  %v6166_v40 = vld [vmem:[%s10555_s4 + $0x350] sm:$0xff]  ;;  %v6149_v57 = vld [vmem:[%s10555_s4 + $0x2c8] sm:$0xff] }
 0x156   : > { %7412 = vmatprep.subr.mxu0 %v6168_v13  ;;  %7310 = vmatprep.subr.mxu1 %v6151_v52 }
 0x157   : > { %7139 = vmatmul.mubr.f32.gmra.mxu1 %v11033_v14  ;;  %7240 = vmatmul.mubr.f32.gmra.mxu0 %v8497_v32  ;;  %v11036_v32 = vld [vmem:[#allocation112_spill] sm:$0xff] }
 0x158   : > { %7141 = vmatprep.mubr.f32.mxu1 %v8642_v22  ;;  %7242 = vmatprep.mubr.f32.mxu0 %v8535_v43  ;;  %v9386_v43 = vpop.f32.mrf.mxu1 }
 0x159   : > { %7413 = vmatpush3.msra.mxu0 %v6168_v13  ;;  %7311 = vmatpush3.msra.mxu1 %v6151_v52  ;;  %v11034_v13 = vld [vmem:[#allocation106_spill] sm:$0xff]  ;;  %v6165_v52 = vld [vmem:[%s10555_s4 + $0x348] sm:$0xff]  ;;  %11035 = vst [vmem:[#allocation28_spill] sm:$0xff] %v9386_v43  ;;  %v11080_v43 = vld [vmem:[#allocation119_spill] sm:$0xff] }
 0x15a   : > { %7414 = vmatprep.subr.mxu0 %v6167_v38  ;;  %7312 = vmatprep.subr.mxu1 %v6150_v54 }
 0x15b   : > { %7142 = vmatmul.mubr.f32.gmra.mxu1 %v8677_v39  ;;  %7243 = vmatmul.mubr.f32.gmra.mxu0 %v8568_v62  ;;  %v6148_v62 = vld [vmem:[%s10555_s4 + $0x2c0] sm:$0xff] }
 0x15c   : > { %7144 = vmatprep.mubr.f32.mxu1 %v8703_v16  ;;  %7245 = vmatprep.mubr.f32.mxu0 %v8608_v9  ;;  %v9398_v9 = vpop.f32.mrf.mxu1 }
 0x15d   : > { %7415 = vmatpush3.msra.mxu0 %v6167_v38  ;;  %7313 = vmatpush3.msra.mxu1 %v6150_v54  ;;  %v11037_v54 = vld [vmem:[#allocation118_spill] sm:$0xff]  ;;  %v6164_v38 = vld [vmem:[%s10555_s4 + $0x340] sm:$0xff]  ;;  %11038 = vst [vmem:[#allocation36_spill] sm:$0xff] %v9398_v9  ;;  %v9565_v9 = vpop.permute.xlu0 %744 }
 0x15e   : > { %7416 = vmatprep.subr.mxu0 %v6166_v40  ;;  %7314 = vmatprep.subr.mxu1 %v6149_v57 }
 0x15f   : > { %7145 = vmatmul.mubr.f32.gmra.mxu1 %v11034_v13  ;;  %7246 = vmatmul.mubr.f32.gmra.mxu0 %v8635_v51  ;;  %v6147_v51 = vld [vmem:[%s10555_s4 + $0x2b8] sm:$0xff] }
 0x160   : > { %7147 = vmatprep.mubr.f32.mxu1 %v11036_v32  ;;  %7248 = vmatprep.mubr.f32.mxu0 %v8673_v50  ;;  %v9414_v50 = vpop.f32.mrf.mxu0 }
 0x161   : > { %7417 = vmatpush3.msra.mxu0 %v6166_v40  ;;  %7315 = vmatpush3.msra.mxu1 %v6149_v57  ;;  %v6163_v40 = vld [vmem:[%s10555_s4 + $0x338] sm:$0xff]  ;;  %v6146_v57 = vld [vmem:[%s10555_s4 + $0x2b0] sm:$0xff] }
 0x162   : > { %7418 = vmatprep.subr.mxu0 %v6165_v52  ;;  %7316 = vmatprep.subr.mxu1 %v6148_v62 }
 0x163   : > { %7148 = vmatmul.mubr.f32.gmra.mxu1 %v11037_v54  ;;  %7249 = vmatmul.mubr.f32.gmra.mxu0 %v8696_v48  ;;  %v9412_v48 = vpop.f32.mrf.mxu1 }
 0x164   : > { %7150 = vmatprep.mubr.f32.mxu1 %v8799_v42  ;;  %7251 = vmatprep.mubr.f32.mxu0 %v8723_v44  ;;  %11039 = vst [vmem:[#allocation42_spill] sm:$0xff] %v9412_v48  ;;  %v9428_v44 = vpop.f32.mrf.mxu0  ;;  %v6156_v48 = vld [vmem:[%s10555_s4 + $0x300] sm:$0xff] }
 0x165   : > { %7419 = vmatpush3.msra.mxu0 %v6165_v52  ;;  %7317 = vmatpush3.msra.mxu1 %v6148_v62  ;;  %v6162_v62 = vld [vmem:[%s10555_s4 + $0x330] sm:$0xff]  ;;  %v6145_v52 = vld [vmem:[%s10555_s4 + $0x2a8] sm:$0xff] }
 0x166   : > { %7420 = vmatprep.subr.mxu0 %v6164_v38  ;;  %7318 = vmatprep.subr.mxu1 %v6147_v51  ;;  %v9442_v24 = vpop.f32.mrf.mxu0 }
 0x167   : > { %7151 = vmatmul.mubr.f32.gmra.mxu1 %v8822_v18  ;;  %7252 = vmatmul.mubr.f32.gmra.mxu0 %v8744_v25  ;;  %v9426_v25 = vpop.f32.mrf.mxu1 }
 0x168   : > { %7153 = vmatprep.mubr.f32.mxu1 %v8839_v19  ;;  %7254 = vmatprep.mubr.f32.mxu0 %v8771_v60  ;;  %11040 = vst [vmem:[#allocation49_spill] sm:$0xff] %v9426_v25  ;;  %v6161_v60 = vld [vmem:[%s10555_s4 + $0x328] sm:$0xff] }
 0x169   : > { %7421 = vmatpush3.msra.mxu0 %v6164_v38  ;;  %7319 = vmatpush3.msra.mxu1 %v6147_v51  ;;  %v11041_v38 = vld [vmem:[#allocation134_spill] sm:$0xff]  ;;  %v9432_v51 = vpop.f32.mrf.mxu1 }
 0x16a   : > { %7422 = vmatprep.subr.mxu0 %v6163_v40  ;;  %7320 = vmatprep.subr.mxu1 %v6146_v57  ;;  %11042 = vst [vmem:[#allocation55_spill] sm:$0xff] %v9432_v51  ;;  %v6141_v51 = vld [vmem:[%s10555_s4 + $0x288] sm:$0xff] }
 0x16b   : > { %7154 = vmatmul.mubr.f32.gmra.mxu1 %v8857_v27  ;;  %7255 = vmatmul.mubr.f32.gmra.mxu0 %v8792_v53  ;;  %v11043_v53 = vld [vmem:[#allocation21_spill] sm:$0xff] }
 0x16c   : > { %7156 = vmatprep.mubr.f32.mxu1 %v11041_v38  ;;  %7257 = vmatprep.mubr.f32.mxu0 %v8818_v12  ;;  %v9448_v12 = vpop.f32.mrf.mxu0 }
 0x16d   : > { %7423 = vmatpush3.msra.mxu0 %v6163_v40  ;;  %7321 = vmatpush3.msra.mxu1 %v6146_v57  ;;  %v11044_v40 = vld [vmem:[#allocation22_spill] sm:$0xff]  ;;  %v9446_v57 = vpop.f32.mrf.mxu1 }
 0x16e   : > { %7424 = vmatprep.subr.mxu0 %v6162_v62  ;;  %7322 = vmatprep.subr.mxu1 %v6145_v52  ;;  %11045 = vst [vmem:[#allocation61_spill] sm:$0xff] %v9446_v57  ;;  %v9462_v56 = vpop.f32.mrf.mxu0 }
 0x16f   : > { %7157 = vmatmul.mubr.f32.gmra.mxu1 %v11043_v53  ;;  %7258 = vmatmul.mubr.f32.gmra.mxu0 %v8835_v3  ;;  %v11046_v3 = vld [vmem:[#allocation26_spill] sm:$0xff] }
 0x170   : > { %7159 = vmatprep.mubr.f32.mxu1 %v11044_v40  ;;  %7260 = vmatprep.mubr.f32.mxu0 %v8146_v30  ;;  %v6143_v30 = vld [vmem:[%s10555_s4 + $0x298] sm:$0xff] }
 0x171   : > { %7425 = vmatpush3.msra.mxu0 %v6162_v62  ;;  %7323 = vmatpush3.msra.mxu1 %v6145_v52  ;;  %v9458_v62 = vpop.f32.mrf.mxu1  ;;  %v11048_v52 = vld [vmem:[#allocation27_spill] sm:$0xff] }
 0x172   : > { %7426 = vmatprep.subr.mxu0 %v6161_v60  ;;  %7324 = vmatprep.subr.mxu1 %v6144_v0  ;;  %11047 = vst [vmem:[#allocation67_spill] sm:$0xff] %v9458_v62  ;;  %v6142_v62 = vld [vmem:[%s10555_s4 + $0x290] sm:$0xff]  ;;  %11076 = vst [vmem:[#allocation27_spill] sm:$0xff] %v9565_v9 }
 0x173   : > { %7160 = vmatmul.mubr.f32.gmra.mxu1 %v11046_v3  ;;  %7261 = vmatmul.mubr.f32.gmra.mxu0 %v8166_v45  ;;  %v11049_v45 = vld [vmem:[#allocation32_spill] sm:$0xff]  ;;  %v9472_v57 = vpop.f32.mrf.mxu1 }
 0x174   : > { %7162 = vmatprep.mubr.f32.mxu1 %v11048_v52  ;;  %7263 = vmatprep.mubr.f32.mxu0 %v8151_v33  ;;  %11050 = vst [vmem:[#allocation73_spill] sm:$0xff] %v9472_v57  ;;  %v6158_v57 = vld [vmem:[%s10555_s4 + $0x310] sm:$0xff] }
 0x175   : > { %7427 = vmatpush3.msra.mxu0 %v6161_v60  ;;  %7325 = vmatpush3.msra.mxu1 %v6144_v0  ;;  %v9474_v60 = vpop.f32.mrf.mxu0  ;;  %v11051_v0 = vld [vmem:[#allocation37_spill] sm:$0xff]  ;;  %v9478_v33 = vpop.f32.mrf.mxu1 }
 0x176   : > { %7428 = vmatprep.subr.mxu0 %v6160_v41  ;;  %7326 = vmatprep.subr.mxu1 %v6143_v30  ;;  %11052 = vst [vmem:[#allocation79_spill] sm:$0xff] %v9478_v33  ;;  %v6157_v33 = vld [vmem:[%s10555_s4 + $0x308] sm:$0xff] }
 0x177   : > { %7163 = vmatmul.mubr.f32.gmra.mxu1 %v11049_v45  ;;  %7264 = vmatmul.mubr.f32.gmra.mxu0 %v8189_v7  ;;  %v11053_v7 = vld [vmem:[#allocation43_spill] sm:$0xff]  ;;  %v9488_v25 = vpop.f32.mrf.mxu0 }
 0x178   : > { %7165 = vmatprep.mubr.f32.mxu1 %v11051_v0  ;;  %7266 = vmatprep.mubr.f32.mxu0 %v8186_v6 }
 0x179   : > { %7429 = vmatpush3.msra.mxu0 %v6160_v41  ;;  %7327 = vmatpush3.msra.mxu1 %v6143_v30  ;;  %v11054_v41 = vld [vmem:[#allocation50_spill] sm:$0xff]  ;;  %v9492_v30 = vpop.f32.mrf.mxu1  ;;  %v9494_v6 = vpop.f32.mrf.mxu0 }
 0x17a   : > { %7430 = vmatprep.subr.mxu0 %v6159_v35  ;;  %7328 = vmatprep.subr.mxu1 %v6142_v62  ;;  %11055 = vst [vmem:[#allocation85_spill] sm:$0xff] %v9492_v30 }
 0x17b   : > { %7166 = vmatmul.mubr.f32.gmra.mxu1 %v11053_v7  ;;  %7267 = vmatmul.mubr.f32.gmra.mxu0 %v8231_v46  ;;  %v11056_v46 = vld [vmem:[#allocation56_spill] sm:$0xff]  ;;  %v9508_v30 = vpop.f32.mrf.mxu0 }
 0x17c   : > { %7168 = vmatprep.mubr.f32.mxu1 %v11054_v41  ;;  %7269 = vmatprep.mubr.f32.mxu0 %v8272_v55  ;;  %v6140_v55 = vld [vmem:[%s10555_s4 + $0x280] sm:$0xff]  ;;  %v11077_v41 = vld [vmem:[#allocation113_spill] sm:$0xff] }
 0x17d   : > { %7431 = vmatpush3.msra.mxu0 %v6159_v35  ;;  %7329 = vmatpush3.msra.mxu1 %v6142_v62  ;;  %v9504_v35 = vpop.f32.mrf.mxu1  ;;  %v11058_v62 = vld [vmem:[#allocation62_spill] sm:$0xff] }
 0x17e   : > { %7432 = vmatprep.subr.mxu0 %v6158_v57  ;;  %7330 = vmatprep.subr.mxu1 %v6141_v51  ;;  %11057 = vst [vmem:[#allocation106_spill] sm:$0xff] %v9504_v35  ;;  %v9518_v35 = vld [vmem:[%s10555_s4 + $0x3f8] sm:$0xff] }
 0x17f   : > { %7169 = vmatmul.mubr.f32.gmra.mxu1 %v11056_v46  ;;  %7270 = vmatmul.mubr.f32.gmra.mxu0 %v8307_v17  ;;  %v11059_v17 = vld [vmem:[#allocation68_spill] sm:$0xff] }
 0x180   : > { %7171 = vmatprep.mubr.f32.mxu1 %v11058_v62  ;;  %7272 = vmatprep.mubr.f32.mxu0 %v8346_v1  ;;  %v9520_v1 = vpop.f32.mrf.mxu1 }
 0x181   : > { %7433 = vmatpush3.msra.mxu0 %v6158_v57  ;;  %7331 = vmatpush3.msra.mxu1 %v6141_v51  ;;  %11060 = vst [vmem:[#allocation112_spill] sm:$0xff] %v9520_v1  ;;  %v9522_v51 = vpop.f32.mrf.mxu0  ;;  %v11061_v57 = vld [vmem:[#allocation74_spill] sm:$0xff]  ;;  %v9534_v1 = vld [vmem:[%s10555_s4 + $0x478] sm:$0xff] }
 0x182   : > { %7434 = vmatprep.subr.mxu0 %v6157_v33  ;;  %7332 = vmatprep.subr.mxu1 %v6140_v55 }
 0x183   : > { %7172 = vmatmul.mubr.f32.gmra.mxu1 %v11059_v17  ;;  %7273 = vmatmul.mubr.f32.gmra.mxu0 %v8381_v58  ;;  %v9526_v58 = vpop.f32.mrf.mxu1  ;;  %v11063_v17 = vld [vmem:[#allocation80_spill] sm:$0xff]  ;;  %v9536_v62 = vpop.f32.mrf.mxu0 }
 0x184   : > { %7174 = vmatprep.mubr.f32.mxu1 %v11061_v57  ;;  %7275 = vmatprep.mubr.f32.mxu0 %v8423_v34  ;;  %11062 = vst [vmem:[#allocation118_spill] sm:$0xff] %v9526_v58  ;;  %v11064_v57 = vld [vmem:[#allocation86_spill] sm:$0xff]  ;;  %v11066_v34 = vld [vmem:[#allocation91_spill] sm:$0xff]  ;;  %v11068_v58 = vld [vmem:[#allocation96_spill] sm:$0xff] }
 0x185   : > { %7435 = vmatpush3.msra.mxu0 %v6157_v33  ;;  %7333 = vmatpush3.msra.mxu1 %v6140_v55  ;;  %v9540_v33 = vpop.f32.mrf.mxu1  ;;  %v9542_v55 = vpop.f32.mrf.mxu0 }
 0x186   : > { %7436 = vmatprep.subr.mxu0 %v6156_v48  ;;  %7510 = vmatprep.subr.mxu1 %v9518_v35  ;;  %11065 = vst [vmem:[#allocation134_spill] sm:$0xff] %v9540_v33 }
 0x187   : > { %7175 = vmatmul.mubr.f32.gmra.mxu1 %v11063_v17  ;;  %7276 = vmatmul.mubr.f32.gmra.mxu0 %v8459_v23  ;;  %v9547_v23 = vpop.f32.mrf.mxu1  ;;  %v11071_v17 = vld [vmem:[#allocation107_spill] sm:$0xff] }
 0x188   : > { %7177 = vmatprep.mubr.f32.mxu1 %v11064_v57  ;;  %7278 = vmatprep.mubr.f32.mxu0 %v8500_v63  ;;  %11067 = vst [vmem:[#allocation21_spill] sm:$0xff] %v9547_v23  ;;  %v9551_v57 = vpop.f32.mrf.mxu0  ;;  %v11069_v63 = vld [vmem:[#allocation101_spill] sm:$0xff] }
 0x189   : > { %7437 = vmatpush3.msra.mxu0 %v6156_v48  ;;  %v9555_v48 = vpop.f32.mrf.mxu1 }
 0x18a   : > { %7614 = vmatprep.subr.mxu0 %v9534_v1  ;;  %11070 = vst [vmem:[#allocation22_spill] sm:$0xff] %v9555_v48  ;;  %v9557_v33 = vpop.f32.mrf.mxu0 }
 0x18b   : > { %7178 = vmatmul.mubr.f32.gmra.mxu1 %v11066_v34  ;;  %7279 = vmatmul.mubr.f32.gmra.mxu0 %v8532_v2  ;;  %v11072_v34 = vld [vmem:[#allocation90_spill] sm:$0xff]  ;;  %v11073_v2 = vld [vmem:[#allocation5_spill] sm:$0xff] }
 0x18c   : > { %7180 = vmatprep.mubr.f32.mxu1 %v11068_v58  ;;  %7281 = vmatprep.mubr.f32.mxu0 %v8571_v29  ;;  %v514_v23 = vmax.f32 %v11073_v2, 0.0  ;;  %v11075_v58 = vld [vmem:[#allocation4_spill] sm:$0xff]  ;;  %v9571_v48 = vpop.f32.mrf.mxu0 }
 0x18d   : > { %v515_v29 = vmax.f32 %v11075_v58, 0.0 }
 0x18e   : > { %v9576_v2 = vmul.f32 %v9565_v9, %v514_v23  ;;  %v11087_v9 = vld [vmem:[#allocation132_spill] sm:$0xff] }
 0x18f   : > { %7181 = vmatmul.mubr.f32.gmra.mxu1 %v11069_v63  ;;  %7282 = vmatmul.mubr.f32.gmra.mxu0 %v8605_v37  ;;  %v9562_v46 = vpop.f32.mrf.mxu1  ;;  %v11078_v63 = vld [vmem:[#allocation94_spill] sm:$0xff]  ;;  %v9569_v37 = vpop.permute.xlu1 %749 }
 0x190   : > { %7183 = vmatprep.mubr.f32.mxu1 %v11071_v17  ;;  %7284 = vmatprep.mubr.f32.mxu0 %v11072_v34  ;;  %11074 = vst [vmem:[#allocation26_spill] sm:$0xff] %v9562_v46  ;;  %11079 = vst [vmem:[#allocation32_spill] sm:$0xff] %v9569_v37  ;;  %v9583_v46 = vmul.f32 %v9569_v37, %v515_v29  ;;  %v11086_v17 = vld [vmem:[#allocation129_spill] sm:$0xff]  ;;  %v2497_v23 = vrot.slane %v9576_v2, 7 }
 0x191   : > { %11081 = vst [vmem:[#allocation37_spill] sm:$0xff] %v9576_v2  ;;  %v9578_v34 = vpop.f32.mrf.mxu1 }
 0x192   : > { %11082 = vst [vmem:[#allocation43_spill] sm:$0xff] %v9578_v34  ;;  %v9580_v58 = vpop.f32.mrf.mxu0  ;;  %11083 = vst [vmem:[#allocation5_spill] sm:$0xff] %v9583_v46  ;;  %v2498_v29 = vrot.slane %v9583_v46, 7 }
 0x193   : > { %7184 = vmatmul.mubr.f32.gmra.mxu1 %v11077_v41  ;;  %7285 = vmatmul.mubr.f32.gmra.mxu0 %v11078_v63  ;;  %v11084_v41 = vld [vmem:[#allocation124_spill] sm:$0xff] }
 0x194   : > { %7186 = vmatprep.mubr.f32.mxu1 %v11080_v43  ;;  %7287 = vmatprep.mubr.f32.mxu0 %v8699_v47  ;;  %v9591_v47 = vpop.f32.mrf.mxu0 }
 0x197   : > { %7187 = vmatmul.mubr.f32.gmra.mxu1 %v11084_v41  ;;  %7288 = vmatmul.mubr.f32.gmra.mxu0 %v8720_v61  ;;  %v9587_v63 = vpop.f32.mrf.mxu1  ;;  %v11089_v61 = vld [vmem:[#allocation133_spill] sm:$0xff] }
 0x198   : > { %11085 = vst [vmem:[#allocation4_spill] sm:$0xff] %v9587_v63  ;;  %7189 = vmatprep.mubr.f32.mxu1 %v11086_v17  ;;  %7290 = vmatprep.mubr.f32.mxu0 %v8747_v15  ;;  %v11091_v15 = vld [vmem:[#allocation16_spill] sm:$0xff] }
 0x199   : > { %v9597_v37 = vpop.f32.mrf.mxu1  ;;  %v9608_v17 = vsel %vm957_vm0, %v11091_v15, %v2497_v23  ;;  %v9627_v15 = vsel %vm957_vm0, %v2498_v29, %v9293_v21  ;;  %v11101_v21 = vld [vmem:[#allocation13_spill] sm:$0xff] }
 0x19a   : > { %11088 = vst [vmem:[#allocation119_spill] sm:$0xff] %v9597_v37  ;;  %v9599_v34 = vpop.f32.mrf.mxu0  ;;  %11092 = vst [vmem:[#allocation16_spill] sm:$0xff] %v9608_v17 }
 0x19b   : > { %7190 = vmatmul.mubr.f32.gmra.mxu1 %v11087_v9  ;;  %7291 = vmatmul.mubr.f32.gmra.mxu0 %v8768_v8  ;;  %v9614_v8 = vsel %vm957_vm0, %v2497_v23, %v2498_v29  ;;  %11095 = vst [vmem:[#allocation189_spill] sm:$0xff] %v9627_v15  ;;  %v11099_v29 = vld [vmem:[#allocation139_spill] sm:$0xff] }
 0x19c   : > { %7192 = vmatprep.mubr.f32.mxu1 %v11089_v61  ;;  %7293 = vmatprep.mubr.f32.mxu0 %v8795_v4  ;;  %11093 = vst [vmem:[#allocation187_spill] sm:$0xff] %v9614_v8  ;;  %v9616_v37 = vpop.f32.mrf.mxu0 }
 0x19f   : > { %v9603_v63 = vpop.f32.mrf.mxu1  ;;  %7193 = vmatmul.mubr.f32.gmra.mxu1 %v9608_v17  ;;  %7294 = vmatmul.mubr.f32.gmra.mxu0 %v8815_v11  ;;  %v6186_v17 = vld [vmem:[%s10555_s4 + $0x3f0] sm:$0xff] }
 0x1a0   : > { %11090 = vst [vmem:[#allocation186_spill] sm:$0xff] %v9603_v63  ;;  %7195 = vmatprep.mubr.f32.mxu1 %v9614_v8  ;;  %7296 = vmatprep.mubr.f32.mxu0 %v11020_v59 }
 0x1a1   : > { %v9618_v61 = vpop.f32.mrf.mxu1 }
 0x1a2   : > { %11094 = vst [vmem:[#allocation188_spill] sm:$0xff] %v9618_v61  ;;  %v9622_v4 = vpop.f32.mrf.mxu0  ;;  %v11097_v61 = vld [vmem:[#allocation137_spill] sm:$0xff] }
 0x1a3   : > { %v9629_v11 = vpop.f32.mrf.mxu1  ;;  %7196 = vmatmul.mubr.f32.gmra.mxu1 %v9627_v15  ;;  %7297 = vmatmul.mubr.f32.gmra.mxu0 %v9576_v2  ;;  %v11103_v2 = vld [vmem:[#allocation141_spill] sm:$0xff] }
 0x1a4   : > { %11096 = vst [vmem:[#allocation190_spill] sm:$0xff] %v9629_v11  ;;  %v9633_v23 = vpop.f32.mrf.mxu0  ;;  %7299 = vmatprep.mubr.f32.mxu0 %v9583_v46  ;;  %7334 = vmatprep.mubr.f32.mxu1 %v11097_v61  ;;  %v11100_v11 = vld [vmem:[#allocation44_spill] sm:$0xff] }
 0x1a5   : > { %v9637_v59 = vpop.f32.mrf.mxu1  ;;  %v4185_v15 = vsel %vm957_vm0, %v11101_v21, %v11100_v11  ;;  %v11102_v46 = vld [vmem:[#allocation140_spill] sm:$0xff]  ;;  %v6202_v11 = vld [vmem:[%s10555_s4 + $0x470] sm:$0xff] }
 0x1a6   : > { %11098 = vst [vmem:[#allocation137_spill] sm:$0xff] %v9637_v59 }
 0x1a7   : > { %v9639_v63 = vpop.f32.mrf.mxu0  ;;  %v6920_v8 = vpop.f32.mrf.mxu1  ;;  %7300 = vmatmul.mubr.f32.gmra.mxu0 %v9270_v28  ;;  %7335 = vmatmul.mubr.f32.vlgmr.msra.gmra.mxu1 %v11099_v29 }
 0x1a8   : > { %7337 = vmatprep.mubr.f32.mxu1 %v11102_v46  ;;  %7438 = vmatprep.mubr.f32.mxu0 %v4185_v15  ;;  %v1746_v28 = vadd.f32 %v6920_v8, %v9400_v10  ;;  %v6185_v46 = vld [vmem:[%s10555_s4 + $0x3e8] sm:$0xff]  ;;  %v11104_v10 = vld [vmem:[#allocation142_spill] sm:$0xff] }
 0x1a9   : > { %v9651_v61 = vpop.f32.mrf.mxu0  ;;  %v1458_v59 = vpop.f32.mrf.mxu1  ;;  %7511 = vmatpush3.msra.mxu1 %v9518_v35 }
 0x1aa   : > { %7512 = vmatprep.subr.mxu1 %v6186_v17  ;;  %v1745_v15 = vadd.f32 %v1458_v59, %v9414_v50  ;;  %v11105_v50 = vld [vmem:[#allocation143_spill] sm:$0xff] }
 0x1ab   : > { %v6923_v29 = vpop.f32.mrf.mxu1  ;;  %v7024_v9 = vpop.f32.mrf.mxu0  ;;  %7338 = vmatmul.mubr.f32.gmra.mxu1 %v11103_v2  ;;  %7439 = vmatmul.mubr.f32.vlgmr.msra.gmra.mxu0 %v11028_v36 }
 0x1ac   : > { %v9664_v35 = vadd.f32 %v7024_v9, %v1746_v28  ;;  %7615 = vmatpush3.msra.mxu0 %v9534_v1  ;;  %7340 = vmatprep.mubr.f32.mxu1 %v11104_v10  ;;  %v1748_v2 = vadd.f32 %v6923_v29, %v9428_v44  ;;  %v6201_v1 = vld [vmem:[%s10555_s4 + $0x468] sm:$0xff]  ;;  %v11106_v28 = vld [vmem:[#allocation144_spill] sm:$0xff] }
 0x1ad   : > { %7441 = vmatprep.mubr.f32.mxu0 %v11029_v49  ;;  %v1468_v8 = vpop.f32.mrf.mxu1  ;;  %v2021_v36 = vpop.f32.mrf.mxu0  ;;  %7513 = vmatpush3.msra.mxu1 %v6186_v17  ;;  %v6184_v17 = vld [vmem:[%s10555_s4 + $0x3e0] sm:$0xff] }
 0x1ae   : > { %v9670_v21 = vadd.f32 %v2021_v36, %v1745_v15  ;;  %7616 = vmatprep.subr.mxu0 %v6202_v11  ;;  %7514 = vmatprep.subr.mxu1 %v6185_v46  ;;  %v1747_v9 = vadd.f32 %v1468_v8, %v9442_v24  ;;  %v6200_v24 = vld [vmem:[%s10555_s4 + $0x460] sm:$0xff] }
 0x1af   : > { %v6926_v26 = vpop.f32.mrf.mxu1  ;;  %v7027_v41 = vpop.f32.mrf.mxu0  ;;  %7341 = vmatmul.mubr.f32.gmra.mxu1 %v11105_v50  ;;  %7442 = vmatmul.mubr.f32.gmra.mxu0 %v11030_v20  ;;  %v11107_v50 = vld [vmem:[#allocation145_spill] sm:$0xff] }
 0x1b0   : > { %v9681_v44 = vadd.f32 %v7027_v41, %v1748_v2  ;;  %7343 = vmatprep.mubr.f32.mxu1 %v11106_v28  ;;  %7444 = vmatprep.mubr.f32.mxu0 %v11031_v5  ;;  %v1750_v20 = vadd.f32 %v6926_v26, %v9448_v12  ;;  %v6183_v5 = vld [vmem:[%s10555_s4 + $0x3d8] sm:$0xff]  ;;  %v11108_v41 = vld [vmem:[#allocation146_spill] sm:$0xff] }
 0x1b1   : > { %v1478_v59 = vpop.f32.mrf.mxu1  ;;  %v2031_v49 = vpop.f32.mrf.mxu0  ;;  %7617 = vmatpush3.msra.mxu0 %v6202_v11  ;;  %7515 = vmatpush3.msra.mxu1 %v6185_v46 }
 0x1b2   : > { %v9686_v29 = vadd.f32 %v2031_v49, %v1747_v9  ;;  %7618 = vmatprep.subr.mxu0 %v6201_v1  ;;  %7516 = vmatprep.subr.mxu1 %v6184_v17  ;;  %v1749_v26 = vadd.f32 %v1478_v59, %v9462_v56  ;;  %v11109_v49 = vld [vmem:[#allocation147_spill] sm:$0xff] }
 0x1b3   : > { %v6929_v15 = vpop.f32.mrf.mxu1  ;;  %v7030_v36 = vpop.f32.mrf.mxu0  ;;  %7344 = vmatmul.mubr.f32.gmra.mxu1 %v11107_v50  ;;  %7445 = vmatmul.mubr.f32.gmra.mxu0 %v11032_v31  ;;  %v6199_v56 = vld [vmem:[%s10555_s4 + $0x458] sm:$0xff] }
 0x1b4   : > { %v9697_v12 = vadd.f32 %v7030_v36, %v1750_v20  ;;  %7346 = vmatprep.mubr.f32.mxu1 %v11108_v41  ;;  %7447 = vmatprep.mubr.f32.mxu0 %v11033_v14  ;;  %v1752_v31 = vadd.f32 %v6929_v15, %v9474_v60  ;;  %v6182_v14 = vld [vmem:[%s10555_s4 + $0x3d0] sm:$0xff] }
 0x1b5   : > { %v1488_v2 = vpop.f32.mrf.mxu1  ;;  %v2041_v11 = vpop.f32.mrf.mxu0  ;;  %7619 = vmatpush3.msra.mxu0 %v6201_v1  ;;  %7517 = vmatpush3.msra.mxu1 %v6184_v17  ;;  %v11110_v17 = vld [vmem:[#allocation148_spill] sm:$0xff] }
 0x1b6   : > { %v9702_v46 = vadd.f32 %v2041_v11, %v1749_v26  ;;  %7620 = vmatprep.subr.mxu0 %v6200_v24  ;;  %7518 = vmatprep.subr.mxu1 %v6183_v5  ;;  %v1751_v60 = vadd.f32 %v1488_v2, %v9488_v25  ;;  %v11111_v2 = vld [vmem:[#allocation149_spill] sm:$0xff] }
 0x1b7   : > { %v6932_v8 = vpop.f32.mrf.mxu1  ;;  %v7033_v9 = vpop.f32.mrf.mxu0  ;;  %7347 = vmatmul.mubr.f32.gmra.mxu1 %v11109_v49  ;;  %7448 = vmatmul.mubr.f32.gmra.mxu0 %v8642_v22 }
 0x1b8   : > { %v9713_v1 = vadd.f32 %v7033_v9, %v1752_v31  ;;  %7349 = vmatprep.mubr.f32.mxu1 %v11110_v17  ;;  %7450 = vmatprep.mubr.f32.mxu0 %v8677_v39  ;;  %v1754_v22 = vadd.f32 %v6932_v8, %v9494_v6  ;;  %v6198_v39 = vld [vmem:[%s10555_s4 + $0x450] sm:$0xff]  ;;  %v6181_v6 = vld [vmem:[%s10555_s4 + $0x3c8] sm:$0xff] }
 0x1b9   : > { %v1498_v59 = vpop.f32.mrf.mxu1  ;;  %v2051_v20 = vpop.f32.mrf.mxu0  ;;  %7621 = vmatpush3.msra.mxu0 %v6200_v24  ;;  %7519 = vmatpush3.msra.mxu1 %v6183_v5  ;;  %v11112_v5 = vld [vmem:[#allocation150_spill] sm:$0xff] }
 0x1ba   : > { %v1753_v15 = vadd.f32 %v1498_v59, %v9508_v30  ;;  %v9719_v36 = vadd.f32 %v2051_v20, %v1751_v60  ;;  %7622 = vmatprep.subr.mxu0 %v6199_v56  ;;  %7520 = vmatprep.subr.mxu1 %v6182_v14  ;;  %v11113_v59 = vld [vmem:[#allocation151_spill] sm:$0xff] }
 0x1bb   : > { %v6935_v26 = vpop.f32.mrf.mxu1  ;;  %v7036_v25 = vpop.f32.mrf.mxu0  ;;  %7350 = vmatmul.mubr.f32.gmra.mxu1 %v11111_v2  ;;  %7451 = vmatmul.mubr.f32.gmra.mxu0 %v8703_v16 }
 0x1bc   : > { %v1756_v30 = vadd.f32 %v6935_v26, %v9522_v51  ;;  %v9730_v24 = vadd.f32 %v7036_v25, %v1754_v22  ;;  %7352 = vmatprep.mubr.f32.mxu1 %v11112_v5  ;;  %7453 = vmatprep.mubr.f32.mxu0 %v11034_v13  ;;  %v6197_v13 = vld [vmem:[%s10555_s4 + $0x448] sm:$0xff]  ;;  %v6180_v51 = vld [vmem:[%s10555_s4 + $0x3c0] sm:$0xff] }
 0x1bd   : > { %v1508_v11 = vpop.f32.mrf.mxu1  ;;  %v2061_v31 = vpop.f32.mrf.mxu0  ;;  %7623 = vmatpush3.msra.mxu0 %v6199_v56  ;;  %7521 = vmatpush3.msra.mxu1 %v6182_v14  ;;  %v11114_v14 = vld [vmem:[#allocation152_spill] sm:$0xff] }
 0x1be   : > { %v1755_v16 = vadd.f32 %v1508_v11, %v9536_v62  ;;  %v9735_v8 = vadd.f32 %v2061_v31, %v1753_v15  ;;  %7624 = vmatprep.subr.mxu0 %v6198_v39  ;;  %7522 = vmatprep.subr.mxu1 %v6181_v6  ;;  %v11115_v11 = vld [vmem:[#allocation153_spill] sm:$0xff] }
 0x1bf   : > { %v6938_v9 = vpop.f32.mrf.mxu1  ;;  %v7039_v60 = vpop.f32.mrf.mxu0  ;;  %7353 = vmatmul.mubr.f32.gmra.mxu1 %v11113_v59  ;;  %7454 = vmatmul.mubr.f32.gmra.mxu0 %v11036_v32 }
 0x1c0   : > { %v1758_v62 = vadd.f32 %v6938_v9, %v9542_v55  ;;  %v9746_v56 = vadd.f32 %v7039_v60, %v1756_v30  ;;  %7355 = vmatprep.mubr.f32.mxu1 %v11114_v14  ;;  %7456 = vmatprep.mubr.f32.mxu0 %v11037_v54  ;;  %v6196_v54 = vld [vmem:[%s10555_s4 + $0x440] sm:$0xff]  ;;  %v6179_v55 = vld [vmem:[%s10555_s4 + $0x3b8] sm:$0xff] }
 0x1c1   : > { %v1518_v20 = vpop.f32.mrf.mxu1  ;;  %v2071_v22 = vpop.f32.mrf.mxu0  ;;  %7625 = vmatpush3.msra.mxu0 %v6198_v39  ;;  %7523 = vmatpush3.msra.mxu1 %v6181_v6  ;;  %v11116_v6 = vld [vmem:[#allocation154_spill] sm:$0xff] }
 0x1c2   : > { %v1757_v32 = vadd.f32 %v1518_v20, %v9551_v57  ;;  %v9751_v15 = vadd.f32 %v2071_v22, %v1755_v16  ;;  %7626 = vmatprep.subr.mxu0 %v6197_v13  ;;  %7524 = vmatprep.subr.mxu1 %v6180_v51  ;;  %v11117_v20 = vld [vmem:[#allocation155_spill] sm:$0xff] }
 0x1c3   : > { %v6941_v26 = vpop.f32.mrf.mxu1  ;;  %v7042_v25 = vpop.f32.mrf.mxu0  ;;  %7356 = vmatmul.mubr.f32.gmra.mxu1 %v11115_v11  ;;  %7457 = vmatmul.mubr.f32.gmra.mxu0 %v8799_v42 }
 0x1c4   : > { %v1760_v57 = vadd.f32 %v6941_v26, %v9557_v33  ;;  %v9762_v39 = vadd.f32 %v7042_v25, %v1758_v62  ;;  %7358 = vmatprep.mubr.f32.mxu1 %v11116_v6  ;;  %7459 = vmatprep.mubr.f32.mxu0 %v8822_v18  ;;  %v6195_v18 = vld [vmem:[%s10555_s4 + $0x438] sm:$0xff]  ;;  %v6178_v33 = vld [vmem:[%s10555_s4 + $0x3b0] sm:$0xff] }
 0x1c5   : > { %v1528_v30 = vpop.f32.mrf.mxu1  ;;  %v2081_v31 = vpop.f32.mrf.mxu0  ;;  %7627 = vmatpush3.msra.mxu0 %v6197_v13  ;;  %7525 = vmatpush3.msra.mxu1 %v6180_v51  ;;  %v11118_v51 = vld [vmem:[#allocation156_spill] sm:$0xff] }
 0x1c6   : > { %v1759_v42 = vadd.f32 %v1528_v30, %v9571_v48  ;;  %v9767_v16 = vadd.f32 %v2081_v31, %v1757_v32  ;;  %7628 = vmatprep.subr.mxu0 %v6196_v54  ;;  %7526 = vmatprep.subr.mxu1 %v6179_v55  ;;  %v11119_v30 = vld [vmem:[#allocation157_spill] sm:$0xff] }
 0x1c7   : > { %v6944_v9 = vpop.f32.mrf.mxu1  ;;  %v7045_v60 = vpop.f32.mrf.mxu0  ;;  %7359 = vmatmul.mubr.f32.gmra.mxu1 %v11117_v20  ;;  %7460 = vmatmul.mubr.f32.gmra.mxu0 %v8839_v19 }
 0x1c8   : > { %v1762_v48 = vadd.f32 %v6944_v9, %v9580_v58  ;;  %v9778_v13 = vadd.f32 %v7045_v60, %v1760_v57  ;;  %7361 = vmatprep.mubr.f32.mxu1 %v11118_v51  ;;  %7462 = vmatprep.mubr.f32.mxu0 %v8857_v27  ;;  %v6194_v27 = vld [vmem:[%s10555_s4 + $0x430] sm:$0xff]  ;;  %v6177_v58 = vld [vmem:[%s10555_s4 + $0x3a8] sm:$0xff] }
 0x1c9   : > { %v1538_v62 = vpop.f32.mrf.mxu1  ;;  %v2091_v22 = vpop.f32.mrf.mxu0  ;;  %7629 = vmatpush3.msra.mxu0 %v6196_v54  ;;  %7527 = vmatpush3.msra.mxu1 %v6179_v55  ;;  %v11120_v55 = vld [vmem:[#allocation158_spill] sm:$0xff] }
 0x1ca   : > { %v1761_v19 = vadd.f32 %v1538_v62, %v9591_v47  ;;  %v9783_v32 = vadd.f32 %v2091_v22, %v1759_v42  ;;  %7630 = vmatprep.subr.mxu0 %v6195_v18  ;;  %7528 = vmatprep.subr.mxu1 %v6178_v33  ;;  %v11121_v62 = vld [vmem:[#allocation159_spill] sm:$0xff] }
 0x1cb   : > { %v6947_v26 = vpop.f32.mrf.mxu1  ;;  %v7048_v25 = vpop.f32.mrf.mxu0  ;;  %7362 = vmatmul.mubr.f32.gmra.mxu1 %v11119_v30  ;;  %7463 = vmatmul.mubr.f32.gmra.mxu0 %v11041_v38 }
 0x1cc   : > { %v1764_v47 = vadd.f32 %v6947_v26, %v9599_v34  ;;  %v9794_v54 = vadd.f32 %v7048_v25, %v1762_v48  ;;  %7364 = vmatprep.mubr.f32.mxu1 %v11120_v55  ;;  %7465 = vmatprep.mubr.f32.mxu0 %v11043_v53  ;;  %v6193_v34 = vld [vmem:[%s10555_s4 + $0x428] sm:$0xff]  ;;  %v6176_v53 = vld [vmem:[%s10555_s4 + $0x3a0] sm:$0xff] }
 0x1cd   : > { %v1548_v57 = vpop.f32.mrf.mxu1  ;;  %v2101_v31 = vpop.f32.mrf.mxu0  ;;  %7631 = vmatpush3.msra.mxu0 %v6195_v18  ;;  %7529 = vmatpush3.msra.mxu1 %v6178_v33  ;;  %v11122_v33 = vld [vmem:[#allocation160_spill] sm:$0xff] }
 0x1ce   : > { %v1763_v38 = vadd.f32 %v1548_v57, %v9616_v37  ;;  %v9799_v42 = vadd.f32 %v2101_v31, %v1761_v19  ;;  %7632 = vmatprep.subr.mxu0 %v6194_v27  ;;  %7530 = vmatprep.subr.mxu1 %v6177_v58  ;;  %v11123_v57 = vld [vmem:[#allocation161_spill] sm:$0xff] }
 0x1cf   : > { %v6950_v9 = vpop.f32.mrf.mxu1  ;;  %v7051_v60 = vpop.f32.mrf.mxu0  ;;  %7365 = vmatmul.mubr.f32.gmra.mxu1 %v11121_v62  ;;  %7466 = vmatmul.mubr.f32.gmra.mxu0 %v11044_v40 }
 0x1d0   : > { %v1766_v37 = vadd.f32 %v6950_v9, %v9622_v4  ;;  %v9810_v18 = vadd.f32 %v7051_v60, %v1764_v47  ;;  %7367 = vmatprep.mubr.f32.mxu1 %v11122_v33  ;;  %7468 = vmatprep.mubr.f32.mxu0 %v11046_v3  ;;  %v6192_v4 = vld [vmem:[%s10555_s4 + $0x420] sm:$0xff]  ;;  %v6175_v3 = vld [vmem:[%s10555_s4 + $0x398] sm:$0xff] }
 0x1d1   : > { %v1558_v48 = vpop.f32.mrf.mxu1  ;;  %v2111_v22 = vpop.f32.mrf.mxu0  ;;  %7633 = vmatpush3.msra.mxu0 %v6194_v27  ;;  %7531 = vmatpush3.msra.mxu1 %v6177_v58  ;;  %v11124_v58 = vld [vmem:[#allocation162_spill] sm:$0xff] }
 0x1d2   : > { %v1765_v40 = vadd.f32 %v1558_v48, %v9633_v23  ;;  %v9815_v19 = vadd.f32 %v2111_v22, %v1763_v38  ;;  %7634 = vmatprep.subr.mxu0 %v6193_v34  ;;  %7532 = vmatprep.subr.mxu1 %v6176_v53  ;;  %v11125_v48 = vld [vmem:[#allocation163_spill] sm:$0xff]  ;;  %v11128_v22 = vld [vmem:[#allocation28_spill] sm:$0xff] }
 0x1d3   : > { %v6953_v26 = vpop.f32.mrf.mxu1  ;;  %v7054_v25 = vpop.f32.mrf.mxu0  ;;  %7368 = vmatmul.mubr.f32.gmra.mxu1 %v11123_v57  ;;  %7469 = vmatmul.mubr.f32.gmra.mxu0 %v11048_v52 }
 0x1d4   : > { %v1768_v23 = vadd.f32 %v6953_v26, %v9639_v63  ;;  %v9826_v27 = vadd.f32 %v7054_v25, %v1766_v37  ;;  %7370 = vmatprep.mubr.f32.mxu1 %v11124_v58  ;;  %7471 = vmatprep.mubr.f32.mxu0 %v11049_v45  ;;  %v6191_v45 = vld [vmem:[%s10555_s4 + $0x418] sm:$0xff]  ;;  %v6174_v63 = vld [vmem:[%s10555_s4 + $0x390] sm:$0xff] }
 0x1d5   : > { %v1568_v47 = vpop.f32.mrf.mxu1  ;;  %v2121_v31 = vpop.f32.mrf.mxu0  ;;  %7635 = vmatpush3.msra.mxu0 %v6193_v34  ;;  %7533 = vmatpush3.msra.mxu1 %v6176_v53 }
 0x1d6   : > { %v1767_v52 = vadd.f32 %v1568_v47, %v9651_v61  ;;  %v9831_v38 = vadd.f32 %v2121_v31, %v1765_v40  ;;  %7636 = vmatprep.subr.mxu0 %v6192_v4  ;;  %7534 = vmatprep.subr.mxu1 %v6175_v3  ;;  %v11127_v61 = vld [vmem:[#allocation164_spill] sm:$0xff]  ;;  %v11130_v47 = vld [vmem:[#allocation165_spill] sm:$0xff] }
 0x1d7   : > { %v6956_v9 = vpop.f32.mrf.mxu1  ;;  %v7057_v60 = vpop.f32.mrf.mxu0  ;;  %7371 = vmatmul.mubr.f32.gmra.mxu1 %v11125_v48  ;;  %7472 = vmatmul.mubr.f32.gmra.mxu0 %v11051_v0 }
 0x1d8   : > { %v9841_v34 = vadd.f32 %v7057_v60, %v1768_v23  ;;  %7373 = vmatprep.mubr.f32.mxu1 %v11127_v61  ;;  %7474 = vmatprep.mubr.f32.mxu0 %v11053_v7  ;;  %v1770_v0 = vadd.f32 %v6956_v9, %v11128_v22  ;;  %v11131_v23 = vld [vmem:[#allocation50_spill] sm:$0xff]  ;;  %v11135_v60 = vld [vmem:[#allocation56_spill] sm:$0xff] }
 0x1d9   : > { %v1578_v53 = vpop.f32.mrf.mxu1  ;;  %v2131_v37 = vpop.f32.mrf.mxu0  ;;  %7637 = vmatpush3.msra.mxu0 %v6192_v4  ;;  %7535 = vmatpush3.msra.mxu1 %v6175_v3  ;;  %v6190_v7 = vld [vmem:[%s10555_s4 + $0x410] sm:$0xff]  ;;  %v6173_v4 = vld [vmem:[%s10555_s4 + $0x388] sm:$0xff]  ;;  %v11132_v3 = vld [vmem:[#allocation36_spill] sm:$0xff] }
 0x1da   : > { %11126 = vst [vmem:[#allocation139_spill] sm:$0xff] %v9841_v34  ;;  %v9846_v40 = vadd.f32 %v2131_v37, %v1767_v52  ;;  %7638 = vmatprep.subr.mxu0 %v6191_v45  ;;  %7536 = vmatprep.subr.mxu1 %v6174_v63  ;;  %v1769_v31 = vadd.f32 %v1578_v53, %v11132_v3  ;;  %v11134_v9 = vld [vmem:[#allocation166_spill] sm:$0xff]  ;;  %v11138_v34 = vld [vmem:[#allocation167_spill] sm:$0xff]  ;;  %v11141_v3 = vld [vmem:[#allocation168_spill] sm:$0xff] }
 0x1db   : > { %v6959_v26 = vpop.f32.mrf.mxu1  ;;  %v7060_v25 = vpop.f32.mrf.mxu0  ;;  %7374 = vmatmul.mubr.f32.gmra.mxu1 %v11130_v47  ;;  %7475 = vmatmul.mubr.f32.gmra.mxu0 %v11131_v23  ;;  %v11136_v23 = vld [vmem:[#allocation42_spill] sm:$0xff] }
 0x1dc   : > { %11129 = vst [vmem:[#allocation44_spill] sm:$0xff] %v9846_v40  ;;  %v9857_v52 = vadd.f32 %v7060_v25, %v1770_v0  ;;  %7376 = vmatprep.mubr.f32.mxu1 %v11134_v9  ;;  %7477 = vmatprep.mubr.f32.mxu0 %v11135_v60  ;;  %v1772_v47 = vadd.f32 %v6959_v26, %v11136_v23  ;;  %v11139_v53 = vld [vmem:[#allocation62_spill] sm:$0xff]  ;;  %v6189_v0 = vld [vmem:[%s10555_s4 + $0x408] sm:$0xff]  ;;  %v11143_v23 = vld [vmem:[#allocation55_spill] sm:$0xff] }
 0x1dd   : > { %v1588_v37 = vpop.f32.mrf.mxu1  ;;  %v2141_v22 = vpop.f32.mrf.mxu0  ;;  %7639 = vmatpush3.msra.mxu0 %v6191_v45  ;;  %7537 = vmatpush3.msra.mxu1 %v6174_v63  ;;  %v6172_v45 = vld [vmem:[%s10555_s4 + $0x380] sm:$0xff]  ;;  %v11140_v63 = vld [vmem:[#allocation49_spill] sm:$0xff] }
 0x1de   : > { %11133 = vst [vmem:[#allocation140_spill] sm:$0xff] %v9857_v52  ;;  %v9862_v61 = vadd.f32 %v2141_v22, %v1769_v31  ;;  %7640 = vmatprep.subr.mxu0 %v6190_v7  ;;  %7538 = vmatprep.subr.mxu1 %v6173_v4  ;;  %v1771_v26 = vadd.f32 %v1588_v37, %v11140_v63  ;;  %v11142_v31 = vld [vmem:[#allocation68_spill] sm:$0xff]  ;;  %v11145_v52 = vld [vmem:[#allocation169_spill] sm:$0xff] }
 0x1df   : > { %v6962_v40 = vpop.f32.mrf.mxu1  ;;  %v7063_v48 = vpop.f32.mrf.mxu0  ;;  %7377 = vmatmul.mubr.f32.gmra.mxu1 %v11138_v34  ;;  %7478 = vmatmul.mubr.f32.gmra.mxu0 %v11139_v53  ;;  %v11147_v37 = vld [vmem:[#allocation61_spill] sm:$0xff] }
 0x1e0   : > { %11137 = vst [vmem:[#allocation142_spill] sm:$0xff] %v9862_v61  ;;  %v9873_v25 = vadd.f32 %v7063_v48, %v1772_v47  ;;  %7379 = vmatprep.mubr.f32.mxu1 %v11141_v3  ;;  %7480 = vmatprep.mubr.f32.mxu0 %v11142_v31  ;;  %v1774_v53 = vadd.f32 %v6962_v40, %v11143_v23  ;;  %v11146_v48 = vld [vmem:[#allocation74_spill] sm:$0xff]  ;;  %v6188_v47 = vld [vmem:[%s10555_s4 + $0x400] sm:$0xff] }
 0x1e1   : > { %v1598_v60 = vpop.f32.mrf.mxu1  ;;  %v2151_v22 = vpop.f32.mrf.mxu0  ;;  %7641 = vmatpush3.msra.mxu0 %v6190_v7  ;;  %7539 = vmatpush3.msra.mxu1 %v6173_v4  ;;  %v11149_v4 = vld [vmem:[#allocation170_spill] sm:$0xff]  ;;  %v11150_v40 = vld [vmem:[#allocation80_spill] sm:$0xff] }
 0x1e2   : > { %v9878_v34 = vadd.f32 %v2151_v22, %v1771_v26  ;;  %7642 = vmatprep.subr.mxu0 %v6189_v0  ;;  %7540 = vmatprep.subr.mxu1 %v6172_v45  ;;  %v1773_v63 = vadd.f32 %v1598_v60, %v11147_v37  ;;  %v11151_v22 = vld [vmem:[#allocation67_spill] sm:$0xff]  ;;  %v11154_v60 = vld [vmem:[#allocation86_spill] sm:$0xff] }
 0x1e3   : > { %v6965_v9 = vpop.f32.mrf.mxu1  ;;  %v7066_v61 = vpop.f32.mrf.mxu0  ;;  %7380 = vmatmul.mubr.f32.gmra.mxu1 %v11145_v52  ;;  %7481 = vmatmul.mubr.f32.gmra.mxu0 %v11146_v48 }
 0x1e4   : > { %11144 = vst [vmem:[#allocation144_spill] sm:$0xff] %v9878_v34  ;;  %v9886_v7 = vadd.f32 %v7066_v61, %v1774_v53  ;;  %7382 = vmatprep.mubr.f32.mxu1 %v11149_v4  ;;  %7483 = vmatprep.mubr.f32.mxu0 %v11150_v40  ;;  %v1776_v23 = vadd.f32 %v6965_v9, %v11151_v22  ;;  %v11153_v34 = vld [vmem:[#allocation171_spill] sm:$0xff]  ;;  %v11155_v61 = vld [vmem:[#allocation73_spill] sm:$0xff]  ;;  %v11157_v40 = vld [vmem:[#allocation172_spill] sm:$0xff] }
 0x1e5   : > { %v1608_v26 = vpop.f32.mrf.mxu1  ;;  %v2161_v31 = vpop.f32.mrf.mxu0  ;;  %7643 = vmatpush3.msra.mxu0 %v6189_v0  ;;  %7541 = vmatpush3.msra.mxu1 %v6172_v45  ;;  %v11158_v4 = vld [vmem:[#allocation91_spill] sm:$0xff] }
 0x1e6   : > { %11148 = vst [vmem:[#allocation145_spill] sm:$0xff] %v9886_v7  ;;  %v9891_v52 = vadd.f32 %v2161_v31, %v1773_v63  ;;  %7644 = vmatprep.subr.mxu0 %v6188_v47  ;;  %v1775_v53 = vadd.f32 %v1608_v26, %v11155_v61  ;;  %v11159_v9 = vld [vmem:[#allocation79_spill] sm:$0xff]  ;;  %v11163_v26 = vld [vmem:[#allocation85_spill] sm:$0xff]  ;;  %v11165_v61 = vld [vmem:[#allocation174_spill] sm:$0xff] }
 0x1e7   : > { %v6968_v48 = vpop.f32.mrf.mxu1  ;;  %v7069_v3 = vpop.f32.mrf.mxu0  ;;  %7383 = vmatmul.mubr.f32.gmra.mxu1 %v11153_v34  ;;  %7484 = vmatmul.mubr.f32.gmra.mxu0 %v11154_v60  ;;  %v11161_v34 = vld [vmem:[#allocation173_spill] sm:$0xff]  ;;  %v11162_v60 = vld [vmem:[#allocation96_spill] sm:$0xff] }
 0x1e8   : > { %11152 = vst [vmem:[#allocation146_spill] sm:$0xff] %v9891_v52  ;;  %v9896_v37 = vadd.f32 %v7069_v3, %v1776_v23  ;;  %7385 = vmatprep.mubr.f32.mxu1 %v11157_v40  ;;  %7486 = vmatprep.mubr.f32.mxu0 %v11158_v4  ;;  %v1778_v63 = vadd.f32 %v6968_v48, %v11159_v9  ;;  %v11166_v4 = vld [vmem:[#allocation101_spill] sm:$0xff] }
 0x1e9   : > { %v1618_v0 = vpop.f32.mrf.mxu1  ;;  %v2171_v45 = vpop.f32.mrf.mxu0  ;;  %7645 = vmatpush3.msra.mxu0 %v6188_v47  ;;  %v11193_v7 = vld [vmem:[#allocation185_spill] sm:$0xff] }
 0x1ea   : > { %11156 = vst [vmem:[#allocation147_spill] sm:$0xff] %v9896_v37  ;;  %v9901_v31 = vadd.f32 %v2171_v45, %v1775_v53  ;;  %v1777_v3 = vadd.f32 %v1618_v0, %v11163_v26  ;;  %v11167_v37 = vld [vmem:[#allocation106_spill] sm:$0xff]  ;;  %v11174_v26 = vld [vmem:[#allocation113_spill] sm:$0xff] }
 0x1eb   : > { %v6971_v22 = vpop.f32.mrf.mxu1  ;;  %v7072_v52 = vpop.f32.mrf.mxu0  ;;  %7386 = vmatmul.mubr.f32.gmra.mxu1 %v11161_v34  ;;  %7487 = vmatmul.mubr.f32.gmra.mxu0 %v11162_v60  ;;  %v11170_v34 = vld [vmem:[#allocation107_spill] sm:$0xff]  ;;  %v11171_v60 = vld [vmem:[#allocation112_spill] sm:$0xff] }
 0x1ec   : > { %11160 = vst [vmem:[#allocation148_spill] sm:$0xff] %v9901_v31  ;;  %v9906_v23 = vadd.f32 %v7072_v52, %v1778_v63  ;;  %7388 = vmatprep.mubr.f32.mxu1 %v11165_v61  ;;  %7489 = vmatprep.mubr.f32.mxu0 %v11166_v4  ;;  %v1780_v48 = vadd.f32 %v6971_v22, %v11167_v37  ;;  %v11169_v31 = vld [vmem:[#allocation175_spill] sm:$0xff]  ;;  %v11173_v63 = vld [vmem:[#allocation177_spill] sm:$0xff] }
 0x1ed   : > { %v1628_v40 = vpop.f32.mrf.mxu1  ;;  %v2181_v47 = vpop.f32.mrf.mxu0 }
 0x1ee   : > { %11164 = vst [vmem:[#allocation149_spill] sm:$0xff] %v9906_v23  ;;  %v9911_v53 = vadd.f32 %v2181_v47, %v1777_v3  ;;  %v1779_v0 = vadd.f32 %v1628_v40, %v11171_v60  ;;  %v11175_v23 = vld [vmem:[#allocation118_spill] sm:$0xff]  ;;  %v11181_v60 = vld [vmem:[#allocation124_spill] sm:$0xff] }
 0x1ef   : > { %v6974_v45 = vpop.f32.mrf.mxu1  ;;  %v7075_v9 = vpop.f32.mrf.mxu0  ;;  %7389 = vmatmul.mubr.f32.gmra.mxu1 %v11169_v31  ;;  %7490 = vmatmul.mubr.f32.gmra.mxu0 %v11170_v34  ;;  %v11178_v34 = vld [vmem:[#allocation134_spill] sm:$0xff]  ;;  %v11182_v31 = vld [vmem:[#allocation21_spill] sm:$0xff] }
 0x1f0   : > { %11168 = vst [vmem:[#allocation150_spill] sm:$0xff] %v9911_v53  ;;  %v9916_v52 = vadd.f32 %v7075_v9, %v1780_v48  ;;  %7391 = vmatprep.mubr.f32.mxu1 %v11173_v63  ;;  %7492 = vmatprep.mubr.f32.mxu0 %v11174_v26  ;;  %v1782_v37 = vadd.f32 %v6974_v45, %v11175_v23  ;;  %v11177_v53 = vld [vmem:[#allocation179_spill] sm:$0xff]  ;;  %v11180_v9 = vld [vmem:[#allocation180_spill] sm:$0xff] }
 0x1f1   : > { %v1638_v4 = vpop.f32.mrf.mxu1  ;;  %v2191_v61 = vpop.f32.mrf.mxu0 }
 0x1f2   : > { %11172 = vst [vmem:[#allocation151_spill] sm:$0xff] %v9916_v52  ;;  %v9921_v22 = vadd.f32 %v2191_v61, %v1779_v0  ;;  %v1781_v40 = vadd.f32 %v1638_v4, %v11178_v34 }
 0x1f3   : > { %v6977_v3 = vpop.f32.mrf.mxu1  ;;  %v7078_v47 = vpop.f32.mrf.mxu0  ;;  %7392 = vmatmul.mubr.f32.gmra.mxu1 %v11177_v53  ;;  %7493 = vmatmul.mubr.f32.gmra.mxu0 %v11080_v43  ;;  %v11185_v53 = vld [vmem:[#allocation129_spill] sm:$0xff] }
 0x1f4   : > { %11176 = vst [vmem:[#allocation152_spill] sm:$0xff] %v9921_v22  ;;  %v9926_v48 = vadd.f32 %v7078_v47, %v1782_v37  ;;  %7394 = vmatprep.mubr.f32.mxu1 %v11180_v9  ;;  %7495 = vmatprep.mubr.f32.mxu0 %v11181_v60  ;;  %v1784_v23 = vadd.f32 %v6977_v3, %v11182_v31  ;;  %v11184_v22 = vld [vmem:[#allocation181_spill] sm:$0xff]  ;;  %v11187_v37 = vld [vmem:[#allocation22_spill] sm:$0xff]  ;;  %v11188_v9 = vld [vmem:[#allocation184_spill] sm:$0xff] }
 0x1f5   : > { %v1648_v26 = vpop.f32.mrf.mxu1  ;;  %v2201_v63 = vpop.f32.mrf.mxu0  ;;  %v11186_v43 = vld [vmem:[#allocation37_spill] sm:$0xff]  ;;  %v11189_v60 = vld [vmem:[#allocation132_spill] sm:$0xff] }
 0x1f6   : > { %11179 = vst [vmem:[#allocation153_spill] sm:$0xff] %v9926_v48  ;;  %v9931_v61 = vadd.f32 %v2201_v63, %v1781_v40  ;;  %v3525_v4 = vrot.slane %v11186_v43, 1  ;;  %v1783_v47 = vadd.f32 %v1648_v26, %v11187_v37  ;;  %v11190_v63 = vld [vmem:[#allocation26_spill] sm:$0xff]  ;;  %v11194_v43 = vld [vmem:[#allocation133_spill] sm:$0xff]  ;;  %v11195_v26 = vld [vmem:[#allocation183_spill] sm:$0xff] }
 0x1f7   : > { %v6980_v45 = vpop.f32.mrf.mxu1  ;;  %v7081_v0 = vpop.f32.mrf.mxu0  ;;  %7395 = vmatmul.mubr.f32.gmra.mxu1 %v11184_v22  ;;  %7496 = vmatmul.mubr.f32.gmra.mxu0 %v11185_v53  ;;  %v11198_v37 = vld [vmem:[#allocation43_spill] sm:$0xff] }
 0x1f8   : > { %11183 = vst [vmem:[#allocation154_spill] sm:$0xff] %v9931_v61  ;;  %v9937_v34 = vadd.f32 %v7081_v0, %v1784_v23  ;;  %7397 = vmatprep.mubr.f32.mxu1 %v11188_v9  ;;  %7498 = vmatprep.mubr.f32.mxu0 %v11189_v60  ;;  %v1786_v3 = vadd.f32 %v6980_v45, %v11190_v63  ;;  %v11192_v61 = vld [vmem:[#allocation5_spill] sm:$0xff]  ;;  %v11200_v45 = vld [vmem:[#allocation16_spill] sm:$0xff]  ;;  %v11201_v63 = vld [vmem:[#allocation178_spill] sm:$0xff] }
 0x1f9   : > { %v1658_v48 = vpop.f32.mrf.mxu1  ;;  %v2211_v31 = vpop.f32.mrf.mxu0  ;;  %v3526_v22 = vrot.slane %v11192_v61, 1  ;;  %v9950_v0 = vsel %vm1889_vm1, %v11195_v26, %v3525_v4  ;;  %v9958_v61 = vrot.slane %v11201_v63, 1 }
 0x1fa   : > { %v9942_v40 = vadd.f32 %v2211_v31, %v1783_v47  ;;  %11197 = vst [vmem:[#allocation156_spill] sm:$0xff] %v9950_v0  ;;  %v1785_v60 = vadd.f32 %v1658_v48, %v11198_v37 }
 0x1fb   : > { %v6983_v52 = vpop.f32.mrf.mxu1  ;;  %v7084_v53 = vpop.f32.mrf.mxu0  ;;  %7398 = vmatmul.mubr.f32.gmra.mxu1 %v11193_v7  ;;  %7499 = vmatmul.mubr.f32.gmra.mxu0 %v11194_v43  ;;  %11202 = vst [vmem:[#allocation158_spill] sm:$0xff] %v9958_v61  ;;  %v11203_v7 = vld [vmem:[#allocation4_spill] sm:$0xff]  ;;  %v9965_v26 = vsel %vm1889_vm1, %v3525_v4, %v3526_v22  ;;  %v9972_v37 = vsel %vm1889_vm1, %v3526_v22, %v9958_v61 }
 0x1fc   : > { %11191 = vst [vmem:[#allocation155_spill] sm:$0xff] %v9942_v40  ;;  %v9953_v9 = vadd.f32 %v7084_v53, %v1786_v3  ;;  %7400 = vmatprep.mubr.f32.mxu1 %v9950_v0  ;;  %7501 = vmatprep.mubr.f32.mxu0 %v11200_v45  ;;  %v1788_v43 = vadd.f32 %v6983_v52, %v11203_v7  ;;  %11205 = vst [vmem:[#allocation160_spill] sm:$0xff] %v9965_v26  ;;  %v11206_v53 = vld [vmem:[#allocation187_spill] sm:$0xff]  ;;  %v11209_v52 = vld [vmem:[#allocation189_spill] sm:$0xff] }
 0x1fd   : > { %v1668_v47 = vpop.f32.mrf.mxu1  ;;  %v2221_v31 = vpop.f32.mrf.mxu0  ;;  %11207 = vst [vmem:[#allocation161_spill] sm:$0xff] %v9972_v37  ;;  %v11208_v45 = vld [vmem:[#allocation119_spill] sm:$0xff] }
 0x1fe   : > { %11199 = vst [vmem:[#allocation157_spill] sm:$0xff] %v9953_v9  ;;  %v9961_v40 = vadd.f32 %v2221_v31, %v1785_v60  ;;  %v1787_v63 = vadd.f32 %v1668_v47, %v11208_v45  ;;  %v11210_v31 = vld [vmem:[#allocation186_spill] sm:$0xff]  ;;  %v11214_v45 = vld [vmem:[#allocation188_spill] sm:$0xff] }
 0x1ff   : > { %v6986_v48 = vpop.f32.mrf.mxu1  ;;  %v7087_v3 = vpop.f32.mrf.mxu0  ;;  %7401 = vmatmul.mubr.f32.gmra.mxu1 %v9965_v26  ;;  %7502 = vmatmul.mubr.f32.gmra.mxu0 %v11206_v53  ;;  %v11211_v53 = vld [vmem:[#allocation136_spill] sm:$0xff]  ;;  %v11213_v9 = vld [vmem:[#allocation182_spill] sm:$0xff] }
 0x200   : > { %11204 = vst [vmem:[#allocation159_spill] sm:$0xff] %v9961_v40  ;;  %v9975_v7 = vadd.f32 %v7087_v3, %v1788_v43  ;;  %7403 = vmatprep.mubr.f32.mxu1 %v9972_v37  ;;  %7504 = vmatprep.mubr.f32.mxu0 %v11209_v52  ;;  %v1790_v0 = vadd.f32 %v6986_v48, %v11210_v31  ;;  %v11212_v40 = vld [vmem:[#allocation13_spill] sm:$0xff]  ;;  %v11217_v31 = vld [vmem:[#allocation190_spill] sm:$0xff] }
 0x201   : > { %v1678_v4 = vpop.f32.mrf.mxu1  ;;  %v2231_v60 = vpop.f32.mrf.mxu0  ;;  %v3575_v22 = vsel %vm1889_vm1, %v9958_v61, %v11211_v53  ;;  %v4140_v47 = vsel %vm957_vm0, %v11213_v9, %v11212_v40 }
 0x202   : > { %v9980_v26 = vadd.f32 %v2231_v60, %v1787_v63  ;;  %v1789_v52 = vadd.f32 %v1678_v4, %v11214_v45  ;;  %v11216_v63 = vld [vmem:[#allocation40_spill] sm:$0xff]  ;;  %v11221_v45 = vld [vmem:[#allocation53_spill] sm:$0xff] }
 0x203   : > { %v6989_v43 = vpop.f32.mrf.mxu1  ;;  %v7090_v3 = vpop.f32.mrf.mxu0  ;;  %7404 = vmatmul.mubr.f32.gmra.mxu1 %v3575_v22  ;;  %7505 = vmatmul.mubr.f32.gmra.mxu0 %v4140_v47  ;;  %v11219_v22 = vld [vmem:[#allocation48_spill] sm:$0xff]  ;;  %v11220_v47 = vld [vmem:[#allocation137_spill] sm:$0xff] }
 0x204   : > { %v9991_v37 = vadd.f32 %v7090_v3, %v1790_v0  ;;  %7542 = vmatprep.mubr.f32.mxu1 %v11216_v63  ;;  %7507 = vmatprep.mubr.f32.mxu0 %v11212_v40  ;;  %v1792_v53 = vadd.f32 %v6989_v43, %v11217_v31  ;;  %v11222_v63 = vld [vmem:[#allocation141_spill] sm:$0xff] }
 0x205   : > { %v1688_v48 = vpop.f32.mrf.mxu1  ;;  %v2241_v60 = vpop.f32.mrf.mxu0 }
 0x206   : > { %11215 = vst [vmem:[#allocation162_spill] sm:$0xff] %v9991_v37  ;;  %v9996_v61 = vadd.f32 %v2241_v60, %v1789_v52  ;;  %v1791_v4 = vadd.f32 %v1688_v48, %v11220_v47 }
 0x207   : > { %v7093_v23 = vpop.f32.mrf.mxu0  ;;  %v7128_v9 = vpop.f32.mrf.mxu1  ;;  %7508 = vmatmul.mubr.f32.gmra.mxu0 %v11212_v40  ;;  %7543 = vmatmul.mubr.f32.vlgmr.msra.gmra.mxu1 %v11219_v22 }
 0x208   : > { %11218 = vst [vmem:[#allocation28_spill] sm:$0xff] %v9996_v61  ;;  %v10001_v0 = vadd.f32 %v7093_v23, %v1792_v53  ;;  %v2919_v3 = vadd.f32 %v7128_v9, %v9664_v35  ;;  %7545 = vmatprep.mubr.f32.mxu1 %v11221_v45  ;;  %7646 = vmatprep.mubr.f32.mxu0 %v11222_v63  ;;  %v11223_v61 = vld [vmem:[#allocation60_spill] sm:$0xff]  ;;  %v11224_v35 = vld [vmem:[#allocation65_spill] sm:$0xff]  ;;  %v11225_v53 = vld [vmem:[#allocation143_spill] sm:$0xff] }
 0x209   : > { %v2251_v37 = vpop.f32.mrf.mxu0  ;;  %v2631_v43 = vpop.f32.mrf.mxu1  ;;  %v11226_v45 = vld [vmem:[#allocation72_spill] sm:$0xff] }
 0x20a   : > { %v10006_v52 = vadd.f32 %v2251_v37, %v1791_v4  ;;  %v2918_v60 = vadd.f32 %v2631_v43, %v9670_v21 }
 0x20b   : > { %v7131_v31 = vpop.f32.mrf.mxu1  ;;  %v7232_v40 = vpop.f32.mrf.mxu0  ;;  %7546 = vmatmul.mubr.f32.gmra.mxu1 %v11223_v61  ;;  %7647 = vmatmul.mubr.f32.vlgmr.msra.gmra.mxu0 %v11104_v10  ;;  %v11227_v61 = vld [vmem:[#allocation77_spill] sm:$0xff] }
 0x20c   : > { %v2921_v23 = vadd.f32 %v7131_v31, %v9681_v44  ;;  %v10012_v48 = vadd.f32 %v7232_v40, %v2919_v3  ;;  %7548 = vmatprep.mubr.f32.mxu1 %v11224_v35  ;;  %7649 = vmatprep.mubr.f32.mxu0 %v11225_v53  ;;  %v11228_v40 = vld [vmem:[#allocation84_spill] sm:$0xff] }
 0x20d   : > { %v2641_v9 = vpop.f32.mrf.mxu1  ;;  %v3097_v22 = vpop.f32.mrf.mxu0 }
 0x20e   : > { %v2920_v37 = vadd.f32 %v2641_v9, %v9686_v29  ;;  %v10017_v47 = vadd.f32 %v3097_v22, %v2918_v60 }
 0x20f   : > { %v7134_v21 = vpop.f32.mrf.mxu1  ;;  %v7235_v4 = vpop.f32.mrf.mxu0  ;;  %7549 = vmatmul.mubr.f32.gmra.mxu1 %v11226_v45  ;;  %7650 = vmatmul.mubr.f32.gmra.mxu0 %v11106_v28 }
 0x210   : > { %v2923_v10 = vadd.f32 %v7134_v21, %v9697_v12  ;;  %v10022_v44 = vadd.f32 %v7235_v4, %v2921_v23  ;;  %7551 = vmatprep.mubr.f32.mxu1 %v11227_v61  ;;  %7652 = vmatprep.mubr.f32.mxu0 %v11107_v50  ;;  %v11229_v23 = vld [vmem:[#allocation89_spill] sm:$0xff]  ;;  %v11231_v21 = vld [vmem:[#allocation99_spill] sm:$0xff] }
 0x211   : > { %v2651_v3 = vpop.f32.mrf.mxu1  ;;  %v3107_v63 = vpop.f32.mrf.mxu0 }
 0x212   : > { %v2922_v29 = vadd.f32 %v2651_v3, %v9702_v46  ;;  %v10027_v43 = vadd.f32 %v3107_v63, %v2920_v37  ;;  %v11230_v37 = vld [vmem:[#allocation95_spill] sm:$0xff]  ;;  %v11232_v3 = vld [vmem:[#allocation105_spill] sm:$0xff]  ;;  %v11233_v63 = vld [vmem:[#allocation110_spill] sm:$0xff] }
 0x213   : > { %v7137_v60 = vpop.f32.mrf.mxu1  ;;  %v7238_v31 = vpop.f32.mrf.mxu0  ;;  %7552 = vmatmul.mubr.f32.gmra.mxu1 %v11228_v40  ;;  %7653 = vmatmul.mubr.f32.gmra.mxu0 %v11108_v41 }
 0x214   : > { %v2925_v28 = vadd.f32 %v7137_v60, %v9713_v1  ;;  %v10032_v12 = vadd.f32 %v7238_v31, %v2923_v10  ;;  %7554 = vmatprep.mubr.f32.mxu1 %v11229_v23  ;;  %7655 = vmatprep.mubr.f32.mxu0 %v11109_v49  ;;  %v11235_v23 = vld [vmem:[#allocation122_spill] sm:$0xff] }
 0x215   : > { %v2661_v50 = vpop.f32.mrf.mxu1  ;;  %v3117_v35 = vpop.f32.mrf.mxu0 }
 0x216   : > { %v2924_v46 = vadd.f32 %v2661_v50, %v9719_v36  ;;  %v10037_v53 = vadd.f32 %v3117_v35, %v2922_v29 }
 0x217   : > { %v7140_v9 = vpop.f32.mrf.mxu1  ;;  %v7241_v22 = vpop.f32.mrf.mxu0  ;;  %7555 = vmatmul.mubr.f32.gmra.mxu1 %v11230_v37  ;;  %7656 = vmatmul.mubr.f32.gmra.mxu0 %v11110_v17  ;;  %v11237_v37 = vld [vmem:[#allocation131_spill] sm:$0xff] }
 0x218   : > { %v2927_v41 = vadd.f32 %v7140_v9, %v9730_v24  ;;  %v10042_v1 = vadd.f32 %v7241_v22, %v2925_v28  ;;  %7557 = vmatprep.mubr.f32.mxu1 %v11231_v21  ;;  %7658 = vmatprep.mubr.f32.mxu0 %v11111_v2  ;;  %v11234_v28 = vld [vmem:[#allocation117_spill] sm:$0xff]  ;;  %v11236_v22 = vld [vmem:[#allocation128_spill] sm:$0xff] }
 0x219   : > { %v2671_v49 = vpop.f32.mrf.mxu1  ;;  %v3127_v4 = vpop.f32.mrf.mxu0 }
 0x21a   : > { %v2926_v36 = vadd.f32 %v2671_v49, %v9735_v8  ;;  %v10047_v45 = vadd.f32 %v3127_v4, %v2924_v46 }
 0x21b   : > { %v7143_v10 = vpop.f32.mrf.mxu1  ;;  %v7244_v61 = vpop.f32.mrf.mxu0  ;;  %7558 = vmatmul.mubr.f32.gmra.mxu1 %v11232_v3  ;;  %7659 = vmatmul.mubr.f32.gmra.mxu0 %v11112_v5 }
 0x21c   : > { %v2929_v17 = vadd.f32 %v7143_v10, %v9746_v56  ;;  %v10052_v24 = vadd.f32 %v7244_v61, %v2927_v41  ;;  %7560 = vmatprep.mubr.f32.mxu1 %v11233_v63  ;;  %7661 = vmatprep.mubr.f32.mxu0 %v11113_v59  ;;  %v11239_v10 = vld [vmem:[#allocation15_spill] sm:$0xff] }
 0x21d   : > { %v2681_v2 = vpop.f32.mrf.mxu1  ;;  %v3137_v29 = vpop.f32.mrf.mxu0 }
 0x21e   : > { %v2928_v8 = vadd.f32 %v2681_v2, %v9751_v15  ;;  %v10057_v60 = vadd.f32 %v3137_v29, %v2926_v36  ;;  %v11238_v36 = vld [vmem:[#allocation9_spill] sm:$0xff]  ;;  %v11240_v2 = vld [vmem:[#allocation10_spill] sm:$0xff]  ;;  %v11241_v29 = vld [vmem:[#allocation20_spill] sm:$0xff] }
 0x21f   : > { %v7146_v31 = vpop.f32.mrf.mxu1  ;;  %v7247_v40 = vpop.f32.mrf.mxu0  ;;  %7561 = vmatmul.mubr.f32.gmra.mxu1 %v11234_v28  ;;  %7662 = vmatmul.mubr.f32.gmra.mxu0 %v11114_v14 }
 0x220   : > { %v2931_v5 = vadd.f32 %v7146_v31, %v9762_v39  ;;  %v10062_v56 = vadd.f32 %v7247_v40, %v2929_v17  ;;  %7563 = vmatprep.mubr.f32.mxu1 %v11235_v23  ;;  %7664 = vmatprep.mubr.f32.mxu0 %v11115_v11  ;;  %v11243_v23 = vld [vmem:[#allocation25_spill] sm:$0xff] }
 0x221   : > { %v2691_v59 = vpop.f32.mrf.mxu1  ;;  %v3147_v50 = vpop.f32.mrf.mxu0 }
 0x222   : > { %v2930_v15 = vadd.f32 %v2691_v59, %v9767_v16  ;;  %v10067_v35 = vadd.f32 %v3147_v50, %v2928_v8 }
 0x223   : > { %v7149_v46 = vpop.f32.mrf.mxu1  ;;  %v7250_v9 = vpop.f32.mrf.mxu0  ;;  %7564 = vmatmul.mubr.f32.gmra.mxu1 %v11236_v22  ;;  %7665 = vmatmul.mubr.f32.gmra.mxu0 %v11116_v6 }
 0x224   : > { %v2933_v14 = vadd.f32 %v7149_v46, %v9778_v13  ;;  %v10072_v39 = vadd.f32 %v7250_v9, %v2931_v5  ;;  %7566 = vmatprep.mubr.f32.mxu1 %v11237_v37  ;;  %7667 = vmatprep.mubr.f32.mxu0 %v11117_v20  ;;  %v11242_v5 = vld [vmem:[#allocation19_spill] sm:$0xff] }
 0x225   : > { %v2701_v11 = vpop.f32.mrf.mxu1  ;;  %v3157_v41 = vpop.f32.mrf.mxu0  ;;  %v11244_v9 = vld [vmem:[#allocation31_spill] sm:$0xff] }
 0x226   : > { %v2932_v16 = vadd.f32 %v2701_v11, %v9783_v32  ;;  %v10077_v21 = vadd.f32 %v3157_v41, %v2930_v15  ;;  %v11247_v37 = vld [vmem:[#allocation163_spill] sm:$0xff]  ;;  %v11248_v41 = vld [vmem:[#allocation44_spill] sm:$0xff] }
 0x227   : > { %v7152_v49 = vpop.f32.mrf.mxu1  ;;  %v7253_v4 = vpop.f32.mrf.mxu0  ;;  %7567 = vmatmul.mubr.f32.gmra.mxu1 %v11238_v36  ;;  %7668 = vmatmul.mubr.f32.gmra.mxu0 %v11118_v51  ;;  %v11249_v36 = vld [vmem:[#allocation41_spill] sm:$0xff] }
 0x228   : > { %v2935_v6 = vadd.f32 %v7152_v49, %v9794_v54  ;;  %v10082_v13 = vadd.f32 %v7253_v4, %v2933_v14  ;;  %7569 = vmatprep.mubr.f32.mxu1 %v11239_v10  ;;  %7670 = vmatprep.mubr.f32.mxu0 %v11119_v30  ;;  %v11246_v14 = vld [vmem:[#allocation35_spill] sm:$0xff] }
 0x229   : > { %v2711_v20 = vpop.f32.mrf.mxu1  ;;  %v3167_v61 = vpop.f32.mrf.mxu0 }
 0x22a   : > { %v2934_v32 = vadd.f32 %v2711_v20, %v9799_v42  ;;  %v10087_v3 = vadd.f32 %v3167_v61, %v2932_v16  ;;  %v11252_v61 = vld [vmem:[#allocation47_spill] sm:$0xff] }
 0x22b   : > { %v7155_v17 = vpop.f32.mrf.mxu1  ;;  %v7256_v63 = vpop.f32.mrf.mxu0  ;;  %7570 = vmatmul.mubr.f32.gmra.mxu1 %v11240_v2  ;;  %7671 = vmatmul.mubr.f32.gmra.mxu0 %v11120_v55  ;;  %v11254_v2 = vld [vmem:[#allocation142_spill] sm:$0xff] }
 0x22c   : > { %v2937_v51 = vadd.f32 %v7155_v17, %v9810_v18  ;;  %v10092_v54 = vadd.f32 %v7256_v63, %v2935_v6  ;;  %7572 = vmatprep.mubr.f32.mxu1 %v11241_v29  ;;  %7673 = vmatprep.mubr.f32.mxu0 %v11121_v62  ;;  %v11250_v6 = vld [vmem:[#allocation164_spill] sm:$0xff] }
 0x22d   : > { %v2721_v30 = vpop.f32.mrf.mxu1  ;;  %v3177_v8 = vpop.f32.mrf.mxu0 }
 0x22e   : > { %v2936_v42 = vadd.f32 %v2721_v30, %v9815_v19  ;;  %v10097_v31 = vadd.f32 %v3177_v8, %v2934_v32  ;;  %v11253_v32 = vld [vmem:[#allocation165_spill] sm:$0xff] }
 0x22f   : > { %v7158_v40 = vpop.f32.mrf.mxu1  ;;  %v7259_v28 = vpop.f32.mrf.mxu0  ;;  %7573 = vmatmul.mubr.f32.gmra.mxu1 %v11242_v5  ;;  %7674 = vmatmul.mubr.f32.gmra.mxu0 %v11122_v33  ;;  %v11245_v33 = vld [vmem:[#allocation139_spill] sm:$0xff] }
 0x230   : > { %v2939_v55 = vadd.f32 %v7158_v40, %v9826_v27  ;;  %v10102_v18 = vadd.f32 %v7259_v28, %v2937_v51  ;;  %7575 = vmatprep.mubr.f32.mxu1 %v11243_v23  ;;  %7676 = vmatprep.mubr.f32.mxu0 %v11123_v57  ;;  %v11256_v40 = vld [vmem:[#allocation166_spill] sm:$0xff]  ;;  %v11258_v23 = vld [vmem:[#allocation167_spill] sm:$0xff] }
 0x231   : > { %v2731_v62 = vpop.f32.mrf.mxu1  ;;  %v3187_v59 = vpop.f32.mrf.mxu0 }
 0x232   : > { %v2938_v19 = vadd.f32 %v2731_v62, %v9831_v38  ;;  %v10107_v50 = vadd.f32 %v3187_v59, %v2936_v42  ;;  %v11255_v42 = vld [vmem:[#allocation54_spill] sm:$0xff] }
 0x233   : > { %v7161_v15 = vpop.f32.mrf.mxu1  ;;  %v7262_v46 = vpop.f32.mrf.mxu0  ;;  %7576 = vmatmul.mubr.f32.gmra.mxu1 %v11244_v9  ;;  %7677 = vmatmul.mubr.f32.gmra.mxu0 %v11124_v58  ;;  %v11251_v58 = vld [vmem:[#allocation140_spill] sm:$0xff] }
 0x234   : > { %v2941_v27 = vadd.f32 %v7161_v15, %v11245_v33  ;;  %v10112_v22 = vadd.f32 %v7262_v46, %v2939_v55  ;;  %7578 = vmatprep.mubr.f32.mxu1 %v11246_v14  ;;  %7679 = vmatprep.mubr.f32.mxu0 %v11247_v37  ;;  %v11257_v55 = vld [vmem:[#allocation59_spill] sm:$0xff]  ;;  %v11261_v14 = vld [vmem:[#allocation168_spill] sm:$0xff]  ;;  %v11262_v37 = vld [vmem:[#allocation145_spill] sm:$0xff] }
 0x235   : > { %v2741_v57 = vpop.f32.mrf.mxu1  ;;  %v3197_v11 = vpop.f32.mrf.mxu0 }
 0x236   : > { %v2940_v38 = vadd.f32 %v2741_v57, %v11248_v41  ;;  %v10117_v16 = vadd.f32 %v3197_v11, %v2938_v19  ;;  %v11259_v19 = vld [vmem:[#allocation144_spill] sm:$0xff]  ;;  %v11263_v11 = vld [vmem:[#allocation71_spill] sm:$0xff]  ;;  %v11264_v41 = vld [vmem:[#allocation169_spill] sm:$0xff] }
 0x237   : > { %v7164_v49 = vpop.f32.mrf.mxu1  ;;  %v7265_v4 = vpop.f32.mrf.mxu0  ;;  %7579 = vmatmul.mubr.f32.gmra.mxu1 %v11249_v36  ;;  %7680 = vmatmul.mubr.f32.gmra.mxu0 %v11250_v6 }
 0x238   : > { %v2943_v10 = vadd.f32 %v7164_v49, %v11251_v58  ;;  %v10122_v20 = vadd.f32 %v7265_v4, %v2941_v27  ;;  %7581 = vmatprep.mubr.f32.mxu1 %v11252_v61  ;;  %7682 = vmatprep.mubr.f32.mxu0 %v11253_v32  ;;  %v11260_v27 = vld [vmem:[#allocation66_spill] sm:$0xff] }
 0x239   : > { %v2751_v17 = vpop.f32.mrf.mxu1  ;;  %v3207_v63 = vpop.f32.mrf.mxu0  ;;  %v11265_v4 = vld [vmem:[#allocation146_spill] sm:$0xff] }
 0x23a   : > { %v2942_v51 = vadd.f32 %v2751_v17, %v11254_v2  ;;  %v10127_v29 = vadd.f32 %v3207_v63, %v2940_v38  ;;  %v11266_v61 = vld [vmem:[#allocation78_spill] sm:$0xff]  ;;  %v11268_v17 = vld [vmem:[#allocation147_spill] sm:$0xff] }
 0x23b   : > { %v7167_v30 = vpop.f32.mrf.mxu1  ;;  %v7268_v8 = vpop.f32.mrf.mxu0  ;;  %7582 = vmatmul.mubr.f32.gmra.mxu1 %v11255_v42  ;;  %7683 = vmatmul.mubr.f32.gmra.mxu0 %v11256_v40  ;;  %v11267_v32 = vld [vmem:[#allocation170_spill] sm:$0xff]  ;;  %v11271_v40 = vld [vmem:[#allocation148_spill] sm:$0xff] }
 0x23c   : > { %v2945_v28 = vadd.f32 %v7167_v30, %v9873_v25  ;;  %v10132_v5 = vadd.f32 %v7268_v8, %v2943_v10  ;;  %7584 = vmatprep.mubr.f32.mxu1 %v11257_v55  ;;  %7685 = vmatprep.mubr.f32.mxu0 %v11258_v23  ;;  %v11270_v30 = vld [vmem:[#allocation171_spill] sm:$0xff] }
 0x23d   : > { %v2761_v62 = vpop.f32.mrf.mxu1  ;;  %v3217_v59 = vpop.f32.mrf.mxu0 }
 0x23e   : > { %v2944_v15 = vadd.f32 %v2761_v62, %v11259_v19  ;;  %v10137_v46 = vadd.f32 %v3217_v59, %v2942_v51  ;;  %v11269_v51 = vld [vmem:[#allocation83_spill] sm:$0xff]  ;;  %v11272_v59 = vld [vmem:[#allocation90_spill] sm:$0xff]  ;;  %v11273_v19 = vld [vmem:[#allocation172_spill] sm:$0xff] }
 0x23f   : > { %v7170_v9 = vpop.f32.mrf.mxu1  ;;  %v7271_v33 = vpop.f32.mrf.mxu0  ;;  %7585 = vmatmul.mubr.f32.gmra.mxu1 %v11260_v27  ;;  %7686 = vmatmul.mubr.f32.gmra.mxu0 %v11261_v14  ;;  %v11275_v27 = vld [vmem:[#allocation94_spill] sm:$0xff]  ;;  %v11276_v14 = vld [vmem:[#allocation173_spill] sm:$0xff] }
 0x240   : > { %v2947_v25 = vadd.f32 %v7170_v9, %v11262_v37  ;;  %v10142_v57 = vadd.f32 %v7271_v33, %v2945_v28  ;;  %7587 = vmatprep.mubr.f32.mxu1 %v11263_v11  ;;  %7688 = vmatprep.mubr.f32.mxu0 %v11264_v41  ;;  %v11277_v11 = vld [vmem:[#allocation150_spill] sm:$0xff] }
 0x241   : > { %v2771_v38 = vpop.f32.mrf.mxu1  ;;  %v3227_v49 = vpop.f32.mrf.mxu0 }
 0x242   : > { %v2946_v36 = vadd.f32 %v2771_v38, %v11265_v4  ;;  %v10147_v6 = vadd.f32 %v3227_v49, %v2944_v15  ;;  %v11274_v15 = vld [vmem:[#allocation149_spill] sm:$0xff] }
 0x243   : > { %v7173_v58 = vpop.f32.mrf.mxu1  ;;  %v7274_v10 = vpop.f32.mrf.mxu0  ;;  %7588 = vmatmul.mubr.f32.gmra.mxu1 %v11266_v61  ;;  %7689 = vmatmul.mubr.f32.gmra.mxu0 %v11267_v32 }
 0x244   : > { %v2949_v63 = vadd.f32 %v7173_v58, %v11268_v17  ;;  %v10152_v2 = vadd.f32 %v7274_v10, %v2947_v25  ;;  %7590 = vmatprep.mubr.f32.mxu1 %v11269_v51  ;;  %7691 = vmatprep.mubr.f32.mxu0 %v11270_v30  ;;  %v11279_v58 = vld [vmem:[#allocation174_spill] sm:$0xff]  ;;  %v11280_v10 = vld [vmem:[#allocation151_spill] sm:$0xff]  ;;  %v11281_v17 = vld [vmem:[#allocation104_spill] sm:$0xff] }
 0x245   : > { %v2781_v8 = vpop.f32.mrf.mxu1  ;;  %v3237_v42 = vpop.f32.mrf.mxu0 }
 0x246   : > { %v2948_v28 = vadd.f32 %v2781_v8, %v11271_v40  ;;  %v10157_v55 = vadd.f32 %v3237_v42, %v2946_v36  ;;  %v11278_v36 = vld [vmem:[#allocation100_spill] sm:$0xff] }
 0x247   : > { %v7176_v23 = vpop.f32.mrf.mxu1  ;;  %v7277_v62 = vpop.f32.mrf.mxu0  ;;  %7591 = vmatmul.mubr.f32.gmra.mxu1 %v11272_v59  ;;  %7692 = vmatmul.mubr.f32.gmra.mxu0 %v11273_v19  ;;  %v11283_v8 = vld [vmem:[#allocation152_spill] sm:$0xff]  ;;  %v11285_v59 = vld [vmem:[#allocation177_spill] sm:$0xff] }
 0x248   : > { %v2951_v9 = vadd.f32 %v7176_v23, %v11274_v15  ;;  %v10162_v33 = vadd.f32 %v7277_v62, %v2949_v63  ;;  %7593 = vmatprep.mubr.f32.mxu1 %v11275_v27  ;;  %7694 = vmatprep.mubr.f32.mxu0 %v11276_v14  ;;  %v11282_v63 = vld [vmem:[#allocation175_spill] sm:$0xff]  ;;  %v11286_v19 = vld [vmem:[#allocation153_spill] sm:$0xff]  ;;  %v11287_v27 = vld [vmem:[#allocation116_spill] sm:$0xff] }
 0x249   : > { %v2791_v37 = vpop.f32.mrf.mxu1  ;;  %v3247_v25 = vpop.f32.mrf.mxu0  ;;  %v11284_v62 = vld [vmem:[#allocation111_spill] sm:$0xff] }
 0x24a   : > { %v2950_v41 = vadd.f32 %v2791_v37, %v11277_v11  ;;  %v10167_v38 = vadd.f32 %v3247_v25, %v2948_v28  ;;  %v11288_v14 = vld [vmem:[#allocation179_spill] sm:$0xff]  ;;  %v11289_v11 = vld [vmem:[#allocation154_spill] sm:$0xff] }
 0x24b   : > { %v7179_v49 = vpop.f32.mrf.mxu1  ;;  %v7280_v4 = vpop.f32.mrf.mxu0  ;;  %7594 = vmatmul.mubr.f32.gmra.mxu1 %v11278_v36  ;;  %7695 = vmatmul.mubr.f32.gmra.mxu0 %v11279_v58  ;;  %v11290_v58 = vld [vmem:[#allocation123_spill] sm:$0xff] }
 0x24c   : > { %v2953_v61 = vadd.f32 %v7179_v49, %v11280_v10  ;;  %v10172_v32 = vadd.f32 %v7280_v4, %v2951_v9  ;;  %7596 = vmatprep.mubr.f32.mxu1 %v11281_v17  ;;  %7697 = vmatprep.mubr.f32.mxu0 %v11282_v63  ;;  %v11291_v10 = vld [vmem:[#allocation180_spill] sm:$0xff]  ;;  %v11292_v63 = vld [vmem:[#allocation127_spill] sm:$0xff] }
 0x24d   : > { %v2801_v51 = vpop.f32.mrf.mxu1  ;;  %v3257_v30 = vpop.f32.mrf.mxu0 }
 0x24e   : > { %v2952_v42 = vadd.f32 %v2801_v51, %v11283_v8  ;;  %v10177_v40 = vadd.f32 %v3257_v30, %v2950_v41  ;;  %v11293_v51 = vld [vmem:[#allocation181_spill] sm:$0xff] }
 0x24f   : > { %v7182_v28 = vpop.f32.mrf.mxu1  ;;  %v7283_v23 = vpop.f32.mrf.mxu0  ;;  %7597 = vmatmul.mubr.f32.gmra.mxu1 %v11284_v62  ;;  %7698 = vmatmul.mubr.f32.gmra.mxu0 %v11285_v59 }
 0x250   : > { %v2955_v15 = vadd.f32 %v7182_v28, %v11286_v19  ;;  %v10182_v9 = vadd.f32 %v7283_v23, %v2953_v61  ;;  %7599 = vmatprep.mubr.f32.mxu1 %v11287_v27  ;;  %7700 = vmatprep.mubr.f32.mxu0 %v11288_v14  ;;  %v11294_v28 = vld [vmem:[#allocation155_spill] sm:$0xff]  ;;  %v11295_v19 = vld [vmem:[#allocation14_spill] sm:$0xff]  ;;  %v11296_v27 = vld [vmem:[#allocation184_spill] sm:$0xff] }
 0x251   : > { %v2811_v37 = vpop.f32.mrf.mxu1  ;;  %v3267_v25 = vpop.f32.mrf.mxu0  ;;  %v11297_v14 = vld [vmem:[#allocation157_spill] sm:$0xff] }
 0x252   : > { %v2954_v49 = vadd.f32 %v2811_v37, %v11289_v11  ;;  %v10187_v41 = vadd.f32 %v3267_v25, %v2952_v42  ;;  %v11298_v37 = vld [vmem:[#allocation37_spill] sm:$0xff] }
 0x253   : > { %v7185_v4 = vpop.f32.mrf.mxu1  ;;  %v7286_v36 = vpop.f32.mrf.mxu0  ;;  %7600 = vmatmul.mubr.f32.gmra.mxu1 %v11290_v58  ;;  %7701 = vmatmul.mubr.f32.gmra.mxu0 %v11291_v10  ;;  %v11299_v25 = vld [vmem:[#allocation185_spill] sm:$0xff] }
 0x254   : > { %v2957_v17 = vadd.f32 %v7185_v4, %v9937_v34  ;;  %v10192_v61 = vadd.f32 %v7286_v36, %v2955_v15  ;;  %7602 = vmatprep.mubr.f32.mxu1 %v11292_v63  ;;  %7703 = vmatprep.mubr.f32.mxu0 %v11293_v51  ;;  %v11300_v36 = vld [vmem:[#allocation159_spill] sm:$0xff]  ;;  %v11301_v51 = vld [vmem:[#allocation5_spill] sm:$0xff] }
 0x255   : > { %v2821_v30 = vpop.f32.mrf.mxu1  ;;  %v3277_v8 = vpop.f32.mrf.mxu0 }
 0x256   : > { %v2956_v23 = vadd.f32 %v2821_v30, %v11294_v28  ;;  %v10197_v42 = vadd.f32 %v3277_v8, %v2954_v49  ;;  %v11302_v30 = vld [vmem:[#allocation156_spill] sm:$0xff]  ;;  %v11303_v28 = vld [vmem:[#allocation178_spill] sm:$0xff] }
 0x257   : > { %v7188_v62 = vpop.f32.mrf.mxu1  ;;  %v7289_v59 = vpop.f32.mrf.mxu0  ;;  %7603 = vmatmul.mubr.f32.gmra.mxu1 %v11295_v19  ;;  %7704 = vmatmul.mubr.f32.gmra.mxu0 %v11296_v27 }
 0x258   : > { %v2959_v34 = vadd.f32 %v7188_v62, %v11297_v14  ;;  %v10202_v15 = vadd.f32 %v7289_v59, %v2957_v17  ;;  %7605 = vmatprep.mubr.f32.mxu1 %v11298_v37  ;;  %7706 = vmatprep.mubr.f32.mxu0 %v11299_v25  ;;  %v11304_v62 = vld [vmem:[#allocation160_spill] sm:$0xff]  ;;  %v11305_v25 = vmov 0.0  }
 0x259   : > { %v2831_v11 = vpop.f32.mrf.mxu1  ;;  %v3287_v4 = vpop.f32.mrf.mxu0 }
 0x25a   : > { %v2958_v58 = vadd.f32 %v2831_v11, %v11300_v36  ;;  %v10207_v49 = vadd.f32 %v3287_v4, %v2956_v23  ;;  %v11306_v11 = vld [vmem:[#allocation161_spill] sm:$0xff]  ;;  %v11307_v4 = vld [vmem:[#allocation135_spill] sm:$0xff] }
 0x25b   : > { %v7191_v10 = vpop.f32.mrf.mxu1  ;;  %v7292_v63 = vpop.f32.mrf.mxu0  ;;  %7606 = vmatmul.mubr.f32.gmra.mxu1 %v11301_v51  ;;  %7707 = vmatmul.mubr.f32.gmra.mxu0 %v11302_v30  ;;  %v11311_v30 = vld [vmem:[#allocation28_spill] sm:$0xff] }
 0x25c   : > { %v2961_v8 = vadd.f32 %v7191_v10, %v9975_v7  ;;  %v10212_v17 = vadd.f32 %v7292_v63, %v2959_v34  ;;  %7608 = vmatprep.mubr.f32.mxu1 %v11303_v28  ;;  %7709 = vmatprep.mubr.f32.mxu0 %v11304_v62  ;;  %v11308_v7 = vld [vmem:[#allocation158_spill] sm:$0xff] }
 0x25d   : > { %v2841_v59 = vpop.f32.mrf.mxu1  ;;  %v3297_v19 = vpop.f32.mrf.mxu0  ;;  %v5168_v36 = vsel %vm1889_vm1, %v11308_v7, %v11307_v4  ;;  %v11310_v10 = vld [vmem:[#allocation162_spill] sm:$0xff] }
 0x25e   : > { %v2960_v27 = vadd.f32 %v2841_v59, %v9980_v26  ;;  %v10217_v23 = vadd.f32 %v3297_v19, %v2958_v58 }
 0x25f   : > { %v7194_v14 = vpop.f32.mrf.mxu1  ;;  %v7295_v37 = vpop.f32.mrf.mxu0  ;;  %7609 = vmatmul.mubr.f32.gmra.mxu1 %v11305_v25  ;;  %7710 = vmatmul.mubr.f32.gmra.mxu0 %v11306_v11 }
 0x260   : > { %v2963_v63 = vadd.f32 %v7194_v14, %v11310_v10  ;;  %v10226_v51 = vadd.f32 %v7295_v37, %v2961_v8  ;;  %7712 = vmatprep.mubr.f32.mxu0 %v5168_v36  ;;  %7611 = vmatprep.mubr.f32.mxu1 %v11305_v25 }
 0x261   : > { %v2851_v26 = vpop.f32.mrf.mxu1  ;;  %v3307_v58 = vpop.f32.mrf.mxu0 }
 0x262   : > { %v2962_v28 = vadd.f32 %v2851_v26, %v11311_v30  ;;  %v10230_v62 = vadd.f32 %v3307_v58, %v2960_v27  ;;  %v11312_v27 = vld [vmem:[#allocation138_spill] sm:$0xff] }
 0x263   : > { %v7197_v59 = vpop.f32.mrf.mxu1  ;;  %v7298_v19 = vpop.f32.mrf.mxu0  ;;  %7612 = vmatmul.mubr.f32.gmra.mxu1 %v11305_v25  ;;  %7713 = vmatmul.mubr.f32.gmra.mxu0 %v11307_v4  ;;  %v5213_v10 = vsel %vm1889_vm1, %v11307_v4, %v11312_v27 }
 0x264   : > { %v2965_v11 = vadd.f32 %v7197_v59, %v10001_v0  ;;  %v10235_v14 = vadd.f32 %v7298_v19, %v2963_v63  ;;  %7715 = vmatprep.mubr.f32.mxu0 %v11307_v4 }
 0x265   : > { %v2861_v8 = vpop.f32.mrf.mxu1  ;;  %v3317_v37 = vpop.f32.mrf.mxu0 }
 0x266   : > { %v2964_v7 = vadd.f32 %v2861_v8, %v10006_v52  ;;  %v10239_v36 = vadd.f32 %v3317_v37, %v2962_v28 }
 0x267   : > { %v7301_v25 = vpop.f32.mrf.mxu0  ;;  %v7336_v26 = vpop.f32.mrf.mxu1  ;;  %7716 = vmatmul.mubr.f32.gmra.mxu0 %v5213_v10 }
 0x268   : > { %v10245_v58 = vadd.f32 %v7301_v25, %v2965_v11  ;;  %v3947_v0 = vadd.f32 %v7336_v26, %v10012_v48 }
 0x269   : > { %v3327_v63 = vpop.f32.mrf.mxu0  ;;  %v3659_v30 = vpop.f32.mrf.mxu1 }
 0x26a   : > { %v10248_v59 = vadd.f32 %v3327_v63, %v2964_v7  ;;  %v3946_v52 = vadd.f32 %v3659_v30, %v10017_v47 }
 0x26b   : > { %v7339_v28 = vpop.f32.mrf.mxu1  ;;  %v7440_v19 = vpop.f32.mrf.mxu0 }
 0x26c   : > { %v3949_v8 = vadd.f32 %v7339_v28, %v10022_v44  ;;  %v10252_v37 = vadd.f32 %v7440_v19, %v3947_v0 }
 0x26d   : > { %v3669_v4 = vpop.f32.mrf.mxu1  ;;  %v4269_v34 = vpop.f32.mrf.mxu0 }
 0x26e   : > { %v3948_v27 = vadd.f32 %v3669_v4, %v10027_v43  ;;  %v10255_v11 = vadd.f32 %v4269_v34, %v3946_v52 }
 0x26f   : > { %v7342_v10 = vpop.f32.mrf.mxu1  ;;  %v7443_v48 = vpop.f32.mrf.mxu0 }
 0x270   : > { %v3951_v25 = vadd.f32 %v7342_v10, %v10032_v12  ;;  %v10258_v7 = vadd.f32 %v7443_v48, %v3949_v8 }
 0x271   : > { %v3679_v26 = vpop.f32.mrf.mxu1  ;;  %v4279_v47 = vpop.f32.mrf.mxu0 }
 0x272   : > { %v3950_v63 = vadd.f32 %v3679_v26, %v10037_v53  ;;  %v10261_v30 = vadd.f32 %v4279_v47, %v3948_v27 }
 0x273   : > { %v7345_v44 = vpop.f32.mrf.mxu1  ;;  %v7446_v0 = vpop.f32.mrf.mxu0 }
 0x274   : > { %v3953_v28 = vadd.f32 %v7345_v44, %v10042_v1  ;;  %v10264_v19 = vadd.f32 %v7446_v0, %v3951_v25 }
 0x275   : > { %v3689_v43 = vpop.f32.mrf.mxu1  ;;  %v4289_v52 = vpop.f32.mrf.mxu0 }
 0x276   : > { %v3952_v4 = vadd.f32 %v3689_v43, %v10047_v45  ;;  %v10267_v34 = vadd.f32 %v4289_v52, %v3950_v63 }
 0x277   : > { %v7348_v12 = vpop.f32.mrf.mxu1  ;;  %v7449_v8 = vpop.f32.mrf.mxu0 }
 0x278   : > { %v3955_v10 = vadd.f32 %v7348_v12, %v10052_v24  ;;  %v10270_v48 = vadd.f32 %v7449_v8, %v3953_v28 }
 0x279   : > { %v3699_v53 = vpop.f32.mrf.mxu1  ;;  %v4299_v27 = vpop.f32.mrf.mxu0 }
 0x27a   : > { %v3954_v26 = vadd.f32 %v3699_v53, %v10057_v60  ;;  %v10273_v47 = vadd.f32 %v4299_v27, %v3952_v4 }
 0x27b   : > { %v7351_v1 = vpop.f32.mrf.mxu1  ;;  %v7452_v25 = vpop.f32.mrf.mxu0 }
 0x27c   : > { %v3957_v44 = vadd.f32 %v7351_v1, %v10062_v56  ;;  %v10276_v0 = vadd.f32 %v7452_v25, %v3955_v10 }
 0x27d   : > { %v3709_v45 = vpop.f32.mrf.mxu1  ;;  %v4309_v63 = vpop.f32.mrf.mxu0 }
 0x27e   : > { %v3956_v43 = vadd.f32 %v3709_v45, %v10067_v35  ;;  %v10279_v52 = vadd.f32 %v4309_v63, %v3954_v26 }
 0x27f   : > { %v7354_v24 = vpop.f32.mrf.mxu1  ;;  %v7455_v28 = vpop.f32.mrf.mxu0 }
 0x280   : > { %v3959_v12 = vadd.f32 %v7354_v24, %v10072_v39  ;;  %v10282_v8 = vadd.f32 %v7455_v28, %v3957_v44 }
 0x281   : > { %v3719_v60 = vpop.f32.mrf.mxu1  ;;  %v4319_v4 = vpop.f32.mrf.mxu0 }
 0x282   : > { %v3958_v53 = vadd.f32 %v3719_v60, %v10077_v21  ;;  %v10285_v27 = vadd.f32 %v4319_v4, %v3956_v43 }
 0x283   : > { %v7357_v56 = vpop.f32.mrf.mxu1  ;;  %v7458_v10 = vpop.f32.mrf.mxu0 }
 0x284   : > { %v3961_v1 = vadd.f32 %v7357_v56, %v10082_v13  ;;  %v10288_v25 = vadd.f32 %v7458_v10, %v3959_v12 }
 0x285   : > { %v3729_v35 = vpop.f32.mrf.mxu1  ;;  %v4329_v26 = vpop.f32.mrf.mxu0 }
 0x286   : > { %v3960_v45 = vadd.f32 %v3729_v35, %v10087_v3  ;;  %v10291_v63 = vadd.f32 %v4329_v26, %v3958_v53 }
 0x287   : > { %v7360_v39 = vpop.f32.mrf.mxu1  ;;  %v7461_v44 = vpop.f32.mrf.mxu0 }
 0x288   : > { %v3963_v24 = vadd.f32 %v7360_v39, %v10092_v54  ;;  %v10294_v28 = vadd.f32 %v7461_v44, %v3961_v1 }
 0x289   : > { %v3739_v21 = vpop.f32.mrf.mxu1  ;;  %v4339_v43 = vpop.f32.mrf.mxu0 }
 0x28a   : > { %v3962_v60 = vadd.f32 %v3739_v21, %v10097_v31  ;;  %v10297_v4 = vadd.f32 %v4339_v43, %v3960_v45 }
 0x28b   : > { %v7363_v13 = vpop.f32.mrf.mxu1  ;;  %v7464_v12 = vpop.f32.mrf.mxu0 }
 0x28c   : > { %v3965_v56 = vadd.f32 %v7363_v13, %v10102_v18  ;;  %v10300_v10 = vadd.f32 %v7464_v12, %v3963_v24 }
 0x28d   : > { %v3749_v3 = vpop.f32.mrf.mxu1  ;;  %v4349_v53 = vpop.f32.mrf.mxu0 }
 0x28e   : > { %v3964_v35 = vadd.f32 %v3749_v3, %v10107_v50  ;;  %v10303_v26 = vadd.f32 %v4349_v53, %v3962_v60 }
 0x28f   : > { %v7366_v54 = vpop.f32.mrf.mxu1  ;;  %v7467_v1 = vpop.f32.mrf.mxu0 }
 0x290   : > { %v3967_v39 = vadd.f32 %v7366_v54, %v10112_v22  ;;  %v10306_v44 = vadd.f32 %v7467_v1, %v3965_v56 }
 0x291   : > { %v3759_v31 = vpop.f32.mrf.mxu1  ;;  %v4359_v45 = vpop.f32.mrf.mxu0 }
 0x292   : > { %v3966_v21 = vadd.f32 %v3759_v31, %v10117_v16  ;;  %v10309_v43 = vadd.f32 %v4359_v45, %v3964_v35 }
 0x293   : > { %v7369_v18 = vpop.f32.mrf.mxu1  ;;  %v7470_v24 = vpop.f32.mrf.mxu0 }
 0x294   : > { %v3969_v13 = vadd.f32 %v7369_v18, %v10122_v20  ;;  %v10312_v12 = vadd.f32 %v7470_v24, %v3967_v39 }
 0x295   : > { %v3769_v50 = vpop.f32.mrf.mxu1  ;;  %v4369_v60 = vpop.f32.mrf.mxu0 }
 0x296   : > { %v3968_v3 = vadd.f32 %v3769_v50, %v10127_v29  ;;  %v10315_v53 = vadd.f32 %v4369_v60, %v3966_v21 }
 0x297   : > { %v7372_v22 = vpop.f32.mrf.mxu1  ;;  %v7473_v56 = vpop.f32.mrf.mxu0 }
 0x298   : > { %v3971_v54 = vadd.f32 %v7372_v22, %v10132_v5  ;;  %v10318_v1 = vadd.f32 %v7473_v56, %v3969_v13 }
 0x299   : > { %v3779_v16 = vpop.f32.mrf.mxu1  ;;  %v4379_v35 = vpop.f32.mrf.mxu0 }
 0x29a   : > { %v3970_v31 = vadd.f32 %v3779_v16, %v10137_v46  ;;  %v10321_v45 = vadd.f32 %v4379_v35, %v3968_v3 }
 0x29b   : > { %v7375_v20 = vpop.f32.mrf.mxu1  ;;  %v7476_v39 = vpop.f32.mrf.mxu0 }
 0x29c   : > { %v3973_v18 = vadd.f32 %v7375_v20, %v10142_v57  ;;  %v10324_v24 = vadd.f32 %v7476_v39, %v3971_v54 }
 0x29d   : > { %v3789_v29 = vpop.f32.mrf.mxu1  ;;  %v4389_v21 = vpop.f32.mrf.mxu0 }
 0x29e   : > { %v3972_v50 = vadd.f32 %v3789_v29, %v10147_v6  ;;  %v10327_v60 = vadd.f32 %v4389_v21, %v3970_v31 }
 0x29f   : > { %v7378_v5 = vpop.f32.mrf.mxu1  ;;  %v7479_v13 = vpop.f32.mrf.mxu0 }
 0x2a0   : > { %v3975_v22 = vadd.f32 %v7378_v5, %v10152_v2  ;;  %v10330_v56 = vadd.f32 %v7479_v13, %v3973_v18 }
 0x2a1   : > { %v3799_v46 = vpop.f32.mrf.mxu1  ;;  %v4399_v3 = vpop.f32.mrf.mxu0 }
 0x2a2   : > { %v3974_v16 = vadd.f32 %v3799_v46, %v10157_v55  ;;  %v10333_v35 = vadd.f32 %v4399_v3, %v3972_v50 }
 0x2a3   : > { %v7381_v57 = vpop.f32.mrf.mxu1  ;;  %v7482_v54 = vpop.f32.mrf.mxu0 }
 0x2a4   : > { %v3977_v20 = vadd.f32 %v7381_v57, %v10162_v33  ;;  %v10336_v39 = vadd.f32 %v7482_v54, %v3975_v22 }
 0x2a5   : > { %v3809_v6 = vpop.f32.mrf.mxu1  ;;  %v4409_v31 = vpop.f32.mrf.mxu0 }
 0x2a6   : > { %v3976_v29 = vadd.f32 %v3809_v6, %v10167_v38  ;;  %v10339_v21 = vadd.f32 %v4409_v31, %v3974_v16 }
 0x2a7   : > { %v7384_v2 = vpop.f32.mrf.mxu1  ;;  %v7485_v18 = vpop.f32.mrf.mxu0 }
 0x2a8   : > { %v3979_v5 = vadd.f32 %v7384_v2, %v10172_v32  ;;  %v10342_v13 = vadd.f32 %v7485_v18, %v3977_v20 }
 0x2a9   : > { %v3819_v55 = vpop.f32.mrf.mxu1  ;;  %v4419_v50 = vpop.f32.mrf.mxu0 }
 0x2aa   : > { %v3978_v46 = vadd.f32 %v3819_v55, %v10177_v40  ;;  %v10345_v3 = vadd.f32 %v4419_v50, %v3976_v29 }
 0x2ab   : > { %v7387_v33 = vpop.f32.mrf.mxu1  ;;  %v7488_v22 = vpop.f32.mrf.mxu0 }
 0x2ac   : > { %v3981_v57 = vadd.f32 %v7387_v33, %v10182_v9  ;;  %v10348_v54 = vadd.f32 %v7488_v22, %v3979_v5 }
 0x2ad   : > { %v3829_v38 = vpop.f32.mrf.mxu1  ;;  %v4429_v16 = vpop.f32.mrf.mxu0 }
 0x2ae   : > { %v3980_v6 = vadd.f32 %v3829_v38, %v10187_v41  ;;  %v10351_v31 = vadd.f32 %v4429_v16, %v3978_v46 }
 0x2af   : > { %v7390_v32 = vpop.f32.mrf.mxu1  ;;  %v7491_v20 = vpop.f32.mrf.mxu0 }
 0x2b0   : > { %v3983_v2 = vadd.f32 %v7390_v32, %v10192_v61  ;;  %v10354_v18 = vadd.f32 %v7491_v20, %v3981_v57 }
 0x2b1   : > { %v3839_v40 = vpop.f32.mrf.mxu1  ;;  %v4439_v29 = vpop.f32.mrf.mxu0 }
 0x2b2   : > { %v3982_v55 = vadd.f32 %v3839_v40, %v10197_v42  ;;  %v10357_v50 = vadd.f32 %v4439_v29, %v3980_v6 }
 0x2b3   : > { %v7393_v9 = vpop.f32.mrf.mxu1  ;;  %v7494_v5 = vpop.f32.mrf.mxu0 }
 0x2b4   : > { %v3985_v33 = vadd.f32 %v7393_v9, %v10202_v15  ;;  %v10360_v22 = vadd.f32 %v7494_v5, %v3983_v2 }
 0x2b5   : > { %v3849_v41 = vpop.f32.mrf.mxu1  ;;  %v4449_v46 = vpop.f32.mrf.mxu0 }
 0x2b6   : > { %v3984_v38 = vadd.f32 %v3849_v41, %v10207_v49  ;;  %v10363_v16 = vadd.f32 %v4449_v46, %v3982_v55 }
 0x2b7   : > { %v7396_v61 = vpop.f32.mrf.mxu1  ;;  %v7497_v57 = vpop.f32.mrf.mxu0 }
 0x2b8   : > { %v3987_v32 = vadd.f32 %v7396_v61, %v10212_v17  ;;  %v10366_v20 = vadd.f32 %v7497_v57, %v3985_v33 }
 0x2b9   : > { %v3859_v42 = vpop.f32.mrf.mxu1  ;;  %v4459_v6 = vpop.f32.mrf.mxu0 }
 0x2ba   : > { %v3986_v40 = vadd.f32 %v3859_v42, %v10217_v23  ;;  %v10369_v29 = vadd.f32 %v4459_v6, %v3984_v38 }
 0x2bb   : > { %v7399_v15 = vpop.f32.mrf.mxu1  ;;  %v7500_v2 = vpop.f32.mrf.mxu0 }
 0x2bc   : > { %v3989_v9 = vadd.f32 %v7399_v15, %v10226_v51  ;;  %v10372_v5 = vadd.f32 %v7500_v2, %v3987_v32 }
 0x2bd   : > { %v3869_v49 = vpop.f32.mrf.mxu1  ;;  %v4469_v55 = vpop.f32.mrf.mxu0 }
 0x2be   : > { %v3988_v41 = vadd.f32 %v3869_v49, %v10230_v62  ;;  %v10375_v46 = vadd.f32 %v4469_v55, %v3986_v40 }
 0x2bf   : > { %v7402_v17 = vpop.f32.mrf.mxu1  ;;  %v7503_v33 = vpop.f32.mrf.mxu0 }
 0x2c0   : > { %v3991_v61 = vadd.f32 %v7402_v17, %v10235_v14  ;;  %v10378_v57 = vadd.f32 %v7503_v33, %v3989_v9 }
 0x2c1   : > { %v3879_v23 = vpop.f32.mrf.mxu1  ;;  %v4479_v38 = vpop.f32.mrf.mxu0 }
 0x2c2   : > { %v3990_v42 = vadd.f32 %v3879_v23, %v10239_v36  ;;  %v10381_v6 = vadd.f32 %v4479_v38, %v3988_v41 }
 0x2c3   : > { %v7405_v51 = vpop.f32.mrf.mxu1  ;;  %v7506_v32 = vpop.f32.mrf.mxu0 }
 0x2c4   : > { %v3993_v15 = vadd.f32 %v7405_v51, %v10245_v58  ;;  %v10384_v2 = vadd.f32 %v7506_v32, %v3991_v61 }
 0x2c5   : > { %v3889_v62 = vpop.f32.mrf.mxu1  ;;  %v4489_v40 = vpop.f32.mrf.mxu0 }
 0x2c6   : > { %11313 = vst [vmem:[#allocation50_spill] sm:$0xff] %v10384_v2  ;;  %v3992_v49 = vadd.f32 %v3889_v62, %v10248_v59  ;;  %v10387_v14 = vadd.f32 %v4489_v40, %v3990_v42 }
 0x2c7   : > { %v7509_v9 = vpop.f32.mrf.mxu0  ;;  %v7544_v55 = vpop.f32.mrf.mxu1 }
 0x2c8   : > { %11314 = vst [vmem:[#allocation36_spill] sm:$0xff] %v10387_v14  ;;  %v10389_v17 = vadd.f32 %v7509_v9, %v3993_v15  ;;  %v5023_v33 = vadd.f32 %v7544_v55, %v10252_v37  ;;  %v11317_v37 = vld [vmem:[#allocation29_spill] sm:$0xff] }
 0x2c9   : > { %v4499_v36 = vpop.f32.mrf.mxu0  ;;  %v4735_v41 = vpop.f32.mrf.mxu1 }
 0x2ca   : > { %11315 = vst [vmem:[#allocation56_spill] sm:$0xff] %v10389_v17  ;;  %v10392_v23 = vadd.f32 %v4499_v36, %v3992_v49  ;;  %v5022_v38 = vadd.f32 %v4735_v41, %v10255_v11  ;;  %v11318_v11 = vld [vmem:[#allocation24_spill] sm:$0xff] }
 0x2cb   : > { %v7547_v58 = vpop.f32.mrf.mxu1  ;;  %v7648_v61 = vpop.f32.mrf.mxu0 }
 0x2cc   : > { %11316 = vst [vmem:[#allocation42_spill] sm:$0xff] %v10392_v23  ;;  %v5585_v51 = vadd.f32 %v7648_v61, %v5023_v33  ;;  %v5025_v32 = vadd.f32 %v7547_v58, %v10258_v7  ;;  %v11319_v58 = vld [vmem:[#allocation38_spill] sm:$0xff] }
 0x2cd   : > { %v4745_v59 = vpop.f32.mrf.mxu1  ;;  %v5297_v42 = vpop.f32.mrf.mxu0 }
 0x2ce   : > { %v5729_v15 = vmul.f32 %v5585_v51, %v11317_v37  ;;  %v5584_v62 = vadd.f32 %v5297_v42, %v5022_v38  ;;  %v5024_v41 = vadd.f32 %v4745_v59, %v10261_v30  ;;  %v11320_v30 = vld [vmem:[#allocation34_spill] sm:$0xff] }
 0x2cf   : > { %v7550_v40 = vpop.f32.mrf.mxu1  ;;  %v7651_v49 = vpop.f32.mrf.mxu0 }
 0x2d0   : > { %5777 = vst [vmem:[%s10400_s15 + $0x8] sm:$0xff] %v5729_v15  ;;  %v5728_v9 = vmul.f32 %v5584_v62, %v11318_v11  ;;  %v5587_v55 = vadd.f32 %v7651_v49, %v5025_v32  ;;  %v5879_v36 = vmul.f32 %v5729_v15, %v5729_v15  ;;  %v5027_v7 = vadd.f32 %v7550_v40, %v10264_v19 }
 0x2d1   : > { %v4755_v33 = vpop.f32.mrf.mxu1  ;;  %v5307_v61 = vpop.f32.mrf.mxu0 }
 0x2d2   : > { %5776 = vst [vmem:[%s10400_s15] sm:$0xff] %v5728_v9  ;;  %v5824_v23 = vadd.f32 %v5729_v15, %v5728_v9  ;;  %v5878_v17 = vmul.f32 %v5728_v9, %v5728_v9  ;;  %v5731_v38 = vmul.f32 %v5587_v55, %v11319_v58  ;;  %v5586_v51 = vadd.f32 %v5307_v61, %v5024_v41  ;;  %v11321_v9 = vld [vmem:[#allocation51_spill] sm:$0xff] }
 0x2d3   : > { %v7553_v42 = vpop.f32.mrf.mxu1  ;;  %v7654_v37 = vpop.f32.mrf.mxu0  ;;  %v5026_v32 = vadd.f32 %v4755_v33, %v10267_v34  ;;  %v11322_v34 = vld [vmem:[#allocation46_spill] sm:$0xff] }
 0x2d4   : > { %v5926_v14 = vadd.f32 %v5879_v36, %v5878_v17  ;;  %5779 = vst [vmem:[%s10400_s15 + $0x18] sm:$0xff] %v5731_v38  ;;  %v5589_v62 = vadd.f32 %v7654_v37, %v5027_v7  ;;  %v5730_v59 = vmul.f32 %v5586_v51, %v11320_v30  ;;  %v5029_v15 = vadd.f32 %v7553_v42, %v10270_v48 }
 0x2d5   : > { %v4765_v49 = vpop.f32.mrf.mxu1  ;;  %v5317_v11 = vpop.f32.mrf.mxu0  ;;  %v5881_v7 = vmul.f32 %v5731_v38, %v5731_v38 }
 0x2d6   : > { %v5733_v2 = vmul.f32 %v5589_v62, %v11321_v9  ;;  %v5588_v19 = vadd.f32 %v5317_v11, %v5026_v32  ;;  %5778 = vst [vmem:[%s10400_s15 + $0x10] sm:$0xff] %v5730_v59  ;;  %v5825_v40 = vadd.f32 %v5824_v23, %v5730_v59  ;;  %v5880_v55 = vmul.f32 %v5730_v59, %v5730_v59  ;;  %v11323_v23 = vld [vmem:[#allocation63_spill] sm:$0xff]  ;;  %v11324_v9 = vld [vmem:[#allocation58_spill] sm:$0xff] }
 0x2d7   : > { %v7556_v41 = vpop.f32.mrf.mxu1  ;;  %v7657_v61 = vpop.f32.mrf.mxu0  ;;  %v5028_v17 = vadd.f32 %v4765_v49, %v10273_v47 }
 0x2d8   : > { %5781 = vst [vmem:[%s10400_s15 + $0x28] sm:$0xff] %v5733_v2  ;;  %v5732_v36 = vmul.f32 %v5588_v19, %v11322_v34  ;;  %v5591_v33 = vadd.f32 %v7657_v61, %v5029_v15  ;;  %v5927_v58 = vadd.f32 %v5926_v14, %v5880_v55  ;;  %v5826_v51 = vadd.f32 %v5825_v40, %v5731_v38  ;;  %v11325_v34 = vld [vmem:[#allocation75_spill] sm:$0xff] }
 0x2d9   : > { %v4775_v48 = vpop.f32.mrf.mxu1  ;;  %v5327_v42 = vpop.f32.mrf.mxu0  ;;  %v5031_v32 = vadd.f32 %v7556_v41, %v10276_v0  ;;  %v5883_v19 = vmul.f32 %v5733_v2, %v5733_v2 }
 0x2da   : > { %5780 = vst [vmem:[%s10400_s15 + $0x20] sm:$0xff] %v5732_v36  ;;  %v5882_v37 = vmul.f32 %v5732_v36, %v5732_v36  ;;  %v5735_v62 = vmul.f32 %v5591_v33, %v11323_v23  ;;  %v5590_v30 = vadd.f32 %v5327_v42, %v5028_v17  ;;  %v5827_v59 = vadd.f32 %v5826_v51, %v5732_v36  ;;  %v11326_v42 = vld [vmem:[#allocation70_spill] sm:$0xff] }
 0x2db   : > { %v5928_v11 = vadd.f32 %v5927_v58, %v5881_v7  ;;  %v7559_v47 = vpop.f32.mrf.mxu1  ;;  %v7660_v49 = vpop.f32.mrf.mxu0  ;;  %v5030_v15 = vadd.f32 %v4775_v48, %v10279_v52 }
 0x2dc   : > { %5783 = vst [vmem:[%s10400_s15 + $0x38] sm:$0xff] %v5735_v62  ;;  %v5734_v14 = vmul.f32 %v5590_v30, %v11324_v9  ;;  %v5593_v38 = vadd.f32 %v7660_v49, %v5031_v32  ;;  %v5828_v55 = vadd.f32 %v5827_v59, %v5733_v2  ;;  %v5033_v17 = vadd.f32 %v7559_v47, %v10282_v8  ;;  %v11327_v49 = vld [vmem:[#allocation87_spill] sm:$0xff] }
 0x2dd   : > { %v5929_v40 = vadd.f32 %v5928_v11, %v5882_v37  ;;  %v4785_v61 = vpop.f32.mrf.mxu1  ;;  %v5337_v0 = vpop.f32.mrf.mxu0  ;;  %v5885_v32 = vmul.f32 %v5735_v62, %v5735_v62 }
 0x2de   : > { %5782 = vst [vmem:[%s10400_s15 + $0x30] sm:$0xff] %v5734_v14  ;;  %v5884_v41 = vmul.f32 %v5734_v14, %v5734_v14  ;;  %v5737_v36 = vmul.f32 %v5593_v38, %v11325_v34  ;;  %v5592_v33 = vadd.f32 %v5337_v0, %v5030_v15  ;;  %v5829_v7 = vadd.f32 %v5828_v55, %v5734_v14  ;;  %v11328_v55 = vld [vmem:[#allocation82_spill] sm:$0xff] }
 0x2df   : > { %v5930_v58 = vadd.f32 %v5929_v40, %v5883_v19  ;;  %v7562_v52 = vpop.f32.mrf.mxu1  ;;  %v7663_v51 = vpop.f32.mrf.mxu0  ;;  %v5032_v48 = vadd.f32 %v4785_v61, %v10285_v27 }
 0x2e0   : > { %5785 = vst [vmem:[%s10400_s15 + $0x48] sm:$0xff] %v5737_v36  ;;  %v5736_v37 = vmul.f32 %v5592_v33, %v11326_v42  ;;  %v5595_v2 = vadd.f32 %v7663_v51, %v5033_v17  ;;  %v5830_v30 = vadd.f32 %v5829_v7, %v5735_v62  ;;  %v5035_v47 = vadd.f32 %v7562_v52, %v10288_v25 }
 0x2e1   : > { %v5931_v23 = vadd.f32 %v5930_v58, %v5884_v41  ;;  %v4795_v59 = vpop.f32.mrf.mxu1  ;;  %v5347_v8 = vpop.f32.mrf.mxu0  ;;  %v5887_v0 = vmul.f32 %v5737_v36, %v5737_v36  ;;  %v11329_v58 = vld [vmem:[#allocation97_spill] sm:$0xff] }
 0x2e2   : > { %5784 = vst [vmem:[%s10400_s15 + $0x40] sm:$0xff] %v5736_v37  ;;  %v5886_v11 = vmul.f32 %v5736_v37, %v5736_v37  ;;  %v5739_v15 = vmul.f32 %v5595_v2, %v11327_v49  ;;  %v5594_v9 = vadd.f32 %v5347_v8, %v5032_v48  ;;  %v5831_v14 = vadd.f32 %v5830_v30, %v5736_v37 }
 0x2e3   : > { %v5932_v38 = vadd.f32 %v5931_v23, %v5885_v32  ;;  %v7565_v27 = vpop.f32.mrf.mxu1  ;;  %v7666_v19 = vpop.f32.mrf.mxu0  ;;  %v5034_v40 = vadd.f32 %v4795_v59, %v10291_v63  ;;  %v11330_v32 = vld [vmem:[#allocation93_spill] sm:$0xff] }
 0x2e4   : > { %5787 = vst [vmem:[%s10400_s15 + $0x58] sm:$0xff] %v5739_v15  ;;  %v5738_v61 = vmul.f32 %v5594_v9, %v11328_v55  ;;  %v5597_v62 = vadd.f32 %v7666_v19, %v5035_v47  ;;  %v5832_v17 = vadd.f32 %v5831_v14, %v5737_v36  ;;  %v5037_v7 = vadd.f32 %v7565_v27, %v10294_v28  ;;  %v11331_v9 = vld [vmem:[#allocation108_spill] sm:$0xff] }
 0x2e5   : > { %v5933_v41 = vadd.f32 %v5932_v38, %v5886_v11  ;;  %v4805_v34 = vpop.f32.mrf.mxu1  ;;  %v5357_v25 = vpop.f32.mrf.mxu0  ;;  %v5889_v30 = vmul.f32 %v5739_v15, %v5739_v15 }
 0x2e6   : > { %5786 = vst [vmem:[%s10400_s15 + $0x50] sm:$0xff] %v5738_v61  ;;  %v5888_v33 = vmul.f32 %v5738_v61, %v5738_v61  ;;  %v5741_v52 = vmul.f32 %v5597_v62, %v11329_v58  ;;  %v5596_v51 = vadd.f32 %v5357_v25, %v5034_v40  ;;  %v5833_v48 = vadd.f32 %v5832_v17, %v5738_v61  ;;  %v11332_v61 = vld [vmem:[#allocation103_spill] sm:$0xff] }
 0x2e7   : > { %v5934_v42 = vadd.f32 %v5933_v41, %v5887_v0  ;;  %v7568_v63 = vpop.f32.mrf.mxu1  ;;  %v7669_v37 = vpop.f32.mrf.mxu0  ;;  %v5036_v2 = vadd.f32 %v4805_v34, %v10297_v4 }
 0x2e8   : > { %5789 = vst [vmem:[%s10400_s15 + $0x68] sm:$0xff] %v5741_v52  ;;  %v5740_v23 = vmul.f32 %v5596_v51, %v11330_v32  ;;  %v5599_v36 = vadd.f32 %v7669_v37, %v5037_v7  ;;  %v5834_v8 = vadd.f32 %v5833_v48, %v5739_v15  ;;  %v5039_v49 = vadd.f32 %v7568_v63, %v10300_v10  ;;  %v11333_v7 = vld [vmem:[#allocation120_spill] sm:$0xff] }
 0x2e9   : > { %v5935_v59 = vadd.f32 %v5934_v42, %v5888_v33  ;;  %v4815_v11 = vpop.f32.mrf.mxu1  ;;  %v5367_v28 = vpop.f32.mrf.mxu0  ;;  %v5891_v0 = vmul.f32 %v5741_v52, %v5741_v52 }
 0x2ea   : > { %5788 = vst [vmem:[%s10400_s15 + $0x60] sm:$0xff] %v5740_v23  ;;  %v5890_v47 = vmul.f32 %v5740_v23, %v5740_v23  ;;  %v5743_v14 = vmul.f32 %v5599_v36, %v11331_v9  ;;  %v5598_v38 = vadd.f32 %v5367_v28, %v5036_v2  ;;  %v5835_v27 = vadd.f32 %v5834_v8, %v5740_v23  ;;  %v11334_v2 = vld [vmem:[#allocation115_spill] sm:$0xff]  ;;  %v11335_v28 = vld [vmem:[#allocation130_spill] sm:$0xff] }
 0x2eb   : > { %v5936_v19 = vadd.f32 %v5935_v59, %v5889_v30  ;;  %v7571_v4 = vpop.f32.mrf.mxu1  ;;  %v7672_v40 = vpop.f32.mrf.mxu0  ;;  %v5038_v55 = vadd.f32 %v4815_v11, %v10303_v26 }
 0x2ec   : > { %5791 = vst [vmem:[%s10400_s15 + $0x78] sm:$0xff] %v5743_v14  ;;  %v5742_v62 = vmul.f32 %v5598_v38, %v11332_v61  ;;  %v5601_v15 = vadd.f32 %v7672_v40, %v5039_v49  ;;  %v5836_v17 = vadd.f32 %v5835_v27, %v5741_v52  ;;  %v5041_v33 = vadd.f32 %v7571_v4, %v10306_v44  ;;  %v11336_v4 = vld [vmem:[#allocation126_spill] sm:$0xff] }
 0x2ed   : > { %v5937_v41 = vadd.f32 %v5936_v19, %v5890_v47  ;;  %v4825_v34 = vpop.f32.mrf.mxu1  ;;  %v5377_v10 = vpop.f32.mrf.mxu0  ;;  %v5893_v23 = vmul.f32 %v5743_v14, %v5743_v14 }
 0x2ee   : > { %5790 = vst [vmem:[%s10400_s15 + $0x70] sm:$0xff] %v5742_v62  ;;  %v5892_v25 = vmul.f32 %v5742_v62, %v5742_v62  ;;  %v5745_v58 = vmul.f32 %v5601_v15, %v11333_v7  ;;  %v5600_v51 = vadd.f32 %v5377_v10, %v5038_v55  ;;  %v5837_v48 = vadd.f32 %v5836_v17, %v5742_v62  ;;  %v11337_v17 = vld [vmem:[#allocation12_spill] sm:$0xff] }
 0x2ef   : > { %v5938_v42 = vadd.f32 %v5937_v41, %v5891_v0  ;;  %v7574_v26 = vpop.f32.mrf.mxu1  ;;  %v7675_v63 = vpop.f32.mrf.mxu0  ;;  %v5040_v37 = vadd.f32 %v4825_v34, %v10309_v43 }
 0x2f0   : > { %5793 = vst [vmem:[%s10400_s15 + $0x88] sm:$0xff] %v5745_v58  ;;  %v5744_v32 = vmul.f32 %v5600_v51, %v11334_v2  ;;  %v5603_v52 = vadd.f32 %v7675_v63, %v5041_v33  ;;  %v5838_v30 = vadd.f32 %v5837_v48, %v5743_v14  ;;  %v5043_v11 = vadd.f32 %v7574_v26, %v10312_v12  ;;  %v11338_v48 = vld [vmem:[#allocation7_spill] sm:$0xff] }
 0x2f1   : > { %v5939_v36 = vadd.f32 %v5938_v42, %v5892_v25  ;;  %v4835_v59 = vpop.f32.mrf.mxu1  ;;  %v5387_v44 = vpop.f32.mrf.mxu0  ;;  %v5895_v55 = vmul.f32 %v5745_v58, %v5745_v58 }
 0x2f2   : > { %5792 = vst [vmem:[%s10400_s15 + $0x80] sm:$0xff] %v5744_v32  ;;  %v5894_v8 = vmul.f32 %v5744_v32, %v5744_v32  ;;  %v5747_v47 = vmul.f32 %v5603_v52, %v11335_v28  ;;  %v5602_v49 = vadd.f32 %v5387_v44, %v5040_v37  ;;  %v5839_v9 = vadd.f32 %v5838_v30, %v5744_v32  ;;  %v11340_v28 = vld [vmem:[#allocation6_spill] sm:$0xff] }
 0x2f3   : > { %v5940_v38 = vadd.f32 %v5939_v36, %v5893_v23  ;;  %v7577_v43 = vpop.f32.mrf.mxu1  ;;  %v7678_v27 = vpop.f32.mrf.mxu0  ;;  %v5042_v19 = vadd.f32 %v4835_v59, %v10315_v53  ;;  %v11339_v23 = vld [vmem:[#allocation18_spill] sm:$0xff] }
 0x2f4   : > { %5795 = vst [vmem:[%s10400_s15 + $0x98] sm:$0xff] %v5747_v47  ;;  %v5746_v40 = vmul.f32 %v5602_v49, %v11336_v4  ;;  %v5605_v14 = vadd.f32 %v7678_v27, %v5043_v11  ;;  %v5840_v62 = vadd.f32 %v5839_v9, %v5745_v58  ;;  %v5045_v41 = vadd.f32 %v7577_v43, %v10318_v1 }
 0x2f5   : > { %v5941_v61 = vadd.f32 %v5940_v38, %v5894_v8  ;;  %v4845_v15 = vpop.f32.mrf.mxu1  ;;  %v5397_v12 = vpop.f32.mrf.mxu0  ;;  %v5897_v26 = vmul.f32 %v5747_v47, %v5747_v47 }
 0x2f6   : > { %5794 = vst [vmem:[%s10400_s15 + $0x90] sm:$0xff] %v5746_v40  ;;  %v5896_v0 = vmul.f32 %v5746_v40, %v5746_v40  ;;  %v5749_v34 = vmul.f32 %v5605_v14, %v11337_v17  ;;  %v5604_v10 = vadd.f32 %v5397_v12, %v5042_v19  ;;  %v5841_v25 = vadd.f32 %v5840_v62, %v5746_v40  ;;  %v11341_v40 = vld [vmem:[#allocation23_spill] sm:$0xff] }
 0x2f7   : > { %v5942_v33 = vadd.f32 %v5941_v61, %v5895_v55  ;;  %v7580_v53 = vpop.f32.mrf.mxu1  ;;  %v7681_v7 = vpop.f32.mrf.mxu0  ;;  %v5044_v51 = vadd.f32 %v4845_v15, %v10321_v45 }
 0x2f8   : > { %5797 = vst [vmem:[%s10400_s15 + $0xa8] sm:$0xff] %v5749_v34  ;;  %v5748_v42 = vmul.f32 %v5604_v10, %v11338_v48  ;;  %v5607_v58 = vadd.f32 %v7681_v7, %v5045_v41  ;;  %v5842_v37 = vadd.f32 %v5841_v25, %v5747_v47  ;;  %v5047_v52 = vadd.f32 %v7580_v53, %v10324_v24 }
 0x2f9   : > { %v5943_v63 = vadd.f32 %v5942_v33, %v5896_v0  ;;  %v4855_v2 = vpop.f32.mrf.mxu1  ;;  %v5407_v1 = vpop.f32.mrf.mxu0  ;;  %v5899_v9 = vmul.f32 %v5749_v34, %v5749_v34  ;;  %v11342_v0 = vld [vmem:[#allocation17_spill] sm:$0xff] }
 0x2fa   : > { %5796 = vst [vmem:[%s10400_s15 + $0xa0] sm:$0xff] %v5748_v42  ;;  %v5898_v32 = vmul.f32 %v5748_v42, %v5748_v42  ;;  %v5751_v36 = vmul.f32 %v5607_v58, %v11339_v23  ;;  %v5606_v30 = vadd.f32 %v5407_v1, %v5044_v51  ;;  %v5843_v59 = vadd.f32 %v5842_v37, %v5748_v42  ;;  %v11343_v51 = vld [vmem:[#allocation33_spill] sm:$0xff] }
 0x2fb   : > { %v5944_v44 = vadd.f32 %v5943_v63, %v5897_v26  ;;  %v7583_v45 = vpop.f32.mrf.mxu1  ;;  %v7684_v8 = vpop.f32.mrf.mxu0  ;;  %v5046_v11 = vadd.f32 %v4855_v2, %v10327_v60  ;;  %v11344_v2 = vld [vmem:[#allocation30_spill] sm:$0xff] }
 0x2fc   : > { %5799 = vst [vmem:[%s10400_s15 + $0xb8] sm:$0xff] %v5751_v36  ;;  %v5750_v49 = vmul.f32 %v5606_v30, %v11340_v28  ;;  %v5609_v47 = vadd.f32 %v7684_v8, %v5047_v52  ;;  %v5844_v43 = vadd.f32 %v5843_v59, %v5749_v34  ;;  %v5049_v4 = vadd.f32 %v7583_v45, %v10330_v56  ;;  %v11345_v45 = vld [vmem:[#allocation45_spill] sm:$0xff] }
 0x2fd   : > { %v5945_v38 = vadd.f32 %v5944_v44, %v5898_v32  ;;  %v4865_v27 = vpop.f32.mrf.mxu1  ;;  %v5417_v24 = vpop.f32.mrf.mxu0  ;;  %v5901_v34 = vmul.f32 %v5751_v36, %v5751_v36 }
 0x2fe   : > { %5798 = vst [vmem:[%s10400_s15 + $0xb0] sm:$0xff] %v5750_v49  ;;  %v5900_v19 = vmul.f32 %v5750_v49, %v5750_v49  ;;  %v5753_v14 = vmul.f32 %v5609_v47, %v11341_v40  ;;  %v5608_v55 = vadd.f32 %v5417_v24, %v5046_v11  ;;  %v5845_v61 = vadd.f32 %v5844_v43, %v5750_v49 }
 0x2ff   : > { %v5946_v62 = vadd.f32 %v5945_v38, %v5899_v9  ;;  %v7586_v60 = vpop.f32.mrf.mxu1  ;;  %v7687_v15 = vpop.f32.mrf.mxu0  ;;  %v5048_v12 = vadd.f32 %v4865_v27, %v10333_v35  ;;  %v11346_v38 = vld [vmem:[#allocation39_spill] sm:$0xff] }
 0x300   : > { %5801 = vst [vmem:[%s10400_s15 + $0xc8] sm:$0xff] %v5753_v14  ;;  %v5752_v41 = vmul.f32 %v5608_v55, %v11342_v0  ;;  %v5611_v17 = vadd.f32 %v7687_v15, %v5049_v4  ;;  %v5846_v25 = vadd.f32 %v5845_v61, %v5751_v36  ;;  %v5051_v7 = vadd.f32 %v7586_v60, %v10336_v39  ;;  %v11347_v61 = vld [vmem:[#allocation57_spill] sm:$0xff] }
 0x301   : > { %v5947_v10 = vadd.f32 %v5946_v62, %v5900_v19  ;;  %v4875_v33 = vpop.f32.mrf.mxu1  ;;  %v5427_v56 = vpop.f32.mrf.mxu0  ;;  %v5903_v52 = vmul.f32 %v5753_v14, %v5753_v14 }
 0x302   : > { %5800 = vst [vmem:[%s10400_s15 + $0xc0] sm:$0xff] %v5752_v41  ;;  %v5902_v53 = vmul.f32 %v5752_v41, %v5752_v41  ;;  %v5755_v48 = vmul.f32 %v5611_v17, %v11343_v51  ;;  %v5610_v42 = vadd.f32 %v5427_v56, %v5048_v12  ;;  %v5847_v58 = vadd.f32 %v5846_v25, %v5752_v41  ;;  %v11348_v17 = vld [vmem:[#allocation52_spill] sm:$0xff] }
 0x303   : > { %v5948_v26 = vadd.f32 %v5947_v10, %v5901_v34  ;;  %v7589_v35 = vpop.f32.mrf.mxu1  ;;  %v7690_v63 = vpop.f32.mrf.mxu0  ;;  %v5050_v37 = vadd.f32 %v4875_v33, %v10339_v21 }
 0x304   : > { %5803 = vst [vmem:[%s10400_s15 + $0xd8] sm:$0xff] %v5755_v48  ;;  %v5754_v1 = vmul.f32 %v5610_v42, %v11344_v2  ;;  %v5613_v32 = vadd.f32 %v7690_v63, %v5051_v7  ;;  %v5848_v36 = vadd.f32 %v5847_v58, %v5753_v14  ;;  %v5053_v44 = vadd.f32 %v7589_v35, %v10342_v13  ;;  %v11350_v2 = vld [vmem:[#allocation64_spill] sm:$0xff] }
 0x305   : > { %v5949_v23 = vadd.f32 %v5948_v26, %v5902_v53  ;;  %v4885_v30 = vpop.f32.mrf.mxu1  ;;  %v5437_v39 = vpop.f32.mrf.mxu0  ;;  %v5905_v24 = vmul.f32 %v5755_v48, %v5755_v48 }
 0x306   : > { %5802 = vst [vmem:[%s10400_s15 + $0xd0] sm:$0xff] %v5754_v1  ;;  %v5904_v59 = vmul.f32 %v5754_v1, %v5754_v1  ;;  %v5757_v8 = vmul.f32 %v5613_v32, %v11345_v45  ;;  %v5612_v11 = vadd.f32 %v5437_v39, %v5050_v37  ;;  %v5849_v28 = vadd.f32 %v5848_v36, %v5754_v1 }
 0x307   : > { %v5950_v49 = vadd.f32 %v5949_v23, %v5903_v52  ;;  %v7592_v21 = vpop.f32.mrf.mxu1  ;;  %v7693_v47 = vpop.f32.mrf.mxu0  ;;  %v5052_v9 = vadd.f32 %v4885_v30, %v10345_v3 }
 0x308   : > { %5805 = vst [vmem:[%s10400_s15 + $0xe8] sm:$0xff] %v5757_v8  ;;  %v5756_v43 = vmul.f32 %v5612_v11, %v11346_v38  ;;  %v5615_v27 = vadd.f32 %v7693_v47, %v5053_v44  ;;  %v5850_v4 = vadd.f32 %v5849_v28, %v5755_v48  ;;  %v5055_v55 = vadd.f32 %v7592_v21, %v10348_v54  ;;  %v11349_v48 = vld [vmem:[#allocation69_spill] sm:$0xff]  ;;  %v11352_v47 = vld [vmem:[#allocation76_spill] sm:$0xff] }
 0x309   : > { %v5951_v19 = vadd.f32 %v5950_v49, %v5904_v59  ;;  %v4895_v40 = vpop.f32.mrf.mxu1  ;;  %v5447_v13 = vpop.f32.mrf.mxu0  ;;  %v5907_v25 = vmul.f32 %v5757_v8, %v5757_v8  ;;  %v11351_v44 = vld [vmem:[#allocation81_spill] sm:$0xff] }
 0x30a   : > { %5804 = vst [vmem:[%s10400_s15 + $0xe0] sm:$0xff] %v5756_v43  ;;  %v5906_v14 = vmul.f32 %v5756_v43, %v5756_v43  ;;  %v5759_v62 = vmul.f32 %v5615_v27, %v11347_v61  ;;  %v5614_v60 = vadd.f32 %v5447_v13, %v5052_v9  ;;  %v5851_v15 = vadd.f32 %v5850_v4, %v5756_v43  ;;  %v11353_v13 = vld [vmem:[#allocation92_spill] sm:$0xff] }
 0x30b   : > { %v5952_v12 = vadd.f32 %v5951_v19, %v5905_v24  ;;  %v7595_v3 = vpop.f32.mrf.mxu1  ;;  %v7696_v0 = vpop.f32.mrf.mxu0  ;;  %v5054_v41 = vadd.f32 %v4895_v40, %v10351_v31 }
 0x30c   : > { %5807 = vst [vmem:[%s10400_s15 + $0xf8] sm:$0xff] %v5759_v62  ;;  %v5758_v34 = vmul.f32 %v5614_v60, %v11348_v17  ;;  %v5617_v10 = vadd.f32 %v7696_v0, %v5055_v55  ;;  %v5852_v56 = vadd.f32 %v5851_v15, %v5757_v8  ;;  %v5057_v51 = vadd.f32 %v7595_v3, %v10354_v18 }
 0x30d   : > { %v5953_v33 = vadd.f32 %v5952_v12, %v5906_v14  ;;  %v4905_v53 = vpop.f32.mrf.mxu1  ;;  %v5457_v54 = vpop.f32.mrf.mxu0  ;;  %v5909_v52 = vmul.f32 %v5759_v62, %v5759_v62  ;;  %v11354_v12 = vld [vmem:[#allocation88_spill] sm:$0xff] }
 0x30e   : > { %5806 = vst [vmem:[%s10400_s15 + $0xf0] sm:$0xff] %v5758_v34  ;;  %v5908_v7 = vmul.f32 %v5758_v34, %v5758_v34  ;;  %v5761_v42 = vmul.f32 %v5617_v10, %v11349_v48  ;;  %v5616_v58 = vadd.f32 %v5457_v54, %v5054_v41  ;;  %v5853_v26 = vadd.f32 %v5852_v56, %v5758_v34  ;;  %v11355_v56 = vld [vmem:[#allocation102_spill] sm:$0xff] }
 0x30f   : > { %v5954_v35 = vadd.f32 %v5953_v33, %v5907_v25  ;;  %v7598_v31 = vpop.f32.mrf.mxu1  ;;  %v7699_v63 = vpop.f32.mrf.mxu0  ;;  %v5056_v37 = vadd.f32 %v4905_v53, %v10357_v50 }
 0x310   : > { %5809 = vst [vmem:[%s10400_s15 + $0x108] sm:$0xff] %v5761_v42  ;;  %v5760_v1 = vmul.f32 %v5616_v58, %v11350_v2  ;;  %v5619_v32 = vadd.f32 %v7699_v63, %v5057_v51  ;;  %v5854_v36 = vadd.f32 %v5853_v26, %v5759_v62  ;;  %v5059_v59 = vadd.f32 %v7598_v31, %v10360_v22  ;;  %v11356_v58 = vld [vmem:[#allocation98_spill] sm:$0xff] }
 0x311   : > { %v5955_v23 = vadd.f32 %v5954_v35, %v5908_v7  ;;  %v4915_v30 = vpop.f32.mrf.mxu1  ;;  %v5467_v18 = vpop.f32.mrf.mxu0  ;;  %v5911_v43 = vmul.f32 %v5761_v42, %v5761_v42 }
 0x312   : > { %5808 = vst [vmem:[%s10400_s15 + $0x100] sm:$0xff] %v5760_v1  ;;  %v5910_v39 = vmul.f32 %v5760_v1, %v5760_v1  ;;  %v5763_v45 = vmul.f32 %v5619_v32, %v11351_v44  ;;  %v5618_v8 = vadd.f32 %v5467_v18, %v5056_v37  ;;  %v5855_v11 = vadd.f32 %v5854_v36, %v5760_v1  ;;  %v11358_v44 = vld [vmem:[#allocation109_spill] sm:$0xff] }
 0x313   : > { %v5956_v28 = vadd.f32 %v5955_v23, %v5909_v52  ;;  %v7601_v50 = vpop.f32.mrf.mxu1  ;;  %v7702_v49 = vpop.f32.mrf.mxu0  ;;  %v5058_v21 = vadd.f32 %v4915_v30, %v10363_v16  ;;  %v11357_v52 = vld [vmem:[#allocation114_spill] sm:$0xff] }
 0x314   : > { %5811 = vst [vmem:[%s10400_s15 + $0x118] sm:$0xff] %v5763_v45  ;;  %v5762_v9 = vmul.f32 %v5618_v8, %v11352_v47  ;;  %v5621_v38 = vadd.f32 %v7702_v49, %v5059_v59  ;;  %v5856_v24 = vadd.f32 %v5855_v11, %v5761_v42  ;;  %v5061_v40 = vadd.f32 %v7601_v50, %v10366_v20  ;;  %v11359_v47 = vld [vmem:[#allocation50_spill] sm:$0xff] }
 0x315   : > { %v5957_v27 = vadd.f32 %v5956_v28, %v5910_v39  ;;  %v4925_v19 = vpop.f32.mrf.mxu1  ;;  %v5477_v22 = vpop.f32.mrf.mxu0  ;;  %v5913_v41 = vmul.f32 %v5763_v45, %v5763_v45 }
 0x316   : > { %5810 = vst [vmem:[%s10400_s15 + $0x110] sm:$0xff] %v5762_v9  ;;  %v5912_v4 = vmul.f32 %v5762_v9, %v5762_v9  ;;  %v5765_v14 = vmul.f32 %v5621_v38, %v11353_v13  ;;  %v5620_v55 = vadd.f32 %v5477_v22, %v5058_v21  ;;  %v5857_v61 = vadd.f32 %v5856_v24, %v5762_v9  ;;  %v11360_v38 = vld [vmem:[#allocation125_spill] sm:$0xff] }
 0x317   : > { %v5958_v62 = vadd.f32 %v5957_v27, %v5911_v43  ;;  %v7604_v16 = vpop.f32.mrf.mxu1  ;;  %v7705_v60 = vpop.f32.mrf.mxu0  ;;  %v5060_v15 = vadd.f32 %v4925_v19, %v10369_v29  ;;  %v11362_v13 = vld [vmem:[#allocation121_spill] sm:$0xff] }
 0x318   : > { %5813 = vst [vmem:[%s10400_s15 + $0x128] sm:$0xff] %v5765_v14  ;;  %v5764_v3 = vmul.f32 %v5620_v55, %v11354_v12  ;;  %v5623_v0 = vadd.f32 %v7705_v60, %v5061_v40  ;;  %v5858_v34 = vadd.f32 %v5857_v61, %v5763_v45  ;;  %v5063_v33 = vadd.f32 %v7604_v16, %v10372_v5 }
 0x319   : > { %v5959_v17 = vadd.f32 %v5958_v62, %v5912_v4  ;;  %v4935_v10 = vpop.f32.mrf.mxu1  ;;  %v5487_v20 = vpop.f32.mrf.mxu0  ;;  %v5915_v31 = vmul.f32 %v5765_v14, %v5765_v14  ;;  %v11361_v4 = vld [vmem:[#allocation36_spill] sm:$0xff] }
 0x31a   : > { %5812 = vst [vmem:[%s10400_s15 + $0x120] sm:$0xff] %v5764_v3  ;;  %v5914_v25 = vmul.f32 %v5764_v3, %v5764_v3  ;;  %v5767_v53 = vmul.f32 %v5623_v0, %v11355_v56  ;;  %v5622_v54 = vadd.f32 %v5487_v20, %v5060_v15  ;;  %v5859_v7 = vadd.f32 %v5858_v34, %v5764_v3  ;;  %v11363_v3 = vld [vmem:[#allocation56_spill] sm:$0xff] }
 0x31b   : > { %v5960_v51 = vadd.f32 %v5959_v17, %v5913_v41  ;;  %v7607_v29 = vpop.f32.mrf.mxu1  ;;  %v7708_v48 = vpop.f32.mrf.mxu0  ;;  %v5062_v42 = vadd.f32 %v4935_v10, %v10375_v46  ;;  %v11364_v41 = vld [vmem:[#allocation27_spill] sm:$0xff] }
 0x31c   : > { %5815 = vst [vmem:[%s10400_s15 + $0x138] sm:$0xff] %v5767_v53  ;;  %v5766_v26 = vmul.f32 %v5622_v54, %v11356_v58  ;;  %v5625_v35 = vadd.f32 %v7708_v48, %v5063_v33  ;;  %v5860_v37 = vadd.f32 %v5859_v7, %v5765_v14  ;;  %v5065_v32 = vadd.f32 %v7607_v29, %v10378_v57  ;;  %v11365_v33 = vld [vmem:[#allocation42_spill] sm:$0xff] }
 0x31d   : > { %v5961_v63 = vadd.f32 %v5960_v51, %v5914_v25  ;;  %v4945_v2 = vpop.f32.mrf.mxu1  ;;  %v5497_v5 = vpop.f32.mrf.mxu0  ;;  %v5917_v11 = vmul.f32 %v5767_v53, %v5767_v53 }
 0x31e   : > { %5814 = vst [vmem:[%s10400_s15 + $0x130] sm:$0xff] %v5766_v26  ;;  %v5916_v1 = vmul.f32 %v5766_v26, %v5766_v26  ;;  %v5769_v23 = vmul.f32 %v5625_v35, %v11357_v52  ;;  %v5624_v36 = vadd.f32 %v5497_v5, %v5062_v42  ;;  %v5861_v30 = vadd.f32 %v5860_v37, %v5766_v26  ;;  %v11367_v26 = vld [vmem:[#allocation176_spill] sm:$0xff] }
 0x31f   : > { %v5962_v18 = vadd.f32 %v5961_v63, %v5915_v31  ;;  %v7610_v46 = vpop.f32.mrf.mxu1  ;;  %v7711_v39 = vpop.f32.mrf.mxu0  ;;  %v5064_v59 = vadd.f32 %v4945_v2, %v10381_v6  ;;  %v11368_v2 = vld [vmem:[#allocation32_spill] sm:$0xff] }
 0x320   : > { %5817 = vst [vmem:[%s10400_s15 + $0x148] sm:$0xff] %v5769_v23  ;;  %v5768_v45 = vmul.f32 %v5624_v36, %v11358_v44  ;;  %v5627_v8 = vadd.f32 %v7711_v39, %v5065_v32  ;;  %v5862_v50 = vadd.f32 %v5861_v30, %v5767_v53  ;;  %v5067_v9 = vadd.f32 %v7610_v46, %v11359_v47  ;;  %v11366_v53 = vld [vmem:[#allocation11_spill] sm:$0xff] }
 0x321   : > { %v5963_v28 = vadd.f32 %v5962_v18, %v5916_v1  ;;  %v4955_v49 = vpop.f32.mrf.mxu1  ;;  %v5507_v57 = vpop.f32.mrf.mxu0  ;;  %v5919_v61 = vmul.f32 %v5769_v23, %v5769_v23 }
 0x322   : > { %5816 = vst [vmem:[%s10400_s15 + $0x140] sm:$0xff] %v5768_v45  ;;  %v5918_v21 = vmul.f32 %v5768_v45, %v5768_v45  ;;  %v5771_v43 = vmul.f32 %v5627_v8, %v11360_v38  ;;  %v5626_v27 = vadd.f32 %v5507_v57, %v5064_v59  ;;  %v5863_v24 = vadd.f32 %v5862_v50, %v5768_v45 }
 0x323   : > { %v5964_v19 = vadd.f32 %v5963_v28, %v5917_v11  ;;  %v7613_v6 = vpop.f32.mrf.mxu1  ;;  %v7714_v22 = vpop.f32.mrf.mxu0  ;;  %v5066_v40 = vadd.f32 %v4955_v49, %v11361_v4 }
 0x324   : > { %5819 = vst [vmem:[%s10400_s15 + $0x158] sm:$0xff] %v5771_v43  ;;  %v5770_v14 = vmul.f32 %v5626_v27, %v11362_v13  ;;  %v5629_v55 = vadd.f32 %v7714_v22, %v5067_v9  ;;  %v5864_v16 = vadd.f32 %v5863_v24, %v5769_v23  ;;  %v5069_v0 = vadd.f32 %v7613_v6, %v11363_v3 }
 0x325   : > { %v5965_v62 = vadd.f32 %v5964_v19, %v5918_v21  ;;  %v4965_v60 = vpop.f32.mrf.mxu1  ;;  %v5517_v15 = vpop.f32.mrf.mxu0  ;;  %v5921_v51 = vmul.f32 %v5771_v43, %v5771_v43 }
 0x326   : > { %5818 = vst [vmem:[%s10400_s15 + $0x150] sm:$0xff] %v5770_v14  ;;  %v5920_v12 = vmul.f32 %v5770_v14, %v5770_v14  ;;  %v5773_v17 = vmul.f32 %v5629_v55, %v11364_v41  ;;  %v5628_v34 = vadd.f32 %v5517_v15, %v5066_v40  ;;  %v5865_v10 = vadd.f32 %v5864_v16, %v5770_v14 }
 0x327   : > { %v5966_v20 = vadd.f32 %v5965_v62, %v5919_v61  ;;  %v7717_v25 = vpop.f32.mrf.mxu0  ;;  %v5068_v56 = vadd.f32 %v4965_v60, %v11365_v33 }
 0x328   : > { %5821 = vst [vmem:[%s10400_s15 + $0x168] sm:$0xff] %v5773_v17  ;;  %v5772_v54 = vmul.f32 %v5628_v34, %v11366_v53  ;;  %v5631_v7 = vadd.f32 %v7717_v25, %v5069_v0  ;;  %v5866_v48 = vadd.f32 %v5865_v10, %v5771_v43  ;;  %v5923_v1 = vmul.f32 %v5773_v17, %v5773_v17 }
 0x329   : > { %v5967_v29 = vadd.f32 %v5966_v20, %v5920_v12  ;;  %v5527_v42 = vpop.f32.mrf.mxu0 }
 0x32a   : > { %5820 = vst [vmem:[%s10400_s15 + $0x160] sm:$0xff] %v5772_v54  ;;  %v5922_v58 = vmul.f32 %v5772_v54, %v5772_v54  ;;  %v5775_v35 = vmul.f32 %v5631_v7, %v11367_v26  ;;  %v5630_v31 = vadd.f32 %v5527_v42, %v5068_v56  ;;  %v5867_v63 = vadd.f32 %v5866_v48, %v5772_v54 }
 0x32b   : > { %v5968_v37 = vadd.f32 %v5967_v29, %v5921_v51 }
 0x32c   : > { %5823 = vst [vmem:[%s10400_s15 + $0x178] sm:$0xff] %v5775_v35  ;;  %v5774_v5 = vmul.f32 %v5630_v31, %v11368_v2  ;;  %v5868_v52 = vadd.f32 %v5867_v63, %v5773_v17  ;;  %v5925_v18 = vmul.f32 %v5775_v35, %v5775_v35 }
 0x32d   : > { %v5969_v32 = vadd.f32 %v5968_v37, %v5922_v58 }
 0x32e   : > { %5822 = vst [vmem:[%s10400_s15 + $0x170] sm:$0xff] %v5774_v5  ;;  %v5924_v23 = vmul.f32 %v5774_v5, %v5774_v5  ;;  %v5869_v36 = vadd.f32 %v5868_v52, %v5774_v5 }
 0x32f   : > { %v5970_v30 = vadd.f32 %v5969_v32, %v5923_v1 }
 0x330   : > { %v5870_v46 = vadd.f32 %v5869_v36, %v5775_v35 }
 0x331   : > { %v5971_v39 = vadd.f32 %v5970_v30, %v5924_v23 }
 0x332   : > { %v5871_v59 = vrot.slane %v5870_v46, 4 }
 0x333   : > { %v5972_v44 = vadd.f32 %v5971_v39, %v5925_v18 }
 0x334   : > { %v5872_v45 = vadd.f32 %v5871_v59, %v5870_v46 }
 0x335   : > { %v5973_v8 = vrot.slane %v5972_v44, 4 }
 0x336   : > { %v5873_v11 = vrot.slane %v5872_v45, 2 }
 0x337   : > { %v5974_v28 = vadd.f32 %v5973_v8, %v5972_v44 }
 0x338   : > { %v5874_v50 = vadd.f32 %v5873_v11, %v5872_v45 }
 0x339   : > { %v5975_v49 = vrot.slane %v5974_v28, 2 }
 0x33a   : > { %v5875_v57 = vrot.slane %v5874_v50, 1 }
 0x33b   : > { %v5976_v21 = vadd.f32 %v5975_v49, %v5974_v28 }
 0x33c   : > { %v5876_v47 = vadd.f32 %v5875_v57, %v5874_v50 }
 0x33d   : > { %v5977_v9 = vrot.slane %v5976_v21, 1 }
 0x33e   : > { %5877 = vst [vmem:[%s262_s18] sm:$0x1] %v5876_v47 }
 0x33f   : > { %v5978_v38 = vadd.f32 %v5977_v9, %v5976_v21 }
 0x341   : > { %5979 = vst [vmem:[%s262_s18 + $0x1] sm:$0x1] %v5978_v38 }
 0x342 PF: > { %s17_s21 = sadd.s32 1, %s7769_s21  }
 0x343   : > { %p14_p4 = scmp.ge.s32.totalorder %s17_s21, 4  }
 0x345   :  { %16 = sbr.rel (!%p14_p4) target bundleno = 1 (0x1), region = 90 }

// kernel: basic_block_forward.3
= control target key start
LH: loop header
LB: loop body
LE: loop exit
PB: predicated region body
PF: predicated region fallthrough
CT: control target
= control target key end

     0   :  { %s7512_s15 = smov 0   ;;  %s10171_s0 = inlined_call_operand.vmem [shape: f32[2,432,128], index: 0, kind: input, shape index: {}]   ;;  %s10172_s1 = inlined_call_operand.vmem [shape: f32[384,1], index: 1, kind: input, shape index: {}]   ;;  %s10173_s2 = inlined_call_operand.vmem [shape: f32[3,3,128,128], index: 2, kind: input, shape index: {}]   ;;  %s10174_s3 = inlined_call_operand.vmem [shape: f32[2,384,128], index: 3, kind: output, shape index: {0}]   ;;  %s10175_s4 = inlined_call_operand.vmem [shape: f32[2,2,128], index: 4, kind: output, shape index: {1}]  }
   0x1 LB: > { %s5704_s16 = sadd.s32 4294967295, %s7484_s15   ;;  %p5708_p0 = scmp.ge.s32.totalorder %s7484_s15, 1  ;;  %s7484_s15 = sphi %s7512_s15, %s15_s15  }
   0x2   : > { %p165_p1 = scmp.lt.s32.totalorder %s7484_s15, 3 }
   0x4   : > { %p166_p2 = pnand %p5708_p0, %p165_p1 }
   0x6   : > { %169 = sbr.rel (%p166_p2) target bundleno = 701 (0x2bd), region = 32 }
   0xb   : > { %v371_v0 = vld [vmem:[%s10173_s2 + $0x78] sm:$0xff]  ;;  %v370_v1 = vld [vmem:[%s10173_s2 + $0x70] sm:$0xff]  ;;  %v369_v2 = vld [vmem:[%s10173_s2 + $0x68] sm:$0xff]  ;;  %p195_p3 = scmp.lt.s32.totalorder %s5704_s16, 1  ;;  %v305_v11 = vlaneseq }
   0xc   : > { %7354 = vmatprep.subr.mxu1 %v371_v0  ;;  %6418 = vmatprep.subr.mxu0 %v371_v0  ;;  %v368_v3 = vld [vmem:[%s10173_s2 + $0x60] sm:$0xff]  ;;  %v367_v4 = vld [vmem:[%s10173_s2 + $0x58] sm:$0xff]  ;;  %v366_v5 = vld [vmem:[%s10173_s2 + $0x50] sm:$0xff] }
   0xd   : > { %7370 = vmatpush3.msra.mxu1 %v371_v0  ;;  %6419 = vmatpush3.msra.mxu0 %v371_v0  ;;  %v365_v6 = vld [vmem:[%s10173_s2 + $0x48] sm:$0xff]  ;;  %s10389_s16 = smov (!%p195_p3, %s5704_s16), 1  ;;  %v364_v7 = vld [vmem:[%s10173_s2 + $0x40] sm:$0xff]  ;;  %v363_v8 = vld [vmem:[%s10173_s2 + $0x38] sm:$0xff]  ;;  %v7577_v16 = vshrl.u32 %v305_v11, 7 }
   0xe   : > { %7355 = vmatprep.subr.mxu1 %v370_v1  ;;  %6420 = vmatprep.subr.mxu0 %v370_v1  ;;  %s7386_s9 = smul.u32 432, %s10389_s16  ;;  %v362_v9 = vld [vmem:[%s10173_s2 + $0x30] sm:$0xff]  ;;  %v361_v10 = vld [vmem:[%s10173_s2 + $0x28] sm:$0xff]  ;;  %v360_v12 = vld [vmem:[%s10173_s2 + $0x20] sm:$0xff]  ;;  %s5711_s13 = sshll.u32 %s10389_s16, 1 }
   0xf   : > { %7371 = vmatpush3.msra.mxu1 %v370_v1  ;;  %6421 = vmatpush3.msra.mxu0 %v370_v1  ;;  %v359_v13 = vld [vmem:[%s10173_s2 + $0x18] sm:$0xff]  ;;  %v358_v19 = vld [vmem:[%s10173_s2 + $0x10] sm:$0xff]  ;;  %v357_v24 = vld [vmem:[%s10173_s2 + $0x8] sm:$0xff]  ;;  %vm307_vm0 = vcmp.lt.s32.totalorder %v7577_v16, 1  ;;  %vm1239_vm1 = vcmp.lt.s32.totalorder %v7577_v16, 7  ;;  %s208_s19 = scalar_lea.vmem %s10175_s4, %s5711_s13 }
  0x10   : > { %7356 = vmatprep.subr.mxu1 %v369_v2  ;;  %6422 = vmatprep.subr.mxu0 %v369_v2  ;;  %s7563_s18 = scalar_lea.vmem %s10171_s0, %s7386_s9  ;;  %v356_v29 = vld [vmem:[%s10173_s2] sm:$0xff]  ;;  %v5727_v38 = vld [vmem:[%s10173_s2 + $0xf8] sm:$0xff]  ;;  %v5726_v48 = vld [vmem:[%s10173_s2 + $0xf0] sm:$0xff] }
  0x11   : > { %7372 = vmatpush3.msra.mxu1 %v369_v2  ;;  %6423 = vmatpush3.msra.mxu0 %v369_v2  ;;  %v7572_v14 = vld [vmem:[%s7563_s18 + $0xb8] sm:$0xff]  ;;  %v7575_v15 = vld [vmem:[%s7563_s18 + $0xc0] sm:$0xff]  ;;  %v7589_v20 = vld [vmem:[%s7563_s18 + $0xc8] sm:$0xff] }
  0x12   : > { %7357 = vmatprep.subr.mxu1 %v368_v3  ;;  %6424 = vmatprep.subr.mxu0 %v368_v3  ;;  %v7580_v17 = vld [vmem:[%s7563_s18] sm:$0xff]  ;;  %v7583_v18 = vld [vmem:[%s7563_s18 + $0x178] sm:$0xff]  ;;  %v10176_v21 = vrot.slane %v7572_v14, 7  ;;  %v281_v22 = vrot.slane %v7575_v15, 7  ;;  %v7594_v23 = vld [vmem:[%s7563_s18 + $0x8] sm:$0xff]  ;;  %v282_v28 = vrot.slane %v7589_v20, 7 }
  0x13   : > { %7373 = vmatpush3.msra.mxu1 %v368_v3  ;;  %6425 = vmatpush3.msra.mxu0 %v368_v3  ;;  %v257_v25 = vrot.slane %v7580_v17, 7  ;;  %v10177_v26 = vrot.slane %v7583_v18, 7  ;;  %v7603_v27 = vld [vmem:[%s7563_s18 + $0xd0] sm:$0xff]  ;;  %v258_v30 = vrot.slane %v7594_v23, 7  ;;  %v7614_v32 = vld [vmem:[%s7563_s18 + $0xd8] sm:$0xff]  ;;  %v7636_v41 = vld [vmem:[%s7563_s18 + $0xe0] sm:$0xff] }
  0x14   : > { %7358 = vmatprep.subr.mxu1 %v367_v4  ;;  %6426 = vmatprep.subr.mxu0 %v367_v4  ;;  %v7611_v31 = vld [vmem:[%s7563_s18 + $0x10] sm:$0xff]  ;;  %v331_v33 = vsel %vm307_vm0, %v10176_v21, %v281_v22  ;;  %v283_v34 = vrot.slane %v7603_v27, 7  ;;  %v7622_v35 = vld [vmem:[%s7563_s18 + $0x18] sm:$0xff]  ;;  %v330_v37 = vsel %vm307_vm0, %v281_v22, %v282_v28  ;;  %v284_v40 = vrot.slane %v7614_v32, 7  ;;  %v7642_v44 = vld [vmem:[%s7563_s18 + $0x20] sm:$0xff] }
  0x15   : > { %7374 = vmatpush3.msra.mxu1 %v367_v4  ;;  %6427 = vmatpush3.msra.mxu0 %v367_v4  ;;  %v355_v36 = vsel %vm307_vm0, %v10177_v26, %v257_v25  ;;  %v259_v39 = vrot.slane %v7611_v31, 7  ;;  %v354_v42 = vsel %vm307_vm0, %v257_v25, %v258_v30  ;;  %v260_v43 = vrot.slane %v7622_v35, 7  ;;  %v5743_v45 = vld [vmem:[%s10173_s2 + $0x178] sm:$0xff]  ;;  %v7650_v47 = vld [vmem:[%s7563_s18 + $0xe8] sm:$0xff]  ;;  %v5742_v55 = vld [vmem:[%s10173_s2 + $0x170] sm:$0xff] }
  0x16   : > { %7359 = vmatprep.subr.mxu1 %v366_v5  ;;  %6428 = vmatprep.subr.mxu0 %v366_v5  ;;  %v329_v46 = vsel %vm307_vm0, %v282_v28, %v283_v34  ;;  %v285_v49 = vrot.slane %v7636_v41, 7  ;;  %v7657_v50 = vld [vmem:[%s7563_s18 + $0x28] sm:$0xff]  ;;  %v328_v52 = vsel %vm307_vm0, %v283_v34, %v284_v40  ;;  %v261_v53 = vrot.slane %v7642_v44, 7  ;;  %v7671_v57 = vld [vmem:[%s7563_s18 + $0xf0] sm:$0xff]  ;;  %v7681_v61 = vld [vmem:[%s7563_s18 + $0xf8] sm:$0xff] }
  0x17   : > { %7375 = vmatpush3.msra.mxu1 %v366_v5  ;;  %6429 = vmatpush3.msra.mxu0 %v366_v5  ;;  %v353_v51 = vsel %vm307_vm0, %v258_v30, %v259_v39  ;;  %v352_v54 = vsel %vm307_vm0, %v259_v39, %v260_v43  ;;  %v286_v56 = vrot.slane %v7650_v47, 7  ;;  %v5725_v58 = vld [vmem:[%s10173_s2 + $0xe8] sm:$0xff]  ;;  %v262_v59 = vrot.slane %v7657_v50, 7  ;;  %v7678_v60 = vld [vmem:[%s7563_s18 + $0x30] sm:$0xff]  ;;  %v7689_v1 = vld [vmem:[%s7563_s18 + $0x38] sm:$0xff] }
  0x18   : > { %7360 = vmatprep.subr.mxu1 %v365_v6  ;;  %6430 = vmatprep.subr.mxu0 %v365_v6  ;;  %v327_v62 = vsel %vm307_vm0, %v284_v40, %v285_v49  ;;  %v351_v63 = vsel %vm307_vm0, %v260_v43, %v261_v53  ;;  %v287_v0 = vrot.slane %v7671_v57, 7  ;;  %v5741_v3 = vld [vmem:[%s10173_s2 + $0x168] sm:$0xff]  ;;  %v263_v4 = vrot.slane %v7678_v60, 7  ;;  %v5723_v28 = vld [vmem:[%s10173_s2 + $0xd8] sm:$0xff] }
  0x19   : > { %7376 = vmatpush3.msra.mxu1 %v365_v6  ;;  %6431 = vmatpush3.msra.mxu0 %v365_v6  ;;  %v326_v2 = vsel %vm307_vm0, %v285_v49, %v286_v56  ;;  %v288_v5 = vrot.slane %v7681_v61, 7  ;;  %v7699_v6 = vld [vmem:[%s7563_s18 + $0x100] sm:$0xff]  ;;  %v7711_v11 = vld [vmem:[%s7563_s18 + $0x108] sm:$0xff]  ;;  %v7748_v40 = vld [vmem:[%s7563_s18 + $0x118] sm:$0xff] }
  0x1a   : > { %7361 = vmatprep.subr.mxu1 %v364_v7  ;;  %6432 = vmatprep.subr.mxu0 %v364_v7  ;;  %v7720_v22 = vld [vmem:[%s7563_s18 + $0x48] sm:$0xff]  ;;  %v290_v30 = vrot.slane %v7711_v11, 7  ;;  %v7908_v26 = vld [vmem:[%s7563_s18 + $0x98] sm:$0xff] }
  0x1b   : > { %7377 = vmatpush3.msra.mxu1 %v364_v7  ;;  %6433 = vmatpush3.msra.mxu0 %v364_v7  ;;  %v350_v7 = vsel %vm307_vm0, %v261_v53, %v262_v59  ;;  %v324_v25 = vsel %vm307_vm0, %v287_v0, %v288_v5  ;;  %v292_v53 = vrot.slane %v7748_v40, 7 }
  0x1c   : > { %7362 = vmatprep.subr.mxu1 %v363_v8  ;;  %6434 = vmatprep.subr.mxu0 %v363_v8 }
  0x1d   : > { %7378 = vmatpush3.msra.mxu1 %v363_v8  ;;  %6435 = vmatpush3.msra.mxu0 %v363_v8  ;;  %v5724_v8 = vld [vmem:[%s10173_s2 + $0xe0] sm:$0xff] }
  0x1e   : > { %7363 = vmatprep.subr.mxu1 %v362_v9  ;;  %6436 = vmatprep.subr.mxu0 %v362_v9 }
  0x1f   : > { %7379 = vmatpush3.msra.mxu1 %v362_v9  ;;  %6437 = vmatpush3.msra.mxu0 %v362_v9  ;;  %v264_v9 = vrot.slane %v7689_v1, 7 }
  0x20   : > { %7364 = vmatprep.subr.mxu1 %v361_v10  ;;  %6438 = vmatprep.subr.mxu0 %v361_v10 }
  0x21   : > { %7380 = vmatpush3.msra.mxu1 %v361_v10  ;;  %6439 = vmatpush3.msra.mxu0 %v361_v10  ;;  %v7708_v10 = vld [vmem:[%s7563_s18 + $0x40] sm:$0xff]  ;;  %v348_v34 = vsel %vm307_vm0, %v263_v4, %v264_v9 }
  0x22   : > { %7365 = vmatprep.subr.mxu1 %v360_v12  ;;  %6440 = vmatprep.subr.mxu0 %v360_v12 }
  0x23   : > { %7381 = vmatpush3.msra.mxu1 %v360_v12  ;;  %6441 = vmatpush3.msra.mxu0 %v360_v12  ;;  %v325_v12 = vsel %vm307_vm0, %v286_v56, %v287_v0 }
  0x24   : > { %7366 = vmatprep.subr.mxu1 %v359_v13  ;;  %6442 = vmatprep.subr.mxu0 %v359_v13 }
  0x25   : > { %7382 = vmatpush3.msra.mxu1 %v359_v13  ;;  %6443 = vmatpush3.msra.mxu0 %v359_v13  ;;  %v5740_v13 = vld [vmem:[%s10173_s2 + $0x160] sm:$0xff] }
  0x26   : > { %7367 = vmatprep.subr.mxu1 %v358_v19  ;;  %6444 = vmatprep.subr.mxu0 %v358_v19 }
  0x27   : > { %7383 = vmatpush3.msra.mxu1 %v358_v19  ;;  %6445 = vmatpush3.msra.mxu0 %v358_v19  ;;  %v289_v19 = vrot.slane %v7699_v6, 7 }
  0x28   : > { %7368 = vmatprep.subr.mxu1 %v357_v24  ;;  %6446 = vmatprep.subr.mxu0 %v357_v24 }
  0x29   : > { %7384 = vmatpush3.msra.mxu1 %v357_v24  ;;  %6447 = vmatpush3.msra.mxu0 %v357_v24  ;;  %v349_v24 = vsel %vm307_vm0, %v262_v59, %v263_v4  ;;  %v323_v39 = vsel %vm307_vm0, %v288_v5, %v289_v19  ;;  %v7783_v59 = vld [vmem:[%s7563_s18 + $0x128] sm:$0xff] }
  0x2a   : > { %7369 = vmatprep.subr.mxu1 %v356_v29  ;;  %6448 = vmatprep.subr.mxu0 %v356_v29  ;;  %v5737_v4 = vld [vmem:[%s10173_s2 + $0x148] sm:$0xff] }
  0x2b   : > { %7385 = vmatpush3.msra.mxu1 %v356_v29  ;;  %6486 = vmatprep.mubr.f32.mxu1 %v331_v33  ;;  %v7734_v33 = vld [vmem:[%s7563_s18 + $0x110] sm:$0xff] }
  0x2c   : > { %6449 = vmatpush3.msra.mxu0 %v356_v29  ;;  %6450 = vmatprep.mubr.f32.mxu0 %v355_v36  ;;  %v7730_v29 = vrot.slane %v7708_v10, 7  ;;  %v266_v36 = vrot.slane %v7720_v22, 7  ;;  %v291_v43 = vrot.slane %v7734_v33, 7 }
  0x2d   : > { %6487 = vmatmul.mubr.f32.vlgmr.msra.gmra.mxu1 %v330_v37  ;;  %6522 = vmatprep.subr.mxu1 %v5727_v38  ;;  %v7740_v37 = vld [vmem:[%s7563_s18 + $0x50] sm:$0xff] }
  0x2e   : > { %6451 = vmatmul.mubr.f32.vlgmr.msra.gmra.mxu0 %v354_v42  ;;  %6523 = vmatpush3.msra.mxu1 %v5727_v38  ;;  %10215 = vst [vmem:[#allocation3_spill] sm:$0xff] %v7730_v29  ;;  %v5739_v38 = vld [vmem:[%s10173_s2 + $0x158] sm:$0xff]  ;;  %v5722_v42 = vld [vmem:[%s10173_s2 + $0xd0] sm:$0xff]  ;;  %v267_v49 = vrot.slane %v7740_v37, 7 }
  0x2f   : > { %6626 = vmatprep.subr.mxu0 %v5743_v45  ;;  %6489 = vmatprep.mubr.f32.mxu1 %v329_v46  ;;  %v347_v46 = vsel %vm307_vm0, %v264_v9, %v7730_v29 }
  0x30   : > { %6524 = vmatprep.subr.mxu1 %v5726_v48  ;;  %6627 = vmatpush3.msra.mxu0 %v5743_v45  ;;  %v7755_v45 = vld [vmem:[%s7563_s18 + $0x58] sm:$0xff] }
  0x31   : > { %6453 = vmatprep.mubr.f32.mxu0 %v353_v51  ;;  %6490 = vmatmul.mubr.f32.gmra.mxu1 %v328_v52  ;;  %v7766_v51 = vsel %vm307_vm0, %v7730_v29, %v266_v36  ;;  %v5738_v52 = vld [vmem:[%s10173_s2 + $0x150] sm:$0xff]  ;;  %v268_v56 = vrot.slane %v7755_v45, 7 }
  0x32   : > { %6525 = vmatpush3.msra.mxu1 %v5726_v48  ;;  %6454 = vmatmul.mubr.f32.gmra.mxu0 %v352_v54  ;;  %v322_v48 = vsel %vm307_vm0, %v289_v19, %v290_v30  ;;  %10216 = vst [vmem:[#allocation4_spill] sm:$0xff] %v7766_v51  ;;  %v7773_v54 = vld [vmem:[%s7563_s18 + $0x120] sm:$0xff]  ;;  %v7816_v19 = vld [vmem:[%s7563_s18 + $0x70] sm:$0xff] }
  0x33   : > { %6628 = vmatprep.subr.mxu0 %v5742_v55  ;;  %6526 = vmatprep.subr.mxu1 %v5725_v58  ;;  %v293_v0 = vrot.slane %v7773_v54, 7  ;;  %v7808_v9 = vsel %vm307_vm0, %v267_v49, %v268_v56  ;;  %v7957_v29 = vld [vmem:[%s7563_s18 + $0x170] sm:$0xff] }
  0x34   : > { %6629 = vmatpush3.msra.mxu0 %v5742_v55  ;;  %6492 = vmatprep.mubr.f32.mxu1 %v327_v62  ;;  %v5721_v55 = vld [vmem:[%s10173_s2 + $0xc8] sm:$0xff]  ;;  %v321_v62 = vsel %vm307_vm0, %v290_v30, %v291_v43  ;;  %10218 = vst [vmem:[#allocation6_spill] sm:$0xff] %v7808_v9 }
  0x35   : > { %6527 = vmatpush3.msra.mxu1 %v5725_v58  ;;  %6456 = vmatprep.mubr.f32.mxu0 %v351_v63  ;;  %v7780_v58 = vld [vmem:[%s7563_s18 + $0x60] sm:$0xff]  ;;  %v7790_v63 = vsel %vm307_vm0, %v266_v36, %v267_v49 }
  0x36   : > { %6493 = vmatmul.mubr.f32.gmra.mxu1 %v326_v2  ;;  %6630 = vmatprep.subr.mxu0 %v5741_v3  ;;  %10217 = vst [vmem:[#allocation5_spill] sm:$0xff] %v7790_v63  ;;  %v7794_v2 = vld [vmem:[%s7563_s18 + $0x68] sm:$0xff]  ;;  %v269_v5 = vrot.slane %v7780_v58, 7 }
  0x37   : > { %6457 = vmatmul.mubr.f32.gmra.mxu0 %v350_v7  ;;  %6528 = vmatprep.subr.mxu1 %v5724_v8  ;;  %v294_v7 = vrot.slane %v7783_v59, 7 }
  0x38   : > { %6631 = vmatpush3.msra.mxu0 %v5741_v3  ;;  %6529 = vmatpush3.msra.mxu1 %v5724_v8  ;;  %v320_v3 = vsel %vm307_vm0, %v291_v43, %v292_v53  ;;  %v7804_v8 = vld [vmem:[%s7563_s18 + $0x130] sm:$0xff]  ;;  %v7833_v36 = vsel %vm307_vm0, %v268_v56, %v269_v5  ;;  %v7860_v56 = vld [vmem:[%s7563_s18 + $0x148] sm:$0xff] }
  0x39   : > { %6495 = vmatprep.mubr.f32.mxu1 %v325_v12  ;;  %6632 = vmatprep.subr.mxu0 %v5740_v13  ;;  %v5720_v12 = vld [vmem:[%s10173_s2 + $0xc0] sm:$0xff]  ;;  %v295_v30 = vrot.slane %v7804_v8, 7  ;;  %10219 = vst [vmem:[#allocation7_spill] sm:$0xff] %v7833_v36 }
  0x3a   : > { %6459 = vmatprep.mubr.f32.mxu0 %v349_v24  ;;  %6496 = vmatmul.mubr.f32.gmra.mxu1 %v324_v25  ;;  %v7819_v24 = vld [vmem:[%s7563_s18 + $0x138] sm:$0xff]  ;;  %v319_v25 = vsel %vm307_vm0, %v292_v53, %v293_v0 }
  0x3b   : > { %6530 = vmatprep.subr.mxu1 %v5723_v28  ;;  %6633 = vmatpush3.msra.mxu0 %v5740_v13  ;;  %v270_v13 = vrot.slane %v7794_v2, 7  ;;  %v296_v43 = vrot.slane %v7819_v24, 7  ;;  %v5735_v53 = vld [vmem:[%s10173_s2 + $0x138] sm:$0xff] }
  0x3c   : > { %6460 = vmatmul.mubr.f32.gmra.mxu0 %v348_v34  ;;  %6531 = vmatpush3.msra.mxu1 %v5723_v28  ;;  %v5736_v28 = vld [vmem:[%s10173_s2 + $0x140] sm:$0xff]  ;;  %v7828_v34 = vld [vmem:[%s7563_s18 + $0x78] sm:$0xff] }
  0x3d   : > { %6634 = vmatprep.subr.mxu0 %v5739_v38  ;;  %6498 = vmatprep.mubr.f32.mxu1 %v323_v39  ;;  %v5719_v39 = vld [vmem:[%s10173_s2 + $0xb8] sm:$0xff]  ;;  %v272_v49 = vrot.slane %v7828_v34, 7 }
  0x3e   : > { %6532 = vmatprep.subr.mxu1 %v5722_v42  ;;  %6635 = vmatpush3.msra.mxu0 %v5739_v38  ;;  %v318_v38 = vsel %vm307_vm0, %v293_v0, %v294_v7 }
  0x3f   : > { %6462 = vmatprep.mubr.f32.mxu0 %v347_v46  ;;  %6499 = vmatmul.mubr.f32.gmra.mxu1 %v322_v48  ;;  %v7843_v46 = vld [vmem:[%s7563_s18 + $0x140] sm:$0xff]  ;;  %v7847_v48 = vsel %vm307_vm0, %v269_v5, %v270_v13  ;;  %v316_v5 = vsel %vm307_vm0, %v295_v30, %v296_v43 }
  0x40   : > { %6533 = vmatpush3.msra.mxu1 %v5722_v42  ;;  %6463 = vmatmul.mubr.f32.gmra.mxu0 %v7766_v51  ;;  %v271_v42 = vrot.slane %v7816_v19, 7  ;;  %10220 = vst [vmem:[#allocation8_spill] sm:$0xff] %v7847_v48  ;;  %v297_v0 = vrot.slane %v7843_v46, 7 }
  0x41   : > { %6636 = vmatprep.subr.mxu0 %v5738_v52  ;;  %6534 = vmatprep.subr.mxu1 %v5721_v55 }
  0x42   : > { %6637 = vmatpush3.msra.mxu0 %v5738_v52  ;;  %6501 = vmatprep.mubr.f32.mxu1 %v321_v62  ;;  %v7851_v52 = vld [vmem:[%s7563_s18 + $0x80] sm:$0xff]  ;;  %v5718_v62 = vld [vmem:[%s10173_s2 + $0xb0] sm:$0xff] }
  0x43   : > { %6535 = vmatpush3.msra.mxu1 %v5721_v55  ;;  %6465 = vmatprep.mubr.f32.mxu0 %v7790_v63  ;;  %v317_v55 = vsel %vm307_vm0, %v294_v7, %v295_v30  ;;  %v273_v7 = vrot.slane %v7851_v52, 7  ;;  %v5717_v30 = vld [vmem:[%s10173_s2 + $0xa8] sm:$0xff] }
  0x44   : > { %6502 = vmatmul.mubr.f32.gmra.mxu1 %v320_v3  ;;  %6638 = vmatprep.subr.mxu0 %v5737_v4  ;;  %v7867_v3 = vld [vmem:[%s7563_s18 + $0x88] sm:$0xff] }
  0x45   : > { %6466 = vmatmul.mubr.f32.gmra.mxu0 %v7808_v9  ;;  %6536 = vmatprep.subr.mxu1 %v5720_v12  ;;  %v7933_v9 = vld [vmem:[%s7563_s18 + $0x168] sm:$0xff] }
  0x46   : > { %6639 = vmatpush3.msra.mxu0 %v5737_v4  ;;  %6537 = vmatpush3.msra.mxu1 %v5720_v12  ;;  %v7872_v4 = vsel %vm307_vm0, %v270_v13, %v271_v42  ;;  %v7879_v12 = vsel %vm307_vm0, %v271_v42, %v272_v49  ;;  %v7886_v13 = vld [vmem:[%s7563_s18 + $0x150] sm:$0xff]  ;;  %v7896_v42 = vld [vmem:[%s7563_s18 + $0x158] sm:$0xff]  ;;  %v302_v51 = vrot.slane %v7933_v9, 7 }
  0x47   : > { %6504 = vmatprep.mubr.f32.mxu1 %v319_v25  ;;  %6640 = vmatprep.subr.mxu0 %v5736_v28  ;;  %10221 = vst [vmem:[#allocation9_spill] sm:$0xff] %v7872_v4  ;;  %10222 = vst [vmem:[#allocation10_spill] sm:$0xff] %v7879_v12  ;;  %v5734_v25 = vld [vmem:[%s10173_s2 + $0x130] sm:$0xff]  ;;  %v299_v21 = vrot.slane %v7886_v13, 7 }
  0x48   : > { %6468 = vmatprep.mubr.f32.mxu0 %v7833_v36  ;;  %6505 = vmatmul.mubr.f32.gmra.mxu1 %v318_v38  ;;  %v274_v38 = vrot.slane %v7867_v3, 7  ;;  %v7930_v36 = vld [vmem:[%s7563_s18 + $0xa0] sm:$0xff] }
  0x49   : > { %6538 = vmatprep.subr.mxu1 %v5719_v39  ;;  %6641 = vmatpush3.msra.mxu0 %v5736_v28  ;;  %v298_v28 = vrot.slane %v7860_v56, 7  ;;  %v277_v63 = vrot.slane %v7930_v36, 7 }
  0x4a   : > { %6469 = vmatmul.mubr.f32.gmra.mxu0 %v7847_v48  ;;  %6539 = vmatpush3.msra.mxu1 %v5719_v39  ;;  %v7893_v39 = vld [vmem:[%s7563_s18 + $0x90] sm:$0xff]  ;;  %v276_v48 = vrot.slane %v7908_v26, 7 }
  0x4b   : > { %6642 = vmatprep.subr.mxu0 %v5735_v53  ;;  %6507 = vmatprep.mubr.f32.mxu1 %v317_v55  ;;  %v315_v55 = vsel %vm307_vm0, %v296_v43, %v297_v0  ;;  %v5733_v43 = vld [vmem:[%s10173_s2 + $0x128] sm:$0xff] }
  0x4c   : > { %6540 = vmatprep.subr.mxu1 %v5718_v62  ;;  %6643 = vmatpush3.msra.mxu0 %v5735_v53  ;;  %v7904_v53 = vsel %vm307_vm0, %v272_v49, %v273_v7  ;;  %v300_v49 = vrot.slane %v7896_v42, 7 }
  0x4d   : > { %6471 = vmatprep.mubr.f32.mxu0 %v7872_v4  ;;  %6508 = vmatmul.mubr.f32.gmra.mxu1 %v316_v5  ;;  %10223 = vst [vmem:[#allocation11_spill] sm:$0xff] %v7904_v53  ;;  %v314_v5 = vsel %vm307_vm0, %v297_v0, %v298_v28  ;;  %v7922_v4 = vsel %vm307_vm0, %v273_v7, %v274_v38  ;;  %v5716_v0 = vld [vmem:[%s10173_s2 + $0xa0] sm:$0xff] }
  0x4e   : > { %6541 = vmatpush3.msra.mxu1 %v5718_v62  ;;  %6472 = vmatmul.mubr.f32.gmra.mxu0 %v7879_v12  ;;  %v275_v62 = vrot.slane %v7893_v39, 7  ;;  %v7918_v12 = vld [vmem:[%s7563_s18 + $0x160] sm:$0xff]  ;;  %10224 = vst [vmem:[#allocation12_spill] sm:$0xff] %v7922_v4  ;;  %v313_v7 = vsel %vm307_vm0, %v298_v28, %v299_v21  ;;  %v5715_v28 = vld [vmem:[%s10173_s2 + $0x98] sm:$0xff] }
  0x4f   : > { %6644 = vmatprep.subr.mxu0 %v5734_v25  ;;  %6542 = vmatprep.subr.mxu1 %v5717_v30 }
  0x50   : > { %6645 = vmatpush3.msra.mxu0 %v5734_v25  ;;  %6510 = vmatprep.mubr.f32.mxu1 %v315_v55  ;;  %v5732_v25 = vld [vmem:[%s10173_s2 + $0x120] sm:$0xff]  ;;  %v7942_v55 = vld [vmem:[%s7563_s18 + $0xa8] sm:$0xff] }
  0x51   : > { %6543 = vmatpush3.msra.mxu1 %v5717_v30  ;;  %6474 = vmatprep.mubr.f32.mxu0 %v7904_v53  ;;  %v301_v30 = vrot.slane %v7918_v12, 7  ;;  %v7947_v53 = vsel %vm307_vm0, %v274_v38, %v275_v62  ;;  %v7961_v38 = vsel %vm307_vm0, %v275_v62, %v276_v48  ;;  %v5714_v62 = vld [vmem:[%s10173_s2 + $0x90] sm:$0xff] }
  0x52   : > { %6511 = vmatmul.mubr.f32.gmra.mxu1 %v314_v5  ;;  %6646 = vmatprep.subr.mxu0 %v5733_v43  ;;  %10225 = vst [vmem:[#allocation13_spill] sm:$0xff] %v7947_v53  ;;  %v312_v5 = vsel %vm307_vm0, %v299_v21, %v300_v49  ;;  %v278_v21 = vrot.slane %v7942_v55, 7 }
  0x53   : > { %6475 = vmatmul.mubr.f32.gmra.mxu0 %v7922_v4  ;;  %6544 = vmatprep.subr.mxu1 %v5716_v0  ;;  %v311_v4 = vsel %vm307_vm0, %v300_v49, %v301_v30 }
  0x54   : > { %6647 = vmatpush3.msra.mxu0 %v5733_v43  ;;  %6545 = vmatpush3.msra.mxu1 %v5716_v0  ;;  %v7965_v43 = vld [vmem:[%s7563_s18 + $0xb0] sm:$0xff]  ;;  %v5731_v0 = vld [vmem:[%s10173_s2 + $0x118] sm:$0xff] }
  0x55   : > { %6513 = vmatprep.mubr.f32.mxu1 %v313_v7  ;;  %6648 = vmatprep.subr.mxu0 %v5732_v25  ;;  %v303_v7 = vrot.slane %v7957_v29, 7  ;;  %v7985_v49 = vrot.slane %v7965_v43, 7 }
  0x56   : > { %6477 = vmatprep.mubr.f32.mxu0 %v7947_v53  ;;  %6514 = vmatmul.mubr.f32.gmra.mxu1 %v312_v5  ;;  %v7980_v5 = vsel %vm307_vm0, %v276_v48, %v277_v63  ;;  %v310_v53 = vsel %vm307_vm0, %v301_v30, %v302_v51  ;;  %v5713_v48 = vld [vmem:[%s10173_s2 + $0x88] sm:$0xff]  ;;  %v10226_v30 = vrot.slane %v7583_v18, 7  ;;  %v10189_v18 = vrot.slane %v7580_v17, 1 }
  0x57   : > { %6546 = vmatprep.subr.mxu1 %v5715_v28  ;;  %6649 = vmatpush3.msra.mxu0 %v5732_v25  ;;  %v7989_v25 = vsel %vm307_vm0, %v277_v63, %v278_v21  ;;  %v8004_v63 = vsel %vm307_vm0, %v278_v21, %v7985_v49 }
  0x58   : > { %6478 = vmatmul.mubr.f32.gmra.mxu0 %v7961_v38  ;;  %6547 = vmatpush3.msra.mxu1 %v5715_v28  ;;  %v5730_v28 = vld [vmem:[%s10173_s2 + $0x110] sm:$0xff] }
  0x59   : > { %6650 = vmatprep.subr.mxu0 %v5731_v0  ;;  %6516 = vmatprep.mubr.f32.mxu1 %v311_v4  ;;  %v309_v4 = vsel %vm307_vm0, %v302_v51, %v303_v7  ;;  %v10227_v51 = vrot.slane %v7572_v14, 7 }
  0x5a   : > { %6548 = vmatprep.subr.mxu1 %v5714_v62  ;;  %6651 = vmatpush3.msra.mxu0 %v5731_v0  ;;  %v308_v0 = vsel %vm307_vm0, %v303_v7, %v10226_v30  ;;  %v1192_v7 = vrot.slane %v7594_v23, 1  ;;  %v5759_v30 = vld [vmem:[%s10173_s2 + $0x1f8] sm:$0xff] }
  0x5b   : > { %6480 = vmatprep.mubr.f32.mxu0 %v7980_v5  ;;  %6517 = vmatmul.mubr.f32.gmra.mxu1 %v310_v53  ;;  %v5729_v53 = vld [vmem:[%s10173_s2 + $0x108] sm:$0xff]  ;;  %v332_v21 = vsel %vm307_vm0, %v7985_v49, %v10227_v51 }
  0x5c   : > { %6549 = vmatpush3.msra.mxu1 %v5714_v62  ;;  %6481 = vmatmul.mubr.f32.gmra.mxu0 %v7989_v25  ;;  %v5712_v62 = vld [vmem:[%s10173_s2 + $0x80] sm:$0xff] }
  0x5d   : > { %6652 = vmatprep.subr.mxu0 %v5730_v28  ;;  %6550 = vmatprep.subr.mxu1 %v5713_v48 }
  0x5e   : > { %6653 = vmatpush3.msra.mxu0 %v5730_v28  ;;  %6519 = vmatprep.mubr.f32.mxu1 %v309_v4  ;;  %v1193_v28 = vrot.slane %v7611_v31, 1  ;;  %v5728_v4 = vld [vmem:[%s10173_s2 + $0x100] sm:$0xff] }
  0x5f   : > { %6551 = vmatpush3.msra.mxu1 %v5713_v48  ;;  %6483 = vmatprep.mubr.f32.mxu0 %v8004_v63  ;;  %v1286_v48 = vsel %vm1239_vm1, %v10189_v18, %v1192_v7 }
  0x60   : > { %6520 = vmatmul.mubr.f32.gmra.mxu1 %v308_v0  ;;  %6654 = vmatprep.subr.mxu0 %v5729_v53  ;;  %v1194_v0 = vrot.slane %v7622_v35, 1  ;;  %v1285_v51 = vsel %vm1239_vm1, %v1192_v7, %v1193_v28  ;;  %v5758_v7 = vld [vmem:[%s10173_s2 + $0x1f0] sm:$0xff] }
  0x61   : > { %6484 = vmatmul.mubr.f32.gmra.mxu0 %v332_v21  ;;  %6552 = vmatprep.subr.mxu1 %v5712_v62  ;;  %v5775_v21 = vld [vmem:[%s10173_s2 + $0x278] sm:$0xff] }
  0x62   : > { %6655 = vmatpush3.msra.mxu0 %v5729_v53  ;;  %6553 = vmatpush3.msra.mxu1 %v5712_v62  ;;  %v1195_v53 = vrot.slane %v7642_v44, 1  ;;  %v1196_v62 = vrot.slane %v7657_v50, 1  ;;  %v1284_v18 = vsel %vm1239_vm1, %v1193_v28, %v1194_v0  ;;  %v1198_v28 = vrot.slane %v7689_v1, 1 }
  0x63   : > { %6554 = vmatprep.mubr.f32.mxu1 %v7580_v17  ;;  %6656 = vmatprep.subr.mxu0 %v5728_v4 }
  0x64   : > { %6555 = vmatmul.mubr.f32.vlgmr.msra.gmra.mxu1 %v7594_v23  ;;  %6657 = vmatpush3.msra.mxu0 %v5728_v4  ;;  %v1283_v23 = vsel %vm1239_vm1, %v1194_v0, %v1195_v53  ;;  %v1197_v4 = vrot.slane %v7678_v60, 1  ;;  %v1199_v0 = vrot.slane %v7708_v10, 1 }
  0x65   : > { %6658 = vmatprep.mubr.f32.mxu0 %v1286_v48  ;;  %6730 = vmatprep.subr.mxu1 %v5759_v30  ;;  %v1282_v48 = vsel %vm1239_vm1, %v1195_v53, %v1196_v62 }
  0x66   : > { %6659 = vmatmul.mubr.f32.vlgmr.msra.gmra.mxu0 %v1285_v51  ;;  %6731 = vmatpush3.msra.mxu1 %v5759_v30  ;;  %v5774_v30 = vld [vmem:[%s10173_s2 + $0x270] sm:$0xff]  ;;  %v1200_v51 = vrot.slane %v7720_v22, 1  ;;  %v1279_v53 = vsel %vm1239_vm1, %v1198_v28, %v1199_v0 }
  0x67   : > { %6834 = vmatprep.subr.mxu0 %v5775_v21  ;;  %6557 = vmatprep.mubr.f32.mxu1 %v7611_v31  ;;  %v1281_v31 = vsel %vm1239_vm1, %v1196_v62, %v1197_v4  ;;  %v1202_v62 = vrot.slane %v7755_v45, 1 }
  0x68   : > { %6835 = vmatpush3.msra.mxu0 %v5775_v21  ;;  %6558 = vmatmul.mubr.f32.gmra.mxu1 %v7622_v35  ;;  %v5757_v35 = vld [vmem:[%s10173_s2 + $0x1e8] sm:$0xff]  ;;  %v5756_v21 = vld [vmem:[%s10173_s2 + $0x1e0] sm:$0xff] }
  0x69   : > { %6661 = vmatprep.mubr.f32.mxu0 %v1284_v18  ;;  %6732 = vmatprep.subr.mxu1 %v5758_v7  ;;  %v1280_v18 = vsel %vm1239_vm1, %v1197_v4, %v1198_v28  ;;  %v5755_v4 = vld [vmem:[%s10173_s2 + $0x1d8] sm:$0xff] }
  0x6a   : > { %6662 = vmatmul.mubr.f32.gmra.mxu0 %v1283_v23  ;;  %6560 = vmatprep.mubr.f32.mxu1 %v7642_v44  ;;  %v5773_v44 = vld [vmem:[%s10173_s2 + $0x268] sm:$0xff]  ;;  %v5771_v28 = vld [vmem:[%s10173_s2 + $0x258] sm:$0xff] }
  0x6b   : > { %6733 = vmatpush3.msra.mxu1 %v5758_v7  ;;  %6664 = vmatprep.mubr.f32.mxu0 %v1282_v48  ;;  %v5772_v7 = vld [vmem:[%s10173_s2 + $0x260] sm:$0xff]  ;;  %v1204_v48 = vrot.slane %v7794_v2, 1 }
  0x6c   : > { %6561 = vmatmul.mubr.f32.gmra.mxu1 %v7657_v50  ;;  %6836 = vmatprep.subr.mxu0 %v5774_v30  ;;  %v1201_v50 = vrot.slane %v7740_v37, 1 }
  0x6d   : > { %6837 = vmatpush3.msra.mxu0 %v5774_v30  ;;  %6563 = vmatprep.mubr.f32.mxu1 %v7678_v60  ;;  %v1278_v60 = vsel %vm1239_vm1, %v1199_v0, %v1200_v51  ;;  %v5770_v0 = vld [vmem:[%s10173_s2 + $0x250] sm:$0xff] }
  0x6e   : > { %6665 = vmatmul.mubr.f32.gmra.mxu0 %v1281_v31  ;;  %6734 = vmatprep.subr.mxu1 %v5757_v35  ;;  %v1277_v23 = vsel %vm1239_vm1, %v1200_v51, %v1201_v50  ;;  %v5754_v31 = vld [vmem:[%s10173_s2 + $0x1d0] sm:$0xff]  ;;  %v5753_v51 = vld [vmem:[%s10173_s2 + $0x1c8] sm:$0xff] }
  0x6f   : > { %6667 = vmatprep.mubr.f32.mxu0 %v1280_v18  ;;  %6735 = vmatpush3.msra.mxu1 %v5757_v35  ;;  %v1206_v35 = vrot.slane %v7828_v34, 1 }
  0x70   : > { %6564 = vmatmul.mubr.f32.gmra.mxu1 %v7689_v1  ;;  %6838 = vmatprep.subr.mxu0 %v5773_v44  ;;  %v1203_v1 = vrot.slane %v7780_v58, 1 }
  0x71   : > { %6566 = vmatprep.mubr.f32.mxu1 %v7708_v10  ;;  %6839 = vmatpush3.msra.mxu0 %v5773_v44  ;;  %v1276_v10 = vsel %vm1239_vm1, %v1201_v50, %v1202_v62  ;;  %v1208_v44 = vrot.slane %v7867_v3, 1 }
  0x72   : > { %6668 = vmatmul.mubr.f32.gmra.mxu0 %v1279_v53  ;;  %6736 = vmatprep.subr.mxu1 %v5756_v21  ;;  %v1275_v30 = vsel %vm1239_vm1, %v1202_v62, %v1203_v1  ;;  %v5769_v53 = vld [vmem:[%s10173_s2 + $0x248] sm:$0xff]  ;;  %v1210_v62 = vrot.slane %v7908_v26, 1 }
  0x73   : > { %6670 = vmatprep.mubr.f32.mxu0 %v1278_v60  ;;  %6737 = vmatpush3.msra.mxu1 %v5756_v21  ;;  %v5752_v21 = vld [vmem:[%s10173_s2 + $0x1c0] sm:$0xff] }
  0x74   : > { %6567 = vmatmul.mubr.f32.gmra.mxu1 %v7720_v22  ;;  %6840 = vmatprep.subr.mxu0 %v5772_v7  ;;  %v1205_v22 = vrot.slane %v7816_v19, 1 }
  0x75   : > { %6569 = vmatprep.mubr.f32.mxu1 %v7740_v37  ;;  %6841 = vmatpush3.msra.mxu0 %v5772_v7  ;;  %v1274_v37 = vsel %vm1239_vm1, %v1203_v1, %v1204_v48  ;;  %v5768_v7 = vld [vmem:[%s10173_s2 + $0x240] sm:$0xff]  ;;  %v1211_v1 = vrot.slane %v7930_v36, 1 }
  0x76   : > { %6671 = vmatmul.mubr.f32.gmra.mxu0 %v1277_v23  ;;  %6738 = vmatprep.subr.mxu1 %v5755_v4  ;;  %v1273_v18 = vsel %vm1239_vm1, %v1204_v48, %v1205_v22  ;;  %v1212_v48 = vrot.slane %v7942_v55, 1 }
  0x77   : > { %6673 = vmatprep.mubr.f32.mxu0 %v1276_v10  ;;  %6739 = vmatpush3.msra.mxu1 %v5755_v4  ;;  %v5751_v4 = vld [vmem:[%s10173_s2 + $0x1b8] sm:$0xff] }
  0x78   : > { %6570 = vmatmul.mubr.f32.gmra.mxu1 %v7755_v45  ;;  %6842 = vmatprep.subr.mxu0 %v5771_v28  ;;  %v1207_v45 = vrot.slane %v7851_v52, 1 }
  0x79   : > { %6572 = vmatprep.mubr.f32.mxu1 %v7780_v58  ;;  %6843 = vmatpush3.msra.mxu0 %v5771_v28  ;;  %v1272_v58 = vsel %vm1239_vm1, %v1205_v22, %v1206_v35  ;;  %v5767_v28 = vld [vmem:[%s10173_s2 + $0x238] sm:$0xff]  ;;  %v1213_v22 = vrot.slane %v7965_v43, 1 }
  0x7a   : > { %6674 = vmatmul.mubr.f32.gmra.mxu0 %v1275_v30  ;;  %6740 = vmatprep.subr.mxu1 %v5754_v31  ;;  %v1271_v50 = vsel %vm1239_vm1, %v1206_v35, %v1207_v45  ;;  %v1270_v60 = vsel %vm1239_vm1, %v1207_v45, %v1208_v44  ;;  %v1267_v30 = vsel %vm1239_vm1, %v1210_v62, %v1211_v1  ;;  %v1214_v35 = vrot.slane %v7572_v14, 1 }
  0x7b   : > { %6676 = vmatprep.mubr.f32.mxu0 %v1274_v37  ;;  %6741 = vmatpush3.msra.mxu1 %v5754_v31  ;;  %v5750_v31 = vld [vmem:[%s10173_s2 + $0x1b0] sm:$0xff]  ;;  %v1266_v37 = vsel %vm1239_vm1, %v1211_v1, %v1212_v48  ;;  %v1215_v45 = vrot.slane %v7575_v15, 1  ;;  %v5747_v1 = vld [vmem:[%s10173_s2 + $0x198] sm:$0xff] }
  0x7c   : > { %6573 = vmatmul.mubr.f32.gmra.mxu1 %v7794_v2  ;;  %6844 = vmatprep.subr.mxu0 %v5770_v0  ;;  %v1209_v2 = vrot.slane %v7893_v39, 1 }
  0x7d   : > { %6575 = vmatprep.mubr.f32.mxu1 %v7816_v19  ;;  %6845 = vmatpush3.msra.mxu0 %v5770_v0  ;;  %v5766_v0 = vld [vmem:[%s10173_s2 + $0x230] sm:$0xff] }
  0x7e   : > { %6677 = vmatmul.mubr.f32.gmra.mxu0 %v1273_v18  ;;  %6742 = vmatprep.subr.mxu1 %v5753_v51  ;;  %v1269_v23 = vsel %vm1239_vm1, %v1208_v44, %v1209_v2  ;;  %v1268_v10 = vsel %vm1239_vm1, %v1209_v2, %v1210_v62  ;;  %v1265_v18 = vsel %vm1239_vm1, %v1212_v48, %v1213_v22  ;;  %v1216_v44 = vrot.slane %v7589_v20, 1 }
  0x7f   : > { %6679 = vmatprep.mubr.f32.mxu0 %v1272_v58  ;;  %6743 = vmatpush3.msra.mxu1 %v5753_v51  ;;  %v5749_v51 = vld [vmem:[%s10173_s2 + $0x1a8] sm:$0xff]  ;;  %v1264_v58 = vsel %vm1239_vm1, %v1213_v22, %v1214_v35  ;;  %v1217_v2 = vrot.slane %v7603_v27, 1  ;;  %v1218_v62 = vrot.slane %v7614_v32, 1  ;;  %v5762_v22 = vld [vmem:[%s10173_s2 + $0x210] sm:$0xff] }
  0x80   : > { %6576 = vmatmul.mubr.f32.gmra.mxu1 %v7828_v34  ;;  %6846 = vmatprep.subr.mxu0 %v5769_v53 }
  0x81   : > { %6578 = vmatprep.mubr.f32.mxu1 %v7851_v52  ;;  %6847 = vmatpush3.msra.mxu0 %v5769_v53  ;;  %v5765_v53 = vld [vmem:[%s10173_s2 + $0x228] sm:$0xff] }
  0x82   : > { %6680 = vmatmul.mubr.f32.gmra.mxu0 %v1271_v50  ;;  %6744 = vmatprep.subr.mxu1 %v5752_v21  ;;  %v1263_v50 = vsel %vm1239_vm1, %v1214_v35, %v1215_v45  ;;  %v1224_v35 = vrot.slane %v7711_v11, 1 }
  0x83   : > { %6682 = vmatprep.mubr.f32.mxu0 %v1270_v60  ;;  %6745 = vmatpush3.msra.mxu1 %v5752_v21  ;;  %v5748_v21 = vld [vmem:[%s10173_s2 + $0x1a0] sm:$0xff]  ;;  %v1262_v60 = vsel %vm1239_vm1, %v1215_v45, %v1216_v44 }
  0x84   : > { %6579 = vmatmul.mubr.f32.gmra.mxu1 %v7867_v3  ;;  %6848 = vmatprep.subr.mxu0 %v5768_v7  ;;  %v5744_v45 = vld [vmem:[%s10173_s2 + $0x180] sm:$0xff] }
  0x85   : > { %6581 = vmatprep.mubr.f32.mxu1 %v7893_v39  ;;  %6849 = vmatpush3.msra.mxu0 %v5768_v7  ;;  %v5764_v7 = vld [vmem:[%s10173_s2 + $0x220] sm:$0xff] }
  0x86   : > { %6683 = vmatmul.mubr.f32.gmra.mxu0 %v1269_v23  ;;  %6746 = vmatprep.subr.mxu1 %v5751_v4  ;;  %v1261_v23 = vsel %vm1239_vm1, %v1216_v44, %v1217_v2 }
  0x87   : > { %6685 = vmatprep.mubr.f32.mxu0 %v1268_v10  ;;  %6747 = vmatpush3.msra.mxu1 %v5751_v4  ;;  %v1220_v4 = vrot.slane %v7650_v47, 1  ;;  %v5763_v10 = vld [vmem:[%s10173_s2 + $0x218] sm:$0xff] }
  0x88   : > { %6582 = vmatmul.mubr.f32.gmra.mxu1 %v7908_v26  ;;  %6850 = vmatprep.subr.mxu0 %v5767_v28 }
  0x89   : > { %6584 = vmatprep.mubr.f32.mxu1 %v7930_v36  ;;  %6851 = vmatpush3.msra.mxu0 %v5767_v28  ;;  %v5746_v28 = vld [vmem:[%s10173_s2 + $0x190] sm:$0xff] }
  0x8a   : > { %6686 = vmatmul.mubr.f32.gmra.mxu0 %v1267_v30  ;;  %6748 = vmatprep.subr.mxu1 %v5750_v31  ;;  %v1222_v30 = vrot.slane %v7681_v61, 1 }
  0x8b   : > { %6688 = vmatprep.mubr.f32.mxu0 %v1266_v37  ;;  %6749 = vmatpush3.msra.mxu1 %v5750_v31  ;;  %v5745_v37 = vld [vmem:[%s10173_s2 + $0x188] sm:$0xff] }
  0x8c   : > { %6585 = vmatmul.mubr.f32.gmra.mxu1 %v7942_v55  ;;  %6852 = vmatprep.subr.mxu0 %v5766_v0 }
  0x8d   : > { %6587 = vmatprep.mubr.f32.mxu1 %v7965_v43  ;;  %6853 = vmatpush3.msra.mxu0 %v5766_v0  ;;  %v5761_v0 = vld [vmem:[%s10173_s2 + $0x208] sm:$0xff] }
  0x8e   : > { %6689 = vmatmul.mubr.f32.gmra.mxu0 %v1265_v18  ;;  %6750 = vmatprep.subr.mxu1 %v5749_v51 }
  0x8f   : > { %6691 = vmatprep.mubr.f32.mxu0 %v1264_v58  ;;  %6751 = vmatpush3.msra.mxu1 %v5749_v51  ;;  %v1226_v51 = vrot.slane %v7748_v40, 1  ;;  %v5760_v58 = vld [vmem:[%s10173_s2 + $0x200] sm:$0xff] }
  0x90   : > { %6588 = vmatmul.mubr.f32.gmra.mxu1 %v7572_v14  ;;  %6854 = vmatprep.subr.mxu0 %v5765_v53  ;;  %v1219_v14 = vrot.slane %v7636_v41, 1 }
  0x91   : > { %6590 = vmatprep.mubr.f32.mxu1 %v7575_v15  ;;  %6855 = vmatpush3.msra.mxu0 %v5765_v53  ;;  %v1260_v15 = vsel %vm1239_vm1, %v1217_v2, %v1218_v62  ;;  %v8265_v53 = vld [vmem:[%s10173_s2 + $0x2f8] sm:$0xff] }
  0x92   : > { %6692 = vmatmul.mubr.f32.gmra.mxu0 %v1263_v50  ;;  %6752 = vmatprep.subr.mxu1 %v5748_v21  ;;  %v1259_v48 = vsel %vm1239_vm1, %v1218_v62, %v1219_v14  ;;  %v1228_v50 = vrot.slane %v7783_v59, 1  ;;  %v8274_v2 = vld [vmem:[%s10173_s2 + $0x378] sm:$0xff]  ;;  %v1230_v62 = vrot.slane %v7819_v24, 1 }
  0x93   : > { %6694 = vmatprep.mubr.f32.mxu0 %v1262_v60  ;;  %6753 = vmatpush3.msra.mxu1 %v5748_v21  ;;  %v1229_v21 = vrot.slane %v7804_v8, 1 }
  0x94   : > { %6591 = vmatmul.mubr.f32.gmra.mxu1 %v7589_v20  ;;  %6856 = vmatprep.subr.mxu0 %v5764_v7  ;;  %v1221_v20 = vrot.slane %v7671_v57, 1 }
  0x95   : > { %6593 = vmatprep.mubr.f32.mxu1 %v7603_v27  ;;  %6857 = vmatpush3.msra.mxu0 %v5764_v7  ;;  %v1258_v27 = vsel %vm1239_vm1, %v1219_v14, %v1220_v4  ;;  %v1231_v7 = vrot.slane %v7843_v46, 1  ;;  %v1233_v14 = vrot.slane %v7886_v13, 1 }
  0x96   : > { %6695 = vmatmul.mubr.f32.gmra.mxu0 %v1261_v23  ;;  %6754 = vmatprep.subr.mxu1 %v5747_v1  ;;  %v1257_v31 = vsel %vm1239_vm1, %v1220_v4, %v1221_v20  ;;  %v1248_v23 = vsel %vm1239_vm1, %v1229_v21, %v1230_v62  ;;  %v1236_v4 = vrot.slane %v7933_v9, 1 }
  0x97   : > { %6697 = vmatprep.mubr.f32.mxu0 %v1260_v15  ;;  %6755 = vmatpush3.msra.mxu1 %v5747_v1  ;;  %v1234_v1 = vrot.slane %v7896_v42, 1  ;;  %v1235_v15 = vrot.slane %v7918_v12, 1 }
  0x98   : > { %6594 = vmatmul.mubr.f32.gmra.mxu1 %v7614_v32  ;;  %6858 = vmatprep.subr.mxu0 %v5763_v10  ;;  %v1223_v32 = vrot.slane %v7699_v6, 1 }
  0x99   : > { %6596 = vmatprep.mubr.f32.mxu1 %v7636_v41  ;;  %6859 = vmatpush3.msra.mxu0 %v5763_v10  ;;  %v1256_v41 = vsel %vm1239_vm1, %v1221_v20, %v1222_v30  ;;  %v1237_v10 = vrot.slane %v7957_v29, 1  ;;  %v8318_v20 = vld [vmem:[%s7563_s18 + $0x190] sm:$0xff] }
  0x9a   : > { %6698 = vmatmul.mubr.f32.gmra.mxu0 %v1259_v48  ;;  %6756 = vmatprep.subr.mxu1 %v5746_v28  ;;  %v1255_v18 = vsel %vm1239_vm1, %v1222_v30, %v1223_v32  ;;  %v8315_v48 = vld [vmem:[%s7563_s18 + $0x18] sm:$0xff]  ;;  %v10190_v30 = vrot.slane %v8318_v20, 7 }
  0x9b   : > { %6700 = vmatprep.mubr.f32.mxu0 %v1258_v27  ;;  %6757 = vmatpush3.msra.mxu1 %v5746_v28  ;;  %10228 = vst [vmem:[#allocation14_spill] sm:$0xff] %v8315_v48  ;;  %v7399_v28 = vld [vmem:[%s7563_s18 + $0x178] sm:$0xff] }
  0x9c   : > { %6597 = vmatmul.mubr.f32.gmra.mxu1 %v7650_v47  ;;  %6860 = vmatprep.subr.mxu0 %v5762_v22  ;;  %v1225_v47 = vrot.slane %v7734_v33, 1  ;;  %v1238_v27 = vrot.slane %v7399_v28, 1 }
  0x9d   : > { %6599 = vmatprep.mubr.f32.mxu1 %v7671_v57  ;;  %6861 = vmatpush3.msra.mxu0 %v5762_v22  ;;  %v1254_v57 = vsel %vm1239_vm1, %v1223_v32, %v1224_v35  ;;  %v8328_v22 = vld [vmem:[%s7563_s18 + $0x20] sm:$0xff] }
  0x9e   : > { %6701 = vmatmul.mubr.f32.gmra.mxu0 %v1257_v31  ;;  %6758 = vmatprep.subr.mxu1 %v5745_v37  ;;  %v1253_v44 = vsel %vm1239_vm1, %v1224_v35, %v1225_v47  ;;  %v8333_v31 = vld [vmem:[%s7563_s18 + $0x28] sm:$0xff]  ;;  %v1240_v32 = vsel %vm1239_vm1, %v1237_v10, %v1238_v27  ;;  %v8346_v35 = vld [vmem:[%s7563_s18 + $0x30] sm:$0xff] }
  0x9f   : > { %6703 = vmatprep.mubr.f32.mxu0 %v1256_v41  ;;  %6759 = vmatpush3.msra.mxu1 %v5745_v37  ;;  %v1804_v41 = vrot.slane %v8333_v31, 7 }
  0xa0   : > { %6600 = vmatmul.mubr.f32.gmra.mxu1 %v7681_v61  ;;  %6862 = vmatprep.subr.mxu0 %v5761_v0  ;;  %v1227_v61 = vrot.slane %v7773_v54, 1 }
  0xa1   : > { %6602 = vmatprep.mubr.f32.mxu1 %v7699_v6  ;;  %6863 = vmatpush3.msra.mxu0 %v5761_v0  ;;  %v1252_v6 = vsel %vm1239_vm1, %v1225_v47, %v1226_v51  ;;  %v8358_v47 = vrot.slane %v8346_v35, 7 }
  0xa2   : > { %6704 = vmatmul.mubr.f32.gmra.mxu0 %v1255_v18  ;;  %6760 = vmatprep.subr.mxu1 %v5744_v45  ;;  %v1250_v60 = vsel %vm1239_vm1, %v1227_v61, %v1228_v50  ;;  %v8353_v18 = vld [vmem:[%s7563_s18 + $0x38] sm:$0xff] }
  0xa3   : > { %6706 = vmatprep.mubr.f32.mxu0 %v1254_v57  ;;  %6761 = vmatpush3.msra.mxu1 %v5744_v45  ;;  %v8363_v57 = vrot.slane %v8353_v18, 7 }
  0xa4   : > { %6603 = vmatmul.mubr.f32.gmra.mxu1 %v7711_v11  ;;  %6864 = vmatprep.subr.mxu0 %v5760_v58  ;;  %v1251_v11 = vsel %vm1239_vm1, %v1226_v51, %v1227_v61  ;;  %v1894_v51 = vsel %vm307_vm0, %v1804_v41, %v8358_v47  ;;  %v5789_v61 = vld [vmem:[%s10173_s2 + $0x2e8] sm:$0xff] }
  0xa5   : > { %6605 = vmatprep.mubr.f32.mxu1 %v7734_v33  ;;  %6865 = vmatpush3.msra.mxu0 %v5760_v58  ;;  %v1249_v33 = vsel %vm1239_vm1, %v1228_v50, %v1229_v21  ;;  %v5806_v58 = vld [vmem:[%s10173_s2 + $0x370] sm:$0xff]  ;;  %v5805_v50 = vld [vmem:[%s10173_s2 + $0x368] sm:$0xff]  ;;  %v5804_v21 = vld [vmem:[%s10173_s2 + $0x360] sm:$0xff] }
  0xa6   : > { %6707 = vmatmul.mubr.f32.gmra.mxu0 %v1253_v44  ;;  %6938 = vmatprep.subr.mxu1 %v8265_v53  ;;  %v8381_v44 = vsel %vm307_vm0, %v8358_v47, %v8363_v57 }
  0xa7   : > { %6709 = vmatprep.mubr.f32.mxu0 %v1252_v6  ;;  %7042 = vmatprep.subr.mxu0 %v8274_v2 }
  0xa8   : > { %6606 = vmatmul.mubr.f32.gmra.mxu1 %v7748_v40  ;;  %v1232_v40 = vrot.slane %v7860_v56, 1 }
  0xa9   : > { %6608 = vmatprep.mubr.f32.mxu1 %v7773_v54  ;;  %v1247_v54 = vsel %vm1239_vm1, %v1230_v62, %v1231_v7  ;;  %v8410_v62 = vld [vmem:[%s7563_s18 + $0x48] sm:$0xff] }
  0xaa   : > { %6710 = vmatmul.mubr.f32.gmra.mxu0 %v1251_v11  ;;  %v10231_v11 = vld [vmem:[#allocation4_spill] sm:$0xff] }
  0xab   : > { %6712 = vmatprep.mubr.f32.mxu0 %v1250_v60  ;;  %v8406_v60 = vld [vmem:[%s7563_s18 + $0x40] sm:$0xff] }
  0xac   : > { %6609 = vmatmul.mubr.f32.gmra.mxu1 %v7783_v59  ;;  %v1246_v59 = vsel %vm1239_vm1, %v1231_v7, %v1232_v40  ;;  %v10232_v7 = vld [vmem:[#allocation5_spill] sm:$0xff] }
  0xad   : > { %6611 = vmatprep.mubr.f32.mxu1 %v7804_v8  ;;  %v1245_v8 = vsel %vm1239_vm1, %v1232_v40, %v1233_v14  ;;  %v5803_v40 = vld [vmem:[%s10173_s2 + $0x358] sm:$0xff] }
  0xae   : > { %6713 = vmatmul.mubr.f32.gmra.mxu0 %v1249_v33  ;;  %v5787_v33 = vld [vmem:[%s10173_s2 + $0x2d8] sm:$0xff] }
  0xaf   : > { %6715 = vmatprep.mubr.f32.mxu0 %v1248_v23  ;;  %v10233_v23 = vld [vmem:[#allocation6_spill] sm:$0xff] }
  0xb0   : > { %6612 = vmatmul.mubr.f32.gmra.mxu1 %v7819_v24  ;;  %v1244_v24 = vsel %vm1239_vm1, %v1233_v14, %v1234_v1  ;;  %v8426_v14 = vld [vmem:[%s7563_s18 + $0x58] sm:$0xff] }
  0xb1   : > { %6614 = vmatprep.mubr.f32.mxu1 %v7843_v46  ;;  %v1243_v46 = vsel %vm1239_vm1, %v1234_v1, %v1235_v15  ;;  %v10234_v1 = vld [vmem:[#allocation7_spill] sm:$0xff] }
  0xb2   : > { %6716 = vmatmul.mubr.f32.gmra.mxu0 %v1247_v54  ;;  %v8422_v54 = vld [vmem:[%s7563_s18 + $0x50] sm:$0xff] }
  0xb3   : > { %6718 = vmatprep.mubr.f32.mxu0 %v1246_v59  ;;  %v5786_v59 = vld [vmem:[%s10173_s2 + $0x2d0] sm:$0xff] }
  0xb4   : > { %6615 = vmatmul.mubr.f32.gmra.mxu1 %v7860_v56  ;;  %v1242_v56 = vsel %vm1239_vm1, %v1235_v15, %v1236_v4  ;;  %v5802_v15 = vld [vmem:[%s10173_s2 + $0x350] sm:$0xff] }
  0xb5   : > { %6617 = vmatprep.mubr.f32.mxu1 %v7886_v13  ;;  %v1802_v13 = vrot.slane %v8315_v48, 7 }
  0xb6   : > { %6719 = vmatmul.mubr.f32.gmra.mxu0 %v1245_v8  ;;  %v10235_v8 = vld [vmem:[#allocation8_spill] sm:$0xff] }
  0xb7   : > { %6721 = vmatprep.mubr.f32.mxu0 %v1244_v24  ;;  %v1897_v37 = vsel %vm307_vm0, %v10190_v30, %v1802_v13  ;;  %v8438_v24 = vld [vmem:[%s7563_s18 + $0x60] sm:$0xff]  ;;  %v1789_v30 = vld [vmem:[%s7563_s18 + $0x130] sm:$0xff] }
  0xb8   : > { %6618 = vmatmul.mubr.f32.gmra.mxu1 %v7896_v42  ;;  %v1241_v42 = vsel %vm1239_vm1, %v1236_v4, %v1237_v10  ;;  %v8442_v4 = vld [vmem:[%s7563_s18 + $0x68] sm:$0xff]  ;;  %v10236_v10 = vld [vmem:[#allocation9_spill] sm:$0xff] }
  0xb9   : > { %6620 = vmatprep.mubr.f32.mxu1 %v7918_v12  ;;  %v1803_v12 = vrot.slane %v8328_v22, 7 }
  0xba   : > { %6722 = vmatmul.mubr.f32.gmra.mxu0 %v1243_v46  ;;  %v5785_v46 = vld [vmem:[%s10173_s2 + $0x2c8] sm:$0xff] }
  0xbb   : > { %6724 = vmatprep.mubr.f32.mxu0 %v1242_v56  ;;  %v1895_v45 = vsel %vm307_vm0, %v1803_v12, %v1804_v41  ;;  %v10237_v56 = vld [vmem:[#allocation10_spill] sm:$0xff]  ;;  %v1776_v41 = vld [vmem:[%s7563_s18 + $0xc8] sm:$0xff] }
  0xbc   : > { %6621 = vmatmul.mubr.f32.gmra.mxu1 %v7933_v9  ;;  %v10229_v9 = vrot.slane %v7580_v17, 1  ;;  %v5790_v17 = vld [vmem:[%s10173_s2 + $0x2f0] sm:$0xff] }
  0xbd   : > { %6623 = vmatprep.mubr.f32.mxu1 %v7957_v29  ;;  %v1896_v29 = vsel %vm307_vm0, %v1802_v13, %v1803_v12  ;;  %v10238_v13 = vld [vmem:[#allocation11_spill] sm:$0xff]  ;;  %v10240_v12 = vld [vmem:[#allocation13_spill] sm:$0xff] }
  0xbe   : > { %6725 = vmatmul.mubr.f32.gmra.mxu0 %v1241_v42  ;;  %v1287_v0 = vsel %vm1239_vm1, %v1238_v27, %v10229_v9  ;;  %v5784_v27 = vld [vmem:[%s10173_s2 + $0x2c0] sm:$0xff]  ;;  %v10239_v42 = vld [vmem:[#allocation12_spill] sm:$0xff]  ;;  %v5798_v9 = vld [vmem:[%s10173_s2 + $0x330] sm:$0xff] }
  0xbf   : > { %6727 = vmatprep.mubr.f32.mxu0 %v1240_v32  ;;  %v5800_v32 = vld [vmem:[%s10173_s2 + $0x340] sm:$0xff] }
  0xc0   : > { %6624 = vmatmul.mubr.f32.gmra.mxu1 %v7399_v28  ;;  %v5801_v28 = vld [vmem:[%s10173_s2 + $0x348] sm:$0xff] }
  0xc1   : > { %6762 = vmatprep.mubr.f32.mxu1 %v1897_v37  ;;  %v8481_v37 = vld [vmem:[%s7563_s18 + $0xc0] sm:$0xff] }
  0xc2   : > { %6728 = vmatmul.mubr.f32.gmra.mxu0 %v1287_v0  ;;  %v1824_v0 = vrot.slane %v1776_v41, 7 }
  0xc3   : > { %6866 = vmatprep.mubr.f32.mxu0 %v8315_v48 }
  0xc4   : > { %6763 = vmatmul.mubr.f32.vlgmr.msra.gmra.mxu1 %v1896_v29  ;;  %v8500_v29 = vld [vmem:[%s7563_s18 + $0xd0] sm:$0xff] }
  0xc5   : > { %6939 = vmatpush3.msra.mxu1 %v8265_v53  ;;  %6765 = vmatprep.mubr.f32.mxu1 %v1895_v45  ;;  %v10230_v53 = vld [vmem:[#allocation3_spill] sm:$0xff] }
  0xc6   : > { %6867 = vmatmul.mubr.f32.vlgmr.msra.gmra.mxu0 %v8328_v22  ;;  %6940 = vmatprep.subr.mxu1 %v5790_v17  ;;  %v1892_v6 = vsel %vm307_vm0, %v8363_v57, %v10230_v53 }
  0xc7   : > { %7043 = vmatpush3.msra.mxu0 %v8274_v2  ;;  %6869 = vmatprep.mubr.f32.mxu0 %v8333_v31  ;;  %v5788_v2 = vld [vmem:[%s10173_s2 + $0x2e0] sm:$0xff] }
  0xc8   : > { %6766 = vmatmul.mubr.f32.gmra.mxu1 %v1894_v51  ;;  %7044 = vmatprep.subr.mxu0 %v5806_v58  ;;  %v1780_v51 = vld [vmem:[%s7563_s18 + $0xe8] sm:$0xff] }
  0xc9   : > { %6768 = vmatprep.mubr.f32.mxu1 %v8381_v44  ;;  %6941 = vmatpush3.msra.mxu1 %v5790_v17  ;;  %v1779_v17 = vld [vmem:[%s7563_s18 + $0xe0] sm:$0xff] }
  0xca   : > { %6870 = vmatmul.mubr.f32.gmra.mxu0 %v8346_v35  ;;  %6942 = vmatprep.subr.mxu1 %v5789_v61  ;;  %v1827_v53 = vrot.slane %v1779_v17, 7 }
  0xcb   : > { %6872 = vmatprep.mubr.f32.mxu0 %v8353_v18  ;;  %7045 = vmatpush3.msra.mxu0 %v5806_v58  ;;  %v5780_v58 = vld [vmem:[%s10173_s2 + $0x2a0] sm:$0xff] }
  0xcc   : > { %6769 = vmatmul.mubr.f32.gmra.mxu1 %v1892_v6  ;;  %7046 = vmatprep.subr.mxu0 %v5805_v50  ;;  %v5796_v6 = vld [vmem:[%s10173_s2 + $0x320] sm:$0xff] }
  0xcd   : > { %6771 = vmatprep.mubr.f32.mxu1 %v10231_v11  ;;  %6943 = vmatpush3.msra.mxu1 %v5789_v61  ;;  %v1828_v11 = vrot.slane %v1780_v51, 7 }
  0xce   : > { %6873 = vmatmul.mubr.f32.gmra.mxu0 %v8406_v60  ;;  %6944 = vmatprep.subr.mxu1 %v5788_v2 }
  0xcf   : > { %6875 = vmatprep.mubr.f32.mxu0 %v8410_v62  ;;  %7047 = vmatpush3.msra.mxu0 %v5805_v50 }
  0xd0   : > { %6772 = vmatmul.mubr.f32.gmra.mxu1 %v10232_v7  ;;  %7048 = vmatprep.subr.mxu0 %v5804_v21  ;;  %v1782_v7 = vld [vmem:[%s7563_s18 + $0xf8] sm:$0xff] }
  0xd1   : > { %6774 = vmatprep.mubr.f32.mxu1 %v10233_v23  ;;  %6945 = vmatpush3.msra.mxu1 %v5788_v2  ;;  %v5779_v23 = vld [vmem:[%s10173_s2 + $0x298] sm:$0xff] }
  0xd2   : > { %6876 = vmatmul.mubr.f32.gmra.mxu0 %v8422_v54  ;;  %6946 = vmatprep.subr.mxu1 %v5787_v33 }
  0xd3   : > { %6878 = vmatprep.mubr.f32.mxu0 %v8426_v14  ;;  %7049 = vmatpush3.msra.mxu0 %v5804_v21  ;;  %v1781_v21 = vld [vmem:[%s7563_s18 + $0xf0] sm:$0xff] }
  0xd4   : > { %6775 = vmatmul.mubr.f32.gmra.mxu1 %v10234_v1  ;;  %7050 = vmatprep.subr.mxu0 %v5803_v40 }
  0xd5   : > { %6777 = vmatprep.mubr.f32.mxu1 %v10235_v8  ;;  %6947 = vmatpush3.msra.mxu1 %v5787_v33  ;;  %v1829_v8 = vrot.slane %v1781_v21, 7 }
  0xd6   : > { %6879 = vmatmul.mubr.f32.gmra.mxu0 %v8438_v24  ;;  %6948 = vmatprep.subr.mxu1 %v5786_v59 }
  0xd7   : > { %6881 = vmatprep.mubr.f32.mxu0 %v8442_v4  ;;  %7051 = vmatpush3.msra.mxu0 %v5803_v40 }
  0xd8   : > { %6778 = vmatmul.mubr.f32.gmra.mxu1 %v10236_v10  ;;  %7052 = vmatprep.subr.mxu0 %v5802_v15 }
  0xd9   : > { %6780 = vmatprep.mubr.f32.mxu1 %v10237_v56  ;;  %6949 = vmatpush3.msra.mxu1 %v5786_v59  ;;  %v8573_v56 = vrot.slane %v1782_v7, 7 }
  0xda   : > { %6882 = vmatmul.mubr.f32.gmra.mxu0 %v7816_v19  ;;  %6950 = vmatprep.subr.mxu1 %v5785_v46  ;;  %v8466_v19 = vld [vmem:[%s7563_s18 + $0xb8] sm:$0xff] }
  0xdb   : > { %6884 = vmatprep.mubr.f32.mxu0 %v7828_v34  ;;  %7053 = vmatpush3.msra.mxu0 %v5802_v15  ;;  %v5783_v34 = vld [vmem:[%s10173_s2 + $0x2b8] sm:$0xff]  ;;  %10245 = vst [vmem:[#allocation7_spill] sm:$0xff] %v8573_v56 }
  0xdc   : > { %6781 = vmatmul.mubr.f32.gmra.mxu1 %v10238_v13  ;;  %7054 = vmatprep.subr.mxu0 %v5801_v28  ;;  %v5795_v15 = vld [vmem:[%s10173_s2 + $0x318] sm:$0xff]  ;;  %v1784_v13 = vld [vmem:[%s7563_s18 + $0x108] sm:$0xff] }
  0xdd   : > { %6783 = vmatprep.mubr.f32.mxu1 %v10239_v42  ;;  %6951 = vmatpush3.msra.mxu1 %v5785_v46  ;;  %v8569_v46 = vsel %vm307_vm0, %v1827_v53, %v1828_v11  ;;  %v5778_v42 = vld [vmem:[%s10173_s2 + $0x290] sm:$0xff] }
  0xde   : > { %6885 = vmatmul.mubr.f32.gmra.mxu0 %v7851_v52  ;;  %6952 = vmatprep.subr.mxu1 %v5784_v27  ;;  %v5799_v52 = vld [vmem:[%s10173_s2 + $0x338] sm:$0xff]  ;;  %10244 = vst [vmem:[#allocation6_spill] sm:$0xff] %v8569_v46 }
  0xdf   : > { %6887 = vmatprep.mubr.f32.mxu0 %v7867_v3  ;;  %7055 = vmatpush3.msra.mxu0 %v5801_v28  ;;  %v8478_v3 = vrot.slane %v8466_v19, 7  ;;  %v1783_v28 = vld [vmem:[%s7563_s18 + $0x100] sm:$0xff] }
  0xe0   : > { %6784 = vmatmul.mubr.f32.gmra.mxu1 %v10240_v12  ;;  %7056 = vmatprep.subr.mxu0 %v5800_v32  ;;  %v1831_v12 = vrot.slane %v1783_v28, 7 }
  0xe1   : > { %6786 = vmatprep.mubr.f32.mxu1 %v7961_v38  ;;  %6953 = vmatpush3.msra.mxu1 %v5784_v27  ;;  %v5782_v38 = vld [vmem:[%s10173_s2 + $0x2b0] sm:$0xff] }
  0xe2   : > { %6888 = vmatmul.mubr.f32.gmra.mxu0 %v7893_v39  ;;  %6954 = vmatprep.subr.mxu1 %v5783_v34  ;;  %v1823_v39 = vrot.slane %v8481_v37, 7 }
  0xe3   : > { %6890 = vmatprep.mubr.f32.mxu0 %v7908_v26  ;;  %7057 = vmatpush3.msra.mxu0 %v5800_v32  ;;  %v1877_v26 = vsel %vm307_vm0, %v7985_v49, %v8478_v3  ;;  %v1825_v49 = vrot.slane %v8500_v29, 7 }
  0xe4   : > { %6787 = vmatmul.mubr.f32.gmra.mxu1 %v7980_v5  ;;  %7058 = vmatprep.subr.mxu0 %v5799_v52  ;;  %v1778_v5 = vld [vmem:[%s7563_s18 + $0xd8] sm:$0xff]  ;;  %v8520_v45 = vsel %vm307_vm0, %v1823_v39, %v1824_v0 }
  0xe5   : > { %6789 = vmatprep.mubr.f32.mxu1 %v7989_v25  ;;  %6955 = vmatpush3.msra.mxu1 %v5783_v34  ;;  %v5781_v25 = vld [vmem:[%s10173_s2 + $0x2a8] sm:$0xff]  ;;  %v8588_v34 = vsel %vm307_vm0, %v1828_v11, %v1829_v8 }
  0xe6   : > { %6891 = vmatmul.mubr.f32.gmra.mxu0 %v7930_v36  ;;  %6956 = vmatprep.subr.mxu1 %v5782_v38  ;;  %v8511_v36 = vsel %vm307_vm0, %v8478_v3, %v1823_v39  ;;  %10247 = vst [vmem:[#allocation9_spill] sm:$0xff] %v8588_v34  ;;  %v1832_v39 = vrot.slane %v1784_v13, 7  ;;  %v1788_v11 = vld [vmem:[%s7563_s18 + $0x128] sm:$0xff] }
  0xe7   : > { %6893 = vmatprep.mubr.f32.mxu0 %v7942_v55  ;;  %7059 = vmatpush3.msra.mxu0 %v5799_v52  ;;  %v5797_v55 = vld [vmem:[%s10173_s2 + $0x328] sm:$0xff]  ;;  %v5794_v52 = vld [vmem:[%s10173_s2 + $0x310] sm:$0xff] }
  0xe8   : > { %6790 = vmatmul.mubr.f32.gmra.mxu1 %v8004_v63  ;;  %7060 = vmatprep.subr.mxu0 %v5798_v9  ;;  %v1826_v63 = vrot.slane %v1778_v5, 7 }
  0xe9   : > { %6792 = vmatprep.mubr.f32.mxu1 %v1877_v26  ;;  %6957 = vmatpush3.msra.mxu1 %v5782_v38 }
  0xea   : > { %6894 = vmatmul.mubr.f32.gmra.mxu0 %v7965_v43  ;;  %6958 = vmatprep.subr.mxu1 %v5781_v25  ;;  %v8532_v43 = vsel %vm307_vm0, %v1824_v0, %v1825_v49  ;;  %v8542_v50 = vsel %vm307_vm0, %v1825_v49, %v1826_v63  ;;  %v8559_v59 = vsel %vm307_vm0, %v1826_v63, %v1827_v53  ;;  %v1786_v0 = vld [vmem:[%s7563_s18 + $0x118] sm:$0xff] }
  0xeb   : > { %6896 = vmatprep.mubr.f32.mxu0 %v8466_v19  ;;  %7061 = vmatpush3.msra.mxu0 %v5798_v9  ;;  %v1785_v9 = vld [vmem:[%s7563_s18 + $0x110] sm:$0xff]  ;;  %v1868_v49 = vsel %vm307_vm0, %v8573_v56, %v1831_v12  ;;  %v1834_v53 = vrot.slane %v1786_v0, 7 }
  0xec   : > { %6793 = vmatmul.mubr.f32.gmra.mxu1 %v8511_v36  ;;  %7062 = vmatprep.subr.mxu0 %v5797_v55  ;;  %v1833_v63 = vrot.slane %v1785_v9, 7 }
  0xed   : > { %6795 = vmatprep.mubr.f32.mxu1 %v8520_v45  ;;  %v8534_v61 = vpop.f32.mrf.mxu1  ;;  %6959 = vmatpush3.msra.mxu1 %v5781_v25 }
  0xee   : > { %10241 = vst [vmem:[#allocation3_spill] sm:$0xff] %v8534_v61  ;;  %6897 = vmatmul.mubr.f32.gmra.mxu0 %v8481_v37  ;;  %v8544_v2 = vpop.f32.mrf.mxu0  ;;  %6960 = vmatprep.subr.mxu1 %v5780_v58  ;;  %v1797_v61 = vld [vmem:[%s7563_s18 + $0x170] sm:$0xff] }
  0xef   : > { %6899 = vmatprep.mubr.f32.mxu0 %v1776_v41  ;;  %v8547_v33 = vpop.f32.mrf.mxu1  ;;  %7063 = vmatpush3.msra.mxu0 %v5797_v55  ;;  %v8596_v41 = vsel %vm307_vm0, %v1829_v8, %v8573_v56 }
  0xf0   : > { %10242 = vst [vmem:[#allocation4_spill] sm:$0xff] %v8547_v33  ;;  %6796 = vmatmul.mubr.f32.gmra.mxu1 %v8532_v43  ;;  %v8554_v40 = vpop.f32.mrf.mxu0  ;;  %7064 = vmatprep.subr.mxu0 %v5796_v6  ;;  %10248 = vst [vmem:[#allocation10_spill] sm:$0xff] %v8596_v41 }
  0xf1   : > { %6798 = vmatprep.mubr.f32.mxu1 %v8542_v50  ;;  %v8561_v1 = vpop.f32.mrf.mxu1  ;;  %6961 = vmatpush3.msra.mxu1 %v5780_v58 }
  0xf2   : > { %10243 = vst [vmem:[#allocation5_spill] sm:$0xff] %v8561_v1  ;;  %6900 = vmatmul.mubr.f32.gmra.mxu0 %v8500_v29  ;;  %v8571_v10 = vpop.f32.mrf.mxu0  ;;  %6962 = vmatprep.subr.mxu1 %v5779_v23  ;;  %v5079_v1 = vld [vmem:[%s10172_s1 + $0x8] sm:$0xff] }
  0xf3   : > { %6902 = vmatprep.mubr.f32.mxu0 %v1778_v5  ;;  %v8576_v27 = vpop.f32.mrf.mxu1  ;;  %7065 = vmatpush3.msra.mxu0 %v5796_v6  ;;  %v5777_v5 = vld [vmem:[%s10173_s2 + $0x288] sm:$0xff]  ;;  %v1787_v6 = vld [vmem:[%s7563_s18 + $0x120] sm:$0xff] }
  0xf4   : > { %10246 = vst [vmem:[#allocation8_spill] sm:$0xff] %v8576_v27  ;;  %6799 = vmatmul.mubr.f32.gmra.mxu1 %v8559_v59  ;;  %v8583_v32 = vpop.f32.mrf.mxu0  ;;  %7066 = vmatprep.subr.mxu0 %v5795_v15  ;;  %v1794_v27 = vld [vmem:[%s7563_s18 + $0x158] sm:$0xff] }
  0xf5   : > { %6801 = vmatprep.mubr.f32.mxu1 %v8569_v46  ;;  %6963 = vmatpush3.msra.mxu1 %v5779_v23  ;;  %v5776_v23 = vld [vmem:[%s10173_s2 + $0x280] sm:$0xff]  ;;  %v1842_v33 = vrot.slane %v1794_v27, 7 }
  0xf6   : > { %6903 = vmatmul.mubr.f32.gmra.mxu0 %v1779_v17  ;;  %v8598_v38 = vpop.f32.mrf.mxu1  ;;  %6964 = vmatprep.subr.mxu1 %v5778_v42  ;;  %v5793_v17 = vld [vmem:[%s10173_s2 + $0x308] sm:$0xff] }
  0xf7   : > { %10249 = vst [vmem:[#allocation11_spill] sm:$0xff] %v8598_v38  ;;  %6905 = vmatprep.mubr.f32.mxu0 %v1780_v51  ;;  %v8601_v26 = vpop.f32.mrf.mxu0  ;;  %7067 = vmatpush3.msra.mxu0 %v5795_v15  ;;  %v1867_v51 = vsel %vm307_vm0, %v1831_v12, %v1832_v39  ;;  %v1866_v15 = vsel %vm307_vm0, %v1832_v39, %v1833_v63  ;;  %v8648_v39 = vld [vmem:[%s10173_s2 + $0x3f8] sm:$0xff] }
  0xf8   : > { %6802 = vmatmul.mubr.f32.gmra.mxu1 %v8588_v34  ;;  %v8608_v25 = vpop.f32.mrf.mxu1  ;;  %7068 = vmatprep.subr.mxu0 %v5794_v52 }
  0xf9   : > { %10250 = vst [vmem:[#allocation12_spill] sm:$0xff] %v8608_v25  ;;  %6804 = vmatprep.mubr.f32.mxu1 %v8596_v41  ;;  %v8614_v55 = vpop.f32.mrf.mxu0  ;;  %6965 = vmatpush3.msra.mxu1 %v5778_v42  ;;  %v1835_v42 = vrot.slane %v1787_v6, 7  ;;  %v7486_v25 = vmov 0  }
  0xfa   : > { %6906 = vmatmul.mubr.f32.gmra.mxu0 %v1781_v21  ;;  %v8621_v58 = vpop.f32.mrf.mxu1  ;;  %6966 = vmatprep.subr.mxu1 %v5777_v5 }
  0xfb   : > { %10251 = vst [vmem:[#allocation13_spill] sm:$0xff] %v8621_v58  ;;  %6908 = vmatprep.mubr.f32.mxu0 %v1782_v7  ;;  %7069 = vmatpush3.msra.mxu0 %v5794_v52  ;;  %v5792_v7 = vld [vmem:[%s10173_s2 + $0x300] sm:$0xff]  ;;  %v1865_v52 = vsel %vm307_vm0, %v1833_v63, %v1834_v53  ;;  %v1837_v63 = vrot.slane %v1789_v30, 7 }
  0xfc   : > { %6805 = vmatmul.mubr.f32.gmra.mxu1 %v1868_v49  ;;  %v8628_v8 = vpop.f32.mrf.mxu0  ;;  %v8630_v21 = vpop.f32.mrf.mxu1  ;;  %7070 = vmatprep.subr.mxu0 %v5793_v17  ;;  %v1836_v49 = vrot.slane %v1788_v11, 7 }
  0xfd   : > { %10252 = vst [vmem:[#allocation15_spill] sm:$0xff] %v8630_v21  ;;  %6807 = vmatprep.mubr.f32.mxu1 %v1867_v51  ;;  %6967 = vmatpush3.msra.mxu1 %v5777_v5  ;;  %v1790_v21 = vld [vmem:[%s7563_s18 + $0x138] sm:$0xff]  ;;  %v1864_v5 = vsel %vm307_vm0, %v1834_v53, %v1835_v42  ;;  %v1792_v53 = vld [vmem:[%s7563_s18 + $0x148] sm:$0xff] }
  0xfe   : > { %6909 = vmatmul.mubr.f32.gmra.mxu0 %v1783_v28  ;;  %v8637_v12 = vpop.f32.mrf.mxu0  ;;  %6968 = vmatprep.subr.mxu1 %v5776_v23  ;;  %v1838_v58 = vrot.slane %v1790_v21, 7  ;;  %v1840_v38 = vrot.slane %v1792_v53, 7 }
  0xff   : > { %6911 = vmatprep.mubr.f32.mxu0 %v1784_v13  ;;  %v8642_v51 = vpop.f32.mrf.mxu1  ;;  %7071 = vmatpush3.msra.mxu0 %v5793_v17  ;;  %v8659_v17 = vld [vmem:[%s10173_s2 + $0x478] sm:$0xff] }
 0x100   : > { %10253 = vst [vmem:[#allocation16_spill] sm:$0xff] %v8642_v51  ;;  %6808 = vmatmul.mubr.f32.gmra.mxu1 %v1866_v15  ;;  %v8650_v28 = vpop.f32.mrf.mxu0  ;;  %7072 = vmatprep.subr.mxu0 %v5792_v7  ;;  %v1863_v15 = vsel %vm307_vm0, %v1835_v42, %v1836_v49 }
 0x101   : > { %6810 = vmatprep.mubr.f32.mxu1 %v1865_v52  ;;  %v8654_v13 = vpop.f32.mrf.mxu1  ;;  %6969 = vmatpush3.msra.mxu1 %v5776_v23  ;;  %v1791_v52 = vld [vmem:[%s7563_s18 + $0x140] sm:$0xff] }
 0x102   : > { %10254 = vst [vmem:[#allocation17_spill] sm:$0xff] %v8654_v13  ;;  %6912 = vmatmul.mubr.f32.gmra.mxu0 %v1785_v9  ;;  %v8661_v51 = vpop.f32.mrf.mxu0  ;;  %7146 = vmatprep.subr.mxu1 %v8648_v39  ;;  %v5078_v23 = vld [vmem:[%s10172_s1] sm:$0xff]  ;;  %v1862_v9 = vsel %vm307_vm0, %v1836_v49, %v1837_v63 }
 0x103   : > { %6914 = vmatprep.mubr.f32.mxu0 %v1786_v0  ;;  %7073 = vmatpush3.msra.mxu0 %v5792_v7  ;;  %v1839_v0 = vrot.slane %v1791_v52, 7  ;;  %v5080_v7 = vld [vmem:[%s10172_s1 + $0x10] sm:$0xff] }
 0x104   : > { %6811 = vmatmul.mubr.f32.gmra.mxu1 %v1864_v5  ;;  %v8671_v13 = vpop.f32.mrf.mxu1  ;;  %7250 = vmatprep.subr.mxu0 %v8659_v17 }
 0x105   : > { %10255 = vst [vmem:[#allocation18_spill] sm:$0xff] %v8671_v13  ;;  %6813 = vmatprep.mubr.f32.mxu1 %v1863_v15  ;;  %v8676_v42 = vpop.f32.mrf.mxu0  ;;  %7397 = vset.pattern.permute.xlu0 %v7486_v25  ;;  %v1861_v13 = vsel %vm307_vm0, %v1837_v63, %v1838_v58  ;;  %v1793_v15 = vld [vmem:[%s7563_s18 + $0x150] sm:$0xff]  ;;  %v1860_v63 = vsel %vm307_vm0, %v1838_v58, %v1839_v0  ;;  %v5082_v58 = vld [vmem:[%s10172_s1 + $0x20] sm:$0xff] }
 0x106   : > { %6915 = vmatmul.mubr.f32.gmra.mxu0 %v1787_v6  ;;  %v8681_v5 = vpop.f32.mrf.mxu1  ;;  %5128 = vperm.xlu0 %7397, %v5078_v23   ;;  %v1841_v23 = vrot.slane %v1793_v15, 7 }
 0x107   : > { %10256 = vst [vmem:[#allocation19_spill] sm:$0xff] %v8681_v5  ;;  %6917 = vmatprep.mubr.f32.mxu0 %v1788_v11  ;;  %v8686_v49 = vpop.f32.mrf.mxu0  ;;  %7398 = vset.pattern.permute.xlu1 %v7486_v25  ;;  %v5081_v11 = vld [vmem:[%s10172_s1 + $0x18] sm:$0xff] }
 0x108   : > { %6814 = vmatmul.mubr.f32.gmra.mxu1 %v1862_v9  ;;  %v8692_v6 = vpop.f32.mrf.mxu1  ;;  %5138 = vperm.xlu1 %7398, %v5080_v7   ;;  %v1859_v9 = vsel %vm307_vm0, %v1839_v0, %v1840_v38  ;;  %v1858_v0 = vsel %vm307_vm0, %v1840_v38, %v1841_v23  ;;  %v5084_v38 = vld [vmem:[%s10172_s1 + $0x30] sm:$0xff] }
 0x109   : > { %10257 = vst [vmem:[#allocation20_spill] sm:$0xff] %v8692_v6  ;;  %6816 = vmatprep.mubr.f32.mxu1 %v1861_v13  ;;  %v1795_v6 = vld [vmem:[%s7563_s18 + $0x160] sm:$0xff]  ;;  %v1796_v13 = vld [vmem:[%s7563_s18 + $0x168] sm:$0xff] }
 0x10a   : > { %6918 = vmatmul.mubr.f32.gmra.mxu0 %v1789_v30  ;;  %v8699_v25 = vpop.f32.mrf.mxu0  ;;  %v8701_v5 = vpop.f32.mrf.mxu1  ;;  %5133 = vperm.xlu0 %7397, %v5079_v1   ;;  %v5083_v1 = vld [vmem:[%s10172_s1 + $0x28] sm:$0xff]  ;;  %v1844_v41 = vrot.slane %v1796_v13, 7 }
 0x10b   : > { %10258 = vst [vmem:[#allocation21_spill] sm:$0xff] %v8701_v5  ;;  %6920 = vmatprep.mubr.f32.mxu0 %v1790_v21  ;;  %v1843_v5 = vrot.slane %v1795_v6, 7 }
 0x10c   : > { %6817 = vmatmul.mubr.f32.gmra.mxu1 %v1860_v63  ;;  %v8710_v30 = vpop.f32.mrf.mxu0  ;;  %5143 = vperm.xlu1 %7398, %v5081_v11   ;;  %v1857_v63 = vsel %vm307_vm0, %v1841_v23, %v1842_v33 }
 0x10d   : > { %6819 = vmatprep.mubr.f32.mxu1 %v1859_v9  ;;  %v8712_v7 = vpop.f32.mrf.mxu1  ;;  %v1798_v9 = vld [vmem:[%s7563_s18 + $0x178] sm:$0xff]  ;;  %v1856_v23 = vsel %vm307_vm0, %v1842_v33, %v1843_v5  ;;  %v5086_v33 = vld [vmem:[%s10172_s1 + $0x40] sm:$0xff] }
 0x10e   : > { %10259 = vst [vmem:[#allocation22_spill] sm:$0xff] %v8712_v7  ;;  %6921 = vmatmul.mubr.f32.gmra.mxu0 %v1791_v52  ;;  %v8719_v21 = vpop.f32.mrf.mxu0  ;;  %5148 = vperm.xlu0 %7397, %v5082_v58   ;;  %v1845_v7 = vrot.slane %v1797_v61, 7  ;;  %v1846_v56 = vrot.slane %v1798_v9, 7 }
 0x10f   : > { %6923 = vmatprep.mubr.f32.mxu0 %v1792_v53  ;;  %v8724_v11 = vpop.f32.mrf.mxu1  ;;  %v5085_v53 = vld [vmem:[%s10172_s1 + $0x38] sm:$0xff] }
 0x110   : > { %10260 = vst [vmem:[#allocation23_spill] sm:$0xff] %v8724_v11  ;;  %6820 = vmatmul.mubr.f32.gmra.mxu1 %v1858_v0  ;;  %v8730_v52 = vpop.f32.mrf.mxu0  ;;  %5153 = vperm.xlu1 %7398, %v5083_v1   ;;  %v1855_v11 = vsel %vm307_vm0, %v1843_v5, %v1844_v41  ;;  %v1799_v0 = vld [vmem:[%s7563_s18 + $0x180] sm:$0xff]  ;;  %v1854_v5 = vsel %vm307_vm0, %v1844_v41, %v1845_v7 }
 0x111   : > { %6822 = vmatprep.mubr.f32.mxu1 %v1857_v63  ;;  %v1800_v63 = vld [vmem:[%s7563_s18 + $0x188] sm:$0xff] }
 0x112   : > { %6924 = vmatmul.mubr.f32.gmra.mxu0 %v1793_v15  ;;  %v8737_v58 = vpop.f32.mrf.mxu1  ;;  %5158 = vperm.xlu0 %7397, %v5084_v38   ;;  %v1847_v38 = vrot.slane %v1799_v0, 7 }
 0x113   : > { %10261 = vst [vmem:[#allocation24_spill] sm:$0xff] %v8737_v58  ;;  %6926 = vmatprep.mubr.f32.mxu0 %v1794_v27  ;;  %v8742_v1 = vpop.f32.mrf.mxu0  ;;  %v5087_v27 = vld [vmem:[%s10172_s1 + $0x48] sm:$0xff] }
 0x114   : > { %6823 = vmatmul.mubr.f32.gmra.mxu1 %v1856_v23  ;;  %v8748_v34 = vpop.f32.mrf.mxu1  ;;  %5163 = vperm.xlu1 %7398, %v5085_v53   ;;  %v1853_v23 = vsel %vm307_vm0, %v1845_v7, %v1846_v56 }
 0x115   : > { %10262 = vst [vmem:[#allocation25_spill] sm:$0xff] %v8748_v34  ;;  %v8750_v15 = vpop.f32.mrf.mxu0  ;;  %6825 = vmatprep.mubr.f32.mxu1 %v1855_v11  ;;  %v1848_v34 = vrot.slane %v1800_v63, 7  ;;  %v5088_v11 = vld [vmem:[%s10172_s1 + $0x50] sm:$0xff] }
 0x116   : > { %6927 = vmatmul.mubr.f32.gmra.mxu0 %v1795_v6  ;;  %v8757_v58 = vpop.f32.mrf.mxu1  ;;  %5168 = vperm.xlu0 %7397, %v5086_v33   ;;  %v1852_v6 = vsel %vm307_vm0, %v1846_v56, %v1847_v38  ;;  %v5090_v56 = vld [vmem:[%s10172_s1 + $0x60] sm:$0xff] }
 0x117   : > { %10263 = vst [vmem:[#allocation26_spill] sm:$0xff] %v8757_v58  ;;  %6929 = vmatprep.mubr.f32.mxu0 %v1796_v13  ;;  %v8771_v58 = vld [vmem:[%s7563_s18 + $0x1a8] sm:$0xff]  ;;  %v5089_v13 = vld [vmem:[%s10172_s1 + $0x58] sm:$0xff]  ;;  %v1851_v33 = vsel %vm307_vm0, %v1847_v38, %v1848_v34  ;;  %v2832_v38 = vrot.slane %v8333_v31, 1 }
 0x118   : > { %6826 = vmatmul.mubr.f32.gmra.mxu1 %v1854_v5  ;;  %v8764_v41 = vpop.f32.mrf.mxu0  ;;  %v8766_v53 = vpop.f32.mrf.mxu1  ;;  %5173 = vperm.xlu1 %7398, %v5087_v27   ;;  %v2831_v27 = vrot.slane %v8328_v22, 1  ;;  %v10266_v22 = vrot.slane %v8318_v20, 7 }
 0x119   : > { %10264 = vst [vmem:[#allocation27_spill] sm:$0xff] %v8766_v53  ;;  %6828 = vmatprep.mubr.f32.mxu1 %v1853_v23  ;;  %v10196_v53 = vrot.slane %v8771_v58, 7 }
 0x11a   : > { %6930 = vmatmul.mubr.f32.gmra.mxu0 %v1797_v61  ;;  %v8776_v7 = vpop.f32.mrf.mxu0  ;;  %5178 = vperm.xlu0 %7397, %v5088_v11   ;;  %v3394_v11 = vld [vmem:[%s7563_s18 + $0x40] sm:$0xff] }
 0x11b   : > { %v8782_v23 = vpop.f32.mrf.mxu1  ;;  %6932 = vmatprep.mubr.f32.mxu0 %v1798_v9  ;;  %v1850_v9 = vsel %vm307_vm0, %v1848_v34, %v10266_v22  ;;  %v5092_v34 = vld [vmem:[%s10172_s1 + $0x70] sm:$0xff] }
 0x11c   : > { %6829 = vmatmul.mubr.f32.gmra.mxu1 %v1852_v6  ;;  %v8787_v61 = vpop.f32.mrf.mxu0  ;;  %5183 = vperm.xlu1 %7398, %v5089_v13   ;;  %v5091_v6 = vld [vmem:[%s10172_s1 + $0x68] sm:$0xff]  ;;  %v10267_v13 = vrot.slane %v8315_v48, 1 }
 0x11d   : > { %v8791_v46 = vpop.f32.mrf.mxu1  ;;  %6831 = vmatprep.mubr.f32.mxu1 %v1851_v33  ;;  %v2833_v33 = vrot.slane %v8346_v35, 1  ;;  %v3395_v48 = vld [vmem:[%s7563_s18 + $0x48] sm:$0xff]  ;;  %v2923_v35 = vsel %vm1239_vm1, %v2831_v27, %v2832_v38 }
 0x11e   : > { %10265 = vst [vmem:[#allocation28_spill] sm:$0xff] %v8791_v46  ;;  %6933 = vmatmul.mubr.f32.gmra.mxu0 %v1799_v0  ;;  %v8801_v5 = vpop.f32.mrf.mxu0  ;;  %v2924_v31 = vsel %vm1239_vm1, %v10267_v13, %v2831_v27  ;;  %5188 = vperm.xlu0 %7397, %v5090_v56   ;;  %v3535_v0 = vsel %vm307_vm0, %v10196_v53, %v8358_v47  ;;  %v3442_v46 = vrot.slane %v3394_v11, 7  ;;  %v8825_v56 = vld [vmem:[%s7563_s18 + $0x50] sm:$0xff] }
 0x11f   : > { %6935 = vmatprep.mubr.f32.mxu0 %v1800_v63  ;;  %v2834_v63 = vrot.slane %v8353_v18, 1  ;;  %v2922_v11 = vsel %vm1239_vm1, %v2832_v38, %v2833_v33  ;;  %v3443_v18 = vrot.slane %v3395_v48, 7  ;;  %v3444_v38 = vrot.slane %v8825_v56, 7 }
 0x120   : > { %v8811_v22 = vpop.f32.mrf.mxu1  ;;  %6832 = vmatmul.mubr.f32.gmra.mxu1 %v1850_v9  ;;  %5193 = vperm.xlu1 %7398, %v5091_v6   ;;  %v5093_v9 = vld [vmem:[%s10172_s1 + $0x78] sm:$0xff]  ;;  %v2835_v6 = vrot.slane %v8406_v60, 1 }
 0x121   : > { %v8819_v13 = vpop.f32.mrf.mxu0  ;;  %6970 = vmatprep.mubr.f32.mxu1 %v2924_v31  ;;  %v5822_v31 = vld [vmem:[%s10173_s2 + $0x3f0] sm:$0xff]  ;;  %v2921_v48 = vsel %vm1239_vm1, %v2833_v33, %v2834_v63  ;;  %v3532_v33 = vsel %vm307_vm0, %v3442_v46, %v3443_v18 }
 0x122   : > { %6936 = vmatmul.mubr.f32.gmra.mxu0 %v8318_v20  ;;  %v8831_v47 = vpop.f32.mrf.mxu1  ;;  %5198 = vperm.xlu0 %7397, %v5092_v34   ;;  %v3533_v20 = vsel %vm307_vm0, %v8363_v57, %v3442_v46  ;;  %v2836_v34 = vrot.slane %v8410_v62, 1 }
 0x123   : > { %10268 = vst [vmem:[#allocation29_spill] sm:$0xff] %v8831_v47  ;;  %v8836_v27 = vpop.f32.mrf.mxu0  ;;  %7074 = vmatprep.mubr.f32.mxu0 %v3535_v0  ;;  %v3397_v47 = vld [vmem:[%s7563_s18 + $0x58] sm:$0xff]  ;;  %v5838_v0 = vld [vmem:[%s10173_s2 + $0x470] sm:$0xff] }
 0x124   : > { %v6556_v53 = vpop.f32.mrf.mxu1  ;;  %6971 = vmatmul.mubr.f32.vlgmr.msra.gmra.mxu1 %v2923_v35  ;;  %5203 = vperm.xlu1 %7398, %v5093_v9   ;;  %v8855_v35 = vld [vmem:[%s7563_s18 + $0x60] sm:$0xff]  ;;  %v3445_v9 = vrot.slane %v3397_v47, 7  ;;  %v2919_v47 = vsel %vm1239_vm1, %v2835_v6, %v2836_v34 }
 0x125   : > { %v1096_v60 = vadd.f32 %v6556_v53, %v8544_v2  ;;  %7147 = vmatpush3.msra.mxu1 %v8648_v39  ;;  %6973 = vmatprep.mubr.f32.mxu1 %v2922_v11  ;;  %v2920_v2 = vsel %vm1239_vm1, %v2834_v63, %v2835_v6  ;;  %v2837_v39 = vrot.slane %v8422_v54, 1  ;;  %v3531_v54 = vsel %vm307_vm0, %v3443_v18, %v3444_v38  ;;  %v8884_v18 = vld [vmem:[%s7563_s18 + $0x70] sm:$0xff] }
 0x126   : > { %v6660_v57 = vpop.f32.mrf.mxu0  ;;  %7075 = vmatmul.mubr.f32.vlgmr.msra.gmra.mxu0 %v8381_v44  ;;  %v808_v56 = vpop.f32.mrf.mxu1  ;;  %7148 = vmatprep.subr.mxu1 %v5822_v31  ;;  %v5821_v44 = vld [vmem:[%s10173_s2 + $0x3e8] sm:$0xff]  ;;  %v3530_v6 = vsel %vm307_vm0, %v3444_v38, %v3445_v9 }
 0x127   : > { %v8861_v53 = vadd.f32 %v6660_v57, %v1096_v60  ;;  %v1095_v62 = vadd.f32 %v808_v56, %v8554_v40  ;;  %7251 = vmatpush3.msra.mxu0 %v8659_v17  ;;  %7077 = vmatprep.mubr.f32.mxu0 %v3533_v20  ;;  %v3446_v40 = vrot.slane %v8855_v35, 7  ;;  %v3399_v17 = vld [vmem:[%s7563_s18 + $0x68] sm:$0xff]  ;;  %v2838_v60 = vrot.slane %v8426_v14, 1 }
 0x128   : > { %v1371_v11 = vpop.f32.mrf.mxu0  ;;  %v6559_v63 = vpop.f32.mrf.mxu1  ;;  %6974 = vmatmul.mubr.f32.gmra.mxu1 %v2921_v48  ;;  %7252 = vmatprep.subr.mxu0 %v5838_v0  ;;  %v5837_v48 = vld [vmem:[%s10173_s2 + $0x468] sm:$0xff]  ;;  %v2918_v56 = vsel %vm1239_vm1, %v2836_v34, %v2837_v39 }
 0x129   : > { %v8874_v20 = vadd.f32 %v1371_v11, %v1095_v62  ;;  %v1098_v46 = vadd.f32 %v6559_v63, %v8571_v10  ;;  %6976 = vmatprep.mubr.f32.mxu1 %v2920_v2  ;;  %7149 = vmatpush3.msra.mxu1 %v5822_v31  ;;  %v2839_v10 = vrot.slane %v8438_v24, 1  ;;  %v3447_v2 = vrot.slane %v3399_v17, 7  ;;  %v5820_v62 = vld [vmem:[%s10173_s2 + $0x3e0] sm:$0xff]  ;;  %v3401_v11 = vld [vmem:[%s7563_s18 + $0x78] sm:$0xff] }
 0x12a   : > { %v6663_v57 = vpop.f32.mrf.mxu0  ;;  %7078 = vmatmul.mubr.f32.gmra.mxu0 %v3532_v33  ;;  %v818_v35 = vpop.f32.mrf.mxu1  ;;  %7150 = vmatprep.subr.mxu1 %v5821_v44  ;;  %v3529_v24 = vsel %vm307_vm0, %v3445_v9, %v3446_v40  ;;  %v8908_v17 = vld [vmem:[%s7563_s18 + $0x80] sm:$0xff] }
 0x12b   : > { %v8889_v31 = vadd.f32 %v6663_v57, %v1098_v46  ;;  %v1097_v14 = vadd.f32 %v818_v35, %v8583_v32  ;;  %7080 = vmatprep.mubr.f32.mxu0 %v3531_v54  ;;  %7253 = vmatpush3.msra.mxu0 %v5838_v0  ;;  %v3448_v32 = vrot.slane %v8884_v18, 7  ;;  %v2917_v0 = vsel %vm1239_vm1, %v2837_v39, %v2838_v60  ;;  %v5836_v9 = vld [vmem:[%s10173_s2 + $0x460] sm:$0xff] }
 0x12c   : > { %v1381_v34 = vpop.f32.mrf.mxu0  ;;  %v6562_v33 = vpop.f32.mrf.mxu1  ;;  %6977 = vmatmul.mubr.f32.gmra.mxu1 %v2919_v47  ;;  %7254 = vmatprep.subr.mxu0 %v5837_v48  ;;  %v2840_v54 = vrot.slane %v8442_v4, 1  ;;  %v2916_v18 = vsel %vm1239_vm1, %v2838_v60, %v2839_v10  ;;  %v3449_v35 = vrot.slane %v3401_v11, 7  ;;  %v5819_v60 = vld [vmem:[%s10173_s2 + $0x3d8] sm:$0xff] }
 0x12d   : > { %v8901_v63 = vadd.f32 %v1381_v34, %v1097_v14  ;;  %v1100_v38 = vadd.f32 %v6562_v33, %v8601_v26  ;;  %6979 = vmatprep.mubr.f32.mxu1 %v2918_v56  ;;  %7151 = vmatpush3.msra.mxu1 %v5821_v44  ;;  %v7406_v26 = vld [vmem:[%s7563_s18 + $0x70] sm:$0xff]  ;;  %v3528_v44 = vsel %vm307_vm0, %v3446_v40, %v3447_v2  ;;  %v3403_v34 = vld [vmem:[%s7563_s18 + $0x88] sm:$0xff] }
 0x12e   : > { %v6666_v46 = vpop.f32.mrf.mxu0  ;;  %7081 = vmatmul.mubr.f32.gmra.mxu0 %v3530_v6  ;;  %v828_v47 = vpop.f32.mrf.mxu1  ;;  %7152 = vmatprep.subr.mxu1 %v5820_v62  ;;  %v2841_v57 = vrot.slane %v7406_v26, 1  ;;  %v3527_v6 = vsel %vm307_vm0, %v3447_v2, %v3448_v32  ;;  %v2915_v33 = vsel %vm1239_vm1, %v2839_v10, %v2840_v54  ;;  %v5835_v2 = vld [vmem:[%s10173_s2 + $0x458] sm:$0xff]  ;;  %v3451_v26 = vrot.slane %v3403_v34, 7  ;;  %v7409_v34 = vld [vmem:[%s7563_s18 + $0x88] sm:$0xff] }
 0x12f   : > { %v8916_v39 = vadd.f32 %v6666_v46, %v1100_v38  ;;  %v1099_v4 = vadd.f32 %v828_v47, %v8614_v55  ;;  %7083 = vmatprep.mubr.f32.mxu0 %v3529_v24  ;;  %7255 = vmatpush3.msra.mxu0 %v5837_v48  ;;  %v3450_v55 = vrot.slane %v8908_v17, 7  ;;  %v7407_v24 = vld [vmem:[%s7563_s18 + $0x78] sm:$0xff]  ;;  %v8935_v38 = vld [vmem:[%s7563_s18 + $0x90] sm:$0xff] }
 0x130   : > { %v1391_v56 = vpop.f32.mrf.mxu0  ;;  %v6565_v14 = vpop.f32.mrf.mxu1  ;;  %6980 = vmatmul.mubr.f32.gmra.mxu1 %v2917_v0  ;;  %7256 = vmatprep.subr.mxu0 %v5836_v9  ;;  %v2842_v11 = vrot.slane %v7407_v24, 1  ;;  %v2914_v46 = vsel %vm1239_vm1, %v2840_v54, %v2841_v57  ;;  %v5818_v54 = vld [vmem:[%s10173_s2 + $0x3d0] sm:$0xff] }
 0x131   : > { %v8928_v40 = vadd.f32 %v1391_v56, %v1099_v4  ;;  %v1102_v48 = vadd.f32 %v6565_v14, %v8628_v8  ;;  %6982 = vmatprep.mubr.f32.mxu1 %v2916_v18  ;;  %7153 = vmatpush3.msra.mxu1 %v5820_v62  ;;  %v7408_v8 = vld [vmem:[%s7563_s18 + $0x80] sm:$0xff]  ;;  %v3526_v18 = vsel %vm307_vm0, %v3448_v32, %v3449_v35  ;;  %v3405_v14 = vld [vmem:[%s7563_s18 + $0x98] sm:$0xff] }
 0x132   : > { %v6669_v0 = vpop.f32.mrf.mxu0  ;;  %7084 = vmatmul.mubr.f32.gmra.mxu0 %v3528_v44  ;;  %v838_v17 = vpop.f32.mrf.mxu1  ;;  %v2843_v47 = vrot.slane %v7408_v8, 1  ;;  %7154 = vmatprep.subr.mxu1 %v5819_v60  ;;  %v3525_v56 = vsel %vm307_vm0, %v3449_v35, %v3450_v55  ;;  %v5834_v35 = vld [vmem:[%s10173_s2 + $0x450] sm:$0xff]  ;;  %v3453_v8 = vrot.slane %v3405_v14, 7  ;;  %v7411_v14 = vld [vmem:[%s7563_s18 + $0x98] sm:$0xff] }
 0x133   : > { %v8943_v10 = vadd.f32 %v6669_v0, %v1102_v48  ;;  %v1101_v62 = vadd.f32 %v838_v17, %v8637_v12  ;;  %7086 = vmatprep.mubr.f32.mxu0 %v3527_v6  ;;  %7257 = vmatpush3.msra.mxu0 %v5836_v9  ;;  %v3452_v12 = vrot.slane %v8935_v38, 7  ;;  %v2913_v9 = vsel %vm1239_vm1, %v2841_v57, %v2842_v11 }
 0x134   : > { %v1401_v4 = vpop.f32.mrf.mxu0  ;;  %v6568_v44 = vpop.f32.mrf.mxu1  ;;  %6983 = vmatmul.mubr.f32.gmra.mxu1 %v2915_v33  ;;  %7258 = vmatprep.subr.mxu0 %v5835_v2  ;;  %v2844_v48 = vrot.slane %v7409_v34, 1  ;;  %v8962_v33 = vld [vmem:[%s7563_s18 + $0xa0] sm:$0xff]  ;;  %v2912_v0 = vsel %vm1239_vm1, %v2842_v11, %v2843_v47  ;;  %v5817_v11 = vld [vmem:[%s10173_s2 + $0x3c8] sm:$0xff] }
 0x135   : > { %v8955_v6 = vadd.f32 %v1401_v4, %v1101_v62  ;;  %v1104_v32 = vadd.f32 %v6568_v44, %v8650_v28  ;;  %6985 = vmatprep.mubr.f32.mxu1 %v2914_v46  ;;  %7155 = vmatpush3.msra.mxu1 %v5819_v60  ;;  %v7410_v28 = vld [vmem:[%s7563_s18 + $0x90] sm:$0xff]  ;;  %v3524_v46 = vsel %vm307_vm0, %v3450_v55, %v3451_v26  ;;  %v3407_v44 = vld [vmem:[%s7563_s18 + $0xa8] sm:$0xff] }
 0x136   : > { %v6672_v24 = vpop.f32.mrf.mxu0  ;;  %7087 = vmatmul.mubr.f32.gmra.mxu0 %v3526_v18  ;;  %v848_v38 = vpop.f32.mrf.mxu1  ;;  %v2845_v17 = vrot.slane %v7410_v28, 1  ;;  %7156 = vmatprep.subr.mxu1 %v5818_v54  ;;  %v3523_v4 = vsel %vm307_vm0, %v3451_v26, %v3452_v12  ;;  %v5833_v26 = vld [vmem:[%s10173_s2 + $0x448] sm:$0xff]  ;;  %v3455_v28 = vrot.slane %v3407_v44, 7 }
 0x137   : > { %v8970_v57 = vadd.f32 %v6672_v24, %v1104_v32  ;;  %v1103_v60 = vadd.f32 %v848_v38, %v8661_v51  ;;  %7089 = vmatprep.mubr.f32.mxu0 %v3525_v56  ;;  %7259 = vmatpush3.msra.mxu0 %v5835_v2  ;;  %v3454_v51 = vrot.slane %v8962_v33, 7  ;;  %v2911_v2 = vsel %vm1239_vm1, %v2843_v47, %v2844_v48 }
 0x138   : > { %v1411_v62 = vpop.f32.mrf.mxu0  ;;  %v6571_v18 = vpop.f32.mrf.mxu1  ;;  %6986 = vmatmul.mubr.f32.gmra.mxu1 %v2913_v9  ;;  %7260 = vmatprep.subr.mxu0 %v5834_v35  ;;  %v2846_v32 = vrot.slane %v7411_v14, 1  ;;  %v8989_v9 = vld [vmem:[%s7563_s18 + $0xb0] sm:$0xff]  ;;  %v2910_v24 = vsel %vm1239_vm1, %v2844_v48, %v2845_v17 }
 0x139   : > { %v8982_v56 = vadd.f32 %v1411_v62, %v1103_v60  ;;  %v1106_v55 = vadd.f32 %v6571_v18, %v8676_v42  ;;  %6988 = vmatprep.mubr.f32.mxu1 %v2912_v0  ;;  %7157 = vmatpush3.msra.mxu1 %v5818_v54  ;;  %v7412_v42 = vld [vmem:[%s7563_s18 + $0xa0] sm:$0xff]  ;;  %v3522_v54 = vsel %vm307_vm0, %v3452_v12, %v3453_v8 }
 0x13a   : > { %v6675_v34 = vpop.f32.mrf.mxu0  ;;  %7090 = vmatmul.mubr.f32.gmra.mxu0 %v3524_v46  ;;  %v858_v33 = vpop.f32.mrf.mxu1  ;;  %v2847_v38 = vrot.slane %v7412_v42, 1  ;;  %7158 = vmatprep.subr.mxu1 %v5817_v11  ;;  %v5816_v60 = vld [vmem:[%s10173_s2 + $0x3c0] sm:$0xff]  ;;  %v3521_v62 = vsel %vm307_vm0, %v3453_v8, %v3454_v51 }
 0x13b   : > { %v8997_v0 = vadd.f32 %v6675_v34, %v1106_v55  ;;  %v1105_v47 = vadd.f32 %v858_v33, %v8686_v49  ;;  %7092 = vmatprep.mubr.f32.mxu0 %v3523_v4  ;;  %7261 = vmatpush3.msra.mxu0 %v5834_v35  ;;  %v3456_v49 = vrot.slane %v8989_v9, 7  ;;  %v2909_v35 = vsel %vm1239_vm1, %v2845_v17, %v2846_v32  ;;  %v7413_v4 = vld [vmem:[%s7563_s18 + $0xa8] sm:$0xff]  ;;  %v5832_v55 = vld [vmem:[%s10173_s2 + $0x440] sm:$0xff]  ;;  %v7414_v9 = vld [vmem:[%s7563_s18 + $0xb0] sm:$0xff] }
 0x13c   : > { %v1421_v46 = vpop.f32.mrf.mxu0  ;;  %v6574_v48 = vpop.f32.mrf.mxu1  ;;  %6989 = vmatmul.mubr.f32.gmra.mxu1 %v2911_v2  ;;  %7262 = vmatprep.subr.mxu0 %v5833_v26  ;;  %v2848_v44 = vrot.slane %v7413_v4, 1  ;;  %v2908_v14 = vsel %vm1239_vm1, %v2846_v32, %v2847_v38  ;;  %v2849_v34 = vrot.slane %v7414_v9, 1  ;;  %v5815_v33 = vld [vmem:[%s10173_s2 + $0x3b8] sm:$0xff] }
 0x13d   : > { %v9008_v18 = vadd.f32 %v1421_v46, %v1105_v47  ;;  %v1108_v12 = vadd.f32 %v6574_v48, %v8699_v25  ;;  %6991 = vmatprep.mubr.f32.mxu1 %v2910_v24  ;;  %7159 = vmatpush3.msra.mxu1 %v5817_v11  ;;  %v3520_v11 = vsel %vm307_vm0, %v3454_v51, %v3455_v28 }
 0x13e   : > { %v6678_v2 = vpop.f32.mrf.mxu0  ;;  %7093 = vmatmul.mubr.f32.gmra.mxu0 %v3522_v54  ;;  %v868_v8 = vpop.f32.mrf.mxu1  ;;  %7160 = vmatprep.subr.mxu1 %v5816_v60  ;;  %v3519_v32 = vsel %vm307_vm0, %v3455_v28, %v3456_v49  ;;  %v2907_v51 = vsel %vm1239_vm1, %v2847_v38, %v2848_v44  ;;  %v5831_v54 = vld [vmem:[%s10173_s2 + $0x438] sm:$0xff]  ;;  %v2906_v28 = vsel %vm1239_vm1, %v2848_v44, %v2849_v34  ;;  %v7415_v44 = vld [vmem:[%s7563_s18 + $0xc8] sm:$0xff] }
 0x13f   : > { %v9020_v25 = vadd.f32 %v6678_v2, %v1108_v12  ;;  %v1107_v17 = vadd.f32 %v868_v8, %v8710_v30  ;;  %7095 = vmatprep.mubr.f32.mxu0 %v3521_v62  ;;  %7263 = vmatpush3.msra.mxu0 %v5833_v26  ;;  %v2850_v26 = vrot.slane %v8466_v19, 1  ;;  %v2851_v62 = vrot.slane %v8481_v37, 1 }
 0x140   : > { %v1431_v24 = vpop.f32.mrf.mxu0  ;;  %v6577_v42 = vpop.f32.mrf.mxu1  ;;  %6992 = vmatmul.mubr.f32.gmra.mxu1 %v2909_v35  ;;  %7264 = vmatprep.subr.mxu0 %v5832_v55  ;;  %v3518_v19 = vsel %vm307_vm0, %v3456_v49, %v8478_v3  ;;  %v2852_v2 = vrot.slane %v7415_v44, 1  ;;  %v5830_v3 = vld [vmem:[%s10173_s2 + $0x430] sm:$0xff] }
 0x141   : > { %v9030_v47 = vadd.f32 %v1431_v24, %v1107_v17  ;;  %v1110_v30 = vadd.f32 %v6577_v42, %v8719_v21  ;;  %6994 = vmatprep.mubr.f32.mxu1 %v2908_v14  ;;  %7161 = vmatpush3.msra.mxu1 %v5816_v60  ;;  %v5814_v60 = vld [vmem:[%s10173_s2 + $0x3b0] sm:$0xff]  ;;  %v2904_v8 = vsel %vm1239_vm1, %v2850_v26, %v2851_v62  ;;  %v7416_v24 = vld [vmem:[%s7563_s18 + $0xd8] sm:$0xff]  ;;  %v5829_v42 = vld [vmem:[%s10173_s2 + $0x428] sm:$0xff] }
 0x142   : > { %v6681_v46 = vpop.f32.mrf.mxu0  ;;  %7096 = vmatmul.mubr.f32.gmra.mxu0 %v3520_v11  ;;  %v878_v48 = vpop.f32.mrf.mxu1  ;;  %7162 = vmatprep.subr.mxu1 %v5815_v33 }
 0x143   : > { %v9042_v21 = vadd.f32 %v6681_v46, %v1110_v30  ;;  %v1109_v38 = vadd.f32 %v878_v48, %v8730_v52  ;;  %7098 = vmatprep.mubr.f32.mxu0 %v3519_v32  ;;  %7265 = vmatpush3.msra.mxu0 %v5832_v55  ;;  %v2905_v52 = vsel %vm1239_vm1, %v2849_v34, %v2850_v26  ;;  %v5813_v34 = vld [vmem:[%s10173_s2 + $0x3a8] sm:$0xff]  ;;  %v7417_v26 = vld [vmem:[%s7563_s18 + $0xe0] sm:$0xff] }
 0x144   : > { %v1441_v12 = vpop.f32.mrf.mxu0  ;;  %v6580_v35 = vpop.f32.mrf.mxu1  ;;  %6995 = vmatmul.mubr.f32.gmra.mxu1 %v2907_v51  ;;  %7266 = vmatprep.subr.mxu0 %v5831_v54 }
 0x145   : > { %v9051_v37 = vadd.f32 %v1441_v12, %v1109_v38  ;;  %v1112_v4 = vadd.f32 %v6580_v35, %v8742_v1  ;;  %6997 = vmatprep.mubr.f32.mxu1 %v2906_v28  ;;  %7163 = vmatpush3.msra.mxu1 %v5815_v33  ;;  %v2853_v1 = vrot.slane %v8500_v29, 1  ;;  %v5828_v12 = vld [vmem:[%s10173_s2 + $0x420] sm:$0xff] }
 0x146   : > { %v6684_v49 = vpop.f32.mrf.mxu0  ;;  %7099 = vmatmul.mubr.f32.gmra.mxu0 %v3518_v19  ;;  %v888_v55 = vpop.f32.mrf.mxu1  ;;  %7164 = vmatprep.subr.mxu1 %v5814_v60  ;;  %v7418_v19 = vld [vmem:[%s7563_s18 + $0xe8] sm:$0xff] }
 0x147   : > { %v9063_v14 = vadd.f32 %v6684_v49, %v1112_v4  ;;  %v1111_v9 = vadd.f32 %v888_v55, %v8750_v15  ;;  %7101 = vmatprep.mubr.f32.mxu0 %v8511_v36  ;;  %7267 = vmatpush3.msra.mxu0 %v5831_v54  ;;  %v2903_v15 = vsel %vm1239_vm1, %v2851_v62, %v2852_v2  ;;  %v2854_v36 = vrot.slane %v7416_v24, 1  ;;  %v10269_v24 = vld [vmem:[#allocation6_spill] sm:$0xff] }
 0x148   : > { %v1451_v17 = vpop.f32.mrf.mxu0  ;;  %v6583_v11 = vpop.f32.mrf.mxu1  ;;  %6998 = vmatmul.mubr.f32.gmra.mxu1 %v2905_v52  ;;  %7268 = vmatprep.subr.mxu0 %v5830_v3  ;;  %v2902_v51 = vsel %vm1239_vm1, %v2852_v2, %v2853_v1  ;;  %v7419_v52 = vld [vmem:[%s7563_s18 + $0xf0] sm:$0xff] }
 0x149   : > { %v9070_v33 = vadd.f32 %v1451_v17, %v1111_v9  ;;  %v1114_v29 = vadd.f32 %v6583_v11, %v8764_v41  ;;  %7000 = vmatprep.mubr.f32.mxu1 %v2904_v8  ;;  %7165 = vmatpush3.msra.mxu1 %v5814_v60  ;;  %v2855_v41 = vrot.slane %v7417_v26, 1  ;;  %v9097_v60 = vld [vmem:[%s7563_s18 + $0x100] sm:$0xff]  ;;  %v2857_v44 = vrot.slane %v7419_v52, 1  ;;  %v9122_v11 = vld [vmem:[%s7563_s18 + $0x110] sm:$0xff] }
 0x14a   : > { %v6687_v32 = vpop.f32.mrf.mxu0  ;;  %7102 = vmatmul.mubr.f32.gmra.mxu0 %v8520_v45  ;;  %v898_v30 = vpop.f32.mrf.mxu1  ;;  %7166 = vmatprep.subr.mxu1 %v5813_v34  ;;  %v5812_v45 = vld [vmem:[%s10173_s2 + $0x3a0] sm:$0xff]  ;;  %v3466_v8 = vrot.slane %v9097_v60, 7  ;;  %v10270_v26 = vld [vmem:[#allocation9_spill] sm:$0xff] }
 0x14b   : > { %v9083_v54 = vadd.f32 %v6687_v32, %v1114_v29  ;;  %v1113_v46 = vadd.f32 %v898_v30, %v8776_v7  ;;  %7104 = vmatprep.mubr.f32.mxu0 %v8532_v43  ;;  %7269 = vmatpush3.msra.mxu0 %v5830_v3  ;;  %v2901_v7 = vsel %vm1239_vm1, %v2853_v1, %v2854_v36  ;;  %v2856_v43 = vrot.slane %v7418_v19, 1  ;;  %v3419_v1 = vld [vmem:[%s7563_s18 + $0x108] sm:$0xff]  ;;  %v5827_v29 = vld [vmem:[%s10173_s2 + $0x418] sm:$0xff]  ;;  %v5826_v52 = vld [vmem:[%s10173_s2 + $0x410] sm:$0xff] }
 0x14c   : > { %v1461_v48 = vpop.f32.mrf.mxu0  ;;  %v6586_v28 = vpop.f32.mrf.mxu1  ;;  %7001 = vmatmul.mubr.f32.gmra.mxu1 %v2903_v15  ;;  %7270 = vmatprep.subr.mxu0 %v5829_v42 }
 0x14d   : > { %v9090_v62 = vadd.f32 %v1461_v48, %v1113_v46  ;;  %v1116_v38 = vadd.f32 %v6586_v28, %v8787_v61  ;;  %7003 = vmatprep.mubr.f32.mxu1 %v2902_v51  ;;  %7167 = vmatpush3.msra.mxu1 %v5813_v34  ;;  %v2900_v61 = vsel %vm1239_vm1, %v2854_v36, %v2855_v41  ;;  %v7420_v34 = vld [vmem:[%s7563_s18 + $0xf8] sm:$0xff]  ;;  %v5810_v46 = vld [vmem:[%s10173_s2 + $0x390] sm:$0xff]  ;;  %v10271_v28 = vld [vmem:[#allocation7_spill] sm:$0xff] }
 0x14e   : > { %v6690_v35 = vpop.f32.mrf.mxu0  ;;  %7105 = vmatmul.mubr.f32.gmra.mxu0 %v8542_v50  ;;  %v908_v4 = vpop.f32.mrf.mxu1  ;;  %7168 = vmatprep.subr.mxu1 %v5812_v45  ;;  %v5811_v50 = vld [vmem:[%s10173_s2 + $0x398] sm:$0xff]  ;;  %v2858_v17 = vrot.slane %v7420_v34, 1  ;;  %v10274_v34 = vld [vmem:[#allocation4_spill] sm:$0xff] }
 0x14f   : > { %v9106_v2 = vadd.f32 %v6690_v35, %v1116_v38  ;;  %v1115_v3 = vadd.f32 %v908_v4, %v8801_v5  ;;  %7107 = vmatprep.mubr.f32.mxu0 %v8559_v59  ;;  %7271 = vmatpush3.msra.mxu0 %v5829_v42  ;;  %v2899_v59 = vsel %vm1239_vm1, %v2855_v41, %v2856_v43  ;;  %v7421_v42 = vld [vmem:[%s7563_s18 + $0x100] sm:$0xff]  ;;  %v3467_v41 = vrot.slane %v3419_v1, 7  ;;  %v7422_v35 = vld [vmem:[%s7563_s18 + $0x108] sm:$0xff] }
 0x150   : > { %v1471_v49 = vpop.f32.mrf.mxu0  ;;  %v6589_v55 = vpop.f32.mrf.mxu1  ;;  %7004 = vmatmul.mubr.f32.gmra.mxu1 %v2901_v7  ;;  %7272 = vmatprep.subr.mxu0 %v5828_v12  ;;  %v2859_v32 = vrot.slane %v7421_v42, 1  ;;  %v3509_v38 = vsel %vm307_vm0, %v10271_v28, %v3466_v8  ;;  %v3468_v7 = vrot.slane %v9122_v11, 7  ;;  %v2860_v4 = vrot.slane %v7422_v35, 1 }
 0x151   : > { %v9115_v9 = vadd.f32 %v1471_v49, %v1115_v3  ;;  %v1118_v5 = vadd.f32 %v6589_v55, %v8819_v13  ;;  %7006 = vmatprep.mubr.f32.mxu1 %v2900_v61  ;;  %7169 = vmatpush3.msra.mxu1 %v5812_v45  ;;  %v2898_v13 = vsel %vm1239_vm1, %v2856_v43, %v2857_v44  ;;  %v10272_v43 = vld [vmem:[#allocation3_spill] sm:$0xff]  ;;  %v10273_v49 = vld [vmem:[#allocation10_spill] sm:$0xff] }
 0x152   : > { %v6693_v15 = vpop.f32.mrf.mxu0  ;;  %7108 = vmatmul.mubr.f32.gmra.mxu0 %v10269_v24  ;;  %v918_v36 = vpop.f32.mrf.mxu1  ;;  %7170 = vmatprep.subr.mxu1 %v5811_v50  ;;  %v9150_v61 = vld [vmem:[%s7563_s18 + $0x120] sm:$0xff]  ;;  %v2896_v1 = vsel %vm1239_vm1, %v2858_v17, %v2859_v32 }
 0x153   : > { %v9131_v30 = vadd.f32 %v6693_v15, %v1118_v5  ;;  %v1117_v51 = vadd.f32 %v918_v36, %v8836_v27  ;;  %7110 = vmatprep.mubr.f32.mxu0 %v10270_v26  ;;  %7273 = vmatpush3.msra.mxu0 %v5828_v12  ;;  %v3421_v27 = vld [vmem:[%s7563_s18 + $0x118] sm:$0xff]  ;;  %v2897_v12 = vsel %vm1239_vm1, %v2857_v44, %v2858_v17  ;;  %v7423_v5 = vld [vmem:[%s7563_s18 + $0x110] sm:$0xff]  ;;  %v5809_v17 = vld [vmem:[%s10173_s2 + $0x388] sm:$0xff]  ;;  %v3470_v42 = vrot.slane %v9150_v61, 7 }
 0x154   : > { %v1481_v45 = vpop.f32.mrf.mxu0  ;;  %v6592_v48 = vpop.f32.mrf.mxu1  ;;  %7007 = vmatmul.mubr.f32.gmra.mxu1 %v2899_v59  ;;  %7274 = vmatprep.subr.mxu0 %v5827_v29  ;;  %v2861_v59 = vrot.slane %v7423_v5, 1  ;;  %v3469_v15 = vrot.slane %v3421_v27, 7  ;;  %v10276_v61 = vld [vmem:[#allocation8_spill] sm:$0xff] }
 0x155   : > { %v9143_v19 = vadd.f32 %v1481_v45, %v1117_v51  ;;  %v1120_v60 = vadd.f32 %v6592_v48, %v10272_v43  ;;  %7009 = vmatprep.mubr.f32.mxu1 %v2898_v13  ;;  %7171 = vmatpush3.msra.mxu1 %v5811_v50  ;;  %v3508_v50 = vsel %vm307_vm0, %v3466_v8, %v3467_v41  ;;  %v3423_v51 = vld [vmem:[%s7563_s18 + $0x128] sm:$0xff]  ;;  %v10275_v8 = vld [vmem:[#allocation5_spill] sm:$0xff]  ;;  %v7424_v48 = vld [vmem:[%s7563_s18 + $0x118] sm:$0xff] }
 0x156   : > { %v6696_v3 = vpop.f32.mrf.mxu0  ;;  %7111 = vmatmul.mubr.f32.gmra.mxu0 %v10273_v49  ;;  %v928_v55 = vpop.f32.mrf.mxu1  ;;  %7172 = vmatprep.subr.mxu1 %v5810_v46  ;;  %v3507_v13 = vsel %vm307_vm0, %v3467_v41, %v3468_v7  ;;  %v2862_v28 = vrot.slane %v7424_v48, 1  ;;  %v5825_v41 = vld [vmem:[%s10173_s2 + $0x408] sm:$0xff]  ;;  %v3471_v49 = vrot.slane %v3423_v51, 7  ;;  %v3505_v5 = vsel %vm307_vm0, %v3469_v15, %v3470_v42  ;;  %v9207_v51 = vld [vmem:[%s7563_s18 + $0x140] sm:$0xff]  ;;  %v7427_v48 = vld [vmem:[%s7563_s18 + $0x130] sm:$0xff] }
 0x157   : > { %v9159_v44 = vadd.f32 %v6696_v3, %v1120_v60  ;;  %v1119_v11 = vadd.f32 %v928_v55, %v10274_v34  ;;  %7113 = vmatprep.mubr.f32.mxu0 %v3509_v38  ;;  %7275 = vmatpush3.msra.mxu0 %v5827_v29  ;;  %v2895_v29 = vsel %vm1239_vm1, %v2859_v32, %v2860_v4  ;;  %v9178_v38 = vld [vmem:[%s7563_s18 + $0x130] sm:$0xff] }
 0x158   : > { %v1491_v24 = vpop.f32.mrf.mxu0  ;;  %v6595_v36 = vpop.f32.mrf.mxu1  ;;  %7010 = vmatmul.mubr.f32.gmra.mxu1 %v2897_v12  ;;  %7276 = vmatprep.subr.mxu0 %v5826_v52  ;;  %v2894_v60 = vsel %vm1239_vm1, %v2860_v4, %v2861_v59  ;;  %v7425_v12 = vld [vmem:[%s7563_s18 + $0x120] sm:$0xff]  ;;  %v3472_v34 = vrot.slane %v9178_v38, 7  ;;  %v2865_v38 = vrot.slane %v7427_v48, 1 }
 0x159   : > { %v9171_v26 = vadd.f32 %v1491_v24, %v1119_v11  ;;  %v1122_v45 = vadd.f32 %v6595_v36, %v10275_v8  ;;  %7012 = vmatprep.mubr.f32.mxu1 %v2896_v1  ;;  %7173 = vmatpush3.msra.mxu1 %v5810_v46  ;;  %v2863_v35 = vrot.slane %v7425_v12, 1  ;;  %v3506_v46 = vsel %vm307_vm0, %v3468_v7, %v3469_v15  ;;  %v5808_v4 = vld [vmem:[%s10173_s2 + $0x380] sm:$0xff]  ;;  %v9198_v11 = vld [vmem:[%s7563_s18 + $0x138] sm:$0xff]  ;;  %v7426_v36 = vld [vmem:[%s7563_s18 + $0x128] sm:$0xff] }
 0x15a   : > { %v6699_v27 = vpop.f32.mrf.mxu0  ;;  %7114 = vmatmul.mubr.f32.gmra.mxu0 %v3508_v50  ;;  %v938_v43 = vpop.f32.mrf.mxu1  ;;  %7174 = vmatprep.subr.mxu1 %v5809_v17  ;;  %v10277_v50 = vld [vmem:[#allocation11_spill] sm:$0xff]  ;;  %v2893_v24 = vsel %vm1239_vm1, %v2861_v59, %v2862_v28 }
 0x15b   : > { %v9186_v32 = vadd.f32 %v6699_v27, %v1122_v45  ;;  %v1121_v3 = vadd.f32 %v938_v43, %v10276_v61  ;;  %7116 = vmatprep.mubr.f32.mxu0 %v3507_v13  ;;  %7277 = vmatpush3.msra.mxu0 %v5826_v52  ;;  %v2864_v13 = vrot.slane %v7426_v36, 1  ;;  %v5824_v15 = vld [vmem:[%s10173_s2 + $0x400] sm:$0xff]  ;;  %v10278_v27 = vld [vmem:[#allocation12_spill] sm:$0xff] }
 0x15c   : > { %v1501_v55 = vpop.f32.mrf.mxu0  ;;  %v6598_v1 = vpop.f32.mrf.mxu1  ;;  %7013 = vmatmul.mubr.f32.gmra.mxu1 %v2895_v29  ;;  %7278 = vmatprep.subr.mxu0 %v5825_v41  ;;  %v2892_v29 = vsel %vm1239_vm1, %v2862_v28, %v2863_v35  ;;  %v5094_v28 = vld [vmem:[%s10172_s1 + $0x80] sm:$0xff] }
 0x15d   : > { %v9200_v7 = vadd.f32 %v1501_v55, %v1121_v3  ;;  %v1124_v52 = vadd.f32 %v6598_v1, %v10277_v50  ;;  %7015 = vmatprep.mubr.f32.mxu1 %v2894_v60  ;;  %7175 = vmatpush3.msra.mxu1 %v5809_v17  ;;  %v3504_v17 = vsel %vm307_vm0, %v3470_v42, %v3471_v49  ;;  %v3473_v60 = vrot.slane %v9198_v11, 7  ;;  %v9228_v55 = vld [vmem:[%s7563_s18 + $0x148] sm:$0xff]  ;;  %v10279_v1 = vld [vmem:[#allocation13_spill] sm:$0xff]  ;;  %v7428_v50 = vld [vmem:[%s7563_s18 + $0x138] sm:$0xff] }
 0x15e   : > { %v6702_v8 = vpop.f32.mrf.mxu0  ;;  %7117 = vmatmul.mubr.f32.gmra.mxu0 %v3506_v46  ;;  %v948_v45 = vpop.f32.mrf.mxu1  ;;  %7176 = vmatprep.subr.mxu1 %v5808_v4  ;;  %v3503_v3 = vsel %vm307_vm0, %v3471_v49, %v3472_v34  ;;  %v3474_v46 = vrot.slane %v9207_v51, 7  ;;  %v5095_v49 = vld [vmem:[%s10172_s1 + $0x88] sm:$0xff] }
 0x15f   : > { %v9215_v59 = vadd.f32 %v6702_v8, %v1124_v52  ;;  %v1123_v43 = vadd.f32 %v948_v45, %v10278_v27  ;;  %7119 = vmatprep.mubr.f32.mxu0 %v3505_v5  ;;  %7279 = vmatpush3.msra.mxu0 %v5825_v41  ;;  %v2891_v5 = vsel %vm1239_vm1, %v2863_v35, %v2864_v13  ;;  %v2866_v52 = vrot.slane %v7428_v50, 1  ;;  %v10281_v27 = vld [vmem:[#allocation15_spill] sm:$0xff] }
 0x160   : > { %v1511_v12 = vpop.f32.mrf.mxu0  ;;  %v6601_v61 = vpop.f32.mrf.mxu1  ;;  %7016 = vmatmul.mubr.f32.gmra.mxu1 %v2893_v24  ;;  %7280 = vmatprep.subr.mxu0 %v5824_v15  ;;  %v9237_v24 = vld [vmem:[%s7563_s18 + $0x150] sm:$0xff]  ;;  %v2890_v45 = vsel %vm1239_vm1, %v2864_v13, %v2865_v38 }
 0x161   : > { %v9230_v42 = vadd.f32 %v1511_v12, %v1123_v43  ;;  %v1126_v41 = vadd.f32 %v6601_v61, %v10279_v1  ;;  %7018 = vmatprep.mubr.f32.mxu1 %v2892_v29  ;;  %10280 = vst [vmem:[#allocation6_spill] sm:$0xff] %v9237_v24  ;;  %7177 = vmatpush3.msra.mxu1 %v5808_v4  ;;  %v7429_v29 = vld [vmem:[%s7563_s18 + $0x140] sm:$0xff]  ;;  %v3475_v12 = vrot.slane %v9228_v55, 7  ;;  %v5096_v13 = vld [vmem:[%s10172_s1 + $0x90] sm:$0xff]  ;;  %v9258_v1 = vld [vmem:[%s7563_s18 + $0x158] sm:$0xff] }
 0x162   : > { %v6705_v36 = vpop.f32.mrf.mxu0  ;;  %7120 = vmatmul.mubr.f32.gmra.mxu0 %v3504_v17  ;;  %v958_v8 = vpop.f32.mrf.mxu1  ;;  %v2867_v48 = vrot.slane %v7429_v29, 1  ;;  %5208 = vperm.xlu0 %7397, %v5094_v28   ;;  %v3502_v4 = vsel %vm307_vm0, %v3472_v34, %v3473_v60  ;;  %v3501_v28 = vsel %vm307_vm0, %v3473_v60, %v3474_v46  ;;  %10282 = vst [vmem:[#allocation9_spill] sm:$0xff] %v9258_v1  ;;  %v5097_v60 = vld [vmem:[%s10172_s1 + $0x98] sm:$0xff] }
 0x163   : > { %v9245_v35 = vadd.f32 %v6705_v36, %v1126_v41  ;;  %v1125_v43 = vadd.f32 %v958_v8, %v10281_v27  ;;  %7122 = vmatprep.mubr.f32.mxu0 %v3503_v3  ;;  %7281 = vmatpush3.msra.mxu0 %v5824_v15  ;;  %v3476_v3 = vrot.slane %v9237_v24, 7  ;;  %v10284_v41 = vld [vmem:[#allocation16_spill] sm:$0xff]  ;;  %v2889_v50 = vsel %vm1239_vm1, %v2865_v38, %v2866_v52  ;;  %v10287_v38 = vld [vmem:[#allocation17_spill] sm:$0xff] }
 0x164   : > { %v1521_v17 = vpop.f32.mrf.mxu0  ;;  %v6604_v61 = vpop.f32.mrf.mxu1  ;;  %7019 = vmatmul.mubr.f32.gmra.mxu1 %v2891_v5  ;;  %5213 = vperm.xlu1 %7398, %v5095_v49   ;;  %v7430_v36 = vld [vmem:[%s7563_s18 + $0x148] sm:$0xff]  ;;  %v9267_v5 = vld [vmem:[%s7563_s18 + $0x160] sm:$0xff]  ;;  %v2888_v49 = vsel %vm1239_vm1, %v2866_v52, %v2867_v48 }
 0x165   : > { %v9260_v34 = vadd.f32 %v1521_v17, %v1125_v43  ;;  %v1128_v15 = vadd.f32 %v6604_v61, %v10284_v41  ;;  %7021 = vmatprep.mubr.f32.mxu1 %v2890_v45  ;;  %v2868_v8 = vrot.slane %v7430_v36, 1  ;;  %10285 = vst [vmem:[#allocation3_spill] sm:$0xff] %v9267_v5  ;;  %v7431_v43 = vld [vmem:[%s7563_s18 + $0x150] sm:$0xff]  ;;  %v3500_v41 = vsel %vm307_vm0, %v3474_v46, %v3475_v12  ;;  %v5098_v36 = vld [vmem:[%s10172_s1 + $0xa0] sm:$0xff] }
 0x166   : > { %v6708_v29 = vpop.f32.mrf.mxu0  ;;  %7123 = vmatmul.mubr.f32.gmra.mxu0 %v3502_v4  ;;  %v968_v27 = vpop.f32.mrf.mxu1  ;;  %v2869_v45 = vrot.slane %v7431_v43, 1  ;;  %5218 = vperm.xlu0 %7397, %v5096_v13   ;;  %v3477_v4 = vrot.slane %v9258_v1, 7  ;;  %v3499_v13 = vsel %vm307_vm0, %v3475_v12, %v3476_v3  ;;  %v5099_v12 = vld [vmem:[%s10172_s1 + $0xa8] sm:$0xff] }
 0x167   : > { %10283 = vst [vmem:[#allocation7_spill] sm:$0xff] %v9260_v34  ;;  %v9275_v17 = vadd.f32 %v6708_v29, %v1128_v15  ;;  %v1127_v61 = vadd.f32 %v968_v27, %v10287_v38  ;;  %7125 = vmatprep.mubr.f32.mxu0 %v3501_v28  ;;  %v3478_v15 = vrot.slane %v9267_v5, 7  ;;  %v9288_v28 = vld [vmem:[%s7563_s18 + $0x168] sm:$0xff]  ;;  %v10290_v29 = vld [vmem:[#allocation18_spill] sm:$0xff]  ;;  %v2887_v43 = vsel %vm1239_vm1, %v2867_v48, %v2868_v8  ;;  %v10293_v48 = vld [vmem:[#allocation19_spill] sm:$0xff] }
 0x168   : > { %v1531_v52 = vpop.f32.mrf.mxu0  ;;  %v6607_v24 = vpop.f32.mrf.mxu1  ;;  %7022 = vmatmul.mubr.f32.gmra.mxu1 %v2889_v50  ;;  %10288 = vst [vmem:[#allocation4_spill] sm:$0xff] %v9288_v28  ;;  %5223 = vperm.xlu1 %7398, %v5097_v60   ;;  %v7432_v38 = vld [vmem:[%s7563_s18 + $0x158] sm:$0xff]  ;;  %v9297_v50 = vld [vmem:[%s7563_s18 + $0x170] sm:$0xff]  ;;  %v2886_v60 = vsel %vm1239_vm1, %v2868_v8, %v2869_v45 }
 0x169   : > { %10286 = vst [vmem:[#allocation10_spill] sm:$0xff] %v9275_v17  ;;  %v9290_v46 = vadd.f32 %v1531_v52, %v1127_v61  ;;  %v1130_v27 = vadd.f32 %v6607_v24, %v10290_v29  ;;  %7024 = vmatprep.mubr.f32.mxu1 %v2888_v49  ;;  %v2870_v17 = vrot.slane %v7432_v38, 1  ;;  %10291 = vst [vmem:[#allocation8_spill] sm:$0xff] %v9297_v50  ;;  %v7433_v24 = vld [vmem:[%s7563_s18 + $0x160] sm:$0xff]  ;;  %v5100_v38 = vld [vmem:[%s10172_s1 + $0xb0] sm:$0xff] }
 0x16a   : > { %v6711_v5 = vpop.f32.mrf.mxu0  ;;  %7126 = vmatmul.mubr.f32.gmra.mxu0 %v3500_v41  ;;  %v978_v1 = vpop.f32.mrf.mxu1  ;;  %v2871_v49 = vrot.slane %v7433_v24, 1  ;;  %5228 = vperm.xlu0 %7397, %v5098_v36   ;;  %v3498_v29 = vsel %vm307_vm0, %v3476_v3, %v3477_v4  ;;  %v3479_v41 = vrot.slane %v9288_v28, 7  ;;  %v9318_v36 = vld [vmem:[%s7563_s18 + $0x178] sm:$0xff] }
 0x16b   : > { %10289 = vst [vmem:[#allocation5_spill] sm:$0xff] %v9290_v46  ;;  %v9305_v61 = vadd.f32 %v6711_v5, %v1130_v27  ;;  %v1129_v52 = vadd.f32 %v978_v1, %v10293_v48  ;;  %7128 = vmatprep.mubr.f32.mxu0 %v3499_v13  ;;  %v3497_v5 = vsel %vm307_vm0, %v3477_v4, %v3478_v15  ;;  %v3480_v1 = vrot.slane %v9297_v50, 7  ;;  %v10296_v13 = vld [vmem:[#allocation20_spill] sm:$0xff]  ;;  %v5101_v4 = vld [vmem:[%s10172_s1 + $0xb8] sm:$0xff] }
 0x16c   : > { %v1541_v8 = vpop.f32.mrf.mxu0  ;;  %v6610_v46 = vpop.f32.mrf.mxu1  ;;  %7025 = vmatmul.mubr.f32.gmra.mxu1 %v2887_v43  ;;  %10294 = vst [vmem:[#allocation12_spill] sm:$0xff] %v9318_v36  ;;  %5233 = vperm.xlu1 %7398, %v5099_v12   ;;  %v2885_v24 = vsel %vm1239_vm1, %v2869_v45, %v2870_v17  ;;  %v7434_v48 = vld [vmem:[%s7563_s18 + $0x168] sm:$0xff]  ;;  %v9327_v43 = vld [vmem:[%s7563_s18 + $0x180] sm:$0xff]  ;;  %v2884_v12 = vsel %vm1239_vm1, %v2870_v17, %v2871_v49  ;;  %v10299_v45 = vld [vmem:[#allocation21_spill] sm:$0xff] }
 0x16d   : > { %10292 = vst [vmem:[#allocation11_spill] sm:$0xff] %v9305_v61  ;;  %v9320_v3 = vadd.f32 %v1541_v8, %v1129_v52  ;;  %v1132_v27 = vadd.f32 %v6610_v46, %v10296_v13  ;;  %7027 = vmatprep.mubr.f32.mxu1 %v2886_v60  ;;  %v2872_v61 = vrot.slane %v7434_v48, 1  ;;  %10297 = vst [vmem:[#allocation15_spill] sm:$0xff] %v9327_v43  ;;  %v7435_v46 = vld [vmem:[%s7563_s18 + $0x170] sm:$0xff]  ;;  %v5102_v48 = vld [vmem:[%s10172_s1 + $0xc0] sm:$0xff] }
 0x16e   : > { %v6714_v50 = vpop.f32.mrf.mxu0  ;;  %7129 = vmatmul.mubr.f32.gmra.mxu0 %v3498_v29  ;;  %v988_v28 = vpop.f32.mrf.mxu1  ;;  %v2873_v60 = vrot.slane %v7435_v46, 1  ;;  %5238 = vperm.xlu0 %7397, %v5100_v38   ;;  %v3496_v13 = vsel %vm307_vm0, %v3478_v15, %v3479_v41  ;;  %v3481_v29 = vrot.slane %v9318_v36, 7  ;;  %v9348_v38 = vld [vmem:[%s7563_s18 + $0x188] sm:$0xff] }
 0x16f   : > { %10295 = vst [vmem:[#allocation13_spill] sm:$0xff] %v9320_v3  ;;  %v9335_v52 = vadd.f32 %v6714_v50, %v1132_v27  ;;  %v1131_v8 = vadd.f32 %v988_v28, %v10299_v45  ;;  %7131 = vmatprep.mubr.f32.mxu0 %v3497_v5  ;;  %v3495_v50 = vsel %vm307_vm0, %v3479_v41, %v3480_v1  ;;  %v3482_v28 = vrot.slane %v9327_v43, 7  ;;  %v10302_v5 = vld [vmem:[#allocation22_spill] sm:$0xff]  ;;  %v5103_v41 = vld [vmem:[%s10172_s1 + $0xc8] sm:$0xff] }
 0x170   : > { %v1551_v17 = vpop.f32.mrf.mxu0  ;;  %v6613_v3 = vpop.f32.mrf.mxu1  ;;  %7028 = vmatmul.mubr.f32.gmra.mxu1 %v2885_v24  ;;  %10300 = vst [vmem:[#allocation17_spill] sm:$0xff] %v9348_v38  ;;  %5243 = vperm.xlu1 %7398, %v5101_v4   ;;  %v2883_v46 = vsel %vm1239_vm1, %v2871_v49, %v2872_v61  ;;  %v7436_v45 = vld [vmem:[%s7563_s18 + $0x178] sm:$0xff]  ;;  %v9357_v24 = vld [vmem:[%s7563_s18 + $0x190] sm:$0xff]  ;;  %v2882_v4 = vsel %vm1239_vm1, %v2872_v61, %v2873_v60  ;;  %v10305_v49 = vld [vmem:[#allocation23_spill] sm:$0xff] }
 0x171   : > { %10298 = vst [vmem:[#allocation16_spill] sm:$0xff] %v9335_v52  ;;  %v9350_v15 = vadd.f32 %v1551_v17, %v1131_v8  ;;  %v1134_v27 = vadd.f32 %v6613_v3, %v10302_v5  ;;  %7030 = vmatprep.mubr.f32.mxu1 %v2884_v12  ;;  %v2874_v52 = vrot.slane %v7436_v45, 1  ;;  %10303 = vst [vmem:[#allocation19_spill] sm:$0xff] %v9357_v24  ;;  %v7437_v3 = vld [vmem:[%s7563_s18 + $0x180] sm:$0xff]  ;;  %v5104_v45 = vld [vmem:[%s10172_s1 + $0xd0] sm:$0xff] }
 0x172   : > { %v6717_v43 = vpop.f32.mrf.mxu0  ;;  %7132 = vmatmul.mubr.f32.gmra.mxu0 %v3496_v13  ;;  %v998_v36 = vpop.f32.mrf.mxu1  ;;  %v2875_v12 = vrot.slane %v7437_v3, 1  ;;  %5248 = vperm.xlu0 %7397, %v5102_v48   ;;  %v3494_v5 = vsel %vm307_vm0, %v3480_v1, %v3481_v29  ;;  %v3483_v13 = vrot.slane %v9348_v38, 7  ;;  %v9378_v48 = vld [vmem:[%s7563_s18 + $0x198] sm:$0xff] }
 0x173   : > { %10301 = vst [vmem:[#allocation18_spill] sm:$0xff] %v9350_v15  ;;  %v9365_v8 = vadd.f32 %v6717_v43, %v1134_v27  ;;  %v1133_v17 = vadd.f32 %v998_v36, %v10305_v49  ;;  %7134 = vmatprep.mubr.f32.mxu0 %v3495_v50  ;;  %v3493_v43 = vsel %vm307_vm0, %v3481_v29, %v3482_v28  ;;  %v3484_v36 = vrot.slane %v9357_v24, 7  ;;  %v10307_v50 = vld [vmem:[#allocation24_spill] sm:$0xff]  ;;  %v5105_v29 = vld [vmem:[%s10172_s1 + $0xd8] sm:$0xff] }
 0x174   : > { %v1561_v61 = vpop.f32.mrf.mxu0  ;;  %v6616_v15 = vpop.f32.mrf.mxu1  ;;  %7031 = vmatmul.mubr.f32.gmra.mxu1 %v2883_v46  ;;  %5253 = vperm.xlu1 %7398, %v5103_v41   ;;  %v2881_v3 = vsel %vm1239_vm1, %v2873_v60, %v2874_v52  ;;  %v7438_v49 = vld [vmem:[%s7563_s18 + $0x188] sm:$0xff]  ;;  %v9387_v46 = vld [vmem:[%s7563_s18 + $0x1a0] sm:$0xff]  ;;  %v2880_v41 = vsel %vm1239_vm1, %v2874_v52, %v2875_v12  ;;  %v10308_v60 = vld [vmem:[#allocation25_spill] sm:$0xff] }
 0x175   : > { %10304 = vst [vmem:[#allocation20_spill] sm:$0xff] %v9365_v8  ;;  %v9380_v1 = vadd.f32 %v1561_v61, %v1133_v17  ;;  %v1136_v27 = vadd.f32 %v6616_v15, %v10307_v50  ;;  %7033 = vmatprep.mubr.f32.mxu1 %v2882_v4  ;;  %v2876_v8 = vrot.slane %v7438_v49, 1  ;;  %v7439_v17 = vld [vmem:[%s7563_s18 + $0x190] sm:$0xff]  ;;  %v3492_v50 = vsel %vm307_vm0, %v3482_v28, %v3483_v13 }
 0x176   : > { %v6720_v24 = vpop.f32.mrf.mxu0  ;;  %7135 = vmatmul.mubr.f32.gmra.mxu0 %v3494_v5  ;;  %v1008_v38 = vpop.f32.mrf.mxu1  ;;  %v2877_v15 = vrot.slane %v7439_v17, 1  ;;  %5258 = vperm.xlu0 %7397, %v5104_v45   ;;  %v3485_v49 = vrot.slane %v9378_v48, 7  ;;  %v5106_v5 = vld [vmem:[%s10172_s1 + $0xe0] sm:$0xff]  ;;  %v3491_v52 = vsel %vm307_vm0, %v3483_v13, %v3484_v36  ;;  %v10309_v45 = vld [vmem:[#allocation26_spill] sm:$0xff]  ;;  %v5108_v17 = vld [vmem:[%s10172_s1 + $0xf0] sm:$0xff] }
 0x177   : > { %10306 = vst [vmem:[#allocation21_spill] sm:$0xff] %v9380_v1  ;;  %v9395_v4 = vadd.f32 %v6720_v24, %v1136_v27  ;;  %v1135_v61 = vadd.f32 %v1008_v38, %v10308_v60  ;;  %7137 = vmatprep.mubr.f32.mxu0 %v3493_v43  ;;  %v3486_v24 = vrot.slane %v9387_v46, 7  ;;  %v2879_v28 = vsel %vm1239_vm1, %v2875_v12, %v2876_v8  ;;  %v5107_v27 = vld [vmem:[%s10172_s1 + $0xe8] sm:$0xff] }
 0x178   : > { %v1571_v1 = vpop.f32.mrf.mxu0  ;;  %v6619_v34 = vpop.f32.mrf.mxu1  ;;  %7034 = vmatmul.mubr.f32.gmra.mxu1 %v2881_v3  ;;  %5263 = vperm.xlu1 %7398, %v5105_v29   ;;  %v2878_v29 = vsel %vm1239_vm1, %v2876_v8, %v2877_v15  ;;  %v3490_v12 = vsel %vm307_vm0, %v3484_v36, %v3485_v49 }
 0x179   : > { %v9407_v38 = vadd.f32 %v1571_v1, %v1135_v61  ;;  %v1138_v43 = vadd.f32 %v6619_v34, %v10309_v45  ;;  %7036 = vmatprep.mubr.f32.mxu1 %v2880_v41  ;;  %v10310_v34 = vld [vmem:[#allocation27_spill] sm:$0xff]  ;;  %v3489_v8 = vsel %vm307_vm0, %v3485_v49, %v3486_v24  ;;  %v7441_v45 = vld [vmem:[%s7563_s18 + $0x38] sm:$0xff] }
 0x17a   : > { %v6723_v3 = vpop.f32.mrf.mxu0  ;;  %7138 = vmatmul.mubr.f32.gmra.mxu0 %v3492_v50  ;;  %v1018_v13 = vpop.f32.mrf.mxu1  ;;  %5268 = vperm.xlu0 %7397, %v5106_v5   ;;  %v9428_v50 = vld [vmem:[%s7563_s18 + $0x30] sm:$0xff]  ;;  %v5109_v49 = vld [vmem:[%s10172_s1 + $0xf8] sm:$0xff] }
 0x17b   : > { %v9417_v1 = vadd.f32 %v6723_v3, %v1138_v43  ;;  %v1137_v41 = vadd.f32 %v1018_v13, %v10310_v34  ;;  %7140 = vmatprep.mubr.f32.mxu0 %v3491_v52  ;;  %10311 = vst [vmem:[#allocation22_spill] sm:$0xff] %v9428_v50  ;;  %v4469_v52 = vrot.slane %v7441_v45, 1  ;;  %v10312_v3 = vld [vmem:[#allocation14_spill] sm:$0xff] }
 0x17c   : > { %v1581_v60 = vpop.f32.mrf.mxu0  ;;  %v6622_v61 = vpop.f32.mrf.mxu1  ;;  %7037 = vmatmul.mubr.f32.gmra.mxu1 %v2879_v28  ;;  %5273 = vperm.xlu1 %7398, %v5107_v27   ;;  %v10313_v13 = vrot.slane %v10312_v3, 1  ;;  %v7442_v27 = vld [vmem:[%s7563_s18 + $0x40] sm:$0xff] }
 0x17d   : > { %v9432_v43 = vadd.f32 %v1581_v60, %v1137_v41  ;;  %v1140_v36 = vadd.f32 %v6622_v61, %v8782_v23  ;;  %7039 = vmatprep.mubr.f32.mxu1 %v2878_v29  ;;  %v4470_v41 = vrot.slane %v7442_v27, 1  ;;  %v10315_v23 = vld [vmem:[#allocation28_spill] sm:$0xff]  ;;  %v10316_v61 = vrot.slane %v8771_v58, 7  ;;  %v5110_v3 = vld [vmem:[%s10172_s1 + $0x100] sm:$0xff] }
 0x17e   : > { %v2925_v28 = vsel %vm1239_vm1, %v2877_v15, %v10313_v13  ;;  %v6726_v34 = vpop.f32.mrf.mxu0  ;;  %7141 = vmatmul.mubr.f32.gmra.mxu0 %v3490_v12  ;;  %v1028_v5 = vpop.f32.mrf.mxu1  ;;  %5278 = vperm.xlu0 %7397, %v5108_v17   ;;  %v10317_v17 = vrot.slane %v9428_v50, 1 }
 0x17f   : > { %v9443_v60 = vadd.f32 %v6726_v34, %v1140_v36  ;;  %v1139_v29 = vadd.f32 %v1028_v5, %v10315_v23  ;;  %7143 = vmatprep.mubr.f32.mxu0 %v3489_v8  ;;  %v3488_v15 = vsel %vm307_vm0, %v3486_v24, %v10316_v61  ;;  %v7443_v5 = vld [vmem:[%s7563_s18 + $0x48] sm:$0xff] }
 0x180   : > { %v1591_v13 = vpop.f32.mrf.mxu0  ;;  %v6625_v12 = vpop.f32.mrf.mxu1  ;;  %7040 = vmatmul.mubr.f32.gmra.mxu1 %v2925_v28  ;;  %v4562_v36 = vsel %vm1239_vm1, %v10317_v17, %v4469_v52  ;;  %v4471_v8 = vrot.slane %v7443_v5, 1  ;;  %5283 = vperm.xlu1 %7398, %v5109_v49   ;;  %v5111_v34 = vld [vmem:[%s10172_s1 + $0x108] sm:$0xff]  ;;  %v10318_v17 = vld [vmem:[#allocation29_spill] sm:$0xff]  ;;  %v4561_v49 = vsel %vm1239_vm1, %v4469_v52, %v4470_v41 }
 0x181   : > { %10314 = vst [vmem:[#allocation23_spill] sm:$0xff] %v9443_v60  ;;  %v9458_v58 = vadd.f32 %v1591_v13, %v1139_v29  ;;  %v1142_v24 = vadd.f32 %v6625_v12, %v8811_v22  ;;  %7178 = vmatprep.mubr.f32.mxu1 %v9428_v50  ;;  %v7444_v22 = vld [vmem:[%s7563_s18 + $0x50] sm:$0xff] }
 0x182   : > { %v6729_v28 = vpop.f32.mrf.mxu0  ;;  %7144 = vmatmul.mubr.f32.gmra.mxu0 %v3488_v15  ;;  %v1038_v23 = vpop.f32.mrf.mxu1  ;;  %5288 = vperm.xlu0 %7397, %v5110_v3   ;;  %v4472_v29 = vrot.slane %v7444_v22, 1  ;;  %v5112_v13 = vld [vmem:[%s10172_s1 + $0x110] sm:$0xff]  ;;  %v4560_v15 = vsel %vm1239_vm1, %v4470_v41, %v4471_v8  ;;  %v7445_v3 = vld [vmem:[%s7563_s18 + $0x58] sm:$0xff] }
 0x183   : > { %v9465_v61 = vadd.f32 %v6729_v28, %v1142_v24  ;;  %v1141_v60 = vadd.f32 %v1038_v23, %v10318_v17  ;;  %7282 = vmatprep.mubr.f32.mxu0 %v4562_v36  ;;  %v4473_v24 = vrot.slane %v7445_v3, 1  ;;  %v5113_v28 = vld [vmem:[%s10172_s1 + $0x118] sm:$0xff] }
 0x184   : > { %v1601_v12 = vpop.f32.mrf.mxu0  ;;  %v6764_v50 = vpop.f32.mrf.mxu1  ;;  %7179 = vmatmul.mubr.f32.vlgmr.msra.gmra.mxu1 %v7441_v45  ;;  %5293 = vperm.xlu1 %7398, %v5111_v34   ;;  %v7446_v34 = vld [vmem:[%s7563_s18 + $0x60] sm:$0xff] }
 0x185   : > { %v9477_v36 = vadd.f32 %v1601_v12, %v1141_v60  ;;  %v2269_v52 = vadd.f32 %v6764_v50, %v8861_v53  ;;  %7181 = vmatprep.mubr.f32.mxu1 %v7442_v27  ;;  %v4559_v60 = vsel %vm1239_vm1, %v4471_v8, %v4472_v29  ;;  %v4474_v53 = vrot.slane %v7446_v34, 1  ;;  %v5114_v50 = vld [vmem:[%s10172_s1 + $0x120] sm:$0xff] }
 0x186   : > { %v6868_v23 = vpop.f32.mrf.mxu0  ;;  %7283 = vmatmul.mubr.f32.vlgmr.msra.gmra.mxu0 %v4561_v49  ;;  %v1981_v45 = vpop.f32.mrf.mxu1  ;;  %5298 = vperm.xlu0 %7397, %v5112_v13   ;;  %v4558_v49 = vsel %vm1239_vm1, %v4472_v29, %v4473_v24  ;;  %v7447_v13 = vld [vmem:[%s7563_s18 + $0x68] sm:$0xff] }
 0x187   : > { %v9483_v17 = vadd.f32 %v6868_v23, %v2269_v52  ;;  %v2268_v41 = vadd.f32 %v1981_v45, %v8874_v20  ;;  %7285 = vmatprep.mubr.f32.mxu0 %v4560_v15  ;;  %v4475_v52 = vrot.slane %v7447_v13, 1  ;;  %v5115_v15 = vld [vmem:[%s10172_s1 + $0x128] sm:$0xff] }
 0x188   : > { %v2447_v27 = vpop.f32.mrf.mxu0  ;;  %v6767_v12 = vpop.f32.mrf.mxu1  ;;  %7182 = vmatmul.mubr.f32.gmra.mxu1 %v7443_v5  ;;  %5303 = vperm.xlu1 %7398, %v5113_v28   ;;  %v4557_v28 = vsel %vm1239_vm1, %v4473_v24, %v4474_v53 }
 0x189   : > { %v9495_v20 = vadd.f32 %v2447_v27, %v2268_v41  ;;  %v2271_v8 = vadd.f32 %v6767_v12, %v8889_v31  ;;  %7184 = vmatprep.mubr.f32.mxu1 %v7444_v22  ;;  %v7448_v41 = vld [vmem:[%s7563_s18 + $0x70] sm:$0xff] }
 0x18a   : > { %v6871_v23 = vpop.f32.mrf.mxu0  ;;  %7286 = vmatmul.mubr.f32.gmra.mxu0 %v4559_v60  ;;  %v1991_v5 = vpop.f32.mrf.mxu1  ;;  %5308 = vperm.xlu0 %7397, %v5114_v50   ;;  %v4476_v31 = vrot.slane %v7448_v41, 1  ;;  %v5116_v22 = vld [vmem:[%s10172_s1 + $0x130] sm:$0xff]  ;;  %v4556_v60 = vsel %vm1239_vm1, %v4474_v53, %v4475_v52  ;;  %v7449_v50 = vld [vmem:[%s7563_s18 + $0x78] sm:$0xff] }
 0x18b   : > { %v9501_v45 = vadd.f32 %v6871_v23, %v2271_v8  ;;  %v2270_v29 = vadd.f32 %v1991_v5, %v8901_v63  ;;  %7288 = vmatprep.mubr.f32.mxu0 %v4558_v49  ;;  %v4477_v8 = vrot.slane %v7449_v50, 1  ;;  %v5117_v49 = vld [vmem:[%s10172_s1 + $0x138] sm:$0xff] }
 0x18c   : > { %v2457_v27 = vpop.f32.mrf.mxu0  ;;  %v6770_v12 = vpop.f32.mrf.mxu1  ;;  %7185 = vmatmul.mubr.f32.gmra.mxu1 %v7445_v3  ;;  %5313 = vperm.xlu1 %7398, %v5115_v15   ;;  %v4555_v15 = vsel %vm1239_vm1, %v4475_v52, %v4476_v31 }
 0x18d   : > { %v9513_v63 = vadd.f32 %v2457_v27, %v2270_v29  ;;  %v2273_v24 = vadd.f32 %v6770_v12, %v8916_v39  ;;  %7187 = vmatprep.mubr.f32.mxu1 %v7446_v34  ;;  %v7450_v29 = vld [vmem:[%s7563_s18 + $0x80] sm:$0xff] }
 0x18e   : > { %v6874_v23 = vpop.f32.mrf.mxu0  ;;  %7289 = vmatmul.mubr.f32.gmra.mxu0 %v4557_v28  ;;  %v2001_v3 = vpop.f32.mrf.mxu1  ;;  %5318 = vperm.xlu0 %7397, %v5116_v22   ;;  %v4478_v39 = vrot.slane %v7450_v29, 1  ;;  %v5118_v34 = vld [vmem:[%s10172_s1 + $0x140] sm:$0xff]  ;;  %v4554_v28 = vsel %vm1239_vm1, %v4476_v31, %v4477_v8  ;;  %v7451_v22 = vld [vmem:[%s7563_s18 + $0x88] sm:$0xff] }
 0x18f   : > { %v9519_v5 = vadd.f32 %v6874_v23, %v2273_v24  ;;  %v2272_v53 = vadd.f32 %v2001_v3, %v8928_v40  ;;  %7291 = vmatprep.mubr.f32.mxu0 %v4556_v60  ;;  %v4479_v24 = vrot.slane %v7451_v22, 1  ;;  %v5119_v60 = vld [vmem:[%s10172_s1 + $0x148] sm:$0xff] }
 0x190   : > { %v2467_v27 = vpop.f32.mrf.mxu0  ;;  %v6773_v12 = vpop.f32.mrf.mxu1  ;;  %7188 = vmatmul.mubr.f32.gmra.mxu1 %v7447_v13  ;;  %5323 = vperm.xlu1 %7398, %v5117_v49   ;;  %v4553_v49 = vsel %vm1239_vm1, %v4477_v8, %v4478_v39 }
 0x191   : > { %v9531_v40 = vadd.f32 %v2467_v27, %v2272_v53  ;;  %v2275_v52 = vadd.f32 %v6773_v12, %v8943_v10  ;;  %7190 = vmatprep.mubr.f32.mxu1 %v7448_v41  ;;  %v7452_v53 = vld [vmem:[%s7563_s18 + $0x90] sm:$0xff] }
 0x192   : > { %v6877_v23 = vpop.f32.mrf.mxu0  ;;  %7292 = vmatmul.mubr.f32.gmra.mxu0 %v4555_v15  ;;  %v2011_v13 = vpop.f32.mrf.mxu1  ;;  %5328 = vperm.xlu0 %7397, %v5118_v34   ;;  %v4480_v10 = vrot.slane %v7452_v53, 1  ;;  %v5120_v41 = vld [vmem:[%s10172_s1 + $0x150] sm:$0xff]  ;;  %v4552_v15 = vsel %vm1239_vm1, %v4478_v39, %v4479_v24  ;;  %v7453_v34 = vld [vmem:[%s7563_s18 + $0x98] sm:$0xff] }
 0x193   : > { %v9537_v3 = vadd.f32 %v6877_v23, %v2275_v52  ;;  %v2274_v31 = vadd.f32 %v2011_v13, %v8955_v6  ;;  %7294 = vmatprep.mubr.f32.mxu0 %v4554_v28  ;;  %v4481_v52 = vrot.slane %v7453_v34, 1  ;;  %v5121_v28 = vld [vmem:[%s10172_s1 + $0x158] sm:$0xff] }
 0x194   : > { %v2477_v27 = vpop.f32.mrf.mxu0  ;;  %v6776_v12 = vpop.f32.mrf.mxu1  ;;  %7191 = vmatmul.mubr.f32.gmra.mxu1 %v7449_v50  ;;  %5333 = vperm.xlu1 %7398, %v5119_v60   ;;  %v4551_v60 = vsel %vm1239_vm1, %v4479_v24, %v4480_v10 }
 0x195   : > { %v9549_v6 = vadd.f32 %v2477_v27, %v2274_v31  ;;  %v2277_v8 = vadd.f32 %v6776_v12, %v8970_v57  ;;  %7193 = vmatprep.mubr.f32.mxu1 %v7450_v29  ;;  %v7454_v31 = vld [vmem:[%s7563_s18 + $0xa0] sm:$0xff] }
 0x196   : > { %v6880_v23 = vpop.f32.mrf.mxu0  ;;  %7295 = vmatmul.mubr.f32.gmra.mxu0 %v4553_v49  ;;  %v2021_v50 = vpop.f32.mrf.mxu1  ;;  %5338 = vperm.xlu0 %7397, %v5120_v41   ;;  %v4482_v57 = vrot.slane %v7454_v31, 1  ;;  %v5122_v29 = vld [vmem:[%s10172_s1 + $0x160] sm:$0xff]  ;;  %v4550_v49 = vsel %vm1239_vm1, %v4480_v10, %v4481_v52  ;;  %v7455_v41 = vld [vmem:[%s7563_s18 + $0xa8] sm:$0xff] }
 0x197   : > { %v9555_v13 = vadd.f32 %v6880_v23, %v2277_v8  ;;  %v2276_v39 = vadd.f32 %v2021_v50, %v8982_v56  ;;  %7297 = vmatprep.mubr.f32.mxu0 %v4552_v15  ;;  %v4483_v8 = vrot.slane %v7455_v41, 1  ;;  %v5123_v15 = vld [vmem:[%s10172_s1 + $0x168] sm:$0xff] }
 0x198   : > { %v2487_v27 = vpop.f32.mrf.mxu0  ;;  %v6779_v12 = vpop.f32.mrf.mxu1  ;;  %7194 = vmatmul.mubr.f32.gmra.mxu1 %v7451_v22  ;;  %5343 = vperm.xlu1 %7398, %v5121_v28   ;;  %v4549_v28 = vsel %vm1239_vm1, %v4481_v52, %v4482_v57 }
 0x199   : > { %v9567_v56 = vadd.f32 %v2487_v27, %v2276_v39  ;;  %v2279_v24 = vadd.f32 %v6779_v12, %v8997_v0  ;;  %7196 = vmatprep.mubr.f32.mxu1 %v7452_v53  ;;  %v7456_v39 = vld [vmem:[%s7563_s18 + $0xb0] sm:$0xff] }
 0x19a   : > { %v6883_v23 = vpop.f32.mrf.mxu0  ;;  %7298 = vmatmul.mubr.f32.gmra.mxu0 %v4551_v60  ;;  %v2031_v22 = vpop.f32.mrf.mxu1  ;;  %5348 = vperm.xlu0 %7397, %v5122_v29   ;;  %v4484_v0 = vrot.slane %v7456_v39, 1  ;;  %v5124_v53 = vld [vmem:[%s10172_s1 + $0x170] sm:$0xff]  ;;  %v4548_v60 = vsel %vm1239_vm1, %v4482_v57, %v4483_v8  ;;  %v7457_v29 = vld [vmem:[%s7563_s18 + $0xb8] sm:$0xff] }
 0x19b   : > { %v9573_v50 = vadd.f32 %v6883_v23, %v2279_v24  ;;  %v2278_v10 = vadd.f32 %v2031_v22, %v9008_v18  ;;  %7300 = vmatprep.mubr.f32.mxu0 %v4550_v49  ;;  %v4485_v24 = vrot.slane %v7457_v29, 1  ;;  %v5125_v49 = vld [vmem:[%s10172_s1 + $0x178] sm:$0xff] }
 0x19c   : > { %v2497_v27 = vpop.f32.mrf.mxu0  ;;  %v6782_v12 = vpop.f32.mrf.mxu1  ;;  %7197 = vmatmul.mubr.f32.gmra.mxu1 %v7453_v34  ;;  %5353 = vperm.xlu1 %7398, %v5123_v15   ;;  %v4547_v15 = vsel %vm1239_vm1, %v4483_v8, %v4484_v0 }
 0x19d   : > { %v9585_v18 = vadd.f32 %v2497_v27, %v2278_v10  ;;  %v2281_v52 = vadd.f32 %v6782_v12, %v9020_v25  ;;  %7199 = vmatprep.mubr.f32.mxu1 %v7454_v31  ;;  %v7458_v10 = vld [vmem:[%s7563_s18 + $0xc0] sm:$0xff]  ;;  %v4546_v12 = vsel %vm1239_vm1, %v4484_v0, %v4485_v24  ;;  %v7460_v0 = vld [vmem:[%s7563_s18 + $0xd0] sm:$0xff] }
 0x19e   : > { %v6886_v23 = vpop.f32.mrf.mxu0  ;;  %7301 = vmatmul.mubr.f32.gmra.mxu0 %v4549_v28  ;;  %v2041_v34 = vpop.f32.mrf.mxu1  ;;  %5358 = vperm.xlu0 %7397, %v5124_v53   ;;  %v4486_v25 = vrot.slane %v7458_v10, 1  ;;  %v7459_v28 = vld [vmem:[%s7563_s18 + $0xc8] sm:$0xff] }
 0x19f   : > { %10319 = vst [vmem:[#allocation24_spill] sm:$0xff] %v9585_v18  ;;  %v9591_v22 = vadd.f32 %v6886_v23, %v2281_v52  ;;  %v2280_v57 = vadd.f32 %v2041_v34, %v9030_v47  ;;  %7303 = vmatprep.mubr.f32.mxu0 %v4548_v60  ;;  %v4487_v18 = vrot.slane %v7459_v28, 1  ;;  %v4488_v34 = vrot.slane %v7460_v0, 1 }
 0x1a0   : > { %v2507_v31 = vpop.f32.mrf.mxu0  ;;  %v6785_v27 = vpop.f32.mrf.mxu1  ;;  %7200 = vmatmul.mubr.f32.gmra.mxu1 %v7455_v41  ;;  %5363 = vperm.xlu1 %7398, %v5125_v49   ;;  %v4545_v41 = vsel %vm1239_vm1, %v4485_v24, %v4486_v25 }
 0x1a1   : > { %v9600_v53 = vadd.f32 %v2507_v31, %v2280_v57  ;;  %v2283_v47 = vadd.f32 %v6785_v27, %v9042_v21  ;;  %7202 = vmatprep.mubr.f32.mxu1 %v7456_v39  ;;  %v4544_v21 = vsel %vm1239_vm1, %v4486_v25, %v4487_v18  ;;  %v7461_v39 = vld [vmem:[%s7563_s18 + $0xd8] sm:$0xff]  ;;  %v7462_v25 = vld [vmem:[%s7563_s18 + $0xe0] sm:$0xff] }
 0x1a2   : > { %v6889_v60 = vpop.f32.mrf.mxu0  ;;  %7304 = vmatmul.mubr.f32.gmra.mxu0 %v4547_v15  ;;  %v2051_v8 = vpop.f32.mrf.mxu1  ;;  %v4489_v15 = vrot.slane %v7461_v39, 1 }
 0x1a3   : > { %v9603_v52 = vadd.f32 %v6889_v60, %v2283_v47  ;;  %v2282_v23 = vadd.f32 %v2051_v8, %v9051_v37  ;;  %7306 = vmatprep.mubr.f32.mxu0 %v4546_v12  ;;  %v4490_v60 = vrot.slane %v7462_v25, 1 }
 0x1a4   : > { %v2517_v49 = vpop.f32.mrf.mxu0  ;;  %v6788_v57 = vpop.f32.mrf.mxu1  ;;  %7203 = vmatmul.mubr.f32.gmra.mxu1 %v7457_v29  ;;  %v4543_v29 = vsel %vm1239_vm1, %v4487_v18, %v4488_v34 }
 0x1a5   : > { %v9612_v31 = vadd.f32 %v2517_v49, %v2282_v23  ;;  %v2285_v37 = vadd.f32 %v6788_v57, %v9063_v14  ;;  %7205 = vmatprep.mubr.f32.mxu1 %v7458_v10  ;;  %v4542_v14 = vsel %vm1239_vm1, %v4488_v34, %v4489_v15  ;;  %v7463_v10 = vld [vmem:[%s7563_s18 + $0xe8] sm:$0xff]  ;;  %v7464_v34 = vld [vmem:[%s7563_s18 + $0xf0] sm:$0xff] }
 0x1a6   : > { %v6892_v27 = vpop.f32.mrf.mxu0  ;;  %7307 = vmatmul.mubr.f32.gmra.mxu0 %v4545_v41  ;;  %v2061_v24 = vpop.f32.mrf.mxu1  ;;  %v4491_v41 = vrot.slane %v7463_v10, 1 }
 0x1a7   : > { %v9615_v12 = vadd.f32 %v6892_v27, %v2285_v37  ;;  %v2284_v47 = vadd.f32 %v2061_v24, %v9070_v33  ;;  %7309 = vmatprep.mubr.f32.mxu0 %v4544_v21  ;;  %v4492_v27 = vrot.slane %v7464_v34, 1 }
 0x1a8   : > { %v2527_v8 = vpop.f32.mrf.mxu0  ;;  %v6791_v23 = vpop.f32.mrf.mxu1  ;;  %7206 = vmatmul.mubr.f32.gmra.mxu1 %v7459_v28  ;;  %v4541_v28 = vsel %vm1239_vm1, %v4489_v15, %v4490_v60 }
 0x1a9   : > { %v9624_v49 = vadd.f32 %v2527_v8, %v2284_v47  ;;  %v2287_v33 = vadd.f32 %v6791_v23, %v9083_v54  ;;  %7208 = vmatprep.mubr.f32.mxu1 %v7460_v0  ;;  %v4540_v54 = vsel %vm1239_vm1, %v4490_v60, %v4491_v41  ;;  %v7465_v0 = vld [vmem:[%s7563_s18 + $0xf8] sm:$0xff]  ;;  %v7466_v60 = vld [vmem:[%s7563_s18 + $0x100] sm:$0xff] }
 0x1aa   : > { %v6895_v57 = vpop.f32.mrf.mxu0  ;;  %7310 = vmatmul.mubr.f32.gmra.mxu0 %v4543_v29  ;;  %v2071_v18 = vpop.f32.mrf.mxu1  ;;  %v4493_v29 = vrot.slane %v7465_v0, 1 }
 0x1ab   : > { %v9627_v21 = vadd.f32 %v6895_v57, %v2287_v33  ;;  %v2286_v37 = vadd.f32 %v2071_v18, %v9090_v62  ;;  %7312 = vmatprep.mubr.f32.mxu0 %v4542_v14  ;;  %v4494_v57 = vrot.slane %v7466_v60, 1 }
 0x1ac   : > { %v2537_v24 = vpop.f32.mrf.mxu0  ;;  %v6794_v47 = vpop.f32.mrf.mxu1  ;;  %7209 = vmatmul.mubr.f32.gmra.mxu1 %v7461_v39  ;;  %v4539_v39 = vsel %vm1239_vm1, %v4491_v41, %v4492_v27 }
 0x1ad   : > { %v9636_v8 = vadd.f32 %v2537_v24, %v2286_v37  ;;  %v2289_v62 = vadd.f32 %v6794_v47, %v9106_v2  ;;  %7211 = vmatprep.mubr.f32.mxu1 %v7462_v25  ;;  %v4538_v2 = vsel %vm1239_vm1, %v4492_v27, %v4493_v29  ;;  %v7467_v25 = vld [vmem:[%s7563_s18 + $0x108] sm:$0xff]  ;;  %v7468_v27 = vld [vmem:[%s7563_s18 + $0x110] sm:$0xff] }
 0x1ae   : > { %v6898_v23 = vpop.f32.mrf.mxu0  ;;  %7313 = vmatmul.mubr.f32.gmra.mxu0 %v4541_v28  ;;  %v2081_v15 = vpop.f32.mrf.mxu1  ;;  %v4495_v28 = vrot.slane %v7467_v25, 1 }
 0x1af   : > { %v9639_v14 = vadd.f32 %v6898_v23, %v2289_v62  ;;  %v2288_v33 = vadd.f32 %v2081_v15, %v9115_v9  ;;  %7315 = vmatprep.mubr.f32.mxu0 %v4540_v54  ;;  %v4496_v23 = vrot.slane %v7468_v27, 1 }
 0x1b0   : > { %v2547_v18 = vpop.f32.mrf.mxu0  ;;  %v6797_v37 = vpop.f32.mrf.mxu1  ;;  %7212 = vmatmul.mubr.f32.gmra.mxu1 %v7463_v10  ;;  %v4537_v10 = vsel %vm1239_vm1, %v4493_v29, %v4494_v57 }
 0x1b1   : > { %v9648_v24 = vadd.f32 %v2547_v18, %v2288_v33  ;;  %v2291_v9 = vadd.f32 %v6797_v37, %v9131_v30  ;;  %7214 = vmatprep.mubr.f32.mxu1 %v7464_v34  ;;  %v4536_v30 = vsel %vm1239_vm1, %v4494_v57, %v4495_v28  ;;  %v7469_v34 = vld [vmem:[%s7563_s18 + $0x118] sm:$0xff]  ;;  %v7470_v57 = vld [vmem:[%s7563_s18 + $0x120] sm:$0xff] }
 0x1b2   : > { %v6901_v47 = vpop.f32.mrf.mxu0  ;;  %7316 = vmatmul.mubr.f32.gmra.mxu0 %v4539_v39  ;;  %v2091_v41 = vpop.f32.mrf.mxu1  ;;  %v4497_v39 = vrot.slane %v7469_v34, 1 }
 0x1b3   : > { %v9651_v54 = vadd.f32 %v6901_v47, %v2291_v9  ;;  %v2290_v62 = vadd.f32 %v2091_v41, %v9143_v19  ;;  %7318 = vmatprep.mubr.f32.mxu0 %v4538_v2  ;;  %v4498_v47 = vrot.slane %v7470_v57, 1 }
 0x1b4   : > { %v2557_v15 = vpop.f32.mrf.mxu0  ;;  %v6800_v33 = vpop.f32.mrf.mxu1  ;;  %7215 = vmatmul.mubr.f32.gmra.mxu1 %v7465_v0  ;;  %v4535_v0 = vsel %vm1239_vm1, %v4495_v28, %v4496_v23 }
 0x1b5   : > { %v9660_v18 = vadd.f32 %v2557_v15, %v2290_v62  ;;  %v2293_v19 = vadd.f32 %v6800_v33, %v9159_v44  ;;  %7217 = vmatprep.mubr.f32.mxu1 %v7466_v60  ;;  %v4534_v44 = vsel %vm1239_vm1, %v4496_v23, %v4497_v39  ;;  %v7471_v60 = vld [vmem:[%s7563_s18 + $0x128] sm:$0xff] }
 0x1b6   : > { %v6904_v37 = vpop.f32.mrf.mxu0  ;;  %7319 = vmatmul.mubr.f32.gmra.mxu0 %v4537_v10  ;;  %v2101_v29 = vpop.f32.mrf.mxu1  ;;  %v4499_v10 = vrot.slane %v7471_v60, 1 }
 0x1b7   : > { %v9663_v2 = vadd.f32 %v6904_v37, %v2293_v19  ;;  %v2292_v9 = vadd.f32 %v2101_v29, %v9171_v26  ;;  %7321 = vmatprep.mubr.f32.mxu0 %v4536_v30  ;;  %v7472_v37 = vld [vmem:[%s7563_s18 + $0x130] sm:$0xff] }
 0x1b8   : > { %v2567_v41 = vpop.f32.mrf.mxu0  ;;  %v6803_v62 = vpop.f32.mrf.mxu1  ;;  %7218 = vmatmul.mubr.f32.gmra.mxu1 %v7467_v25  ;;  %v4533_v25 = vsel %vm1239_vm1, %v4497_v39, %v4498_v47  ;;  %v4500_v23 = vrot.slane %v7472_v37, 1 }
 0x1b9   : > { %10320 = vst [vmem:[#allocation25_spill] sm:$0xff] %v9663_v2  ;;  %v9672_v15 = vadd.f32 %v2567_v41, %v2292_v9  ;;  %v2295_v33 = vadd.f32 %v6803_v62, %v9186_v32  ;;  %7220 = vmatprep.mubr.f32.mxu1 %v7468_v27  ;;  %v4532_v32 = vsel %vm1239_vm1, %v4498_v47, %v4499_v10  ;;  %v4501_v27 = vrot.slane %v9198_v11, 1 }
 0x1ba   : > { %v6907_v26 = vpop.f32.mrf.mxu0  ;;  %7322 = vmatmul.mubr.f32.gmra.mxu0 %v4535_v0  ;;  %v2111_v30 = vpop.f32.mrf.mxu1  ;;  %v4502_v47 = vrot.slane %v9207_v51, 1  ;;  %v10321_v51 = vld [vmem:[#allocation7_spill] sm:$0xff] }
 0x1bb   : > { %v9675_v28 = vadd.f32 %v6907_v26, %v2295_v33  ;;  %v2294_v19 = vadd.f32 %v2111_v30, %v9200_v7  ;;  %7324 = vmatprep.mubr.f32.mxu0 %v4534_v44 }
 0x1bc   : > { %v2577_v29 = vpop.f32.mrf.mxu0  ;;  %v6806_v2 = vpop.f32.mrf.mxu1  ;;  %7221 = vmatmul.mubr.f32.gmra.mxu1 %v7469_v34  ;;  %v4531_v34 = vsel %vm1239_vm1, %v4499_v10, %v4500_v23 }
 0x1bd   : > { %v9684_v9 = vadd.f32 %v2577_v29, %v2294_v19  ;;  %v2297_v0 = vadd.f32 %v6806_v2, %v9215_v59  ;;  %7223 = vmatprep.mubr.f32.mxu1 %v7470_v57  ;;  %v4530_v59 = vsel %vm1239_vm1, %v4500_v23, %v4501_v27  ;;  %v4503_v2 = vrot.slane %v9228_v55, 1  ;;  %v10322_v19 = vld [vmem:[#allocation6_spill] sm:$0xff] }
 0x1be   : > { %v6910_v7 = vpop.f32.mrf.mxu0  ;;  %7325 = vmatmul.mubr.f32.gmra.mxu0 %v4533_v25  ;;  %v2121_v41 = vpop.f32.mrf.mxu1  ;;  %v4504_v25 = vrot.slane %v10322_v19, 1  ;;  %v7473_v29 = vld [vmem:[%s7563_s18 + $0x138] sm:$0xff] }
 0x1bf   : > { %v9687_v62 = vadd.f32 %v6910_v7, %v2297_v0  ;;  %v2296_v39 = vadd.f32 %v2121_v41, %v9230_v42  ;;  %7327 = vmatprep.mubr.f32.mxu0 %v4532_v32  ;;  %v10324_v7 = vld [vmem:[#allocation10_spill] sm:$0xff] }
 0x1c0   : > { %v2587_v44 = vpop.f32.mrf.mxu0  ;;  %v6809_v11 = vpop.f32.mrf.mxu1  ;;  %7224 = vmatmul.mubr.f32.gmra.mxu1 %v7471_v60  ;;  %v4529_v60 = vsel %vm1239_vm1, %v4501_v27, %v4502_v47 }
 0x1c1   : > { %v9696_v57 = vadd.f32 %v2587_v44, %v2296_v39  ;;  %v2299_v33 = vadd.f32 %v6809_v11, %v9245_v35  ;;  %7226 = vmatprep.mubr.f32.mxu1 %v7472_v37  ;;  %v4528_v35 = vsel %vm1239_vm1, %v4502_v47, %v4503_v2  ;;  %v10323_v37 = vld [vmem:[#allocation9_spill] sm:$0xff]  ;;  %v7474_v39 = vld [vmem:[%s7563_s18 + $0x140] sm:$0xff]  ;;  %v4527_v47 = vsel %vm1239_vm1, %v4503_v2, %v4504_v25 }
 0x1c2   : > { %v6913_v42 = vpop.f32.mrf.mxu0  ;;  %7328 = vmatmul.mubr.f32.gmra.mxu0 %v4531_v34  ;;  %v2131_v10 = vpop.f32.mrf.mxu1  ;;  %v4505_v32 = vrot.slane %v10323_v37, 1  ;;  %v10326_v11 = vld [vmem:[#allocation5_spill] sm:$0xff] }
 0x1c3   : > { %v9699_v26 = vadd.f32 %v6913_v42, %v2299_v33  ;;  %v2298_v30 = vadd.f32 %v2131_v10, %v10321_v51  ;;  %7330 = vmatprep.mubr.f32.mxu0 %v4530_v59  ;;  %v10327_v33 = vld [vmem:[#allocation3_spill] sm:$0xff] }
 0x1c4   : > { %v2597_v55 = vpop.f32.mrf.mxu0  ;;  %v6812_v23 = vpop.f32.mrf.mxu1  ;;  %7227 = vmatmul.mubr.f32.gmra.mxu1 %v7473_v29  ;;  %v4506_v42 = vrot.slane %v10327_v33, 1  ;;  %v4526_v19 = vsel %vm1239_vm1, %v4504_v25, %v4505_v32  ;;  %v10330_v29 = vld [vmem:[#allocation11_spill] sm:$0xff]  ;;  %v10333_v25 = vld [vmem:[#allocation8_spill] sm:$0xff] }
 0x1c5   : > { %v9709_v0 = vadd.f32 %v2597_v55, %v2298_v30  ;;  %v2301_v41 = vadd.f32 %v6812_v23, %v10324_v7  ;;  %7229 = vmatprep.mubr.f32.mxu1 %v7474_v39  ;;  %v7475_v30 = vld [vmem:[%s7563_s18 + $0x148] sm:$0xff] }
 0x1c6   : > { %v6916_v34 = vpop.f32.mrf.mxu0  ;;  %7331 = vmatmul.mubr.f32.gmra.mxu0 %v4529_v60  ;;  %v2141_v27 = vpop.f32.mrf.mxu1  ;;  %v10328_v55 = vld [vmem:[#allocation4_spill] sm:$0xff] }
 0x1c7   : > { %v9713_v44 = vadd.f32 %v6916_v34, %v2301_v41  ;;  %v2300_v59 = vadd.f32 %v2141_v27, %v10326_v11  ;;  %7333 = vmatprep.mubr.f32.mxu0 %v4528_v35  ;;  %v4507_v60 = vrot.slane %v10328_v55, 1  ;;  %v7476_v41 = vld [vmem:[%s7563_s18 + $0x150] sm:$0xff]  ;;  %v4525_v11 = vsel %vm1239_vm1, %v4505_v32, %v4506_v42 }
 0x1c8   : > { %v2607_v10 = vpop.f32.mrf.mxu0  ;;  %v6815_v51 = vpop.f32.mrf.mxu1  ;;  %7230 = vmatmul.mubr.f32.gmra.mxu1 %v7475_v30  ;;  %v10332_v34 = vld [vmem:[#allocation13_spill] sm:$0xff]  ;;  %v4508_v30 = vrot.slane %v10333_v25, 1 }
 0x1c9   : > { %10325 = vst [vmem:[#allocation26_spill] sm:$0xff] %v9713_v44  ;;  %v9723_v23 = vadd.f32 %v2607_v10, %v2300_v59  ;;  %v2303_v7 = vadd.f32 %v6815_v51, %v10330_v29  ;;  %7232 = vmatprep.mubr.f32.mxu1 %v7476_v41  ;;  %v4524_v10 = vsel %vm1239_vm1, %v4506_v42, %v4507_v60  ;;  %v10334_v51 = vld [vmem:[#allocation12_spill] sm:$0xff]  ;;  %v10339_v42 = vld [vmem:[#allocation15_spill] sm:$0xff] }
 0x1ca   : > { %v6919_v35 = vpop.f32.mrf.mxu0  ;;  %7334 = vmatmul.mubr.f32.gmra.mxu0 %v4527_v47  ;;  %v2151_v2 = vpop.f32.mrf.mxu1  ;;  %v4509_v47 = vrot.slane %v10334_v51, 1 }
 0x1cb   : > { %10329 = vst [vmem:[#allocation27_spill] sm:$0xff] %v9723_v23  ;;  %v9727_v39 = vadd.f32 %v6919_v35, %v2303_v7  ;;  %v2302_v27 = vadd.f32 %v2151_v2, %v10332_v34  ;;  %7336 = vmatprep.mubr.f32.mxu0 %v4526_v19  ;;  %v10336_v7 = vld [vmem:[#allocation16_spill] sm:$0xff]  ;;  %v10338_v2 = vld [vmem:[#allocation18_spill] sm:$0xff] }
 0x1cc   : > { %v2617_v44 = vpop.f32.mrf.mxu0  ;;  %v6818_v59 = vpop.f32.mrf.mxu1  ;;  %7233 = vmatmul.mubr.f32.gmra.mxu1 %v10323_v37  ;;  %v4523_v37 = vsel %vm1239_vm1, %v4507_v60, %v4508_v30 }
 0x1cd   : > { %10331 = vst [vmem:[#allocation14_spill] sm:$0xff] %v9727_v39  ;;  %v9737_v29 = vadd.f32 %v2617_v44, %v2302_v27  ;;  %v2305_v41 = vadd.f32 %v6818_v59, %v10336_v7  ;;  %7235 = vmatprep.mubr.f32.mxu1 %v10327_v33  ;;  %v4510_v39 = vrot.slane %v10339_v42, 1  ;;  %v4522_v33 = vsel %vm1239_vm1, %v4508_v30, %v4509_v47  ;;  %v10340_v27 = vld [vmem:[#allocation17_spill] sm:$0xff]  ;;  %v10341_v7 = vld [vmem:[#allocation20_spill] sm:$0xff]  ;;  %v10343_v30 = vld [vmem:[#allocation19_spill] sm:$0xff] }
 0x1ce   : > { %v6922_v19 = vpop.f32.mrf.mxu0  ;;  %7337 = vmatmul.mubr.f32.gmra.mxu0 %v4525_v11  ;;  %v2161_v32 = vpop.f32.mrf.mxu1  ;;  %v4511_v11 = vrot.slane %v10340_v27, 1 }
 0x1cf   : > { %10335 = vst [vmem:[#allocation28_spill] sm:$0xff] %v9737_v29  ;;  %v9741_v35 = vadd.f32 %v6922_v19, %v2305_v41  ;;  %v2304_v34 = vadd.f32 %v2161_v32, %v10338_v2  ;;  %7339 = vmatprep.mubr.f32.mxu0 %v4524_v10  ;;  %v10342_v32 = vld [vmem:[#allocation21_spill] sm:$0xff] }
 0x1d0   : > { %v2627_v23 = vpop.f32.mrf.mxu0  ;;  %v6821_v44 = vpop.f32.mrf.mxu1  ;;  %7236 = vmatmul.mubr.f32.gmra.mxu1 %v10328_v55  ;;  %v4521_v55 = vsel %vm1239_vm1, %v4509_v47, %v4510_v39 }
 0x1d1   : > { %10337 = vst [vmem:[#allocation29_spill] sm:$0xff] %v9741_v35  ;;  %v9751_v59 = vadd.f32 %v2627_v23, %v2304_v34  ;;  %v2307_v41 = vadd.f32 %v6821_v44, %v10341_v7  ;;  %7238 = vmatprep.mubr.f32.mxu1 %v10333_v25  ;;  %v4512_v35 = vrot.slane %v10343_v30, 1  ;;  %v4520_v25 = vsel %vm1239_vm1, %v4510_v39, %v4511_v11 }
 0x1d2   : > { %v6925_v10 = vpop.f32.mrf.mxu0  ;;  %7340 = vmatmul.mubr.f32.gmra.mxu0 %v4523_v37  ;;  %v2171_v60 = vpop.f32.mrf.mxu1  ;;  %v4513_v34 = vrot.slane %v9378_v48, 1 }
 0x1d3   : > { %v9755_v19 = vadd.f32 %v6925_v10, %v2307_v41  ;;  %v2306_v2 = vadd.f32 %v2171_v60, %v10342_v32  ;;  %7342 = vmatprep.mubr.f32.mxu0 %v4522_v33  ;;  %v4519_v39 = vsel %vm1239_vm1, %v4511_v11, %v4512_v35 }
 0x1d4   : > { %v2637_v29 = vpop.f32.mrf.mxu0  ;;  %v6824_v23 = vpop.f32.mrf.mxu1  ;;  %7239 = vmatmul.mubr.f32.gmra.mxu1 %v10334_v51  ;;  %v4514_v51 = vrot.slane %v9387_v46, 1 }
 0x1d5   : > { %v9765_v37 = vadd.f32 %v2637_v29, %v2306_v2  ;;  %v2309_v44 = vadd.f32 %v6824_v23, %v9395_v4  ;;  %7241 = vmatprep.mubr.f32.mxu1 %v10339_v42  ;;  %v4518_v4 = vsel %vm1239_vm1, %v4512_v35, %v4513_v34  ;;  %v7477_v42 = vld [vmem:[%s7563_s18 + $0x1a8] sm:$0xff]  ;;  %s7387_s18 = smul.u32 384, %s10389_s16 }
 0x1d6   : > { %v6928_v33 = vpop.f32.mrf.mxu0  ;;  %7343 = vmatmul.mubr.f32.gmra.mxu0 %v4521_v55  ;;  %v2181_v47 = vpop.f32.mrf.mxu1  ;;  %v4515_v60 = vrot.slane %v7477_v42, 1 }
 0x1d7   : > { %v9769_v7 = vadd.f32 %v6928_v33, %v2309_v44  ;;  %v2308_v41 = vadd.f32 %v2181_v47, %v9407_v38  ;;  %7345 = vmatprep.mubr.f32.mxu0 %v4520_v25  ;;  %s9992_s12 = scalar_lea.vmem %s10174_s3, %s7387_s18 }
 0x1d8   : > { %v2647_v10 = vpop.f32.mrf.mxu0  ;;  %v6827_v29 = vpop.f32.mrf.mxu1  ;;  %7242 = vmatmul.mubr.f32.gmra.mxu1 %v10340_v27  ;;  %v4517_v27 = vsel %vm1239_vm1, %v4513_v34, %v4514_v51 }
 0x1d9   : > { %v9779_v32 = vadd.f32 %v2647_v10, %v2308_v41  ;;  %v2311_v2 = vadd.f32 %v6827_v29, %v9417_v1  ;;  %7244 = vmatprep.mubr.f32.mxu1 %v10343_v30  ;;  %v4516_v1 = vsel %vm1239_vm1, %v4514_v51, %v4515_v60  ;;  %v10344_v30 = vld [vmem:[#allocation23_spill] sm:$0xff] }
 0x1da   : > { %v6931_v38 = vpop.f32.mrf.mxu0  ;;  %7346 = vmatmul.mubr.f32.gmra.mxu0 %v4519_v39  ;;  %v2191_v11 = vpop.f32.mrf.mxu1  ;;  %v10345_v39 = vld [vmem:[#allocation22_spill] sm:$0xff] }
 0x1db   : > { %v9783_v55 = vadd.f32 %v6931_v38, %v2311_v2  ;;  %v2310_v23 = vadd.f32 %v2191_v11, %v9432_v43  ;;  %7348 = vmatprep.mubr.f32.mxu0 %v4518_v4  ;;  %v10346_v10 = vrot.slane %v10345_v39, 1 }
 0x1dc   : > { %v2657_v35 = vpop.f32.mrf.mxu0  ;;  %v6830_v25 = vpop.f32.mrf.mxu1  ;;  %7245 = vmatmul.mubr.f32.gmra.mxu1 %v9378_v48 }
 0x1dd   : > { %v9791_v44 = vadd.f32 %v2657_v35, %v2310_v23  ;;  %v2313_v33 = vadd.f32 %v6830_v25, %v10344_v30  ;;  %7247 = vmatprep.mubr.f32.mxu1 %v9387_v46  ;;  %v4563_v48 = vsel %vm1239_vm1, %v4515_v60, %v10346_v10 }
 0x1de   : > { %v6934_v47 = vpop.f32.mrf.mxu0  ;;  %7349 = vmatmul.mubr.f32.gmra.mxu0 %v4517_v27  ;;  %v2201_v43 = vpop.f32.mrf.mxu1 }
 0x1df   : > { %v9795_v41 = vadd.f32 %v6934_v47, %v2313_v33  ;;  %v2312_v34 = vadd.f32 %v2201_v43, %v9458_v58  ;;  %7351 = vmatprep.mubr.f32.mxu0 %v4516_v1 }
 0x1e0   : > { %v2667_v51 = vpop.f32.mrf.mxu0  ;;  %v6833_v29 = vpop.f32.mrf.mxu1  ;;  %7248 = vmatmul.mubr.f32.gmra.mxu1 %v7477_v42 }
 0x1e1   : > { %v9802_v4 = vadd.f32 %v2667_v51, %v2312_v34  ;;  %v2315_v46 = vadd.f32 %v6833_v29, %v9465_v61 }
 0x1e2   : > { %v6937_v2 = vpop.f32.mrf.mxu0  ;;  %7352 = vmatmul.mubr.f32.gmra.mxu0 %v4563_v48  ;;  %v2211_v38 = vpop.f32.mrf.mxu1 }
 0x1e3   : > { %v9805_v11 = vadd.f32 %v6937_v2, %v2315_v46  ;;  %v2314_v58 = vadd.f32 %v2211_v38, %v9477_v36 }
 0x1e4   : > { %v2677_v23 = vpop.f32.mrf.mxu0  ;;  %v6972_v27 = vpop.f32.mrf.mxu1 }
 0x1e5   : > { %v9808_v35 = vadd.f32 %v2677_v23, %v2314_v58  ;;  %v3297_v16 = vadd.f32 %v6972_v27, %v9483_v17 }
 0x1e6   : > { %v7076_v60 = vpop.f32.mrf.mxu0  ;;  %v3009_v25 = vpop.f32.mrf.mxu1 }
 0x1e7   : > { %v9811_v42 = vadd.f32 %v7076_v60, %v3297_v16  ;;  %v3296_v1 = vadd.f32 %v3009_v25, %v9495_v20 }
 0x1e8   : > { %v3619_v61 = vpop.f32.mrf.mxu0  ;;  %v6975_v30 = vpop.f32.mrf.mxu1 }
 0x1e9   : > { %v9814_v33 = vadd.f32 %v3619_v61, %v3296_v1  ;;  %v3299_v47 = vadd.f32 %v6975_v30, %v9501_v45 }
 0x1ea   : > { %v7079_v43 = vpop.f32.mrf.mxu0  ;;  %v3019_v36 = vpop.f32.mrf.mxu1 }
 0x1eb   : > { %v9817_v34 = vadd.f32 %v7079_v43, %v3299_v47  ;;  %v3298_v39 = vadd.f32 %v3019_v36, %v9513_v63 }
 0x1ec   : > { %v3629_v10 = vpop.f32.mrf.mxu0  ;;  %v6978_v17 = vpop.f32.mrf.mxu1 }
 0x1ed   : > { %v9820_v48 = vadd.f32 %v3629_v10, %v3298_v39  ;;  %v3301_v51 = vadd.f32 %v6978_v17, %v9519_v5 }
 0x1ee   : > { %v7082_v29 = vpop.f32.mrf.mxu0  ;;  %v3029_v20 = vpop.f32.mrf.mxu1 }
 0x1ef   : > { %v9823_v46 = vadd.f32 %v7082_v29, %v3301_v51  ;;  %v3300_v2 = vadd.f32 %v3029_v20, %v9531_v40  ;;  %v10347_v29 = vld [vmem:[#allocation24_spill] sm:$0xff] }
 0x1f0   : > { %v3639_v38 = vpop.f32.mrf.mxu0  ;;  %v6981_v45 = vpop.f32.mrf.mxu1 }
 0x1f1   : > { %v9826_v58 = vadd.f32 %v3639_v38, %v3300_v2  ;;  %v3303_v23 = vadd.f32 %v6981_v45, %v9537_v3 }
 0x1f2   : > { %v7085_v27 = vpop.f32.mrf.mxu0  ;;  %v3039_v63 = vpop.f32.mrf.mxu1 }
 0x1f3   : > { %v9829_v16 = vadd.f32 %v7085_v27, %v3303_v23  ;;  %v3302_v60 = vadd.f32 %v3039_v63, %v9549_v6 }
 0x1f4   : > { %v3649_v25 = vpop.f32.mrf.mxu0  ;;  %v6984_v5 = vpop.f32.mrf.mxu1 }
 0x1f5   : > { %v9832_v1 = vadd.f32 %v3649_v25, %v3302_v60  ;;  %v3305_v61 = vadd.f32 %v6984_v5, %v9555_v13 }
 0x1f6   : > { %v7088_v30 = vpop.f32.mrf.mxu0  ;;  %v3049_v40 = vpop.f32.mrf.mxu1 }
 0x1f7   : > { %v9835_v47 = vadd.f32 %v7088_v30, %v3305_v61  ;;  %v3304_v43 = vadd.f32 %v3049_v40, %v9567_v56 }
 0x1f8   : > { %v3659_v36 = vpop.f32.mrf.mxu0  ;;  %v6987_v3 = vpop.f32.mrf.mxu1 }
 0x1f9   : > { %v9838_v39 = vadd.f32 %v3659_v36, %v3304_v43  ;;  %v3307_v10 = vadd.f32 %v6987_v3, %v9573_v50 }
 0x1fa   : > { %v7091_v17 = vpop.f32.mrf.mxu0  ;;  %v3059_v6 = vpop.f32.mrf.mxu1 }
 0x1fb   : > { %v9841_v51 = vadd.f32 %v7091_v17, %v3307_v10  ;;  %v3306_v20 = vadd.f32 %v3059_v6, %v10347_v29 }
 0x1fc   : > { %v3669_v2 = vpop.f32.mrf.mxu0  ;;  %v6990_v13 = vpop.f32.mrf.mxu1 }
 0x1fd   : > { %v9844_v38 = vadd.f32 %v3669_v2, %v3306_v20  ;;  %v3309_v45 = vadd.f32 %v6990_v13, %v9591_v22 }
 0x1fe   : > { %v7094_v23 = vpop.f32.mrf.mxu0  ;;  %v3069_v56 = vpop.f32.mrf.mxu1 }
 0x1ff   : > { %v9847_v27 = vadd.f32 %v7094_v23, %v3309_v45  ;;  %v3308_v63 = vadd.f32 %v3069_v56, %v9600_v53 }
 0x200   : > { %v3679_v60 = vpop.f32.mrf.mxu0  ;;  %v6993_v50 = vpop.f32.mrf.mxu1 }
 0x201   : > { %v9850_v25 = vadd.f32 %v3679_v60, %v3308_v63  ;;  %v3311_v5 = vadd.f32 %v6993_v50, %v9603_v52 }
 0x202   : > { %v7097_v61 = vpop.f32.mrf.mxu0  ;;  %v3079_v30 = vpop.f32.mrf.mxu1 }
 0x203   : > { %v9853_v40 = vadd.f32 %v7097_v61, %v3311_v5  ;;  %v3310_v43 = vadd.f32 %v3079_v30, %v9612_v31 }
 0x204   : > { %v3689_v36 = vpop.f32.mrf.mxu0  ;;  %v6996_v22 = vpop.f32.mrf.mxu1 }
 0x205   : > { %v9856_v3 = vadd.f32 %v3689_v36, %v3310_v43  ;;  %v3313_v10 = vadd.f32 %v6996_v22, %v9615_v12 }
 0x206   : > { %v7100_v17 = vpop.f32.mrf.mxu0  ;;  %v3089_v53 = vpop.f32.mrf.mxu1 }
 0x207   : > { %v9859_v6 = vadd.f32 %v7100_v17, %v3313_v10  ;;  %v3312_v29 = vadd.f32 %v3089_v53, %v9624_v49 }
 0x208   : > { %v3699_v20 = vpop.f32.mrf.mxu0  ;;  %v6999_v52 = vpop.f32.mrf.mxu1 }
 0x209   : > { %v9862_v2 = vadd.f32 %v3699_v20, %v3312_v29  ;;  %v3315_v13 = vadd.f32 %v6999_v52, %v9627_v21  ;;  %v10348_v52 = vld [vmem:[#allocation25_spill] sm:$0xff] }
 0x20a   : > { %v7103_v45 = vpop.f32.mrf.mxu0  ;;  %v3099_v31 = vpop.f32.mrf.mxu1 }
 0x20b   : > { %v9865_v23 = vadd.f32 %v7103_v45, %v3315_v13  ;;  %v3314_v56 = vadd.f32 %v3099_v31, %v9636_v8 }
 0x20c   : > { %v3709_v63 = vpop.f32.mrf.mxu0  ;;  %v7002_v12 = vpop.f32.mrf.mxu1 }
 0x20d   : > { %v9868_v60 = vadd.f32 %v3709_v63, %v3314_v56  ;;  %v3317_v50 = vadd.f32 %v7002_v12, %v9639_v14  ;;  %v9886_v12 = vpop.permute.xlu1 %5138 }
 0x20e   : > { %v7106_v5 = vpop.f32.mrf.mxu0  ;;  %v3109_v49 = vpop.f32.mrf.mxu1 }
 0x20f   : > { %v9871_v61 = vadd.f32 %v7106_v5, %v3317_v50  ;;  %v3316_v30 = vadd.f32 %v3109_v49, %v9648_v24 }
 0x210   : > { %v3719_v43 = vpop.f32.mrf.mxu0  ;;  %v7005_v21 = vpop.f32.mrf.mxu1 }
 0x211   : > { %v9874_v36 = vadd.f32 %v3719_v43, %v3316_v30  ;;  %v3319_v22 = vadd.f32 %v7005_v21, %v9651_v54  ;;  %v9891_v30 = vpop.permute.xlu0 %5128 }
 0x212   : > { %v7109_v10 = vpop.f32.mrf.mxu0  ;;  %v3119_v8 = vpop.f32.mrf.mxu1 }
 0x213   : > { %v9877_v17 = vadd.f32 %v7109_v10, %v3319_v22  ;;  %v3318_v53 = vadd.f32 %v3119_v8, %v9660_v18 }
 0x214   : > { %v3729_v29 = vpop.f32.mrf.mxu0  ;;  %v7008_v14 = vpop.f32.mrf.mxu1 }
 0x215   : > { %v9880_v20 = vadd.f32 %v3729_v29, %v3318_v53  ;;  %v3321_v13 = vadd.f32 %v7008_v14, %v10348_v52  ;;  %v9899_v14 = vpop.permute.xlu1 %5143 }
 0x216   : > { %v7112_v45 = vpop.f32.mrf.mxu0  ;;  %v3129_v24 = vpop.f32.mrf.mxu1 }
 0x217   : > { %v9883_v31 = vadd.f32 %v7112_v45, %v3321_v13  ;;  %v3320_v56 = vadd.f32 %v3129_v24, %v9672_v15  ;;  %v9904_v24 = vpop.permute.xlu0 %5133 }
 0x218   : > { %v3739_v63 = vpop.f32.mrf.mxu0  ;;  %v7011_v54 = vpop.f32.mrf.mxu1 }
 0x219   : > { %v9888_v50 = vadd.f32 %v3739_v63, %v3320_v56  ;;  %v3323_v18 = vadd.f32 %v7011_v54, %v9675_v28 }
 0x21a   : > { %v7115_v5 = vpop.f32.mrf.mxu0  ;;  %v3139_v49 = vpop.f32.mrf.mxu1 }
 0x21b   : > { %v9893_v43 = vadd.f32 %v7115_v5, %v3323_v18  ;;  %v3322_v21 = vadd.f32 %v3139_v49, %v9684_v9 }
 0x21c   : > { %v3749_v22 = vpop.f32.mrf.mxu0  ;;  %v7014_v10 = vpop.f32.mrf.mxu1 }
 0x21d   : > { %v9896_v8 = vadd.f32 %v3749_v22, %v3322_v21  ;;  %v3325_v15 = vadd.f32 %v7014_v10, %v9687_v62  ;;  %v9912_v21 = vpop.permute.xlu1 %5153 }
 0x21e   : > { %v7118_v53 = vpop.f32.mrf.mxu0  ;;  %v3149_v29 = vpop.f32.mrf.mxu1 }
 0x21f   : > { %v9901_v52 = vadd.f32 %v7118_v53, %v3325_v15  ;;  %v3324_v28 = vadd.f32 %v3149_v29, %v9696_v57  ;;  %v10353_v57 = vld [vmem:[#allocation26_spill] sm:$0xff]  ;;  %v9917_v29 = vpop.permute.xlu0 %5148 }
 0x220   : > { %v3759_v13 = vpop.f32.mrf.mxu0  ;;  %v7017_v45 = vpop.f32.mrf.mxu1 }
 0x221   : > { %10349 = vst [vmem:[#allocation7_spill] sm:$0xff] %v9901_v52  ;;  %v9906_v56 = vadd.f32 %v3759_v13, %v3324_v28  ;;  %v3327_v9 = vadd.f32 %v7017_v45, %v9699_v26  ;;  %v10355_v26 = vld [vmem:[#allocation27_spill] sm:$0xff] }
 0x222   : > { %v7121_v63 = vpop.f32.mrf.mxu0  ;;  %v3159_v54 = vpop.f32.mrf.mxu1 }
 0x223   : > { %10350 = vst [vmem:[#allocation6_spill] sm:$0xff] %v9906_v56  ;;  %v9909_v18 = vadd.f32 %v7121_v63, %v3327_v9  ;;  %v3326_v62 = vadd.f32 %v3159_v54, %v9709_v0  ;;  %v10357_v0 = vld [vmem:[#allocation14_spill] sm:$0xff] }
 0x224   : > { %v3769_v5 = vpop.f32.mrf.mxu0  ;;  %v7020_v49 = vpop.f32.mrf.mxu1 }
 0x225   : > { %10351 = vst [vmem:[#allocation9_spill] sm:$0xff] %v9909_v18  ;;  %v9914_v22 = vadd.f32 %v3769_v5, %v3326_v62  ;;  %v3329_v10 = vadd.f32 %v7020_v49, %v10353_v57  ;;  %v9925_v62 = vpop.permute.xlu1 %5163  ;;  %v10359_v49 = vld [vmem:[#allocation28_spill] sm:$0xff] }
 0x226   : > { %v7124_v15 = vpop.f32.mrf.mxu0  ;;  %v3169_v53 = vpop.f32.mrf.mxu1 }
 0x227   : > { %10352 = vst [vmem:[#allocation10_spill] sm:$0xff] %v9914_v22  ;;  %v9919_v28 = vadd.f32 %v7124_v15, %v3329_v10  ;;  %v3328_v13 = vadd.f32 %v3169_v53, %v10355_v26  ;;  %v9930_v10 = vpop.permute.xlu0 %5158  ;;  %v10360_v53 = vld [vmem:[#allocation29_spill] sm:$0xff] }
 0x228   : > { %v3779_v45 = vpop.f32.mrf.mxu0  ;;  %v7023_v9 = vpop.f32.mrf.mxu1 }
 0x229   : > { %10354 = vst [vmem:[#allocation5_spill] sm:$0xff] %v9919_v28  ;;  %v9922_v63 = vadd.f32 %v3779_v45, %v3328_v13  ;;  %v3331_v54 = vadd.f32 %v7023_v9, %v10357_v0 }
 0x22a   : > { %v7127_v18 = vpop.f32.mrf.mxu0  ;;  %v3179_v56 = vpop.f32.mrf.mxu1 }
 0x22b   : > { %10356 = vst [vmem:[#allocation3_spill] sm:$0xff] %v9922_v63  ;;  %v9927_v5 = vadd.f32 %v7127_v18, %v3331_v54  ;;  %v3330_v57 = vadd.f32 %v3179_v56, %v10359_v49  ;;  %v9938_v18 = vpop.permute.xlu1 %5173 }
 0x22c   : > { %v3789_v22 = vpop.f32.mrf.mxu0  ;;  %v7026_v52 = vpop.f32.mrf.mxu1 }
 0x22d   : > { %10358 = vst [vmem:[#allocation4_spill] sm:$0xff] %v9927_v5  ;;  %v9932_v15 = vadd.f32 %v3789_v22, %v3330_v57  ;;  %v3333_v26 = vadd.f32 %v7026_v52, %v10360_v53  ;;  %v9943_v22 = vpop.permute.xlu0 %5168 }
 0x22e   : > { %v7130_v13 = vpop.f32.mrf.mxu0  ;;  %v3189_v45 = vpop.f32.mrf.mxu1 }
 0x22f   : > { %v9935_v63 = vadd.f32 %v7130_v13, %v3333_v26  ;;  %v3332_v9 = vadd.f32 %v3189_v45, %v9751_v59 }
 0x230   : > { %v3799_v0 = vpop.f32.mrf.mxu0  ;;  %v7029_v28 = vpop.f32.mrf.mxu1 }
 0x231   : > { %10361 = vst [vmem:[#allocation11_spill] sm:$0xff] %v9935_v63  ;;  %v9940_v54 = vadd.f32 %v3799_v0, %v3332_v9  ;;  %v3335_v56 = vadd.f32 %v7029_v28, %v9755_v19  ;;  %v9951_v9 = vpop.permute.xlu1 %5183 }
 0x232   : > { %v7133_v49 = vpop.f32.mrf.mxu0  ;;  %v3199_v5 = vpop.f32.mrf.mxu1 }
 0x233   : > { %10362 = vst [vmem:[#allocation13_spill] sm:$0xff] %v9940_v54  ;;  %v9945_v57 = vadd.f32 %v7133_v49, %v3335_v56  ;;  %v3334_v52 = vadd.f32 %v3199_v5, %v9765_v37  ;;  %v9956_v56 = vpop.permute.xlu0 %5178 }
 0x234   : > { %v3809_v53 = vpop.f32.mrf.mxu0  ;;  %v7032_v26 = vpop.f32.mrf.mxu1 }
 0x235   : > { %v9948_v13 = vadd.f32 %v3809_v53, %v3334_v52  ;;  %v3337_v59 = vadd.f32 %v7032_v26, %v9769_v7 }
 0x236   : > { %v7136_v45 = vpop.f32.mrf.mxu0  ;;  %v3209_v63 = vpop.f32.mrf.mxu1 }
 0x237   : > { %10363 = vst [vmem:[#allocation8_spill] sm:$0xff] %v9948_v13  ;;  %v9953_v0 = vadd.f32 %v7136_v45, %v3337_v59  ;;  %v3336_v19 = vadd.f32 %v3209_v63, %v9779_v32  ;;  %v9964_v59 = vpop.permute.xlu1 %5193 }
 0x238   : > { %v3819_v28 = vpop.f32.mrf.mxu0  ;;  %v7035_v54 = vpop.f32.mrf.mxu1 }
 0x239   : > { %v9958_v49 = vadd.f32 %v3819_v28, %v3336_v19  ;;  %v3339_v37 = vadd.f32 %v7035_v54, %v9783_v55  ;;  %v9969_v28 = vpop.permute.xlu0 %5188 }
 0x23a   : > { %v7139_v5 = vpop.f32.mrf.mxu0  ;;  %v3219_v52 = vpop.f32.mrf.mxu1 }
 0x23b   : > { %10364 = vst [vmem:[#allocation12_spill] sm:$0xff] %v9958_v49  ;;  %v9961_v53 = vadd.f32 %v7139_v5, %v3339_v37  ;;  %v3338_v7 = vadd.f32 %v3219_v52, %v9791_v44 }
 0x23c   : > { %v3829_v26 = vpop.f32.mrf.mxu0  ;;  %v7038_v13 = vpop.f32.mrf.mxu1 }
 0x23d   : > { %10365 = vst [vmem:[#allocation16_spill] sm:$0xff] %v9961_v53  ;;  %v9966_v45 = vadd.f32 %v3829_v26, %v3338_v7  ;;  %v3341_v32 = vadd.f32 %v7038_v13, %v9795_v41  ;;  %v9977_v26 = vpop.permute.xlu1 %5203 }
 0x23e   : > { %v7142_v63 = vpop.f32.mrf.mxu0  ;;  %v3229_v19 = vpop.f32.mrf.mxu1 }
 0x23f   : > { %10366 = vst [vmem:[#allocation18_spill] sm:$0xff] %v9966_v45  ;;  %v9971_v55 = vadd.f32 %v7142_v63, %v3341_v32  ;;  %v3340_v54 = vadd.f32 %v3229_v19, %v9802_v4  ;;  %v9983_v32 = vpop.permute.xlu0 %5198 }
 0x240   : > { %v3839_v37 = vpop.f32.mrf.mxu0  ;;  %v7041_v5 = vpop.f32.mrf.mxu1 }
 0x241   : > { %10367 = vst [vmem:[#allocation15_spill] sm:$0xff] %v9971_v55  ;;  %v9974_v44 = vadd.f32 %v3839_v37, %v3340_v54  ;;  %v3343_v52 = vadd.f32 %v7041_v5, %v9805_v11  ;;  %v9994_v5 = vpop.permute.xlu1 %5213 }
 0x242   : > { %v7145_v53 = vpop.f32.mrf.mxu0  ;;  %v3239_v7 = vpop.f32.mrf.mxu1 }
 0x243   : > { %10368 = vst [vmem:[#allocation17_spill] sm:$0xff] %v9974_v44  ;;  %v9979_v41 = vadd.f32 %v7145_v53, %v3343_v52  ;;  %v3342_v13 = vadd.f32 %v3239_v7, %v9808_v35 }
 0x244   : > { %v3849_v45 = vpop.f32.mrf.mxu0  ;;  %v7180_v49 = vpop.f32.mrf.mxu1 }
 0x245   : > { %10369 = vst [vmem:[#allocation20_spill] sm:$0xff] %v9979_v41  ;;  %v9985_v4 = vadd.f32 %v3849_v45, %v3342_v13  ;;  %v4373_v63 = vadd.f32 %v7180_v49, %v9811_v42  ;;  %v9998_v13 = vpop.permute.xlu0 %5208  ;;  %v10006_v55 = vpop.permute.xlu1 %5223 }
 0x246   : > { %v7284_v19 = vpop.f32.mrf.mxu0  ;;  %v4085_v54 = vpop.f32.mrf.mxu1 }
 0x247   : > { %10370 = vst [vmem:[#allocation21_spill] sm:$0xff] %v9985_v4  ;;  %v4935_v11 = vadd.f32 %v7284_v19, %v4373_v63  ;;  %v4372_v37 = vadd.f32 %v4085_v54, %v9814_v33 }
 0x248   : > { %v4647_v35 = vpop.f32.mrf.mxu0  ;;  %v7183_v53 = vpop.f32.mrf.mxu1 }
 0x249   : > { %v5367_v45 = vmul.f32 %v9904_v24, %v4935_v11  ;;  %v4934_v52 = vadd.f32 %v4647_v35, %v4372_v37  ;;  %v4375_v42 = vadd.f32 %v7183_v53, %v9817_v34 }
 0x24a   : > { %v7287_v49 = vpop.f32.mrf.mxu0  ;;  %v4095_v7 = vpop.f32.mrf.mxu1 }
 0x24b   : > { %5415 = vst [vmem:[%s9992_s12 + $0x8] sm:$0xff] %v5367_v45  ;;  %v5366_v33 = vmul.f32 %v9891_v30, %v4934_v52  ;;  %v4937_v63 = vadd.f32 %v7287_v49, %v4375_v42  ;;  %v4374_v19 = vadd.f32 %v4095_v7, %v9820_v48  ;;  %v5517_v54 = vmul.f32 %v5367_v45, %v5367_v45  ;;  %v10011_v7 = vpop.permute.xlu0 %5218 }
 0x24c   : > { %v4657_v4 = vpop.f32.mrf.mxu0  ;;  %v7186_v41 = vpop.f32.mrf.mxu1 }
 0x24d   : > { %5414 = vst [vmem:[%s9992_s12] sm:$0xff] %v5366_v33  ;;  %v5462_v44 = vadd.f32 %v5367_v45, %v5366_v33  ;;  %v5516_v24 = vmul.f32 %v5366_v33, %v5366_v33  ;;  %v5369_v34 = vmul.f32 %v9899_v14, %v4937_v63  ;;  %v4936_v11 = vadd.f32 %v4657_v4, %v4374_v19 }
 0x24e   : > { %v4377_v37 = vadd.f32 %v7186_v41, %v9823_v46  ;;  %v7290_v35 = vpop.f32.mrf.mxu0  ;;  %v4105_v53 = vpop.f32.mrf.mxu1 }
 0x24f   : > { %v5564_v30 = vadd.f32 %v5517_v54, %v5516_v24  ;;  %5417 = vst [vmem:[%s9992_s12 + $0x18] sm:$0xff] %v5369_v34  ;;  %v5368_v48 = vmul.f32 %v9886_v12, %v4936_v11  ;;  %v4376_v52 = vadd.f32 %v4105_v53, %v9826_v58  ;;  %v5519_v33 = vmul.f32 %v5369_v34, %v5369_v34  ;;  %v10019_v53 = vpop.permute.xlu1 %5233 }
 0x250   : > { %v4939_v42 = vadd.f32 %v7290_v35, %v4377_v37  ;;  %v4667_v49 = vpop.f32.mrf.mxu0  ;;  %v7189_v45 = vpop.f32.mrf.mxu1 }
 0x251   : > { %5416 = vst [vmem:[%s9992_s12 + $0x10] sm:$0xff] %v5368_v48  ;;  %v5463_v14 = vadd.f32 %v5462_v44, %v5368_v48  ;;  %v5518_v4 = vmul.f32 %v5368_v48, %v5368_v48  ;;  %v4938_v46 = vadd.f32 %v4667_v49, %v4376_v52  ;;  %v4379_v41 = vadd.f32 %v7189_v45, %v9829_v16  ;;  %v10024_v49 = vpop.permute.xlu0 %5228 }
 0x252   : > { %v5371_v63 = vmul.f32 %v9912_v21, %v4939_v42  ;;  %v7293_v19 = vpop.f32.mrf.mxu0  ;;  %v4115_v12 = vpop.f32.mrf.mxu1 }
 0x253   : > { %v5565_v54 = vadd.f32 %v5564_v30, %v5518_v4  ;;  %v5370_v58 = vmul.f32 %v9917_v29, %v4938_v46  ;;  %v5464_v24 = vadd.f32 %v5463_v14, %v5369_v34  ;;  %v4941_v11 = vadd.f32 %v7293_v19, %v4379_v41 }
 0x254   : > { %5419 = vst [vmem:[%s9992_s12 + $0x28] sm:$0xff] %v5371_v63  ;;  %v4378_v37 = vadd.f32 %v4115_v12, %v9832_v1  ;;  %v4677_v44 = vpop.f32.mrf.mxu0  ;;  %v7192_v35 = vpop.f32.mrf.mxu1  ;;  %v5521_v1 = vmul.f32 %v5371_v63, %v5371_v63 }
 0x255   : > { %5418 = vst [vmem:[%s9992_s12 + $0x20] sm:$0xff] %v5370_v58  ;;  %v5465_v16 = vadd.f32 %v5464_v24, %v5370_v58  ;;  %v5520_v48 = vmul.f32 %v5370_v58, %v5370_v58  ;;  %v5566_v52 = vadd.f32 %v5565_v54, %v5519_v33  ;;  %v5373_v21 = vmul.f32 %v9925_v62, %v4941_v11 }
 0x256   : > { %v4940_v42 = vadd.f32 %v4677_v44, %v4378_v37  ;;  %v4381_v30 = vadd.f32 %v7192_v35, %v9835_v47  ;;  %v7296_v29 = vpop.f32.mrf.mxu0  ;;  %v4125_v34 = vpop.f32.mrf.mxu1 }
 0x257   : > { %v5567_v45 = vadd.f32 %v5566_v52, %v5520_v48  ;;  %5421 = vst [vmem:[%s9992_s12 + $0x38] sm:$0xff] %v5373_v21  ;;  %v5466_v14 = vadd.f32 %v5465_v16, %v5371_v63  ;;  %v4380_v4 = vadd.f32 %v4125_v34, %v9838_v39  ;;  %v10032_v37 = vpop.permute.xlu1 %5243  ;;  %v5523_v35 = vmul.f32 %v5373_v21, %v5373_v21 }
 0x258   : > { %v5372_v46 = vmul.f32 %v9930_v10, %v4940_v42  ;;  %v4943_v41 = vadd.f32 %v7296_v29, %v4381_v30  ;;  %v4687_v33 = vpop.f32.mrf.mxu0  ;;  %v7195_v19 = vpop.f32.mrf.mxu1 }
 0x259   : > { %v5568_v62 = vadd.f32 %v5567_v45, %v5521_v1  ;;  %v4942_v12 = vadd.f32 %v4687_v33, %v4380_v4  ;;  %v4383_v47 = vadd.f32 %v7195_v19, %v9841_v51  ;;  %v10037_v42 = vpop.permute.xlu0 %5238 }
 0x25a   : > { %5420 = vst [vmem:[%s9992_s12 + $0x30] sm:$0xff] %v5372_v46  ;;  %v5467_v54 = vadd.f32 %v5466_v14, %v5372_v46  ;;  %v5522_v58 = vmul.f32 %v5372_v46, %v5372_v46  ;;  %v5375_v24 = vmul.f32 %v9938_v18, %v4943_v41  ;;  %v7299_v11 = vpop.f32.mrf.mxu0  ;;  %v4135_v63 = vpop.f32.mrf.mxu1 }
 0x25b   : > { %v5374_v39 = vmul.f32 %v9943_v22, %v4942_v12  ;;  %v4945_v10 = vadd.f32 %v7299_v11, %v4383_v47  ;;  %v4382_v44 = vadd.f32 %v4135_v63, %v9844_v38 }
 0x25c   : > { %v5569_v16 = vadd.f32 %v5568_v62, %v5522_v58  ;;  %5423 = vst [vmem:[%s9992_s12 + $0x48] sm:$0xff] %v5375_v24  ;;  %v5468_v51 = vadd.f32 %v5467_v54, %v5373_v21  ;;  %v4697_v48 = vpop.f32.mrf.mxu0  ;;  %v7198_v52 = vpop.f32.mrf.mxu1  ;;  %v5525_v46 = vmul.f32 %v5375_v24, %v5375_v24 }
 0x25d   : > { %5422 = vst [vmem:[%s9992_s12 + $0x40] sm:$0xff] %v5374_v39  ;;  %v5524_v18 = vmul.f32 %v5374_v39, %v5374_v39  ;;  %v5377_v30 = vmul.f32 %v9951_v9, %v4945_v10  ;;  %v4944_v29 = vadd.f32 %v4697_v48, %v4382_v44  ;;  %v4385_v22 = vadd.f32 %v7198_v52, %v9847_v27  ;;  %v10045_v62 = vpop.permute.xlu1 %5253  ;;  %v10050_v63 = vpop.permute.xlu0 %5248 }
 0x25e   : > { %v5469_v34 = vadd.f32 %v5468_v51, %v5374_v39  ;;  %v5570_v1 = vadd.f32 %v5569_v16, %v5523_v35  ;;  %v7302_v38 = vpop.f32.mrf.mxu0  ;;  %v4145_v45 = vpop.f32.mrf.mxu1 }
 0x25f   : > { %5425 = vst [vmem:[%s9992_s12 + $0x58] sm:$0xff] %v5377_v30  ;;  %v5376_v14 = vmul.f32 %v9956_v56, %v4944_v29  ;;  %v4947_v21 = vadd.f32 %v7302_v38, %v4385_v22  ;;  %v4384_v4 = vadd.f32 %v4145_v45, %v9850_v25  ;;  %v5527_v44 = vmul.f32 %v5377_v30, %v5377_v30 }
 0x260   : > { %v5571_v41 = vadd.f32 %v5570_v1, %v5524_v18  ;;  %v5470_v33 = vadd.f32 %v5469_v34, %v5375_v24  ;;  %v4707_v19 = vpop.f32.mrf.mxu0  ;;  %v7201_v9 = vpop.f32.mrf.mxu1 }
 0x261   : > { %5424 = vst [vmem:[%s9992_s12 + $0x50] sm:$0xff] %v5376_v14  ;;  %v5526_v27 = vmul.f32 %v5376_v14, %v5376_v14  ;;  %v5379_v12 = vmul.f32 %v9964_v59, %v4947_v21  ;;  %v4946_v47 = vadd.f32 %v4707_v19, %v4384_v4  ;;  %v4387_v54 = vadd.f32 %v7201_v9, %v9853_v40  ;;  %v10058_v1 = vpop.permute.xlu1 %5263 }
 0x262   : > { %v5471_v56 = vadd.f32 %v5470_v33, %v5376_v14  ;;  %v5572_v58 = vadd.f32 %v5571_v41, %v5525_v46  ;;  %v7305_v11 = vpop.f32.mrf.mxu0  ;;  %v4155_v25 = vpop.f32.mrf.mxu1 }
 0x263   : > { %5427 = vst [vmem:[%s9992_s12 + $0x68] sm:$0xff] %v5379_v12  ;;  %v5378_v24 = vmul.f32 %v9969_v28, %v4946_v47  ;;  %v4949_v39 = vadd.f32 %v7305_v11, %v4387_v54  ;;  %v4386_v10 = vadd.f32 %v4155_v25, %v9856_v3  ;;  %v5529_v45 = vmul.f32 %v5379_v12, %v5379_v12 }
 0x264   : > { %v5573_v35 = vadd.f32 %v5572_v58, %v5526_v27  ;;  %v5472_v59 = vadd.f32 %v5471_v56, %v5377_v30  ;;  %v4717_v16 = vpop.f32.mrf.mxu0  ;;  %v7204_v51 = vpop.f32.mrf.mxu1 }
 0x265   : > { %5426 = vst [vmem:[%s9992_s12 + $0x60] sm:$0xff] %v5378_v24  ;;  %v5528_v40 = vmul.f32 %v5378_v24, %v5378_v24  ;;  %v5381_v48 = vmul.f32 %v9977_v26, %v4949_v39  ;;  %v4948_v52 = vadd.f32 %v4717_v16, %v4386_v10  ;;  %v4389_v18 = vadd.f32 %v7204_v51, %v9859_v6  ;;  %v10063_v6 = vpop.permute.xlu0 %5258 }
 0x266   : > { %v5473_v29 = vadd.f32 %v5472_v59, %v5378_v24  ;;  %v5574_v22 = vadd.f32 %v5573_v35, %v5527_v44  ;;  %v7308_v28 = vpop.f32.mrf.mxu0  ;;  %v4165_v34 = vpop.f32.mrf.mxu1 }
 0x267   : > { %5429 = vst [vmem:[%s9992_s12 + $0x78] sm:$0xff] %v5381_v48  ;;  %v5380_v3 = vmul.f32 %v9983_v32, %v4948_v52  ;;  %v4951_v30 = vadd.f32 %v7308_v28, %v4389_v18  ;;  %v4388_v38 = vadd.f32 %v4165_v34, %v9862_v2  ;;  %v5531_v56 = vmul.f32 %v5381_v48, %v5381_v48  ;;  %v10071_v24 = vpop.permute.xlu1 %5273 }
 0x268   : > { %v5575_v14 = vadd.f32 %v5574_v22, %v5528_v40  ;;  %v5474_v26 = vadd.f32 %v5473_v29, %v5379_v12  ;;  %v4727_v21 = vpop.f32.mrf.mxu0  ;;  %v7207_v4 = vpop.f32.mrf.mxu1 }
 0x269   : > { %5428 = vst [vmem:[%s9992_s12 + $0x70] sm:$0xff] %v5380_v3  ;;  %v5530_v46 = vmul.f32 %v5380_v3, %v5380_v3  ;;  %v5383_v41 = vmul.f32 %v9994_v5, %v4951_v30  ;;  %v4950_v33 = vadd.f32 %v4727_v21, %v4388_v38  ;;  %v4391_v19 = vadd.f32 %v7207_v4, %v9865_v23  ;;  %v10076_v16 = vpop.permute.xlu0 %5268 }
 0x26a   : > { %v5475_v32 = vadd.f32 %v5474_v26, %v5380_v3  ;;  %v5576_v9 = vadd.f32 %v5575_v14, %v5529_v45  ;;  %v7311_v27 = vpop.f32.mrf.mxu0  ;;  %v4175_v2 = vpop.f32.mrf.mxu1 }
 0x26b   : > { %5431 = vst [vmem:[%s9992_s12 + $0x88] sm:$0xff] %v5383_v41  ;;  %v5382_v47 = vmul.f32 %v9998_v13, %v4950_v33  ;;  %v4953_v12 = vadd.f32 %v7311_v27, %v4391_v19  ;;  %v4390_v54 = vadd.f32 %v4175_v2, %v9868_v60  ;;  %v5533_v52 = vmul.f32 %v5383_v41, %v5383_v41  ;;  %v10084_v14 = vpop.permute.xlu1 %5283 }
 0x26c   : > { %v5577_v58 = vadd.f32 %v5576_v9, %v5530_v46  ;;  %v5476_v11 = vadd.f32 %v5475_v32, %v5381_v48  ;;  %v4737_v25 = vpop.f32.mrf.mxu0  ;;  %v7210_v5 = vpop.f32.mrf.mxu1 }
 0x26d   : > { %5430 = vst [vmem:[%s9992_s12 + $0x80] sm:$0xff] %v5382_v47  ;;  %v5532_v23 = vmul.f32 %v5382_v47, %v5382_v47  ;;  %v5385_v39 = vmul.f32 %v10006_v55, %v4953_v12  ;;  %v4952_v10 = vadd.f32 %v4737_v25, %v4390_v54  ;;  %v4393_v44 = vadd.f32 %v7210_v5, %v9871_v61 }
 0x26e   : > { %v5477_v13 = vadd.f32 %v5476_v11, %v5382_v47  ;;  %v5578_v35 = vadd.f32 %v5577_v58, %v5531_v56  ;;  %v7314_v59 = vpop.f32.mrf.mxu0  ;;  %v4185_v60 = vpop.f32.mrf.mxu1 }
 0x26f   : > { %5433 = vst [vmem:[%s9992_s12 + $0x98] sm:$0xff] %v5385_v39  ;;  %v5384_v51 = vmul.f32 %v10011_v7, %v4952_v10  ;;  %v4955_v40 = vadd.f32 %v7314_v59, %v4393_v44  ;;  %v4392_v48 = vadd.f32 %v4185_v60, %v9874_v36  ;;  %v5535_v4 = vmul.f32 %v5385_v39, %v5385_v39 }
 0x270   : > { %v5579_v18 = vadd.f32 %v5578_v35, %v5532_v23  ;;  %v5478_v55 = vadd.f32 %v5477_v13, %v5383_v41  ;;  %v4747_v29 = vpop.f32.mrf.mxu0  ;;  %v7213_v22 = vpop.f32.mrf.mxu1 }
 0x271   : > { %5432 = vst [vmem:[%s9992_s12 + $0x90] sm:$0xff] %v5384_v51  ;;  %v5534_v61 = vmul.f32 %v5384_v51, %v5384_v51  ;;  %v5387_v28 = vmul.f32 %v10019_v53, %v4955_v40  ;;  %v4954_v34 = vadd.f32 %v4747_v29, %v4392_v48  ;;  %v4395_v3 = vadd.f32 %v7213_v22, %v9877_v17  ;;  %v10089_v17 = vpop.permute.xlu0 %5278  ;;  %v10097_v23 = vpop.permute.xlu1 %5293 }
 0x272   : > { %v5479_v30 = vadd.f32 %v5478_v55, %v5384_v51  ;;  %v5580_v38 = vadd.f32 %v5579_v18, %v5533_v52  ;;  %v7317_v7 = vpop.f32.mrf.mxu0  ;;  %v4195_v45 = vpop.f32.mrf.mxu1 }
 0x273   : > { %5435 = vst [vmem:[%s9992_s12 + $0xa8] sm:$0xff] %v5387_v28  ;;  %v5386_v36 = vmul.f32 %v10024_v49, %v4954_v34  ;;  %v4957_v26 = vadd.f32 %v7317_v7, %v4395_v3  ;;  %v4394_v21 = vadd.f32 %v4195_v45, %v9880_v20  ;;  %v5537_v58 = vmul.f32 %v5387_v28, %v5387_v28  ;;  %v10372_v45 = vld [vmem:[#allocation6_spill] sm:$0xff] }
 0x274   : > { %v5581_v46 = vadd.f32 %v5580_v38, %v5534_v61  ;;  %v5480_v53 = vadd.f32 %v5479_v30, %v5385_v39  ;;  %v4757_v41 = vpop.f32.mrf.mxu0  ;;  %v7216_v33 = vpop.f32.mrf.mxu1  ;;  %v10371_v61 = vld [vmem:[#allocation7_spill] sm:$0xff] }
 0x275   : > { %5434 = vst [vmem:[%s9992_s12 + $0xa0] sm:$0xff] %v5386_v36  ;;  %v5536_v19 = vmul.f32 %v5386_v36, %v5386_v36  ;;  %v5389_v32 = vmul.f32 %v10032_v37, %v4957_v26  ;;  %v4956_v9 = vadd.f32 %v4757_v41, %v4394_v21  ;;  %v4397_v27 = vadd.f32 %v7216_v33, %v9883_v31  ;;  %v10102_v59 = vpop.permute.xlu0 %5288  ;;  %v10110_v38 = vpop.permute.xlu1 %5303 }
 0x276   : > { %v5481_v49 = vadd.f32 %v5480_v53, %v5386_v36  ;;  %v5582_v2 = vadd.f32 %v5581_v46, %v5535_v4  ;;  %v7320_v47 = vpop.f32.mrf.mxu0  ;;  %v4205_v20 = vpop.f32.mrf.mxu1 }
 0x277   : > { %5437 = vst [vmem:[%s9992_s12 + $0xb8] sm:$0xff] %v5389_v32  ;;  %v5388_v12 = vmul.f32 %v10037_v42, %v4956_v9  ;;  %v4959_v54 = vadd.f32 %v7320_v47, %v4397_v27  ;;  %v4396_v56 = vadd.f32 %v4205_v20, %v9888_v50  ;;  %v5539_v48 = vmul.f32 %v5389_v32, %v5389_v32 }
 0x278   : > { %v5583_v11 = vadd.f32 %v5582_v2, %v5536_v19  ;;  %v5482_v25 = vadd.f32 %v5481_v49, %v5387_v28  ;;  %v4767_v5 = vpop.f32.mrf.mxu0  ;;  %v7219_v37 = vpop.f32.mrf.mxu1 }
 0x279   : > { %5436 = vst [vmem:[%s9992_s12 + $0xb0] sm:$0xff] %v5388_v12  ;;  %v5538_v31 = vmul.f32 %v5388_v12, %v5388_v12  ;;  %v5391_v39 = vmul.f32 %v10045_v62, %v4959_v54  ;;  %v4958_v10 = vadd.f32 %v4767_v5, %v4396_v56  ;;  %v4399_v44 = vadd.f32 %v7219_v37, %v9893_v43  ;;  %v10115_v53 = vpop.permute.xlu0 %5298  ;;  %v5314_v5 = vpop.permute.xlu1 %5313 }
 0x27a   : > { %v5483_v42 = vadd.f32 %v5482_v25, %v5388_v12  ;;  %v5584_v13 = vadd.f32 %v5583_v11, %v5537_v58  ;;  %v7323_v35 = vpop.f32.mrf.mxu0  ;;  %v4215_v50 = vpop.f32.mrf.mxu1  ;;  %v10374_v12 = vld [vmem:[#allocation10_spill] sm:$0xff] }
 0x27b   : > { %5439 = vst [vmem:[%s9992_s12 + $0xc8] sm:$0xff] %v5391_v39  ;;  %v5390_v60 = vmul.f32 %v10050_v63, %v4958_v10  ;;  %v4961_v51 = vadd.f32 %v7323_v35, %v4399_v44  ;;  %v4398_v40 = vadd.f32 %v4215_v50, %v9896_v8  ;;  %v5541_v26 = vmul.f32 %v5391_v39, %v5391_v39  ;;  %v10375_v10 = vld [vmem:[#allocation5_spill] sm:$0xff] }
 0x27c   : > { %v5585_v52 = vadd.f32 %v5584_v13, %v5538_v31  ;;  %v5484_v62 = vadd.f32 %v5483_v42, %v5389_v32  ;;  %v4777_v18 = vpop.f32.mrf.mxu0  ;;  %v7222_v55 = vpop.f32.mrf.mxu1  ;;  %v10373_v32 = vld [vmem:[#allocation9_spill] sm:$0xff] }
 0x27d   : > { %5438 = vst [vmem:[%s9992_s12 + $0xc0] sm:$0xff] %v5390_v60  ;;  %v5540_v43 = vmul.f32 %v5390_v60, %v5390_v60  ;;  %v5393_v29 = vmul.f32 %v10058_v1, %v4961_v51  ;;  %v4960_v22 = vadd.f32 %v4777_v18, %v4398_v40  ;;  %v4401_v28 = vadd.f32 %v7222_v55, %v10371_v61  ;;  %v5309_v50 = vpop.permute.xlu0 %5308  ;;  %v10376_v40 = vld [vmem:[#allocation3_spill] sm:$0xff]  ;;  %v10377_v61 = vld [vmem:[#allocation4_spill] sm:$0xff] }
 0x27e   : > { %v5485_v34 = vadd.f32 %v5484_v62, %v5390_v60  ;;  %v5586_v3 = vadd.f32 %v5585_v52, %v5539_v48  ;;  %v7326_v63 = vpop.f32.mrf.mxu0  ;;  %v4225_v30 = vpop.f32.mrf.mxu1 }
 0x27f   : > { %5441 = vst [vmem:[%s9992_s12 + $0xd8] sm:$0xff] %v5393_v29  ;;  %v5392_v8 = vmul.f32 %v10063_v6, %v4960_v22  ;;  %v4963_v7 = vadd.f32 %v7326_v63, %v4401_v28  ;;  %v4400_v36 = vadd.f32 %v4225_v30, %v10372_v45  ;;  %v5543_v56 = vmul.f32 %v5393_v29, %v5393_v29  ;;  %v5324_v30 = vpop.permute.xlu1 %5323 }
 0x280   : > { %v5587_v21 = vadd.f32 %v5586_v3, %v5540_v43  ;;  %v5486_v1 = vadd.f32 %v5485_v34, %v5391_v39  ;;  %v4787_v4 = vpop.f32.mrf.mxu0  ;;  %v7225_v46 = vpop.f32.mrf.mxu1 }
 0x281   : > { %5440 = vst [vmem:[%s9992_s12 + $0xd0] sm:$0xff] %v5392_v8  ;;  %v5542_v41 = vmul.f32 %v5392_v8, %v5392_v8  ;;  %v5395_v33 = vmul.f32 %v10071_v24, %v4963_v7  ;;  %v4962_v19 = vadd.f32 %v4787_v4, %v4400_v36  ;;  %v4403_v9 = vadd.f32 %v7225_v46, %v10373_v32  ;;  %v5319_v4 = vpop.permute.xlu0 %5318 }
 0x282   : > { %v5487_v6 = vadd.f32 %v5486_v1, %v5392_v8  ;;  %v5588_v27 = vadd.f32 %v5587_v21, %v5541_v26  ;;  %v7329_v49 = vpop.f32.mrf.mxu0  ;;  %v4235_v2 = vpop.f32.mrf.mxu1 }
 0x283   : > { %5443 = vst [vmem:[%s9992_s12 + $0xe8] sm:$0xff] %v5395_v33  ;;  %v5394_v47 = vmul.f32 %v10076_v16, %v4962_v19  ;;  %v4965_v20 = vadd.f32 %v7329_v49, %v4403_v9  ;;  %v4402_v54 = vadd.f32 %v4235_v2, %v10374_v12  ;;  %v5545_v52 = vmul.f32 %v5395_v33, %v5395_v33  ;;  %v10378_v19 = vld [vmem:[#allocation11_spill] sm:$0xff]  ;;  %v10379_v2 = vld [vmem:[#allocation13_spill] sm:$0xff] }
 0x284   : > { %v5589_v58 = vadd.f32 %v5588_v27, %v5542_v41  ;;  %v5488_v11 = vadd.f32 %v5487_v6, %v5393_v29  ;;  %v4797_v25 = vpop.f32.mrf.mxu0  ;;  %v7228_v24 = vpop.f32.mrf.mxu1 }
 0x285   : > { %5442 = vst [vmem:[%s9992_s12 + $0xe0] sm:$0xff] %v5394_v47  ;;  %v5544_v37 = vmul.f32 %v5394_v47, %v5394_v47  ;;  %v5397_v31 = vmul.f32 %v10084_v14, %v4965_v20  ;;  %v4964_v39 = vadd.f32 %v4797_v25, %v4402_v54  ;;  %v4405_v44 = vadd.f32 %v7228_v24, %v10375_v10 }
 0x286   : > { %v5489_v42 = vadd.f32 %v5488_v11, %v5394_v47  ;;  %v5590_v16 = vadd.f32 %v5589_v58, %v5543_v56  ;;  %v7332_v13 = vpop.f32.mrf.mxu0  ;;  %v4245_v35 = vpop.f32.mrf.mxu1 }
 0x287   : > { %5445 = vst [vmem:[%s9992_s12 + $0xf8] sm:$0xff] %v5397_v31  ;;  %v5396_v60 = vmul.f32 %v10089_v17, %v4964_v39  ;;  %v4967_v51 = vadd.f32 %v7332_v13, %v4405_v44  ;;  %v4404_v48 = vadd.f32 %v4245_v35, %v10376_v40  ;;  %v5547_v36 = vmul.f32 %v5397_v31, %v5397_v31  ;;  %v5334_v58 = vpop.permute.xlu1 %5333  ;;  %v5329_v44 = vpop.permute.xlu0 %5328  ;;  %v10380_v13 = vld [vmem:[#allocation8_spill] sm:$0xff] }
 0x288   : > { %v5591_v62 = vadd.f32 %v5590_v16, %v5544_v37  ;;  %v5490_v18 = vadd.f32 %v5489_v42, %v5395_v33  ;;  %v4807_v14 = vpop.f32.mrf.mxu0  ;;  %v7231_v55 = vpop.f32.mrf.mxu1 }
 0x289   : > { %5444 = vst [vmem:[%s9992_s12 + $0xf0] sm:$0xff] %v5396_v60  ;;  %v5546_v43 = vmul.f32 %v5396_v60, %v5396_v60  ;;  %v5399_v29 = vmul.f32 %v10097_v23, %v4967_v51  ;;  %v4966_v22 = vadd.f32 %v4807_v14, %v4404_v48  ;;  %v4407_v28 = vadd.f32 %v7231_v55, %v10377_v61 }
 0x28a   : > { %v5491_v34 = vadd.f32 %v5490_v18, %v5396_v60  ;;  %v5592_v3 = vadd.f32 %v5591_v62, %v5545_v52  ;;  %v7335_v17 = vpop.f32.mrf.mxu0  ;;  %v4255_v63 = vpop.f32.mrf.mxu1 }
 0x28b   : > { %5447 = vst [vmem:[%s9992_s12 + $0x108] sm:$0xff] %v5399_v29  ;;  %v5398_v8 = vmul.f32 %v10102_v59, %v4966_v22  ;;  %v4969_v7 = vadd.f32 %v7335_v17, %v4407_v28  ;;  %v4406_v45 = vadd.f32 %v4255_v63, %v9932_v15  ;;  %v5549_v20 = vmul.f32 %v5399_v29, %v5399_v29  ;;  %v10381_v28 = vld [vmem:[#allocation12_spill] sm:$0xff] }
 0x28c   : > { %v5593_v26 = vadd.f32 %v5592_v3, %v5546_v43  ;;  %v5492_v21 = vadd.f32 %v5491_v34, %v5397_v31  ;;  %v4817_v23 = vpop.f32.mrf.mxu0  ;;  %v7234_v1 = vpop.f32.mrf.mxu1 }
 0x28d   : > { %5446 = vst [vmem:[%s9992_s12 + $0x100] sm:$0xff] %v5398_v8  ;;  %v5548_v46 = vmul.f32 %v5398_v8, %v5398_v8  ;;  %v5401_v41 = vmul.f32 %v10110_v38, %v4969_v7  ;;  %v4968_v33 = vadd.f32 %v4817_v23, %v4406_v45  ;;  %v4409_v32 = vadd.f32 %v7234_v1, %v10378_v19  ;;  %v5339_v7 = vpop.permute.xlu0 %5338  ;;  %v10383_v19 = vld [vmem:[#allocation18_spill] sm:$0xff] }
 0x28e   : > { %v5493_v9 = vadd.f32 %v5492_v21, %v5398_v8  ;;  %v5594_v59 = vadd.f32 %v5593_v26, %v5547_v36  ;;  %v7338_v6 = vpop.f32.mrf.mxu0  ;;  %v4265_v27 = vpop.f32.mrf.mxu1  ;;  %v10382_v26 = vld [vmem:[#allocation16_spill] sm:$0xff] }
 0x28f   : > { %5449 = vst [vmem:[%s9992_s12 + $0x118] sm:$0xff] %v5401_v41  ;;  %v5400_v15 = vmul.f32 %v10115_v53, %v4968_v33  ;;  %v4971_v49 = vadd.f32 %v7338_v6, %v4409_v32  ;;  %v4408_v47 = vadd.f32 %v4265_v27, %v10379_v2  ;;  %v5551_v60 = vmul.f32 %v5401_v41, %v5401_v41 }
 0x290   : > { %v5595_v12 = vadd.f32 %v5594_v59, %v5548_v46  ;;  %v5494_v54 = vadd.f32 %v5493_v9, %v5399_v29  ;;  %v4827_v56 = vpop.f32.mrf.mxu0  ;;  %v7237_v38 = vpop.f32.mrf.mxu1 }
 0x291   : > { %5448 = vst [vmem:[%s9992_s12 + $0x110] sm:$0xff] %v5400_v15  ;;  %v5550_v11 = vmul.f32 %v5400_v15, %v5400_v15  ;;  %v5403_v25 = vmul.f32 %v5314_v5, %v4971_v49  ;;  %v4970_v24 = vadd.f32 %v4827_v56, %v4408_v47  ;;  %v4411_v37 = vadd.f32 %v7237_v38, %v9945_v57  ;;  %v5344_v29 = vpop.permute.xlu1 %5343 }
 0x292   : > { %v5495_v31 = vadd.f32 %v5494_v54, %v5400_v15  ;;  %v5596_v39 = vadd.f32 %v5595_v12, %v5549_v20  ;;  %v7341_v53 = vpop.f32.mrf.mxu0  ;;  %v4275_v10 = vpop.f32.mrf.mxu1  ;;  %v10384_v12 = vld [vmem:[#allocation15_spill] sm:$0xff] }
 0x293   : > { %5451 = vst [vmem:[%s9992_s12 + $0x128] sm:$0xff] %v5403_v25  ;;  %v5402_v42 = vmul.f32 %v5309_v50, %v4970_v24  ;;  %v4973_v16 = vadd.f32 %v7341_v53, %v4411_v37  ;;  %v4410_v35 = vadd.f32 %v4275_v10, %v10380_v13  ;;  %v5553_v3 = vmul.f32 %v5403_v25, %v5403_v25 }
 0x294   : > { %v5597_v51 = vadd.f32 %v5596_v39, %v5550_v11  ;;  %v5496_v40 = vadd.f32 %v5495_v31, %v5401_v41  ;;  %v4837_v48 = vpop.f32.mrf.mxu0  ;;  %v7240_v5 = vpop.f32.mrf.mxu1  ;;  %v10385_v31 = vld [vmem:[#allocation17_spill] sm:$0xff] }
 0x295   : > { %5450 = vst [vmem:[%s9992_s12 + $0x120] sm:$0xff] %v5402_v42  ;;  %v5552_v52 = vmul.f32 %v5402_v42, %v5402_v42  ;;  %v5405_v62 = vmul.f32 %v5324_v30, %v4973_v16  ;;  %v4972_v57 = vadd.f32 %v4837_v48, %v4410_v35  ;;  %v4413_v18 = vadd.f32 %v7240_v5, %v9953_v0  ;;  %v5354_v49 = vpop.permute.xlu1 %5353 }
 0x296   : > { %v5497_v14 = vadd.f32 %v5496_v40, %v5402_v42  ;;  %v5598_v55 = vadd.f32 %v5597_v51, %v5551_v60  ;;  %v7344_v43 = vpop.f32.mrf.mxu0  ;;  %v4285_v50 = vpop.f32.mrf.mxu1  ;;  %v10386_v51 = vld [vmem:[#allocation20_spill] sm:$0xff] }
 0x297   : > { %5453 = vst [vmem:[%s9992_s12 + $0x138] sm:$0xff] %v5405_v62  ;;  %v5404_v22 = vmul.f32 %v5319_v4, %v4972_v57  ;;  %v4975_v61 = vadd.f32 %v7344_v43, %v4413_v18  ;;  %v4412_v34 = vadd.f32 %v4285_v50, %v10381_v28  ;;  %v5555_v9 = vmul.f32 %v5405_v62, %v5405_v62 }
 0x298   : > { %v5599_v17 = vadd.f32 %v5598_v55, %v5552_v52  ;;  %v5498_v63 = vadd.f32 %v5497_v14, %v5403_v25  ;;  %v4847_v8 = vpop.f32.mrf.mxu0  ;;  %v7243_v30 = vpop.f32.mrf.mxu1  ;;  %v10387_v14 = vld [vmem:[#allocation21_spill] sm:$0xff] }
 0x299   : > { %5452 = vst [vmem:[%s9992_s12 + $0x130] sm:$0xff] %v5404_v22  ;;  %v5554_v0 = vmul.f32 %v5404_v22, %v5404_v22  ;;  %v5407_v45 = vmul.f32 %v5334_v58, %v4975_v61  ;;  %v4974_v36 = vadd.f32 %v4847_v8, %v4412_v34  ;;  %v4415_v21 = vadd.f32 %v7243_v30, %v10382_v26  ;;  %v5349_v25 = vpop.permute.xlu0 %5348  ;;  %v5364_v43 = vpop.permute.xlu1 %5363 }
 0x29a   : > { %v5499_v23 = vadd.f32 %v5498_v63, %v5404_v22  ;;  %v5600_v1 = vadd.f32 %v5599_v17, %v5553_v3  ;;  %v7347_v4 = vpop.f32.mrf.mxu0  ;;  %v4295_v46 = vpop.f32.mrf.mxu1 }
 0x29b   : > { %5455 = vst [vmem:[%s9992_s12 + $0x148] sm:$0xff] %v5407_v45  ;;  %v5406_v41 = vmul.f32 %v5329_v44, %v4974_v36  ;;  %v4977_v33 = vadd.f32 %v7347_v4, %v4415_v21  ;;  %v4414_v32 = vadd.f32 %v4295_v46, %v10383_v19  ;;  %v5557_v53 = vmul.f32 %v5407_v45, %v5407_v45 }
 0x29c   : > { %v5601_v59 = vadd.f32 %v5600_v1, %v5554_v0  ;;  %v5500_v6 = vadd.f32 %v5499_v23, %v5405_v62  ;;  %v4857_v27 = vpop.f32.mrf.mxu0  ;;  %v7246_v15 = vpop.f32.mrf.mxu1 }
 0x29d   : > { %5454 = vst [vmem:[%s9992_s12 + $0x140] sm:$0xff] %v5406_v41  ;;  %v5556_v2 = vmul.f32 %v5406_v41, %v5406_v41  ;;  %v5409_v47 = vmul.f32 %v5344_v29, %v4977_v33  ;;  %v4976_v20 = vadd.f32 %v4857_v27, %v4414_v32  ;;  %v4417_v54 = vadd.f32 %v7246_v15, %v10384_v12  ;;  %v5359_v17 = vpop.permute.xlu0 %5358 }
 0x29e   : > { %v5501_v56 = vadd.f32 %v5500_v6, %v5406_v41  ;;  %v5602_v38 = vadd.f32 %v5601_v59, %v5555_v9  ;;  %v7350_v58 = vpop.f32.mrf.mxu0  ;;  %v4305_v11 = vpop.f32.mrf.mxu1 }
 0x29f   : > { %5457 = vst [vmem:[%s9992_s12 + $0x158] sm:$0xff] %v5409_v47  ;;  %v5408_v24 = vmul.f32 %v5339_v7, %v4976_v20  ;;  %v4979_v37 = vadd.f32 %v7350_v58, %v4417_v54  ;;  %v4416_v39 = vadd.f32 %v4305_v11, %v10385_v31  ;;  %v5559_v50 = vmul.f32 %v5409_v47, %v5409_v47 }
 0x2a0   : > { %v5603_v10 = vadd.f32 %v5602_v38, %v5556_v2  ;;  %v5502_v44 = vadd.f32 %v5501_v56, %v5407_v45  ;;  %v4867_v42 = vpop.f32.mrf.mxu0  ;;  %v7249_v16 = vpop.f32.mrf.mxu1 }
 0x2a1   : > { %5456 = vst [vmem:[%s9992_s12 + $0x150] sm:$0xff] %v5408_v24  ;;  %v5558_v13 = vmul.f32 %v5408_v24, %v5408_v24  ;;  %v5411_v35 = vmul.f32 %v5354_v49, %v4979_v37  ;;  %v4978_v60 = vadd.f32 %v4867_v42, %v4416_v39  ;;  %v4419_v40 = vadd.f32 %v7249_v16, %v10386_v51 }
 0x2a2   : > { %v5503_v48 = vadd.f32 %v5502_v44, %v5408_v24  ;;  %v5604_v5 = vadd.f32 %v5603_v10, %v5557_v53  ;;  %v7353_v52 = vpop.f32.mrf.mxu0  ;;  %v4315_v62 = vpop.f32.mrf.mxu1 }
 0x2a3   : > { %5459 = vst [vmem:[%s9992_s12 + $0x168] sm:$0xff] %v5411_v35  ;;  %v5410_v57 = vmul.f32 %v5349_v25, %v4978_v60  ;;  %v4981_v18 = vadd.f32 %v7353_v52, %v4419_v40  ;;  %v4418_v55 = vadd.f32 %v4315_v62, %v10387_v14  ;;  %v5561_v7 = vmul.f32 %v5411_v35, %v5411_v35 }
 0x2a4   : > { %v5605_v29 = vadd.f32 %v5604_v5, %v5558_v13  ;;  %v5504_v22 = vadd.f32 %v5503_v48, %v5409_v47  ;;  %v4877_v61 = vpop.f32.mrf.mxu0 }
 0x2a5   : > { %5458 = vst [vmem:[%s9992_s12 + $0x160] sm:$0xff] %v5410_v57  ;;  %v5560_v28 = vmul.f32 %v5410_v57, %v5410_v57  ;;  %v5413_v34 = vmul.f32 %v5364_v43, %v4981_v18  ;;  %v4980_v3 = vadd.f32 %v4877_v61, %v4418_v55 }
 0x2a6   : > { %v5505_v63 = vadd.f32 %v5504_v22, %v5410_v57  ;;  %v5606_v8 = vadd.f32 %v5605_v29, %v5559_v50 }
 0x2a7   : > { %5461 = vst [vmem:[%s9992_s12 + $0x178] sm:$0xff] %v5413_v34  ;;  %v5412_v30 = vmul.f32 %v5359_v17, %v4980_v3  ;;  %v5563_v23 = vmul.f32 %v5413_v34, %v5413_v34 }
 0x2a8   : > { %v5607_v0 = vadd.f32 %v5606_v8, %v5560_v28  ;;  %v5506_v45 = vadd.f32 %v5505_v63, %v5411_v35 }
 0x2a9   : > { %5460 = vst [vmem:[%s9992_s12 + $0x170] sm:$0xff] %v5412_v30  ;;  %v5562_v36 = vmul.f32 %v5412_v30, %v5412_v30 }
 0x2aa   : > { %v5507_v26 = vadd.f32 %v5506_v45, %v5412_v30  ;;  %v5608_v21 = vadd.f32 %v5607_v0, %v5561_v7 }
 0x2ac   : > { %v5508_v1 = vadd.f32 %v5507_v26, %v5413_v34  ;;  %v5609_v4 = vadd.f32 %v5608_v21, %v5562_v36 }
 0x2ae   : > { %v5509_v46 = vrot.slane %v5508_v1, 4  ;;  %v5610_v41 = vadd.f32 %v5609_v4, %v5563_v23 }
 0x2b0   : > { %v5510_v33 = vadd.f32 %v5509_v46, %v5508_v1  ;;  %v5611_v19 = vrot.slane %v5610_v41, 4 }
 0x2b2   : > { %v5511_v32 = vrot.slane %v5510_v33, 2  ;;  %v5612_v9 = vadd.f32 %v5611_v19, %v5610_v41 }
 0x2b4   : > { %v5512_v59 = vadd.f32 %v5511_v32, %v5510_v33  ;;  %v5613_v6 = vrot.slane %v5612_v9, 2 }
 0x2b6   : > { %v5513_v27 = vrot.slane %v5512_v59, 1  ;;  %v5614_v15 = vadd.f32 %v5613_v6, %v5612_v9 }
 0x2b8   : > { %v5514_v49 = vadd.f32 %v5513_v27, %v5512_v59  ;;  %v5615_v2 = vrot.slane %v5614_v15, 1 }
 0x2ba   : > { %5515 = vst [vmem:[%s208_s19] sm:$0x1] %v5514_v49  ;;  %v5616_v47 = vadd.f32 %v5615_v2, %v5614_v15 }
 0x2bc   : > { %5617 = vst [vmem:[%s208_s19 + $0x1] sm:$0x1] %v5616_v47 }
 0x2bd PF: > { %s15_s15 = sadd.s32 1, %s7484_s15  }
 0x2be   : > { %p12_p4 = scmp.ge.s32.totalorder %s15_s15, 4  }
 0x2c0   :  { %14 = sbr.rel (!%p12_p4) target bundleno = 1 (0x1), region = 82 }

</bundles_post_ra>
